<compile_context>
chip_gen: v5e
topology: v5e:2x2
jax: 0.10.0
libtpu: 0.0.40
codegen_flags: <defaults>
</compile_context>

<pallas_src>
import jax
import jax.numpy as jnp
from jax.experimental import pallas as pl
from jax.experimental.pallas import tpu as pltpu

N_FEAT = 32                  # n_feat
REDUCTION = 16               # reduction
MID = N_FEAT // REDUCTION    # squeeze width (= 2)
KS = 3                       # kernel_size (default_conv 3x3, padding = ks//2)
PAD = KS // 2
MXU_DTYPE = jnp.bfloat16     # MXU input dtype (f32 accumulate); jnp.float32 for exact


def rcab_kernel(x_ref, band1_ref, b1_ref, band2_ref, b2_ref,
                wd1t_ref, bd1_ref, wd2_ref, bd2_ref, sel_ref, selt_ref,
                out_ref, pad_scr):
    # x_ref/out_ref: (H, W*C) lane-dense blocks (batch dim squeezed by BlockSpec).
    # pad_scr:       (H + 2*PAD, W*C) scratch in MXU dtype; height halo only.
    H, WC = x_ref.shape
    Hp = pad_scr.shape[0]
    f32 = jnp.float32

    # Zero ONLY the top/bottom halo rows; the interior is fully overwritten
    # below.  Re-done every grid step -> safe under megacore grid splitting.
    pad_scr[0:PAD, :] = jnp.zeros((PAD, WC), pad_scr.dtype)
    pad_scr[PAD + H:Hp, :] = jnp.zeros((PAD, WC), pad_scr.dtype)

    def conv3x3(band_ref, bias_row):
        # 3 lane-dense MXU matmuls: (H, W*C) @ (W*C, W*C), one per kh tap.
        # kw taps and width SAME-padding are folded into the banded weights.
        acc = jnp.zeros((H, WC), f32)
        for kh in range(KS):
            acc = acc + jnp.dot(pad_scr[kh:kh + H, :], band_ref[kh],
                                preferred_element_type=jnp.float32)
        return acc + bias_row                                     # (H, W*C) f32

    # conv1 + ReLU  (aligned dense interior fill, cast once to MXU dtype)
    pad_scr[PAD:PAD + H, :] = x_ref[...].astype(pad_scr.dtype)
    h1 = jnp.maximum(conv3x3(band1_ref, b1_ref[...]), 0.0)

    # conv2 (reuse the same halo scratch; halo rows are still zero)
    pad_scr[PAD:PAD + H, :] = h1.astype(pad_scr.dtype)
    res = conv3x3(band2_ref, b2_ref[...])                         # (H, W*C)

    # --- CALayer ---------------------------------------------------------
    # Global average pool: sublane-sum, then fold the W lane-groups down to C
    # channels with a pre-scaled 0/1 selector matmul (no minor-dim reshapes).
    colsum = jnp.sum(res, axis=0, keepdims=True)                  # (1, W*C)
    pooled = jnp.dot(colsum, selt_ref[...],
                     preferred_element_type=jnp.float32)          # (1, C), /= H*W folded in

    # squeeze-excite (C -> C/r -> C) on the VPU/XLU: broadcast-mul + tiny sums
    z = jnp.maximum(
        jnp.sum(pooled * wd1t_ref[...], axis=1, keepdims=True) + bd1_ref[...],
        0.0)                                                      # (C/r, 1)
    gate = jax.nn.sigmoid(
        jnp.sum(z * wd2_ref[...], axis=0, keepdims=True) + bd2_ref[...])  # (1, C)

    # broadcast the per-channel gate back to lane-dense (1, W*C)
    gate_d = jnp.dot(gate, sel_ref[...],
                     preferred_element_type=jnp.float32)          # (1, W*C)

    # scale + residual add, fully lane-dense; single unmasked store.
    out_ref[...] = (res * gate_d + x_ref[...]).astype(out_ref.dtype)


def _conv_band(w_hwio, W, C):
    """Fold kw taps + width SAME padding of a 3x3 conv into per-kh (W*C, W*C) bands.

    band[kh][w_in*C + cin, w_out*C + cout] = w[kh, w_in - w_out + PAD, cin, cout]
    whenever |w_in - w_out| <= PAD, else 0.  Out-of-range taps simply have no
    row, which is exactly equivalent to zero padding in the width direction.
    """
    bands = []
    for kh in range(KS):
        m = jnp.zeros((W * C, W * C), jnp.float32)
        for kw in range(KS):
            # ones at [w_in, w_out] with w_in = w_out + kw - PAD
            place = jnp.eye(W, W, k=PAD - kw, dtype=jnp.float32)
            m = m + jnp.kron(place, w_hwio[kh, kw])
        bands.append(m)
    return jnp.stack(bands, axis=0).astype(MXU_DTYPE)             # (KS, W*C, W*C)


def rcab_forward(x_nhwc, params):
    """x_nhwc: (N, H, W, C) float32.  Returns (N, H, W, C)."""
    w1, b1, w2, b2, wd1, bd1, wd2, bd2 = params
    N, H, W, C = x_nhwc.shape
    WC = W * C
    Hp = H + 2 * PAD

    # --- wrapper-side (one-time) weight re-layout ---
    band1 = _conv_band(w1, W, C)                      # (3, W*C, W*C) bf16
    band2 = _conv_band(w2, W, C)
    b1t = jnp.tile(b1, (1, W))                        # (1, W*C) f32
    b2t = jnp.tile(b2, (1, W))
    sel = jnp.kron(jnp.ones((1, W), jnp.float32),
                   jnp.eye(C, dtype=jnp.float32))     # (C, W*C) channel broadcast
    selt = sel.T * (1.0 / (H * W))                    # (W*C, C) channel mean
    wd1t = wd1.T                                      # (C/r, C)
    bd1c = bd1.reshape(-1, 1)                         # (C/r, 1)

    # lane-dense views of x / out (free metadata reshapes in HBM)
    x_flat = x_nhwc.reshape(N, H, WC)

    def full_spec(a):
        zeros = (0,) * a.ndim
        return pl.BlockSpec(a.shape, lambda n, _z=zeros: _z)

    out_flat = pl.pallas_call(
        rcab_kernel,
        out_shape=jax.ShapeDtypeStruct((N, H, WC), x_nhwc.dtype),
        grid_spec=pltpu.PrefetchScalarGridSpec(
            num_scalar_prefetch=0,
            grid=(N,),
            in_specs=[
                pl.BlockSpec((None, H, WC), lambda n: (n, 0, 0)),
                full_spec(band1), full_spec(b1t),
                full_spec(band2), full_spec(b2t),
                full_spec(wd1t), full_spec(bd1c),
                full_spec(wd2), full_spec(bd2),
                full_spec(sel), full_spec(selt),
            ],
            out_specs=pl.BlockSpec((None, H, WC), lambda n: (n, 0, 0)),
            scratch_shapes=[pltpu.VMEM((Hp, WC), MXU_DTYPE)],
        ),
        compiler_params=pltpu.CompilerParams(
            dimension_semantics=("parallel",),
            vmem_limit_bytes=32 * 1024 * 1024),
    )(x_flat, band1, b1t, band2, b2t, wd1t, bd1c, wd2, bd2, sel, selt)

    return out_flat.reshape(N, H, W, C)


def rcab_reference(x_nhwc, params):
    """Pure-JAX f32 reference matching the PyTorch forward semantics (NHWC)."""
    w1, b1, w2, b2, wd1, bd1, wd2, bd2 = params

    def conv(v, w, b):
        return jax.lax.conv_general_dilated(
            v, w, (1, 1), "SAME",
            dimension_numbers=("NHWC", "HWIO", "NHWC")) + b

    h = jax.nn.relu(conv(x_nhwc, w1, b1))
    res = conv(h, w2, b2)
    pooled = jnp.mean(res, axis=(1, 2), keepdims=True)            # (N,1,1,C)
    z = jax.nn.relu(jnp.einsum("nijc,cd->nijd", pooled, wd1) + bd1)
    gate = jax.nn.sigmoid(jnp.einsum("nijd,dc->nijc", z, wd2) + bd2)
    return res * gate + x_nhwc


def make_params(key):
    ks = jax.random.split(key, 8)
    scale = 0.05
    w1 = scale * jax.random.normal(ks[0], (KS, KS, N_FEAT, N_FEAT), jnp.float32)
    b1 = scale * jax.random.normal(ks[1], (1, N_FEAT), jnp.float32)
    w2 = scale * jax.random.normal(ks[2], (KS, KS, N_FEAT, N_FEAT), jnp.float32)
    b2 = scale * jax.random.normal(ks[3], (1, N_FEAT), jnp.float32)
    wd1 = scale * jax.random.normal(ks[4], (N_FEAT, MID), jnp.float32)
    bd1 = scale * jax.random.normal(ks[5], (1, MID), jnp.float32)
    wd2 = scale * jax.random.normal(ks[6], (MID, N_FEAT), jnp.float32)
    bd2 = scale * jax.random.normal(ks[7], (1, N_FEAT), jnp.float32)
    return (w1, b1, w2, b2, wd1, bd1, wd2, bd2)


if __name__ == "__main__":
    key = jax.random.PRNGKey(0)
    k_x, k_p = jax.random.split(key)

    # PyTorch-style NCHW input: (batch=2, channels=32, H=16, W=16)
    x_nchw = jax.random.normal(k_x, (2, N_FEAT, 16, 16), jnp.float32)
    x_nhwc = jnp.transpose(x_nchw, (0, 2, 3, 1))

    params = make_params(k_p)

    rcab_jit = jax.jit(rcab_forward)
    out_nhwc = jax.block_until_ready(rcab_jit(x_nhwc, params))

    ref_nhwc = rcab_reference(x_nhwc, params)
    max_err = float(jnp.max(jnp.abs(out_nhwc - ref_nhwc)))
    # tolerance accounts for bf16 MXU inputs (accumulation is f32)
    assert jnp.allclose(out_nhwc, ref_nhwc, rtol=5e-2, atol=5e-2), max_err

    # back to NCHW to match the PyTorch module's output convention
    out_nchw = jnp.transpose(out_nhwc, (0, 3, 1, 2))
    jax.block_until_ready(out_nchw)
    print("KERNEL_OK")
</pallas_src>

<mosaic_0001>
module attributes {stable_mosaic.version = 11 : i64} {
  func.func @rcab_kernel(%arg0: i32, %arg1: memref<1x16x512xf32, #tpu.memory_space<vmem>>, %arg2: memref<3x512x512xbf16, #tpu.memory_space<vmem>>, %arg3: memref<1x512xf32, #tpu.memory_space<vmem>>, %arg4: memref<3x512x512xbf16, #tpu.memory_space<vmem>>, %arg5: memref<1x512xf32, #tpu.memory_space<vmem>>, %arg6: memref<2x32xf32, #tpu.memory_space<vmem>>, %arg7: memref<2x1xf32, #tpu.memory_space<vmem>>, %arg8: memref<2x32xf32, #tpu.memory_space<vmem>>, %arg9: memref<1x32xf32, #tpu.memory_space<vmem>>, %arg10: memref<32x512xf32, #tpu.memory_space<vmem>>, %arg11: memref<512x32xf32, #tpu.memory_space<vmem>>, %arg12: memref<1x16x512xf32, #tpu.memory_space<vmem>>, %arg13: memref<18x512xbf16, #tpu.memory_space<vmem>>) attributes {dimension_semantics = [#tpu.dimension_semantics<parallel>], iteration_bounds = array<i64: 2>, scalar_prefetch = 0 : i64, scratch_operands = 1 : i64, tpu.core_type = #tpu.core_type<tc>, window_params = [{transform_indices = @transform_0, window_bounds = array<i64: 1, 16, 512>}, {pipeline_mode = #tpu.pipeline_mode<synchronous>, transform_indices = @transform_1, window_bounds = array<i64: 3, 512, 512>}, {pipeline_mode = #tpu.pipeline_mode<synchronous>, transform_indices = @transform_2, window_bounds = array<i64: 1, 512>}, {pipeline_mode = #tpu.pipeline_mode<synchronous>, transform_indices = @transform_3, window_bounds = array<i64: 3, 512, 512>}, {pipeline_mode = #tpu.pipeline_mode<synchronous>, transform_indices = @transform_4, window_bounds = array<i64: 1, 512>}, {pipeline_mode = #tpu.pipeline_mode<synchronous>, transform_indices = @transform_5, window_bounds = array<i64: 2, 32>}, {pipeline_mode = #tpu.pipeline_mode<synchronous>, transform_indices = @transform_6, window_bounds = array<i64: 2, 1>}, {pipeline_mode = #tpu.pipeline_mode<synchronous>, transform_indices = @transform_7, window_bounds = array<i64: 2, 32>}, {pipeline_mode = #tpu.pipeline_mode<synchronous>, transform_indices = @transform_8, window_bounds = array<i64: 1, 32>}, {pipeline_mode = #tpu.pipeline_mode<synchronous>, transform_indices = @transform_9, window_bounds = array<i64: 32, 512>}, {pipeline_mode = #tpu.pipeline_mode<synchronous>, transform_indices = @transform_10, window_bounds = array<i64: 512, 32>}, {transform_indices = @transform_11, window_bounds = array<i64: 1, 16, 512>}]} {
    %cst = arith.constant 0.000000e+00 : bf16
    %0 = vector.broadcast %cst : bf16 to vector<1x512xbf16>
    %c0 = arith.constant 0 : index
    %c0_0 = arith.constant 0 : index
    %1 = vector.load %arg13[%c0, %c0_0] : memref<18x512xbf16, #tpu.memory_space<vmem>>, vector<1x512xbf16>
    tpu.vector_store %arg13[%c0, %c0_0], %0 {strides = array<i32>} : memref<18x512xbf16, #tpu.memory_space<vmem>>, vector<1x512xbf16>,
    %cst_1 = arith.constant 0.000000e+00 : bf16
    %2 = vector.broadcast %cst_1 : bf16 to vector<1x512xbf16>
    %c17 = arith.constant 17 : index
    %c0_2 = arith.constant 0 : index
    %3 = vector.load %arg13[%c17, %c0_2] : memref<18x512xbf16, #tpu.memory_space<vmem>>, vector<1x512xbf16>
    tpu.vector_store %arg13[%c17, %c0_2], %2 {strides = array<i32>} : memref<18x512xbf16, #tpu.memory_space<vmem>>, vector<1x512xbf16>,
    %c0_3 = arith.constant 0 : index
    %c0_4 = arith.constant 0 : index
    %c0_5 = arith.constant 0 : index
    %4 = vector.load %arg1[%c0_3, %c0_4, %c0_5] : memref<1x16x512xf32, #tpu.memory_space<vmem>>, vector<1x16x512xf32>
    %5 = vector.shape_cast %4 : vector<1x16x512xf32> to vector<16x512xf32>
    %6 = arith.truncf %5 : vector<16x512xf32> to vector<16x512xbf16>
    %c1 = arith.constant 1 : index
    %c0_6 = arith.constant 0 : index
    %7 = vector.load %arg13[%c1, %c0_6] : memref<18x512xbf16, #tpu.memory_space<vmem>>, vector<16x512xbf16>
    tpu.vector_store %arg13[%c1, %c0_6], %6 {strides = array<i32>} : memref<18x512xbf16, #tpu.memory_space<vmem>>, vector<16x512xbf16>,
    %c0_7 = arith.constant 0 : index
    %c0_8 = arith.constant 0 : index
    %8 = vector.load %arg3[%c0_7, %c0_8] : memref<1x512xf32, #tpu.memory_space<vmem>>, vector<1x512xf32>
    %cst_9 = arith.constant 0.000000e+00 : f32
    %9 = vector.broadcast %cst_9 : f32 to vector<16x512xf32>
    %c0_10 = arith.constant 0 : index
    %c0_11 = arith.constant 0 : index
    %10 = vector.load %arg13[%c0_10, %c0_11] : memref<18x512xbf16, #tpu.memory_space<vmem>>, vector<16x512xbf16>
    %c0_12 = arith.constant 0 : index
    %c0_13 = arith.constant 0 : index
    %c0_14 = arith.constant 0 : index
    %11 = vector.load %arg2[%c0_12, %c0_13, %c0_14] : memref<3x512x512xbf16, #tpu.memory_space<vmem>>, vector<1x512x512xbf16>
    %12 = vector.shape_cast %11 : vector<1x512x512xbf16> to vector<512x512xbf16>
    %cst_15 = arith.constant dense<0.000000e+00> : vector<16x512xf32>
    %13 = tpu.matmul %10, %12, %cst_15 {dimension_numbers = #tpu.dot_dimension_numbers<[1], [0], [0], [1], [0, 0, 1, 1], [], []>} : vector<16x512xbf16>, vector<512x512xbf16>, vector<16x512xf32> -> vector<16x512xf32>
    %14 = arith.addf %9, %13 : vector<16x512xf32>
    %c1_16 = arith.constant 1 : index
    %c0_17 = arith.constant 0 : index
    %15 = vector.load %arg13[%c1_16, %c0_17] : memref<18x512xbf16, #tpu.memory_space<vmem>>, vector<16x512xbf16>
    %c1_18 = arith.constant 1 : index
    %c0_19 = arith.constant 0 : index
    %c0_20 = arith.constant 0 : index
    %16 = vector.load %arg2[%c1_18, %c0_19, %c0_20] : memref<3x512x512xbf16, #tpu.memory_space<vmem>>, vector<1x512x512xbf16>
    %17 = vector.shape_cast %16 : vector<1x512x512xbf16> to vector<512x512xbf16>
    %cst_21 = arith.constant dense<0.000000e+00> : vector<16x512xf32>
    %18 = tpu.matmul %15, %17, %cst_21 {dimension_numbers = #tpu.dot_dimension_numbers<[1], [0], [0], [1], [0, 0, 1, 1], [], []>} : vector<16x512xbf16>, vector<512x512xbf16>, vector<16x512xf32> -> vector<16x512xf32>
    %19 = arith.addf %14, %18 : vector<16x512xf32>
    %c2 = arith.constant 2 : index
    %c0_22 = arith.constant 0 : index
    %20 = vector.load %arg13[%c2, %c0_22] : memref<18x512xbf16, #tpu.memory_space<vmem>>, vector<16x512xbf16>
    %c2_23 = arith.constant 2 : index
    %c0_24 = arith.constant 0 : index
    %c0_25 = arith.constant 0 : index
    %21 = vector.load %arg2[%c2_23, %c0_24, %c0_25] : memref<3x512x512xbf16, #tpu.memory_space<vmem>>, vector<1x512x512xbf16>
    %22 = vector.shape_cast %21 : vector<1x512x512xbf16> to vector<512x512xbf16>
    %cst_26 = arith.constant dense<0.000000e+00> : vector<16x512xf32>
    %23 = tpu.matmul %20, %22, %cst_26 {dimension_numbers = #tpu.dot_dimension_numbers<[1], [0], [0], [1], [0, 0, 1, 1], [], []>} : vector<16x512xbf16>, vector<512x512xbf16>, vector<16x512xf32> -> vector<16x512xf32>
    %24 = arith.addf %19, %23 : vector<16x512xf32>
    %25 = vector.broadcast %8 : vector<1x512xf32> to vector<16x512xf32>
    %26 = arith.addf %24, %25 : vector<16x512xf32>
    %cst_27 = arith.constant 0.000000e+00 : f32
    %27 = vector.broadcast %cst_27 : f32 to vector<16x512xf32>
    %28 = arith.maximumf %26, %27 : vector<16x512xf32>
    %29 = arith.truncf %28 : vector<16x512xf32> to vector<16x512xbf16>
    %c1_28 = arith.constant 1 : index
    %c0_29 = arith.constant 0 : index
    %30 = vector.load %arg13[%c1_28, %c0_29] : memref<18x512xbf16, #tpu.memory_space<vmem>>, vector<16x512xbf16>
    tpu.vector_store %arg13[%c1_28, %c0_29], %29 {strides = array<i32>} : memref<18x512xbf16, #tpu.memory_space<vmem>>, vector<16x512xbf16>,
    %c0_30 = arith.constant 0 : index
    %c0_31 = arith.constant 0 : index
    %31 = vector.load %arg5[%c0_30, %c0_31] : memref<1x512xf32, #tpu.memory_space<vmem>>, vector<1x512xf32>
    %cst_32 = arith.constant 0.000000e+00 : f32
    %32 = vector.broadcast %cst_32 : f32 to vector<16x512xf32>
    %c0_33 = arith.constant 0 : index
    %c0_34 = arith.constant 0 : index
    %33 = vector.load %arg13[%c0_33, %c0_34] : memref<18x512xbf16, #tpu.memory_space<vmem>>, vector<16x512xbf16>
    %c0_35 = arith.constant 0 : index
    %c0_36 = arith.constant 0 : index
    %c0_37 = arith.constant 0 : index
    %34 = vector.load %arg4[%c0_35, %c0_36, %c0_37] : memref<3x512x512xbf16, #tpu.memory_space<vmem>>, vector<1x512x512xbf16>
    %35 = vector.shape_cast %34 : vector<1x512x512xbf16> to vector<512x512xbf16>
    %cst_38 = arith.constant dense<0.000000e+00> : vector<16x512xf32>
    %36 = tpu.matmul %33, %35, %cst_38 {dimension_numbers = #tpu.dot_dimension_numbers<[1], [0], [0], [1], [0, 0, 1, 1], [], []>} : vector<16x512xbf16>, vector<512x512xbf16>, vector<16x512xf32> -> vector<16x512xf32>
    %37 = arith.addf %32, %36 : vector<16x512xf32>
    %c1_39 = arith.constant 1 : index
    %c0_40 = arith.constant 0 : index
    %38 = vector.load %arg13[%c1_39, %c0_40] : memref<18x512xbf16, #tpu.memory_space<vmem>>, vector<16x512xbf16>
    %c1_41 = arith.constant 1 : index
    %c0_42 = arith.constant 0 : index
    %c0_43 = arith.constant 0 : index
    %39 = vector.load %arg4[%c1_41, %c0_42, %c0_43] : memref<3x512x512xbf16, #tpu.memory_space<vmem>>, vector<1x512x512xbf16>
    %40 = vector.shape_cast %39 : vector<1x512x512xbf16> to vector<512x512xbf16>
    %cst_44 = arith.constant dense<0.000000e+00> : vector<16x512xf32>
    %41 = tpu.matmul %38, %40, %cst_44 {dimension_numbers = #tpu.dot_dimension_numbers<[1], [0], [0], [1], [0, 0, 1, 1], [], []>} : vector<16x512xbf16>, vector<512x512xbf16>, vector<16x512xf32> -> vector<16x512xf32>
    %42 = arith.addf %37, %41 : vector<16x512xf32>
    %c2_45 = arith.constant 2 : index
    %c0_46 = arith.constant 0 : index
    %43 = vector.load %arg13[%c2_45, %c0_46] : memref<18x512xbf16, #tpu.memory_space<vmem>>, vector<16x512xbf16>
    %c2_47 = arith.constant 2 : index
    %c0_48 = arith.constant 0 : index
    %c0_49 = arith.constant 0 : index
    %44 = vector.load %arg4[%c2_47, %c0_48, %c0_49] : memref<3x512x512xbf16, #tpu.memory_space<vmem>>, vector<1x512x512xbf16>
    %45 = vector.shape_cast %44 : vector<1x512x512xbf16> to vector<512x512xbf16>
    %cst_50 = arith.constant dense<0.000000e+00> : vector<16x512xf32>
    %46 = tpu.matmul %43, %45, %cst_50 {dimension_numbers = #tpu.dot_dimension_numbers<[1], [0], [0], [1], [0, 0, 1, 1], [], []>} : vector<16x512xbf16>, vector<512x512xbf16>, vector<16x512xf32> -> vector<16x512xf32>
    %47 = arith.addf %42, %46 : vector<16x512xf32>
    %48 = vector.broadcast %31 : vector<1x512xf32> to vector<16x512xf32>
    %49 = arith.addf %47, %48 : vector<16x512xf32>
    %cst_51 = arith.constant dense<0.000000e+00> : vector<512xf32>
    %50 = vector.multi_reduction <add>, %49, %cst_51 [0] : vector<16x512xf32> to vector<512xf32>
    %51 = vector.shape_cast %50 : vector<512xf32> to vector<1x512xf32>
    %c0_52 = arith.constant 0 : index
    %c0_53 = arith.constant 0 : index
    %52 = vector.load %arg11[%c0_52, %c0_53] : memref<512x32xf32, #tpu.memory_space<vmem>>, vector<512x32xf32>
    %cst_54 = arith.constant dense<0.000000e+00> : vector<1x32xf32>
    %53 = tpu.matmul %51, %52, %cst_54 {dimension_numbers = #tpu.dot_dimension_numbers<[1], [0], [0], [1], [0, 0, 1, 1], [], []>} : vector<1x512xf32>, vector<512x32xf32>, vector<1x32xf32> -> vector<1x32xf32>
    %c0_55 = arith.constant 0 : index
    %c0_56 = arith.constant 0 : index
    %54 = vector.load %arg6[%c0_55, %c0_56] : memref<2x32xf32, #tpu.memory_space<vmem>>, vector<2x32xf32>
    %55 = vector.broadcast %53 : vector<1x32xf32> to vector<2x32xf32>
    %56 = arith.mulf %55, %54 : vector<2x32xf32>
    %cst_57 = arith.constant dense<0.000000e+00> : vector<2xf32>
    %57 = vector.multi_reduction <add>, %56, %cst_57 [1] : vector<2x32xf32> to vector<2xf32>
    %58 = vector.shape_cast %57 : vector<2xf32> to vector<2x1xf32>
    %c0_58 = arith.constant 0 : index
    %c0_59 = arith.constant 0 : index
    %59 = vector.load %arg7[%c0_58, %c0_59] : memref<2x1xf32, #tpu.memory_space<vmem>>, vector<2x1xf32>
    %60 = arith.addf %58, %59 : vector<2x1xf32>
    %cst_60 = arith.constant 0.000000e+00 : f32
    %61 = vector.broadcast %cst_60 : f32 to vector<2x1xf32>
    %62 = arith.maximumf %60, %61 : vector<2x1xf32>
    %c0_61 = arith.constant 0 : index
    %c0_62 = arith.constant 0 : index
    %63 = vector.load %arg8[%c0_61, %c0_62] : memref<2x32xf32, #tpu.memory_space<vmem>>, vector<2x32xf32>
    %64 = vector.broadcast %62 : vector<2x1xf32> to vector<2x32xf32>
    %65 = arith.mulf %64, %63 : vector<2x32xf32>
    %cst_63 = arith.constant dense<0.000000e+00> : vector<32xf32>
    %66 = vector.multi_reduction <add>, %65, %cst_63 [0] : vector<2x32xf32> to vector<32xf32>
    %67 = vector.shape_cast %66 : vector<32xf32> to vector<1x32xf32>
    %c0_64 = arith.constant 0 : index
    %c0_65 = arith.constant 0 : index
    %68 = vector.load %arg9[%c0_64, %c0_65] : memref<1x32xf32, #tpu.memory_space<vmem>>, vector<1x32xf32>
    %69 = arith.addf %67, %68 : vector<1x32xf32>
    %70 = arith.negf %69 : vector<1x32xf32>
    %71 = math.exp %70 : vector<1x32xf32>
    %cst_66 = arith.constant 1.000000e+00 : f32
    %72 = vector.broadcast %cst_66 : f32 to vector<1x32xf32>
    %73 = arith.addf %72, %71 : vector<1x32xf32>
    %74 = arith.divf %72, %73 : vector<1x32xf32>
    %c0_67 = arith.constant 0 : index
    %c0_68 = arith.constant 0 : index
    %75 = vector.load %arg10[%c0_67, %c0_68] : memref<32x512xf32, #tpu.memory_space<vmem>>, vector<32x512xf32>
    %cst_69 = arith.constant dense<0.000000e+00> : vector<1x512xf32>
    %76 = tpu.matmul %74, %75, %cst_69 {dimension_numbers = #tpu.dot_dimension_numbers<[1], [0], [0], [1], [0, 0, 1, 1], [], []>} : vector<1x32xf32>, vector<32x512xf32>, vector<1x512xf32> -> vector<1x512xf32>
    %77 = vector.broadcast %76 : vector<1x512xf32> to vector<16x512xf32>
    %78 = arith.mulf %49, %77 : vector<16x512xf32>
    %c0_70 = arith.constant 0 : index
    %c0_71 = arith.constant 0 : index
    %c0_72 = arith.constant 0 : index
    %79 = vector.load %arg1[%c0_70, %c0_71, %c0_72] : memref<1x16x512xf32, #tpu.memory_space<vmem>>, vector<1x16x512xf32>
    %80 = vector.shape_cast %79 : vector<1x16x512xf32> to vector<16x512xf32>
    %81 = arith.addf %78, %80 : vector<16x512xf32>
    %c0_73 = arith.constant 0 : index
    %c0_74 = arith.constant 0 : index
    %c0_75 = arith.constant 0 : index
    %82 = vector.load %arg12[%c0_73, %c0_74, %c0_75] : memref<1x16x512xf32, #tpu.memory_space<vmem>>, vector<1x16x512xf32>
    %83 = vector.shape_cast %82 : vector<1x16x512xf32> to vector<16x512xf32>
    %84 = vector.shape_cast %81 : vector<16x512xf32> to vector<1x16x512xf32>
    tpu.vector_store %arg12[%c0_73, %c0_74, %c0_75], %84 {strides = array<i32>} : memref<1x16x512xf32, #tpu.memory_space<vmem>>, vector<1x16x512xf32>,
    return
  }
  func.func @transform_0(%arg0: i32) -> (i32, i32, i32) {
    %c0_i32 = arith.constant 0 : i32
    %c0_i32_0 = arith.constant 0 : i32
    %c0_i32_1 = arith.constant 0 : i32
    return %arg0, %c0_i32, %c0_i32_0 : i32, i32, i32
  }
  func.func @transform_1(%arg0: i32) -> (i32, i32, i32) {
    %c0_i32 = arith.constant 0 : i32
    %c0_i32_0 = arith.constant 0 : i32
    %c0_i32_1 = arith.constant 0 : i32
    %c0_i32_2 = arith.constant 0 : i32
    return %c0_i32, %c0_i32_0, %c0_i32_1 : i32, i32, i32
  }
  func.func @transform_2(%arg0: i32) -> (i32, i32) {
    %c0_i32 = arith.constant 0 : i32
    %c0_i32_0 = arith.constant 0 : i32
    %c0_i32_1 = arith.constant 0 : i32
    return %c0_i32, %c0_i32_0 : i32, i32
  }
  func.func @transform_3(%arg0: i32) -> (i32, i32, i32) {
    %c0_i32 = arith.constant 0 : i32
    %c0_i32_0 = arith.constant 0 : i32
    %c0_i32_1 = arith.constant 0 : i32
    %c0_i32_2 = arith.constant 0 : i32
    return %c0_i32, %c0_i32_0, %c0_i32_1 : i32, i32, i32
  }
  func.func @transform_4(%arg0: i32) -> (i32, i32) {
    %c0_i32 = arith.constant 0 : i32
    %c0_i32_0 = arith.constant 0 : i32
    %c0_i32_1 = arith.constant 0 : i32
    return %c0_i32, %c0_i32_0 : i32, i32
  }
  func.func @transform_5(%arg0: i32) -> (i32, i32) {
    %c0_i32 = arith.constant 0 : i32
    %c0_i32_0 = arith.constant 0 : i32
    %c0_i32_1 = arith.constant 0 : i32
    return %c0_i32, %c0_i32_0 : i32, i32
  }
  func.func @transform_6(%arg0: i32) -> (i32, i32) {
    %c0_i32 = arith.constant 0 : i32
    %c0_i32_0 = arith.constant 0 : i32
    %c0_i32_1 = arith.constant 0 : i32
    return %c0_i32, %c0_i32_0 : i32, i32
  }
  func.func @transform_7(%arg0: i32) -> (i32, i32) {
    %c0_i32 = arith.constant 0 : i32
    %c0_i32_0 = arith.constant 0 : i32
    %c0_i32_1 = arith.constant 0 : i32
    return %c0_i32, %c0_i32_0 : i32, i32
  }
  func.func @transform_8(%arg0: i32) -> (i32, i32) {
    %c0_i32 = arith.constant 0 : i32
    %c0_i32_0 = arith.constant 0 : i32
    %c0_i32_1 = arith.constant 0 : i32
    return %c0_i32, %c0_i32_0 : i32, i32
  }
  func.func @transform_9(%arg0: i32) -> (i32, i32) {
    %c0_i32 = arith.constant 0 : i32
    %c0_i32_0 = arith.constant 0 : i32
    %c0_i32_1 = arith.constant 0 : i32
    return %c0_i32, %c0_i32_0 : i32, i32
  }
  func.func @transform_10(%arg0: i32) -> (i32, i32) {
    %c0_i32 = arith.constant 0 : i32
    %c0_i32_0 = arith.constant 0 : i32
    %c0_i32_1 = arith.constant 0 : i32
    return %c0_i32, %c0_i32_0 : i32, i32
  }
  func.func @transform_11(%arg0: i32) -> (i32, i32, i32) {
    %c0_i32 = arith.constant 0 : i32
    %c0_i32_0 = arith.constant 0 : i32
    %c0_i32_1 = arith.constant 0 : i32
    return %arg0, %c0_i32, %c0_i32_0 : i32, i32, i32
  }
}

</mosaic_0001>

<bundles_post_ra>
// kernel: rcab_forward.1
= control target key start
LH: loop header
LB: loop body
LE: loop exit
PB: predicated region body
PF: predicated region fallthrough
CT: control target
= control target key end

     0   :  { %s11654_s17 = smov 0   ;;  %s17330_s0 = inlined_call_operand.vmem [shape: f32[2,16,512], index: 0, kind: input, shape index: {}]   ;;  %s17331_s1 = inlined_call_operand.vmem [shape: bf16[3,512,512], index: 1, kind: input, shape index: {}]   ;;  %s17332_s2 = inlined_call_operand.vmem [shape: f32[1,512], index: 2, kind: input, shape index: {}]   ;;  %s17333_s3 = inlined_call_operand.vmem [shape: bf16[3,512,512], index: 3, kind: input, shape index: {}]   ;;  %s17334_s4 = inlined_call_operand.vmem [shape: f32[1,512], index: 4, kind: input, shape index: {}]   ;;  %s17335_s5 = inlined_call_operand.vmem [shape: f32[2,32], index: 5, kind: input, shape index: {}]   ;;  %s17336_s6 = inlined_call_operand.vmem [shape: f32[2,1], index: 6, kind: input, shape index: {}]   ;;  %s17337_s7 = inlined_call_operand.vmem [shape: f32[2,32], index: 7, kind: input, shape index: {}]   ;;  %s17338_s8 = inlined_call_operand.vmem [shape: f32[1,32], index: 8, kind: input, shape index: {}]   ;;  %s17339_s9 = inlined_call_operand.vmem [shape: f32[32,512], index: 9, kind: input, shape index: {}]   ;;  %s17340_s10 = inlined_call_operand.vmem [shape: f32[512,32], index: 10, kind: input, shape index: {}]   ;;  %s17341_s11 = inlined_call_operand.vmem [shape: f32[2,16,512], index: 11, kind: output, shape index: {}]  }
   0x1 LB: > { %s7200_s18 = sadd.s32 4294967295, %s11591_s17   ;;  %p7204_p0 = scmp.ge.s32.totalorder %s11591_s17, 1  ;;  %s11591_s17 = sphi %s11654_s17, %s21_s17  }
   0x2   : > { %p337_p1 = scmp.lt.s32.totalorder %s11591_s17, 3 }
   0x4   : > { %p338_p2 = pnand %p7204_p0, %p337_p1 }
   0x5   : > { %p11958_p3 = scmp.lt.s32.totalorder (!%p338_p2), %s7200_s18, 1 }
   0x6   : > { %341 = sbr.rel (%p338_p2) target bundleno = 1627 (0x65b), region = 64 }
   0xb   : > { %v7451_v0 = vld [vmem:[%s17331_s1 + $0x4e0] sm:$0xf]  ;;  %v10960_v1 = vld [vmem:[%s17331_s1 + $0x4ec] sm:$0xf0]  ;;  %vm388_vm0 = vcmask 1040384   ;;  %vm391_vm3 = vcmask 1044484  }
   0xc   : > { %v7579_v2 = vld [vmem:[%s17331_s1 + $0x5e0] sm:$0xf]  ;;  %v7452_v3 = vor.u32 %v10960_v1, %v7451_v0  ;;  %v10992_v4 = vld [vmem:[%s17331_s1 + $0x5ec] sm:$0xf0]  ;;  %vm389_vm1 = vsmask.f32 256 }
   0xd   : > { %v7707_v5 = vld [vmem:[%s17331_s1 + $0x6e0] sm:$0xf]  ;;  %v11024_v6 = vld [vmem:[%s17331_s1 + $0x6ec] sm:$0xf0]  ;;  %v7580_v7 = vor.u32 %v10992_v4, %v7579_v2  ;;  %vm11974_vm2 = vmand %vm388_vm0, %vm389_vm1  ;;  %vm392_vm4 = vsmask.f32 4352 }
   0xe   : > { %v7708_v8 = vor.u32 %v11024_v6, %v7707_v5  ;;  %v7835_v9 = vld [vmem:[%s17331_s1 + $0x7e0] sm:$0xf]  ;;  %v11056_v10 = vld [vmem:[%s17331_s1 + $0x7ec] sm:$0xf0]  ;;  %1468 = vmatpush.bf16.msra.mxu0 %v7452_v3  ;;  %s17360_s18 = smov (!%p11958_p3, %s7200_s18), 1  ;;  %vm393_vm5 = vmand %vm391_vm3, %vm392_vm4  ;;  %vm466_vm12 = vcmask 1043456  }
   0xf   : > { %v7435_v11 = vld [vmem:[%s17331_s1 + $0x4c0] sm:$0xf]  ;;  %v7836_v12 = vor.u32 %v11056_v10, %v7835_v9  ;;  %v10956_v13 = vld [vmem:[%s17331_s1 + $0x4cc] sm:$0xf0]  ;;  %1482 = vmatpush.bf16.msra.mxu1 %v7580_v7  ;;  %vm401_vm6 = vsmask.f32 7938  ;;  %vm12017_vm7 = vmor %vm393_vm5, %vm11974_vm2 }
  0x10   : > { %v7563_v14 = vld [vmem:[%s17331_s1 + $0x5c0] sm:$0xf]  ;;  %v10988_v15 = vld [vmem:[%s17331_s1 + $0x5cc] sm:$0xf0]  ;;  %1496 = vmatpush.bf16.msra.mxu2 %v7708_v8  ;;  %v7436_v16 = vor.u32 %v10956_v13, %v7435_v11  ;;  %vm403_vm8 = vsmask.f32 7954  ;;  %vm12030_vm9 = vmand %vm388_vm0, %vm401_vm6 }
  0x11   : > { %v7564_v17 = vor.u32 %v10988_v15, %v7563_v14  ;;  %v7691_v18 = vld [vmem:[%s17331_s1 + $0x6c0] sm:$0xf]  ;;  %v11020_v19 = vld [vmem:[%s17331_s1 + $0x6cc] sm:$0xf0]  ;;  %1510 = vmatpush.bf16.msra.mxu3 %v7836_v12  ;;  %s10800_s20 = sshll.u32 %s17360_s18, 6  ;;  %vm12057_vm10 = vmand %vm391_vm3, %vm403_vm8  ;;  %vm468_vm13 = vcmask 1047556  }
  0x12   : > { %v7819_v20 = vld [vmem:[%s17331_s1 + $0x7c0] sm:$0xf]  ;;  %v7692_v21 = vor.u32 %v11020_v19, %v7691_v18  ;;  %v11052_v22 = vld [vmem:[%s17331_s1 + $0x7cc] sm:$0xf0]  ;;  %1469 = vmatpush.bf16.msra.mxu0 %v7436_v16  ;;  %s12053_s27 = scalar_lea.vmem %s17330_s0, %s10800_s20  ;;  %vm405_vm11 = vmor %vm12057_vm10, %vm12030_vm9  ;;  %vm424_vm14 = vsmask.f32 4368  ;;  %s386_s19 = scalar_lea.vmem %s17341_s11, %s10800_s20 }
  0x13   : > { %v7419_v23 = vld [vmem:[%s17331_s1 + $0x4a0] sm:$0xf]  ;;  %v10952_v24 = vld [vmem:[%s17331_s1 + $0x4ac] sm:$0xf0]  ;;  %v7820_v25 = vor.u32 %v11052_v22, %v7819_v20  ;;  %1483 = vmatpush.bf16.msra.mxu1 %v7564_v17  ;;  %vm12126_vm15 = vmand %vm466_vm12, %vm401_vm6  ;;  %vm2701_vm4 = vcmask 1046528   ;;  %vm6967_vm5 = vcmask 254976  }
  0x14   : > { %v7547_v26 = vld [vmem:[%s17331_s1 + $0x5a0] sm:$0xf]  ;;  %v10984_v27 = vld [vmem:[%s17331_s1 + $0x5ac] sm:$0xf0]  ;;  %v7420_v29 = vor.u32 %v10952_v24, %v7419_v23  ;;  %1497 = vmatpush.bf16.msra.mxu2 %v7692_v21  ;;  %vm12134_vm0 = vmand %vm468_vm13, %vm403_vm8  ;;  %vm7025_vm9 = vcmask 261120  }
  0x15   : > { %v7675_v28 = vld [vmem:[%s17331_s1 + $0x6a0] sm:$0xf]  ;;  %v11016_v30 = vld [vmem:[%s17331_s1 + $0x6ac] sm:$0xf0]  ;;  %v7548_v33 = vor.u32 %v10984_v27, %v7547_v26  ;;  %1511 = vmatpush.bf16.msra.mxu3 %v7820_v25  ;;  %vm12183_vm2 = vmor %vm12134_vm0, %vm12126_vm15 }
  0x16   : > { %v7803_v31 = vld [vmem:[%s17331_s1 + $0x7a0] sm:$0xf]  ;;  %v11048_v32 = vld [vmem:[%s17331_s1 + $0x7ac] sm:$0xf0]  ;;  %v7676_v34 = vor.u32 %v11016_v30, %v7675_v28  ;;  %1470 = vmatpush.bf16.msra.mxu0 %v7420_v29  ;;  %v10958_v28 = vld [vmem:[%s17331_s1 + $0x4e4] sm:$0xf] }
  0x17   : > { %v7403_v35 = vld [vmem:[%s17331_s1 + $0x480] sm:$0xf]  ;;  %v10948_v36 = vld [vmem:[%s17331_s1 + $0x48c] sm:$0xf0]  ;;  %v7804_v38 = vor.u32 %v11048_v32, %v7803_v31  ;;  %1484 = vmatpush.bf16.msra.mxu1 %v7548_v33  ;;  %v7453_v29 = vld [vmem:[%s17331_s1 + $0x4f0] sm:$0xf0] }
  0x18   : > { %v7531_v37 = vld [vmem:[%s17331_s1 + $0x580] sm:$0xf]  ;;  %v10980_v39 = vld [vmem:[%s17331_s1 + $0x58c] sm:$0xf0]  ;;  %v7404_v44 = vor.u32 %v10948_v36, %v7403_v35  ;;  %1498 = vmatpush.bf16.msra.mxu2 %v7676_v34  ;;  %v10990_v30 = vld [vmem:[%s17331_s1 + $0x5e4] sm:$0xf] }
  0x19   : > { %v7659_v40 = vld [vmem:[%s17331_s1 + $0x680] sm:$0xf]  ;;  %v11012_v41 = vld [vmem:[%s17331_s1 + $0x68c] sm:$0xf0]  ;;  %v7532_v45 = vor.u32 %v10980_v39, %v7531_v37  ;;  %1512 = vmatpush.bf16.msra.mxu3 %v7804_v38  ;;  %v7581_v32 = vld [vmem:[%s17331_s1 + $0x5f0] sm:$0xf0] }
  0x1a   : > { %v7787_v42 = vld [vmem:[%s17331_s1 + $0x780] sm:$0xf]  ;;  %v11044_v43 = vld [vmem:[%s17331_s1 + $0x78c] sm:$0xf0]  ;;  %v7660_v46 = vor.u32 %v11012_v41, %v7659_v40  ;;  %1471 = vmatpush.bf16.msra.mxu0 %v7404_v44  ;;  %v11022_v33 = vld [vmem:[%s17331_s1 + $0x6e4] sm:$0xf]  ;;  %v7456_v40 = vor.u32 %v10958_v28, %v7453_v29  ;;  %v7584_v41 = vor.u32 %v10990_v30, %v7581_v32 }
  0x1b   : > { %v7387_v47 = vld [vmem:[%s17331_s1 + $0x460] sm:$0xf]  ;;  %v10944_v48 = vld [vmem:[%s17331_s1 + $0x46c] sm:$0xf0]  ;;  %v7788_v50 = vor.u32 %v11044_v43, %v7787_v42  ;;  %1485 = vmatpush.bf16.msra.mxu1 %v7532_v45  ;;  %v7709_v34 = vld [vmem:[%s17331_s1 + $0x6f0] sm:$0xf0] }
  0x1c   : > { %v7515_v49 = vld [vmem:[%s17331_s1 + $0x560] sm:$0xf]  ;;  %v10976_v51 = vld [vmem:[%s17331_s1 + $0x56c] sm:$0xf0]  ;;  %v7388_v56 = vor.u32 %v10944_v48, %v7387_v47  ;;  %1499 = vmatpush.bf16.msra.mxu2 %v7660_v46  ;;  %v11054_v37 = vld [vmem:[%s17331_s1 + $0x7e4] sm:$0xf]  ;;  %v7712_v42 = vor.u32 %v11022_v33, %v7709_v34 }
  0x1d   : > { %v7643_v52 = vld [vmem:[%s17331_s1 + $0x660] sm:$0xf]  ;;  %v11008_v53 = vld [vmem:[%s17331_s1 + $0x66c] sm:$0xf0]  ;;  %v7516_v57 = vor.u32 %v10976_v51, %v7515_v49  ;;  %1513 = vmatpush.bf16.msra.mxu3 %v7788_v50  ;;  %v7837_v38 = vld [vmem:[%s17331_s1 + $0x7f0] sm:$0xf0] }
  0x1e   : > { %v7771_v54 = vld [vmem:[%s17331_s1 + $0x760] sm:$0xf]  ;;  %v11040_v55 = vld [vmem:[%s17331_s1 + $0x76c] sm:$0xf0]  ;;  %v7644_v58 = vor.u32 %v11008_v53, %v7643_v52  ;;  %1472 = vmatpush.bf16.msra.mxu0 %v7388_v56  ;;  %v10954_v43 = vld [vmem:[%s17331_s1 + $0x4c4] sm:$0xf]  ;;  %v7840_v46 = vor.u32 %v11054_v37, %v7837_v38 }
  0x1f   : > { %v7371_v59 = vld [vmem:[%s17331_s1 + $0x440] sm:$0xf]  ;;  %v10940_v60 = vld [vmem:[%s17331_s1 + $0x44c] sm:$0xf0]  ;;  %v7772_v62 = vor.u32 %v11040_v55, %v7771_v54  ;;  %1486 = vmatpush.bf16.msra.mxu1 %v7516_v57  ;;  %v7437_v44 = vld [vmem:[%s17331_s1 + $0x4d0] sm:$0xf0] }
  0x20   : > { %v7499_v61 = vld [vmem:[%s17331_s1 + $0x540] sm:$0xf]  ;;  %v10972_v63 = vld [vmem:[%s17331_s1 + $0x54c] sm:$0xf0]  ;;  %v7372_v4 = vor.u32 %v10940_v60, %v7371_v59  ;;  %1500 = vmatpush.bf16.msra.mxu2 %v7644_v58  ;;  %v10986_v45 = vld [vmem:[%s17331_s1 + $0x5c4] sm:$0xf]  ;;  %v7440_v52 = vor.u32 %v10954_v43, %v7437_v44 }
  0x21   : > { %v7627_v0 = vld [vmem:[%s17331_s1 + $0x640] sm:$0xf]  ;;  %v11004_v1 = vld [vmem:[%s17331_s1 + $0x64c] sm:$0xf0]  ;;  %v7500_v5 = vor.u32 %v10972_v63, %v7499_v61  ;;  %1514 = vmatpush.bf16.msra.mxu3 %v7772_v62  ;;  %v7565_v47 = vld [vmem:[%s17331_s1 + $0x5d0] sm:$0xf0] }
  0x22   : > { %v7755_v2 = vld [vmem:[%s17331_s1 + $0x740] sm:$0xf]  ;;  %v11036_v3 = vld [vmem:[%s17331_s1 + $0x74c] sm:$0xf0]  ;;  %v7628_v6 = vor.u32 %v11004_v1, %v7627_v0  ;;  %1473 = vmatpush.bf16.msra.mxu0 %v7372_v4  ;;  %v11018_v48 = vld [vmem:[%s17331_s1 + $0x6c4] sm:$0xf]  ;;  %v7568_v54 = vor.u32 %v10986_v45, %v7565_v47 }
  0x23   : > { %v7355_v7 = vld [vmem:[%s17331_s1 + $0x420] sm:$0xf]  ;;  %v10936_v8 = vld [vmem:[%s17331_s1 + $0x42c] sm:$0xf0]  ;;  %v7756_v10 = vor.u32 %v11036_v3, %v7755_v2  ;;  %1487 = vmatpush.bf16.msra.mxu1 %v7500_v5  ;;  %v7693_v49 = vld [vmem:[%s17331_s1 + $0x6d0] sm:$0xf0] }
  0x24   : > { %v7483_v9 = vld [vmem:[%s17331_s1 + $0x520] sm:$0xf]  ;;  %v10968_v11 = vld [vmem:[%s17331_s1 + $0x52c] sm:$0xf0]  ;;  %v7356_v16 = vor.u32 %v10936_v8, %v7355_v7  ;;  %1501 = vmatpush.bf16.msra.mxu2 %v7628_v6  ;;  %v11050_v50 = vld [vmem:[%s17331_s1 + $0x7c4] sm:$0xf]  ;;  %v7696_v55 = vor.u32 %v11018_v48, %v7693_v49 }
  0x25   : > { %v7611_v12 = vld [vmem:[%s17331_s1 + $0x620] sm:$0xf]  ;;  %v11000_v13 = vld [vmem:[%s17331_s1 + $0x62c] sm:$0xf0]  ;;  %v7484_v19 = vor.u32 %v10968_v11, %v7483_v9  ;;  %1515 = vmatpush.bf16.msra.mxu3 %v7756_v10  ;;  %v7821_v51 = vld [vmem:[%s17331_s1 + $0x7d0] sm:$0xf0] }
  0x26   : > { %v7739_v14 = vld [vmem:[%s17331_s1 + $0x720] sm:$0xf]  ;;  %v11032_v15 = vld [vmem:[%s17331_s1 + $0x72c] sm:$0xf0]  ;;  %v7612_v20 = vor.u32 %v11000_v13, %v7611_v12  ;;  %1474 = vmatpush.bf16.msra.mxu0 %v7356_v16  ;;  %v10950_v53 = vld [vmem:[%s17331_s1 + $0x4a4] sm:$0xf]  ;;  %v7824_v59 = vor.u32 %v11050_v50, %v7821_v51 }
  0x27   : > { %v7339_v17 = vld [vmem:[%s17331_s1 + $0x400] sm:$0xf]  ;;  %v10932_v18 = vld [vmem:[%s17331_s1 + $0x40c] sm:$0xf0]  ;;  %v7740_v24 = vor.u32 %v11032_v15, %v7739_v14  ;;  %1488 = vmatpush.bf16.msra.mxu1 %v7484_v19  ;;  %v7421_v56 = vld [vmem:[%s17331_s1 + $0x4b0] sm:$0xf0] }
  0x28   : > { %v7467_v21 = vld [vmem:[%s17331_s1 + $0x500] sm:$0xf]  ;;  %v10964_v22 = vld [vmem:[%s17331_s1 + $0x50c] sm:$0xf0]  ;;  %v7340_v31 = vor.u32 %v10932_v18, %v7339_v17  ;;  %1502 = vmatpush.bf16.msra.mxu2 %v7612_v20  ;;  %v10982_v57 = vld [vmem:[%s17331_s1 + $0x5a4] sm:$0xf]  ;;  %v7424_v2 = vor.u32 %v10950_v53, %v7421_v56 }
  0x29   : > { %v7595_v23 = vld [vmem:[%s17331_s1 + $0x600] sm:$0xf]  ;;  %v10996_v25 = vld [vmem:[%s17331_s1 + $0x60c] sm:$0xf0]  ;;  %v7468_v35 = vor.u32 %v10964_v22, %v7467_v21  ;;  %1516 = vmatpush.bf16.msra.mxu3 %v7740_v24  ;;  %v7549_v58 = vld [vmem:[%s17331_s1 + $0x5b0] sm:$0xf0] }
  0x2a   : > { %v7723_v26 = vld [vmem:[%s17331_s1 + $0x700] sm:$0xf]  ;;  %v11028_v27 = vld [vmem:[%s17331_s1 + $0x70c] sm:$0xf0]  ;;  %v7596_v36 = vor.u32 %v10996_v25, %v7595_v23  ;;  %1475 = vmatpush.bf16.msra.mxu0 %v7340_v31  ;;  %v11014_v60 = vld [vmem:[%s17331_s1 + $0x6a4] sm:$0xf]  ;;  %v7552_v7 = vor.u32 %v10982_v57, %v7549_v58 }
  0x2b   : > { %v7724_v39 = vor.u32 %v11028_v27, %v7723_v26  ;;  %1489 = vmatpush.bf16.msra.mxu1 %v7468_v35  ;;  %v7677_v61 = vld [vmem:[%s17331_s1 + $0x6b0] sm:$0xf0]  ;;  %v11046_v62 = vld [vmem:[%s17331_s1 + $0x7a4] sm:$0xf]  ;;  %v395_v12 = vld [vmem:[#allocation2 + $0x18] sm:$0x11] }
  0x2c   : > { %1503 = vmatpush.bf16.msra.mxu2 %v7596_v36  ;;  %v7805_v63 = vld [vmem:[%s17331_s1 + $0x7b0] sm:$0xf0]  ;;  %v11929_v0 = vld [vmem:[%s17331_s1 + $0x484] sm:$0xf]  ;;  %v7680_v8 = vor.u32 %v11014_v60, %v7677_v61  ;;  %v396_v23 = vsel %vm12017_vm7, 0, %v395_v12  ;;  %v413_v34 = vld [vmem:[%s12053_s27 + $0x8] sm:$0xff] }
  0x2d   : > { %1517 = vmatpush.bf16.msra.mxu3 %v7724_v39  ;;  %v11934_v1 = vld [vmem:[%s17331_s1 + $0x490] sm:$0xf0]  ;;  %v11939_v3 = vld [vmem:[%s17331_s1 + $0x584] sm:$0xf]  ;;  %v7808_v13 = vor.u32 %v11046_v62, %v7805_v63  ;;  %397 = vst [vmem:[#allocation2 + $0x18] sm:$0x11] %v396_v23  ;;  %vm12199_vm3 = vmor %vm389_vm1, %vm424_vm14 }
  0x2e   : > { %1524 = vmatpush.bf16.msrb.mxu0 %v7456_v40  ;;  %v11944_v4 = vld [vmem:[%s17331_s1 + $0x590] sm:$0xf0]  ;;  %v11949_v5 = vld [vmem:[%s17331_s1 + $0x684] sm:$0xf]  ;;  %v7408_v22 = vor.u32 %v11929_v0, %v11934_v1  ;;  %v415_v43 = vld [vmem:[%s12053_s27 + $0x18] sm:$0xff] }
  0x2f   : > { %1538 = vmatpush.bf16.msrb.mxu1 %v7584_v41  ;;  %v11954_v6 = vld [vmem:[%s17331_s1 + $0x690] sm:$0xf0]  ;;  %v11965_v9 = vld [vmem:[%s17331_s1 + $0x784] sm:$0xf]  ;;  %v7536_v27 = vor.u32 %v11939_v3, %v11944_v4  ;;  %v419_v49 = vld [vmem:[%s12053_s27 + $0x38] sm:$0xff] }
  0x30   : > { %1552 = vmatpush.bf16.msrb.mxu2 %v7712_v42  ;;  %v11970_v10 = vld [vmem:[%s17331_s1 + $0x790] sm:$0xf0]  ;;  %v11981_v14 = vld [vmem:[%s17331_s1 + $0x464] sm:$0xf]  ;;  %v7664_v28 = vor.u32 %v11949_v5, %v11954_v6  ;;  %v406_v12 = vld [vmem:[#allocation2 + $0x8] sm:$0x11] }
  0x31   : > { %1566 = vmatpush.bf16.msrb.mxu3 %v7840_v46  ;;  %v11986_v15 = vld [vmem:[%s17331_s1 + $0x470] sm:$0xf0]  ;;  %v398_v16 = vld [vmem:[#allocation2 + $0x20] sm:$0x11]  ;;  %v7792_v32 = vor.u32 %v11965_v9, %v11970_v10  ;;  %vm775_vm1 = vsmask.f32 7424 }
  0x32   : > { %1525 = vmatpush.bf16.msrb.mxu0 %v7440_v52  ;;  %v11998_v17 = vld [vmem:[%s17331_s1 + $0x564] sm:$0xf]  ;;  %v12003_v18 = vld [vmem:[%s17331_s1 + $0x570] sm:$0xf0]  ;;  %v399_v24 = vsel %vm12017_vm7, 0, %v398_v16  ;;  %v7392_v35 = vor.u32 %v11981_v14, %v11986_v15 }
  0x33   : > { %1539 = vmatpush.bf16.msrb.mxu1 %v7568_v54  ;;  %v12008_v19 = vld [vmem:[%s17331_s1 + $0x664] sm:$0xf]  ;;  %v12013_v20 = vld [vmem:[%s17331_s1 + $0x670] sm:$0xf0]  ;;  %400 = vst [vmem:[#allocation2 + $0x20] sm:$0x11] %v399_v24  ;;  %v7520_v46 = vor.u32 %v11998_v17, %v12003_v18 }
  0x34   : > { %1553 = vmatpush.bf16.msrb.mxu2 %v7696_v55  ;;  %v409_v26 = vld [vmem:[#allocation2] sm:$0x11]  ;;  %v12046_v30 = vld [vmem:[%s17331_s1 + $0x770] sm:$0xf0]  ;;  %v7648_v47 = vor.u32 %v12008_v19, %v12013_v20  ;;  %v471_v11 = vld [vmem:[#allocation2 + $0x18] sm:$0xff]  ;;  %v407_v19 = vsel %vm405_vm11, 0, %v406_v12 }
  0x35   : > { %1567 = vmatpush.bf16.msrb.mxu3 %v7824_v59  ;;  %v12041_v29 = vld [vmem:[%s17331_s1 + $0x764] sm:$0xf]  ;;  %v12079_v37 = vld [vmem:[%s17331_s1 + $0x450] sm:$0xf0]  ;;  %v410_v41 = vsel %vm405_vm11, 0, %v409_v26 }
  0x36   : > { %1526 = vmatpush.bf16.msrb.mxu0 %v7424_v2  ;;  %v412_v33 = vld [vmem:[%s12053_s27] sm:$0xff]  ;;  %v12089_v39 = vld [vmem:[%s17331_s1 + $0x550] sm:$0xf0]  ;;  %411 = vst [vmem:[#allocation2] sm:$0x11] %v410_v41  ;;  %v7776_v57 = vor.u32 %v12041_v29, %v12046_v30 }
  0x37   : > { %1540 = vmatpush.bf16.msrb.mxu1 %v7552_v7  ;;  %v12074_v36 = vld [vmem:[%s17331_s1 + $0x444] sm:$0xf]  ;;  %v414_v42 = vld [vmem:[%s12053_s27 + $0x10] sm:$0xff]  ;;  %v420_v45 = vpack.c.bf16 %v413_v34, %v412_v33  ;;  %408 = vst [vmem:[#allocation2 + $0x8] sm:$0x11] %v407_v19 }
  0x38   : > { %1554 = vmatpush.bf16.msrb.mxu2 %v7680_v8  ;;  %v12084_v38 = vld [vmem:[%s17331_s1 + $0x544] sm:$0xf]  ;;  %v418_v44 = vld [vmem:[%s12053_s27 + $0x30] sm:$0xff]  ;;  %v421_v50 = vpack.c.bf16 %v415_v43, %v414_v42  ;;  %v7376_v7 = vor.u32 %v12074_v36, %v12079_v37  ;;  %v11363_v16 = vld [vmem:[%s17333_s3 + $0x58c] sm:$0xf] }
  0x39   : > { %1568 = vmatpush.bf16.msrb.mxu3 %v7808_v13  ;;  %v12094_v40 = vld [vmem:[%s17331_s1 + $0x644] sm:$0xf]  ;;  %v12111_v48 = vld [vmem:[%s17331_s1 + $0x650] sm:$0xf0]  ;;  %v423_v53 = vpack.c.bf16 %v419_v49, %v418_v44  ;;  %v427_v54 = vshrl.u32 %v420_v45, 16  ;;  %v430_v55 = vshll.u32 %v420_v45, 16  ;;  %v7504_v8 = vor.u32 %v12084_v38, %v12089_v39 }
  0x3a   : > { %1527 = vmatpush.bf16.msrb.mxu0 %v7408_v22  ;;  %v12117_v51 = vld [vmem:[%s17331_s1 + $0x744] sm:$0xf]  ;;  %v12122_v52 = vld [vmem:[%s17331_s1 + $0x750] sm:$0xf0]  ;;  %v434_v58 = vshrl.u32 %v421_v50, 16  ;;  %v437_v59 = vshll.u32 %v421_v50, 16  ;;  %v7632_v9 = vor.u32 %v12094_v40, %v12111_v48 }
  0x3b   : > { %1541 = vmatpush.bf16.msrb.mxu1 %v7536_v27  ;;  %v12141_v61 = vld [vmem:[%s17331_s1 + $0x424] sm:$0xf]  ;;  %v12146_v62 = vld [vmem:[%s17331_s1 + $0x430] sm:$0xf0]  ;;  %v12148_v63 = vrot.slane %v427_v54, 7  ;;  %v451_v0 = vshrl.u32 %v423_v53, 16  ;;  %v7760_v22 = vor.u32 %v12117_v51, %v12122_v52 }
  0x3c   : > { %1555 = vmatpush.bf16.msrb.mxu2 %v7664_v28  ;;  %v454_v1 = vshll.u32 %v423_v53, 16  ;;  %v12153_v2 = vld [vmem:[%s17331_s1 + $0x524] sm:$0xf]  ;;  %v12158_v3 = vld [vmem:[%s17331_s1 + $0x530] sm:$0xf0]  ;;  %v436_v10 = vrot.slane %v434_v58, 7  ;;  %v7360_v27 = vor.u32 %v12141_v61, %v12146_v62 }
  0x3d   : > { %1569 = vmatpush.bf16.msrb.mxu3 %v7792_v32  ;;  %v12163_v4 = vld [vmem:[%s17331_s1 + $0x624] sm:$0xf]  ;;  %v12168_v5 = vld [vmem:[%s17331_s1 + $0x630] sm:$0xf0]  ;;  %v417_v13 = vld [vmem:[%s12053_s27 + $0x28] sm:$0xff]  ;;  %v432_v14 = vor.u32 %v430_v55, %v12148_v63  ;;  %v453_v15 = vrot.slane %v451_v0, 7 }
  0x3e   : > { %v416_v6 = vld [vmem:[%s12053_s27 + $0x20] sm:$0xff]  ;;  %1528 = vmatpush.bf16.msrb.mxu0 %v7392_v35  ;;  %v439_v24 = vor.u32 %v437_v59, %v436_v10  ;;  %v449_v26 = vrot.slane %v436_v10, 4  ;;  %v7741_v25 = vld [vmem:[%s17331_s1 + $0x730] sm:$0xf0]  ;;  %v7488_v35 = vor.u32 %v12153_v2, %v12158_v3  ;;  %v7616_v36 = vor.u32 %v12163_v4, %v12168_v5  ;;  %v479_v59 = vld [vmem:[#allocation2 + $0x8] sm:$0x11] }
  0x3f   : > { %1542 = vmatpush.bf16.msrb.mxu1 %v7520_v46  ;;  %v474_v17 = vld [vmem:[#allocation2 + $0x20] sm:$0xff]  ;;  %v422_v20 = vpack.c.bf16 %v417_v13, %v416_v6  ;;  %v456_v28 = vor.u32 %v454_v1, %v453_v15  ;;  %v459_v29 = vrot.slane %v453_v15, 4  ;;  %v12210_v30 = vsel %vm12183_vm2, %v432_v14, %v471_v11  ;;  %v7341_v38 = vld [vmem:[%s17331_s1 + $0x410] sm:$0xf0]  ;;  %v11025_v11 = vld [vmem:[%s17331_s1 + $0x6f4] sm:$0xf0] }
  0x40   : > { %1556 = vmatpush.bf16.msrb.mxu2 %v7648_v47  ;;  %v11030_v18 = vld [vmem:[%s17331_s1 + $0x724] sm:$0xf]  ;;  %473 = vst [vmem:[#allocation2 + $0x18] sm:$0xff] %v12210_v30  ;;  %v475_v34 = vsel %vm12183_vm2, %v439_v24, %v474_v17  ;;  %v7469_v44 = vld [vmem:[%s17331_s1 + $0x510] sm:$0xf0]  ;;  %v440_v51 = vrot.slane %v12148_v63, 4  ;;  %v755_v3 = vunpack.c.l.b16 %v12210_v30  ;;  %v756_v4 = vunpack.c.h.b16 %v12210_v30 }
  0x41   : > { %1570 = vmatpush.bf16.msrb.mxu3 %v7776_v57  ;;  %v482_v31 = vld [vmem:[#allocation2] sm:$0x11]  ;;  %v442_v32 = vshrl.u32 %v422_v20, 16  ;;  %v445_v37 = vshll.u32 %v422_v20, 16  ;;  %v12230_v40 = vsel %vm12199_vm3, %v449_v26, %v456_v28  ;;  %476 = vst [vmem:[#allocation2 + $0x20] sm:$0xff] %v475_v34  ;;  %v757_v42 = vunpack.c.l.b16 %v475_v34 }
  0x42   : > { %v10930_v33 = vld [vmem:[%s17331_s1 + $0x404] sm:$0xf]  ;;  %1529 = vmatpush.bf16.msrb.mxu0 %v7376_v7  ;;  %v483_v41 = vsel %vm12017_vm7, %v459_v29, %v482_v31  ;;  %v758_v43 = vunpack.c.h.b16 %v475_v34  ;;  %v761_v46 = vunpack.c.l.b16 %v12230_v40  ;;  %v762_v47 = vunpack.c.h.b16 %v12230_v40  ;;  %v7597_v50 = vld [vmem:[%s17331_s1 + $0x610] sm:$0xf0]  ;;  %v7715_v7 = vld [vmem:[%s17331_s1 + $0x6e8] sm:$0xf] }
  0x43   : > { %v10962_v39 = vld [vmem:[%s17331_s1 + $0x504] sm:$0xf]  ;;  %1543 = vmatpush.bf16.msrb.mxu1 %v7504_v8  ;;  %484 = vst [vmem:[#allocation2] sm:$0x11] %v483_v41  ;;  %v7744_v48 = vor.u32 %v11030_v18, %v7741_v25  ;;  %v444_v49 = vrot.slane %v442_v32, 7  ;;  %v7344_v52 = vor.u32 %v10930_v33, %v7341_v38  ;;  %v7716_v25 = vor.u32 %v11025_v11, %v7715_v7 }
  0x44   : > { %1557 = vmatpush.bf16.msrb.mxu2 %v7632_v9  ;;  %v10994_v45 = vld [vmem:[%s17331_s1 + $0x604] sm:$0xf]  ;;  %v7725_v54 = vld [vmem:[%s17331_s1 + $0x710] sm:$0xf0]  ;;  %v12254_v55 = vpack.c.b16 %v761_v46, %v757_v42  ;;  %v12258_v56 = vpack.c.b16 %v762_v47, %v758_v43  ;;  %v7472_v60 = vor.u32 %v10962_v39, %v7469_v44  ;;  %v7843_v17 = vld [vmem:[%s17331_s1 + $0x7e8] sm:$0xf] }
  0x45   : > { %1571 = vmatpush.bf16.msrb.mxu3 %v7760_v22  ;;  %v11026_v53 = vld [vmem:[%s17331_s1 + $0x704] sm:$0xf]  ;;  %v447_v57 = vor.u32 %v445_v37, %v444_v49  ;;  %v458_v58 = vrot.slane %v444_v49, 4  ;;  %v7600_v61 = vor.u32 %v10994_v45, %v7597_v50  ;;  %v11057_v18 = vld [vmem:[%s17331_s1 + $0x7f4] sm:$0xf0] }
  0x46   : > { %1530 = vmatpush.bf16.msrb.mxu0 %v7360_v27  ;;  %v803_v62 = vshll.u32 %v12254_v55, 16  ;;  %v815_v63 = vshll.u32 %v12258_v56, 16  ;;  %v7728_v0 = vor.u32 %v11026_v53, %v7725_v54  ;;  %v801_v9 = vshrl.u32 %v12254_v55, 16  ;;  %v7699_v33 = vld [vmem:[%s17331_s1 + $0x6c8] sm:$0xf] }
  0x47   : > { %1544 = vmatpush.bf16.msrb.mxu1 %v7488_v35  ;;  %v12264_v1 = vsel %vm12199_vm3, %v440_v51, %v447_v57  ;;  %v480_v2 = vsel %vm12017_vm7, %v458_v58, %v479_v59  ;;  %v813_v10 = vshrl.u32 %v12258_v56, 16  ;;  %v7844_v28 = vor.u32 %v11057_v18, %v7843_v17  ;;  %v11021_v34 = vld [vmem:[%s17331_s1 + $0x6d4] sm:$0xf0]  ;;  %v7827_v45 = vld [vmem:[%s17331_s1 + $0x7c8] sm:$0xf] }
  0x48   : > { %1558 = vmatpush.bf16.msrb.mxu2 %v7616_v36  ;;  %481 = vst [vmem:[#allocation2 + $0x8] sm:$0x11] %v480_v2  ;;  %v759_v5 = vunpack.c.l.b16 %v12264_v1  ;;  %v760_v6 = vunpack.c.h.b16 %v12264_v1  ;;  %v805_v13 = vrot.slane %v803_v62, 1  ;;  %v817_v15 = vrot.slane %v815_v63, 1  ;;  %v7459_v53 = vld [vmem:[%s17331_s1 + $0x4e8] sm:$0xf] }
  0x49   : > { %1572 = vmatpush.bf16.msrb.mxu3 %v7744_v48  ;;  %v11053_v48 = vld [vmem:[%s17331_s1 + $0x7d4] sm:$0xf0]  ;;  %v7587_v57 = vld [vmem:[%s17331_s1 + $0x5e8] sm:$0xf]  ;;  %v7700_v59 = vor.u32 %v11021_v34, %v7699_v33  ;;  %v11182_v1 = vld [vmem:[%s17331_s1 + $0xbe4] sm:$0xf] }
  0x4a   : > { %1531 = vmatpush.bf16.msrb.mxu0 %v7344_v52  ;;  %v619_v8 = vld [vmem:[#allocation2] sm:$0x11]  ;;  %v12288_v19 = vpack.c.b16 %v759_v5, %v755_v3  ;;  %v12292_v20 = vpack.c.b16 %v760_v6, %v756_v4  ;;  %v806_v29 = vor.u32 %v805_v13, %v801_v9  ;;  %v818_v31 = vor.u32 %v817_v15, %v813_v10  ;;  %v10961_v54 = vld [vmem:[%s17331_s1 + $0x4f4] sm:$0xf0]  ;;  %v7683_v2 = vld [vmem:[%s17331_s1 + $0x6a8] sm:$0xf] }
  0x4b   : > { %1545 = vmatpush.bf16.msrb.mxu1 %v7472_v60  ;;  %v765_v12 = vunpack.c.l.b16 %v619_v8  ;;  %v766_v14 = vunpack.c.h.b16 %v619_v8  ;;  %v10993_v58 = vld [vmem:[%s17331_s1 + $0x5f4] sm:$0xf0]  ;;  %v7828_v60 = vor.u32 %v11053_v48, %v7827_v45  ;;  %v7811_v4 = vld [vmem:[%s17331_s1 + $0x7a8] sm:$0xf]  ;;  %v7460_v10 = vor.u32 %v10961_v54, %v7459_v53  ;;  %v11355_v21 = vld [vmem:[%s17333_s3 + $0x54c] sm:$0xf] }
  0x4c   : > { %1559 = vmatpush.bf16.msrb.mxu2 %v7600_v61  ;;  %v779_v26 = vshll.u32 %v12288_v19, 16  ;;  %v791_v27 = vshll.u32 %v12292_v20, 16  ;;  %v777_v36 = vshrl.u32 %v12288_v19, 16  ;;  %v789_v38 = vshrl.u32 %v12292_v20, 16  ;;  %v11017_v3 = vld [vmem:[%s17331_s1 + $0x6b4] sm:$0xf0] }
  0x4d   : > { %1573 = vmatpush.bf16.msrb.mxu3 %v7728_v0  ;;  %v12294_v22 = vpack.c.b16 %v765_v12, %v765_v12  ;;  %v12296_v24 = vpack.c.b16 %v766_v14, %v766_v14  ;;  %v11049_v7 = vld [vmem:[%s17331_s1 + $0x7b4] sm:$0xf0]  ;;  %v7588_v11 = vor.u32 %v10993_v58, %v7587_v57  ;;  %v7443_v12 = vld [vmem:[%s17331_s1 + $0x4c8] sm:$0xf]  ;;  %v7684_v17 = vor.u32 %v11017_v3, %v7683_v2 }
  0x4e   : > { %v781_v37 = vrot.slane %v779_v26, 1  ;;  %v793_v39 = vrot.slane %v791_v27, 1  ;;  %v10957_v13 = vld [vmem:[%s17331_s1 + $0x4d4] sm:$0xf0]  ;;  %v7571_v14 = vld [vmem:[%s17331_s1 + $0x5c8] sm:$0xf]  ;;  %v7812_v27 = vor.u32 %v11049_v7, %v7811_v4 }
  0x4f   : > { %v808_v30 = vshll.u32 %v12294_v22, 16  ;;  %v820_v32 = vshll.u32 %v12296_v24, 16  ;;  %v618_v35 = vld [vmem:[#allocation2 + $0x8] sm:$0x11]  ;;  %v10989_v15 = vld [vmem:[%s17331_s1 + $0x5d4] sm:$0xf0] }
  0x50   : > { %v763_v43 = vunpack.c.l.b16 %v618_v35  ;;  %v764_v44 = vunpack.c.h.b16 %v618_v35  ;;  %v782_v61 = vor.u32 %v781_v37, %v777_v36  ;;  %v794_v63 = vor.u32 %v793_v39, %v789_v38  ;;  %v7427_v33 = vld [vmem:[%s17331_s1 + $0x4a8] sm:$0xf]  ;;  %v10953_v34 = vld [vmem:[%s17331_s1 + $0x4b4] sm:$0xf0] }
  0x51   : > { %v810_v41 = vrot.slane %v808_v30, 1  ;;  %v822_v42 = vrot.slane %v820_v32, 1  ;;  %v11045_v30 = vld [vmem:[%s17331_s1 + $0x794] sm:$0xf0]  ;;  %v7572_v32 = vor.u32 %v10989_v15, %v7571_v14  ;;  %v7555_v35 = vld [vmem:[%s17331_s1 + $0x5a8] sm:$0xf] }
  0x52   : > { %v12322_v51 = vpack.c.b16 %v763_v43, %v763_v43  ;;  %v12324_v52 = vpack.c.b16 %v764_v44, %v764_v44  ;;  %v10985_v36 = vld [vmem:[%s17331_s1 + $0x5b4] sm:$0xf0]  ;;  %v7651_v39 = vld [vmem:[%s17331_s1 + $0x668] sm:$0xf]  ;;  %v7428_v44 = vor.u32 %v10953_v34, %v7427_v33 }
  0x53   : > { %v12317_v49 = vsel %vm775_vm1, %v806_v29, %v810_v41  ;;  %v12320_v50 = vsel %vm775_vm1, %v818_v31, %v822_v42  ;;  %v7795_v29 = vld [vmem:[%s17331_s1 + $0x788] sm:$0xf]  ;;  %v7444_v31 = vor.u32 %v10957_v13, %v7443_v12  ;;  %v11009_v41 = vld [vmem:[%s17331_s1 + $0x674] sm:$0xf0]  ;;  %v7556_v45 = vor.u32 %v10985_v36, %v7555_v35 }
  0x54   : > { %1504 = vmatmul.bf16.vlgmr.msra.gmra.mxu2 %v12317_v49  ;;  %1518 = vmatmul.bf16.vlgmr.msra.gmra.mxu3 %v12320_v50  ;;  %v784_v62 = vshll.u32 %v12322_v51, 16  ;;  %v796_v0 = vshll.u32 %v12324_v52, 16  ;;  %v7796_v38 = vor.u32 %v11045_v30, %v7795_v29  ;;  %v7779_v42 = vld [vmem:[%s17331_s1 + $0x768] sm:$0xf]  ;;  %v11041_v43 = vld [vmem:[%s17331_s1 + $0x774] sm:$0xf0]  ;;  %v7652_v58 = vor.u32 %v11009_v41, %v7651_v39 }
  0x55   : > { %1608 = vmatpush.bf16.msra.mxu2 %v7716_v25  ;;  %1622 = vmatpush.bf16.msra.mxu3 %v7844_v28  ;;  %v7667_v25 = vld [vmem:[%s17331_s1 + $0x688] sm:$0xf]  ;;  %v11013_v28 = vld [vmem:[%s17331_s1 + $0x694] sm:$0xf0]  ;;  %v7717_v41 = vld [vmem:[%s17331_s1 + $0x6f8] sm:$0xf0] }
  0x56   : > { %v786_v8 = vrot.slane %v784_v62, 1  ;;  %v798_v9 = vrot.slane %v796_v0, 1  ;;  %v7668_v37 = vor.u32 %v11013_v28, %v7667_v25  ;;  %v7411_v48 = vld [vmem:[%s17331_s1 + $0x488] sm:$0xf]  ;;  %v10949_v53 = vld [vmem:[%s17331_s1 + $0x494] sm:$0xf0] }
  0x57   : > { %v7539_v54 = vld [vmem:[%s17331_s1 + $0x588] sm:$0xf]  ;;  %v10981_v57 = vld [vmem:[%s17331_s1 + $0x594] sm:$0xf0]  ;;  %v7412_v0 = vor.u32 %v10949_v53, %v7411_v48 }
  0x58   : > { %v12367_v18 = vsel %vm775_vm1, %v782_v61, %v786_v8  ;;  %v12370_v26 = vsel %vm775_vm1, %v794_v63, %v798_v9  ;;  %v11005_v61 = vld [vmem:[%s17331_s1 + $0x654] sm:$0xf0]  ;;  %v7763_v62 = vld [vmem:[%s17331_s1 + $0x748] sm:$0xf]  ;;  %v7540_v2 = vor.u32 %v10981_v57, %v7539_v54 }
  0x59   : > { %1609 = vmatpush.bf16.msra.mxu2 %v7700_v59  ;;  %1623 = vmatpush.bf16.msra.mxu3 %v7828_v60  ;;  %v7780_v59 = vor.u32 %v11041_v43, %v7779_v42  ;;  %v7635_v60 = vld [vmem:[%s17331_s1 + $0x648] sm:$0xf]  ;;  %v11037_v63 = vld [vmem:[%s17331_s1 + $0x754] sm:$0xf0]  ;;  %v11055_v42 = vld [vmem:[%s17331_s1 + $0x7ec] sm:$0xf] }
  0x5a   : > { %1476 = vmatmul.bf16.vlgmr.msra.gmra.mxu0 %v12367_v18  ;;  %1490 = vmatmul.bf16.vlgmr.msra.gmra.mxu1 %v12370_v26  ;;  %v7395_v3 = vld [vmem:[%s17331_s1 + $0x468] sm:$0xf]  ;;  %v10945_v4 = vld [vmem:[%s17331_s1 + $0x474] sm:$0xf0]  ;;  %v7636_v9 = vor.u32 %v11005_v61, %v7635_v60  ;;  %v7845_v43 = vld [vmem:[%s17331_s1 + $0x7f8] sm:$0xf0] }
  0x5b   : > { %1580 = vmatpush.bf16.msra.mxu0 %v7460_v10  ;;  %1594 = vmatpush.bf16.msra.mxu1 %v7588_v11  ;;  %v7523_v7 = vld [vmem:[%s17331_s1 + $0x568] sm:$0xf]  ;;  %v10977_v8 = vld [vmem:[%s17331_s1 + $0x574] sm:$0xf0]  ;;  %v7764_v10 = vor.u32 %v11037_v63, %v7763_v62  ;;  %v7396_v15 = vor.u32 %v10945_v4, %v7395_v3  ;;  %v7848_v60 = vor.u32 %v11055_v42, %v7845_v43  ;;  %v11019_v61 = vld [vmem:[%s17331_s1 + $0x6cc] sm:$0xf] }
  0x5c   : > { %v7619_v11 = vld [vmem:[%s17331_s1 + $0x628] sm:$0xf]  ;;  %v11001_v12 = vld [vmem:[%s17331_s1 + $0x634] sm:$0xf0]  ;;  %v7829_v3 = vld [vmem:[%s17331_s1 + $0x7d8] sm:$0xf0] }
  0x5d   : > { %1610 = vmatpush.bf16.msra.mxu2 %v7684_v17  ;;  %1624 = vmatpush.bf16.msra.mxu3 %v7812_v27  ;;  %v7747_v13 = vld [vmem:[%s17331_s1 + $0x728] sm:$0xf]  ;;  %v11033_v14 = vld [vmem:[%s17331_s1 + $0x734] sm:$0xf0]  ;;  %v7524_v17 = vor.u32 %v10977_v8, %v7523_v7  ;;  %v7620_v30 = vor.u32 %v11001_v12, %v7619_v11  ;;  %v10959_v8 = vld [vmem:[%s17331_s1 + $0x4ec] sm:$0xf] }
  0x5e   : > { %v7379_v27 = vld [vmem:[%s17331_s1 + $0x448] sm:$0xf]  ;;  %v10941_v25 = vld [vmem:[%s17331_s1 + $0x454] sm:$0xf0]  ;;  %v7589_v11 = vld [vmem:[%s17331_s1 + $0x5f8] sm:$0xf0] }
  0x5f   : > { %1581 = vmatpush.bf16.msra.mxu0 %v7444_v31  ;;  %1595 = vmatpush.bf16.msra.mxu1 %v7572_v32  ;;  %v7507_v28 = vld [vmem:[%s17331_s1 + $0x548] sm:$0xf]  ;;  %v10973_v29 = vld [vmem:[%s17331_s1 + $0x554] sm:$0xf0]  ;;  %v7748_v31 = vor.u32 %v11033_v14, %v7747_v13  ;;  %v11015_v14 = vld [vmem:[%s17331_s1 + $0x6ac] sm:$0xf] }
  0x60   : > { %v7603_v32 = vld [vmem:[%s17331_s1 + $0x608] sm:$0xf]  ;;  %v10997_v33 = vld [vmem:[%s17331_s1 + $0x614] sm:$0xf0]  ;;  %v7508_v39 = vor.u32 %v10973_v29, %v7507_v28  ;;  %v7813_v28 = vld [vmem:[%s17331_s1 + $0x7b8] sm:$0xf0] }
  0x61   : > { %1611 = vmatpush.bf16.msra.mxu2 %v7668_v37  ;;  %1625 = vmatpush.bf16.msra.mxu3 %v7796_v38  ;;  %v7363_v34 = vld [vmem:[%s17331_s1 + $0x428] sm:$0xf]  ;;  %v11029_v36 = vld [vmem:[%s17331_s1 + $0x714] sm:$0xf0]  ;;  %v11023_v37 = vld [vmem:[%s17331_s1 + $0x6ec] sm:$0xf]  ;;  %v7380_v38 = vor.u32 %v10941_v25, %v7379_v27  ;;  %v7604_v53 = vor.u32 %v10997_v33, %v7603_v32 }
  0x62   : > { %v7731_v35 = vld [vmem:[%s17331_s1 + $0x708] sm:$0xf]  ;;  %v10969_v48 = vld [vmem:[%s17331_s1 + $0x534] sm:$0xf0]  ;;  %v7685_v27 = vld [vmem:[%s17331_s1 + $0x6b8] sm:$0xf0] }
  0x63   : > { %1582 = vmatpush.bf16.msra.mxu0 %v7428_v44  ;;  %1596 = vmatpush.bf16.msra.mxu1 %v7556_v45  ;;  %v10937_v44 = vld [vmem:[%s17331_s1 + $0x434] sm:$0xf0]  ;;  %v7491_v45 = vld [vmem:[%s17331_s1 + $0x528] sm:$0xf]  ;;  %v7732_v54 = vor.u32 %v11029_v36, %v7731_v35  ;;  %v11047_v25 = vld [vmem:[%s17331_s1 + $0x7ac] sm:$0xf]  ;;  %v7688_v35 = vor.u32 %v11015_v14, %v7685_v27 }
  0x64   : > { %1560 = vmatmul.bf16.vlgmr.msrb.gmra.mxu2 %v12317_v49  ;;  %1574 = vmatmul.bf16.vlgmr.msrb.gmra.mxu3 %v12320_v50  ;;  %v7347_v57 = vld [vmem:[%s17331_s1 + $0x408] sm:$0xf]  ;;  %v7364_v62 = vor.u32 %v10937_v44, %v7363_v34  ;;  %v7492_v63 = vor.u32 %v10969_v48, %v7491_v45  ;;  %v10965_v7 = vld [vmem:[%s17331_s1 + $0x514] sm:$0xf0]  ;;  %v7445_v32 = vld [vmem:[%s17331_s1 + $0x4d8] sm:$0xf0]  ;;  %v7816_v36 = vor.u32 %v11047_v25, %v7813_v28 }
  0x65   : > { %1612 = vmatpush.bf16.msra.mxu2 %v7652_v58  ;;  %1626 = vmatpush.bf16.msra.mxu3 %v7780_v59  ;;  %v10933_v58 = vld [vmem:[%s17331_s1 + $0x414] sm:$0xf0]  ;;  %v7720_v59 = vor.u32 %v11023_v37, %v7717_v41  ;;  %v7475_v4 = vld [vmem:[%s17331_s1 + $0x508] sm:$0xf]  ;;  %v10987_v33 = vld [vmem:[%s17331_s1 + $0x5cc] sm:$0xf] }
  0x66   : > { %v7573_v34 = vld [vmem:[%s17331_s1 + $0x5d8] sm:$0xf0]  ;;  %v11011_v37 = vld [vmem:[%s17331_s1 + $0x68c] sm:$0xf] }
  0x67   : > { %1583 = vmatpush.bf16.msra.mxu0 %v7412_v0  ;;  %1597 = vmatpush.bf16.msra.mxu1 %v7540_v2  ;;  %v7701_v0 = vld [vmem:[%s17331_s1 + $0x6d8] sm:$0xf0]  ;;  %v11051_v2 = vld [vmem:[%s17331_s1 + $0x7cc] sm:$0xf]  ;;  %v7576_v43 = vor.u32 %v10987_v33, %v7573_v34 }
  0x68   : > { %v7704_v12 = vor.u32 %v11019_v61, %v7701_v0  ;;  %v7832_v13 = vor.u32 %v11051_v2, %v7829_v3  ;;  %v7797_v41 = vld [vmem:[%s17331_s1 + $0x798] sm:$0xf0]  ;;  %v10951_v44 = vld [vmem:[%s17331_s1 + $0x4ac] sm:$0xf] }
  0x69   : > { %1613 = vmatpush.bf16.msra.mxu2 %v7636_v9  ;;  %1627 = vmatpush.bf16.msra.mxu3 %v7764_v10  ;;  %v7461_v9 = vld [vmem:[%s17331_s1 + $0x4f8] sm:$0xf0]  ;;  %v10991_v10 = vld [vmem:[%s17331_s1 + $0x5ec] sm:$0xf] }
  0x6a   : > { %1532 = vmatmul.bf16.vlgmr.msrb.gmra.mxu0 %v12367_v18  ;;  %1546 = vmatmul.bf16.vlgmr.msrb.gmra.mxu1 %v12370_v26  ;;  %v7464_v29 = vor.u32 %v10959_v8, %v7461_v9  ;;  %v7429_v45 = vld [vmem:[%s17331_s1 + $0x4b8] sm:$0xf0]  ;;  %v10983_v48 = vld [vmem:[%s17331_s1 + $0x5ac] sm:$0xf] }
  0x6b   : > { %1584 = vmatpush.bf16.msra.mxu0 %v7396_v15  ;;  %1598 = vmatpush.bf16.msra.mxu1 %v7524_v17  ;;  %v7348_v15 = vor.u32 %v10933_v58, %v7347_v57  ;;  %v7476_v17 = vor.u32 %v10965_v7, %v7475_v4  ;;  %v11007_v58 = vld [vmem:[%s17331_s1 + $0x66c] sm:$0xf]  ;;  %v7781_v61 = vld [vmem:[%s17331_s1 + $0x778] sm:$0xf0] }
  0x6c   : > { %v10947_v0 = vld [vmem:[%s17331_s1 + $0x48c] sm:$0xf]  ;;  %v7413_v2 = vld [vmem:[%s17331_s1 + $0x498] sm:$0xf0] }
  0x6d   : > { %1614 = vmatpush.bf16.msra.mxu2 %v7620_v30  ;;  %1628 = vmatpush.bf16.msra.mxu3 %v7748_v31  ;;  %v7592_v30 = vor.u32 %v10991_v10, %v7589_v11  ;;  %v10955_v31 = vld [vmem:[%s17331_s1 + $0x4cc] sm:$0xf]  ;;  %v7541_v4 = vld [vmem:[%s17331_s1 + $0x598] sm:$0xf0] }
  0x6e   : > { %v7448_v42 = vor.u32 %v10955_v31, %v7445_v32  ;;  %v10979_v3 = vld [vmem:[%s17331_s1 + $0x58c] sm:$0xf]  ;;  %v7637_v10 = vld [vmem:[%s17331_s1 + $0x658] sm:$0xf0] }
  0x6f   : > { %1585 = vmatpush.bf16.msra.mxu0 %v7380_v38  ;;  %1599 = vmatpush.bf16.msra.mxu1 %v7508_v39  ;;  %v7669_v38 = vld [vmem:[%s17331_s1 + $0x698] sm:$0xf0]  ;;  %v11043_v39 = vld [vmem:[%s17331_s1 + $0x78c] sm:$0xf]  ;;  %v7544_v14 = vor.u32 %v10979_v3, %v7541_v4 }
  0x70   : > { %v7800_v57 = vor.u32 %v11043_v39, %v7797_v41  ;;  %v11003_v9 = vld [vmem:[%s17331_s1 + $0x64c] sm:$0xf]  ;;  %v7525_v25 = vld [vmem:[%s17331_s1 + $0x578] sm:$0xf0] }
  0x71   : > { %1615 = vmatpush.bf16.msra.mxu2 %v7604_v53  ;;  %1629 = vmatpush.bf16.msra.mxu3 %v7732_v54  ;;  %v7557_v53 = vld [vmem:[%s17331_s1 + $0x5b8] sm:$0xf0]  ;;  %v7672_v54 = vor.u32 %v11011_v37, %v7669_v38  ;;  %v11035_v11 = vld [vmem:[%s17331_s1 + $0x74c] sm:$0xf]  ;;  %v7640_v28 = vor.u32 %v11003_v9, %v7637_v10  ;;  %v8203_v10 = vld [vmem:[%s17331_s1 + $0x2c0] sm:$0xf] }
  0x72   : > { %v10975_v27 = vld [vmem:[%s17331_s1 + $0x56c] sm:$0xf]  ;;  %v7621_v31 = vld [vmem:[%s17331_s1 + $0x638] sm:$0xf0] }
  0x73   : > { %1586 = vmatpush.bf16.msra.mxu0 %v7364_v62  ;;  %1600 = vmatpush.bf16.msra.mxu1 %v7492_v63  ;;  %v7432_v62 = vor.u32 %v10951_v44, %v7429_v45  ;;  %v7560_v63 = vor.u32 %v10983_v48, %v7557_v53  ;;  %v11031_v32 = vld [vmem:[%s17331_s1 + $0x72c] sm:$0xf]  ;;  %v7749_v33 = vld [vmem:[%s17331_s1 + $0x738] sm:$0xf0] }
  0x74   : > { %1616 = vmatmul.bf16.vlgmr.msra.gmra.mxu2 %v12317_v49  ;;  %1630 = vmatmul.bf16.vlgmr.msra.gmra.mxu3 %v12320_v50  ;;  %v7381_v37 = vld [vmem:[%s17331_s1 + $0x458] sm:$0xf0]  ;;  %v10971_v38 = vld [vmem:[%s17331_s1 + $0x54c] sm:$0xf] }
  0x75   : > { %1664 = vmatpush.bf16.msrb.mxu2 %v7720_v59  ;;  %1678 = vmatpush.bf16.msrb.mxu3 %v7848_v60  ;;  %v7653_v59 = vld [vmem:[%s17331_s1 + $0x678] sm:$0xf0]  ;;  %v11039_v60 = vld [vmem:[%s17331_s1 + $0x76c] sm:$0xf] }
  0x76   : > { %v7656_v7 = vor.u32 %v11007_v58, %v7653_v59  ;;  %v7784_v8 = vor.u32 %v11039_v60, %v7781_v61  ;;  %v7509_v39 = vld [vmem:[%s17331_s1 + $0x558] sm:$0xf0]  ;;  %v10935_v45 = vld [vmem:[%s17331_s1 + $0x42c] sm:$0xf]  ;;  %v10896_v59 = vld [vmem:[%s17331_s1 + $0x2ec] sm:$0xf0] }
  0x77   : > { %1587 = vmatpush.bf16.msra.mxu0 %v7348_v15  ;;  %1601 = vmatpush.bf16.msra.mxu1 %v7476_v17  ;;  %v10943_v15 = vld [vmem:[%s17331_s1 + $0x46c] sm:$0xf]  ;;  %v7397_v17 = vld [vmem:[%s17331_s1 + $0x478] sm:$0xf0]  ;;  %v7512_v58 = vor.u32 %v10971_v38, %v7509_v39  ;;  %v8347_v60 = vld [vmem:[%s17331_s1 + $0x3e0] sm:$0xf] }
  0x78   : > { %v7400_v34 = vor.u32 %v10943_v15, %v7397_v17  ;;  %v7605_v44 = vld [vmem:[%s17331_s1 + $0x618] sm:$0xf0]  ;;  %v11027_v48 = vld [vmem:[%s17331_s1 + $0x70c] sm:$0xf]  ;;  %v10928_v61 = vld [vmem:[%s17331_s1 + $0x3ec] sm:$0xf0] }
  0x79   : > { %1665 = vmatpush.bf16.msrb.mxu2 %v7704_v12  ;;  %1679 = vmatpush.bf16.msrb.mxu3 %v7832_v13  ;;  %v7765_v12 = vld [vmem:[%s17331_s1 + $0x758] sm:$0xf0]  ;;  %v7416_v13 = vor.u32 %v10947_v0, %v7413_v2  ;;  %v10931_v4 = vld [vmem:[%s17331_s1 + $0x40c] sm:$0xf]  ;;  %v8348_v9 = vor.u32 %v10928_v61, %v8347_v60  ;;  %v10924_v15 = vld [vmem:[%s17331_s1 + $0x3cc] sm:$0xf0] }
  0x7a   : > { %1588 = vmatmul.bf16.vlgmr.msra.gmra.mxu0 %v12367_v18  ;;  %1602 = vmatmul.bf16.vlgmr.msra.gmra.mxu1 %v12370_v26  ;;  %v7733_v53 = vld [vmem:[%s17331_s1 + $0x718] sm:$0xf0]  ;;  %v10963_v17 = vld [vmem:[%s17331_s1 + $0x50c] sm:$0xf]  ;;  %v10920_v38 = vld [vmem:[%s17331_s1 + $0x3ac] sm:$0xf0] }
  0x7b   : > { %1636 = vmatpush.bf16.msrb.mxu0 %v7464_v29  ;;  %1650 = vmatpush.bf16.msrb.mxu1 %v7592_v30  ;;  %v7768_v29 = vor.u32 %v11035_v11, %v7765_v12  ;;  %v10999_v30 = vld [vmem:[%s17331_s1 + $0x62c] sm:$0xf]  ;;  %v7493_v0 = vld [vmem:[%s17331_s1 + $0x538] sm:$0xf0]  ;;  %v7736_v3 = vor.u32 %v11027_v48, %v7733_v53  ;;  %v7931_v60 = vld [vmem:[%s17331_s1 + $0xa0] sm:$0xf] }
  0x7c   : > { %v7624_v41 = vor.u32 %v10999_v30, %v7621_v31  ;;  %v10864_v30 = vld [vmem:[%s17331_s1 + $0x1ec] sm:$0xf0] }
  0x7d   : > { %1666 = vmatpush.bf16.msrb.mxu2 %v7688_v35  ;;  %1680 = vmatpush.bf16.msrb.mxu3 %v7816_v36  ;;  %v7528_v35 = vor.u32 %v10975_v27, %v7525_v25  ;;  %v10939_v36 = vld [vmem:[%s17331_s1 + $0x44c] sm:$0xf]  ;;  %v7477_v27 = vld [vmem:[%s17331_s1 + $0x518] sm:$0xf0]  ;;  %v7963_v25 = vld [vmem:[%s17331_s1 + $0xe0] sm:$0xf] }
  0x7e   : > { %v10824_v61 = vld [vmem:[%s17331_s1 + $0xac] sm:$0xf0] }
  0x7f   : > { %1637 = vmatpush.bf16.msrb.mxu0 %v7448_v42  ;;  %1651 = vmatpush.bf16.msrb.mxu1 %v7576_v43  ;;  %v7752_v42 = vor.u32 %v11031_v32, %v7749_v33  ;;  %v10995_v43 = vld [vmem:[%s17331_s1 + $0x60c] sm:$0xf]  ;;  %v8187_v33 = vld [vmem:[%s17331_s1 + $0x2a0] sm:$0xf] }
  0x80   : > { %v7608_v2 = vor.u32 %v10995_v43, %v7605_v44  ;;  %v10828_v43 = vld [vmem:[%s17331_s1 + $0xcc] sm:$0xf0]  ;;  %v8075_v44 = vld [vmem:[%s17331_s1 + $0x1c0] sm:$0xf] }
  0x81   : > { %1667 = vmatpush.bf16.msrb.mxu2 %v7672_v54  ;;  %1681 = vmatpush.bf16.msrb.mxu3 %v7800_v57  ;;  %v8219_v54 = vld [vmem:[%s17331_s1 + $0x2e0] sm:$0xf]  ;;  %v7384_v57 = vor.u32 %v10939_v36, %v7381_v37  ;;  %v10888_v36 = vld [vmem:[%s17331_s1 + $0x2ac] sm:$0xf0] }
  0x82   : > { %v8315_v37 = vld [vmem:[%s17331_s1 + $0x3a0] sm:$0xf]  ;;  %v8188_v48 = vor.u32 %v10888_v36, %v8187_v33  ;;  %v10848_v33 = vld [vmem:[%s17331_s1 + $0x16c] sm:$0xf0] }
  0x83   : > { %1638 = vmatpush.bf16.msrb.mxu0 %v7432_v62  ;;  %1652 = vmatpush.bf16.msrb.mxu1 %v7560_v63  ;;  %v7365_v62 = vld [vmem:[%s17331_s1 + $0x438] sm:$0xf0]  ;;  %v10967_v63 = vld [vmem:[%s17331_s1 + $0x52c] sm:$0xf]  ;;  %v8316_v53 = vor.u32 %v10920_v38, %v8315_v37  ;;  %v8123_v36 = vld [vmem:[%s17331_s1 + $0x220] sm:$0xf] }
  0x84   : > { %v7368_v11 = vor.u32 %v10935_v45, %v7365_v62  ;;  %v7496_v12 = vor.u32 %v10967_v63, %v7493_v0  ;;  %v10860_v45 = vld [vmem:[%s17331_s1 + $0x1cc] sm:$0xf0]  ;;  %v8059_v62 = vld [vmem:[%s17331_s1 + $0x1a0] sm:$0xf] }
  0x85   : > { %1668 = vmatpush.bf16.msrb.mxu2 %v7656_v7  ;;  %1682 = vmatpush.bf16.msrb.mxu3 %v7784_v8  ;;  %v7349_v7 = vld [vmem:[%s17331_s1 + $0x418] sm:$0xf0]  ;;  %v8220_v8 = vor.u32 %v10896_v59, %v8219_v54  ;;  %v8299_v54 = vld [vmem:[%s17331_s1 + $0x380] sm:$0xf]  ;;  %v8076_v59 = vor.u32 %v10860_v45, %v8075_v44  ;;  %v10856_v63 = vld [vmem:[%s17331_s1 + $0x1ac] sm:$0xf0] }
  0x86   : > { %v10872_v37 = vld [vmem:[%s17331_s1 + $0x22c] sm:$0xf0]  ;;  %v8251_v38 = vld [vmem:[%s17331_s1 + $0x320] sm:$0xf] }
  0x87   : > { %1639 = vmatpush.bf16.msrb.mxu0 %v7416_v13  ;;  %1653 = vmatpush.bf16.msrb.mxu1 %v7544_v14  ;;  %v10892_v13 = vld [vmem:[%s17331_s1 + $0x2cc] sm:$0xf0]  ;;  %v8331_v14 = vld [vmem:[%s17331_s1 + $0x3c0] sm:$0xf] }
  0x88   : > { %v8204_v31 = vor.u32 %v10892_v13, %v8203_v10  ;;  %v8332_v32 = vor.u32 %v10924_v15, %v8331_v14  ;;  %v8060_v10 = vor.u32 %v10856_v63, %v8059_v62  ;;  %v8139_v15 = vld [vmem:[%s17331_s1 + $0x240] sm:$0xf]  ;;  %v10812_v44 = vld [vmem:[%s17331_s1 + $0x4c] sm:$0xf0]  ;;  %v8221_v63 = vld [vmem:[%s17331_s1 + $0x2f0] sm:$0xf0] }
  0x89   : > { %1669 = vmatpush.bf16.msrb.mxu2 %v7640_v28  ;;  %1683 = vmatpush.bf16.msrb.mxu3 %v7768_v29  ;;  %v10832_v28 = vld [vmem:[%s17331_s1 + $0xec] sm:$0xf0]  ;;  %v8091_v29 = vld [vmem:[%s17331_s1 + $0x1e0] sm:$0xf] }
  0x8a   : > { %v7964_v39 = vor.u32 %v10832_v28, %v7963_v25  ;;  %v10908_v25 = vld [vmem:[%s17331_s1 + $0x34c] sm:$0xf0]  ;;  %v8011_v45 = vld [vmem:[%s17331_s1 + $0x140] sm:$0xf] }
  0x8b   : > { %1640 = vmatpush.bf16.msrb.mxu0 %v7400_v34  ;;  %1654 = vmatpush.bf16.msrb.mxu1 %v7528_v35  ;;  %v7352_v34 = vor.u32 %v10931_v4, %v7349_v7  ;;  %v7480_v35 = vor.u32 %v10963_v17, %v7477_v27  ;;  %v10880_v4 = vld [vmem:[%s17331_s1 + $0x26c] sm:$0xf0]  ;;  %v8283_v7 = vld [vmem:[%s17331_s1 + $0x360] sm:$0xf] }
  0x8c   : > { %v10876_v17 = vld [vmem:[%s17331_s1 + $0x24c] sm:$0xf0]  ;;  %v8267_v27 = vld [vmem:[%s17331_s1 + $0x340] sm:$0xf] }
  0x8d   : > { %1670 = vmatpush.bf16.msrb.mxu2 %v7624_v41  ;;  %1684 = vmatpush.bf16.msrb.mxu3 %v7752_v42  ;;  %v8092_v41 = vor.u32 %v10864_v30, %v8091_v29  ;;  %v7947_v42 = vld [vmem:[%s17331_s1 + $0xc0] sm:$0xf] }
  0x8e   : > { %v7899_v30 = vld [vmem:[%s17331_s1 + $0x60] sm:$0xf] }
  0x8f   : > { %1641 = vmatpush.bf16.msrb.mxu0 %v7384_v57  ;;  %1655 = vmatpush.bf16.msrb.mxu1 %v7512_v58  ;;  %v10916_v57 = vld [vmem:[%s17331_s1 + $0x38c] sm:$0xf0]  ;;  %v7948_v58 = vor.u32 %v10828_v43, %v7947_v42  ;;  %v7883_v43 = vld [vmem:[%s17331_s1 + $0x40] sm:$0xf] }
  0x91   : > { %1671 = vmatpush.bf16.msrb.mxu2 %v7608_v2  ;;  %1685 = vmatpush.bf16.msrb.mxu3 %v7736_v3  ;;  %v8300_v2 = vor.u32 %v10916_v57, %v8299_v54  ;;  %v8155_v3 = vld [vmem:[%s17331_s1 + $0x260] sm:$0xf]  ;;  %v10868_v54 = vld [vmem:[%s17331_s1 + $0x20c] sm:$0xf0] }
  0x92   : > { %v8156_v13 = vor.u32 %v10880_v4, %v8155_v3  ;;  %v7867_v57 = vld [vmem:[%s17331_s1 + $0x20] sm:$0xf]  ;;  %v10808_v3 = vld [vmem:[%s17331_s1 + $0x2c] sm:$0xf0] }
  0x93   : > { %1642 = vmatpush.bf16.msrb.mxu0 %v7368_v11  ;;  %1656 = vmatpush.bf16.msrb.mxu1 %v7496_v12  ;;  %v10820_v11 = vld [vmem:[%s17331_s1 + $0x8c] sm:$0xf0]  ;;  %v8043_v12 = vld [vmem:[%s17331_s1 + $0x180] sm:$0xf] }
  0x94   : > { %1672 = vmatmul.bf16.vlgmr.msrb.gmra.mxu2 %v12317_v49  ;;  %1686 = vmatmul.bf16.vlgmr.msrb.gmra.mxu3 %v12320_v50  ;;  %v8171_v49 = vld [vmem:[%s17331_s1 + $0x280] sm:$0xf]  ;;  %v10884_v50 = vld [vmem:[%s17331_s1 + $0x28c] sm:$0xf0] }
  0x95   : > { %2364 = vmatpush.bf16.msra.mxu2 %v8220_v8  ;;  %2378 = vmatpush.bf16.msra.mxu3 %v8348_v9  ;;  %v8172_v0 = vor.u32 %v10884_v50, %v8171_v49  ;;  %v10912_v8 = vld [vmem:[%s17331_s1 + $0x36c] sm:$0xf0]  ;;  %v7932_v9 = vor.u32 %v10824_v61, %v7931_v60  ;;  %v8107_v50 = vld [vmem:[%s17331_s1 + $0x200] sm:$0xf]  ;;  %v10894_v60 = vld [vmem:[%s17331_s1 + $0x2e4] sm:$0xf]  ;;  %v7884_v61 = vor.u32 %v10812_v44, %v7883_v43 }
  0x96   : > { %v8284_v14 = vor.u32 %v10912_v8, %v8283_v7  ;;  %v7995_v4 = vld [vmem:[%s17331_s1 + $0x120] sm:$0xf]  ;;  %v10840_v7 = vld [vmem:[%s17331_s1 + $0x12c] sm:$0xf0]  ;;  %v8108_v8 = vor.u32 %v10868_v54, %v8107_v50  ;;  %v10918_v43 = vld [vmem:[%s17331_s1 + $0x3a4] sm:$0xf] }
  0x97   : > { %1643 = vmatpush.bf16.msrb.mxu0 %v7352_v34  ;;  %1657 = vmatpush.bf16.msrb.mxu1 %v7480_v35  ;;  %v8140_v34 = vor.u32 %v10876_v17, %v8139_v15  ;;  %v8268_v35 = vor.u32 %v10908_v25, %v8267_v27  ;;  %v8205_v15 = vld [vmem:[%s17331_s1 + $0x2d0] sm:$0xf0]  ;;  %v10922_v17 = vld [vmem:[%s17331_s1 + $0x3c4] sm:$0xf]  ;;  %v7979_v25 = vld [vmem:[%s17331_s1 + $0x100] sm:$0xf] }
  0x98   : > { %v8333_v27 = vld [vmem:[%s17331_s1 + $0x3d0] sm:$0xf0] }
  0x99   : > { %2365 = vmatpush.bf16.msra.mxu2 %v8204_v31  ;;  %2379 = vmatpush.bf16.msra.mxu3 %v8332_v32  ;;  %v10816_v31 = vld [vmem:[%s17331_s1 + $0x6c] sm:$0xf0]  ;;  %v8027_v32 = vld [vmem:[%s17331_s1 + $0x160] sm:$0xf]  ;;  %v8317_v44 = vld [vmem:[%s17331_s1 + $0x3b0] sm:$0xf0] }
  0x9a   : > { %1644 = vmatmul.bf16.vlgmr.msrb.gmra.mxu0 %v12367_v18  ;;  %1658 = vmatmul.bf16.vlgmr.msrb.gmra.mxu1 %v12370_v26  ;;  %v7915_v18 = vld [vmem:[%s17331_s1 + $0x80] sm:$0xf]  ;;  %v10852_v26 = vld [vmem:[%s17331_s1 + $0x18c] sm:$0xf0]  ;;  %v8028_v42 = vor.u32 %v10848_v33, %v8027_v32  ;;  %v8093_v32 = vld [vmem:[%s17331_s1 + $0x1f0] sm:$0xf0]  ;;  %v8320_v54 = vor.u32 %v10918_v43, %v8317_v44 }
  0x9b   : > { %2336 = vmatpush.bf16.msra.mxu0 %v7964_v39  ;;  %2350 = vmatpush.bf16.msra.mxu1 %v8092_v41  ;;  %v7916_v28 = vor.u32 %v10820_v11, %v7915_v18  ;;  %v8044_v29 = vor.u32 %v10852_v26, %v8043_v12  ;;  %v10904_v39 = vld [vmem:[%s17331_s1 + $0x32c] sm:$0xf0]  ;;  %v7900_v41 = vor.u32 %v10816_v31, %v7899_v30  ;;  %v10890_v26 = vld [vmem:[%s17331_s1 + $0x2c4] sm:$0xf]  ;;  %v7965_v30 = vld [vmem:[%s17331_s1 + $0xf0] sm:$0xf0] }
  0x9c   : > { %v8252_v49 = vor.u32 %v10904_v39, %v8251_v38  ;;  %v10804_v18 = vld [vmem:[%s17331_s1 + $0xc] sm:$0xf0]  ;;  %v8224_v11 = vor.u32 %v10894_v60, %v8221_v63  ;;  %v10862_v31 = vld [vmem:[%s17331_s1 + $0x1e4] sm:$0xf]  ;;  %v8208_v33 = vor.u32 %v10890_v26, %v8205_v15  ;;  %v8173_v60 = vld [vmem:[%s17331_s1 + $0x290] sm:$0xf0] }
  0x9d   : > { %2366 = vmatpush.bf16.msra.mxu2 %v8188_v48  ;;  %2380 = vmatpush.bf16.msra.mxu3 %v8316_v53  ;;  %v10844_v48 = vld [vmem:[%s17331_s1 + $0x14c] sm:$0xf0]  ;;  %v8124_v53 = vor.u32 %v10872_v37, %v8123_v36  ;;  %v10826_v37 = vld [vmem:[%s17331_s1 + $0xc4] sm:$0xf]  ;;  %v7933_v63 = vld [vmem:[%s17331_s1 + $0xb0] sm:$0xf0] }
  0x9e   : > { %v8012_v62 = vor.u32 %v10844_v48, %v8011_v45  ;;  %v10886_v38 = vld [vmem:[%s17331_s1 + $0x2a4] sm:$0xf]  ;;  %v7949_v45 = vld [vmem:[%s17331_s1 + $0xd0] sm:$0xf0] }
  0x9f   : > { %2337 = vmatpush.bf16.msra.mxu0 %v7948_v58  ;;  %2351 = vmatpush.bf16.msra.mxu1 %v8076_v59  ;;  %v8235_v58 = vld [vmem:[%s17331_s1 + $0x300] sm:$0xf]  ;;  %v10900_v59 = vld [vmem:[%s17331_s1 + $0x30c] sm:$0xf0]  ;;  %v10858_v48 = vld [vmem:[%s17331_s1 + $0x1c4] sm:$0xf] }
  0xa0   : > { %v7917_v26 = vld [vmem:[%s17331_s1 + $0x90] sm:$0xf0]  ;;  %v10814_v15 = vld [vmem:[%s17331_s1 + $0x64] sm:$0xf] }
  0xa1   : > { %2367 = vmatpush.bf16.msra.mxu2 %v8172_v0  ;;  %2381 = vmatpush.bf16.msra.mxu3 %v8300_v2  ;;  %v10926_v0 = vld [vmem:[%s17331_s1 + $0x3e4] sm:$0xf]  ;;  %v8349_v2 = vld [vmem:[%s17331_s1 + $0x3f0] sm:$0xf0] }
  0xa2   : > { %v8352_v12 = vor.u32 %v10926_v0, %v8349_v2  ;;  %v10854_v0 = vld [vmem:[%s17331_s1 + $0x1a4] sm:$0xf]  ;;  %v8061_v2 = vld [vmem:[%s17331_s1 + $0x1b0] sm:$0xf0] }
  0xa3   : > { %2338 = vmatpush.bf16.msra.mxu0 %v7932_v9  ;;  %2352 = vmatpush.bf16.msra.mxu1 %v8060_v10  ;;  %v8236_v9 = vor.u32 %v10900_v59, %v8235_v58  ;;  %v7851_v10 = vld [vmem:[%s17331_s1] sm:$0xf]  ;;  %v7952_v58 = vor.u32 %v10826_v37, %v7949_v45  ;;  %v8125_v43 = vld [vmem:[%s17331_s1 + $0x230] sm:$0xf0]  ;;  %v10902_v44 = vld [vmem:[%s17331_s1 + $0x324] sm:$0xf] }
  0xa4   : > { %v8253_v45 = vld [vmem:[%s17331_s1 + $0x330] sm:$0xf0] }
  0xa5   : > { %2368 = vmatpush.bf16.msra.mxu2 %v8156_v13  ;;  %2382 = vmatpush.bf16.msra.mxu3 %v8284_v14  ;;  %v7868_v13 = vor.u32 %v10808_v3, %v7867_v57  ;;  %v7996_v14 = vor.u32 %v10840_v7, %v7995_v4  ;;  %v10882_v57 = vld [vmem:[%s17331_s1 + $0x284] sm:$0xf] }
  0xa6   : > { %v10818_v3 = vld [vmem:[%s17331_s1 + $0x84] sm:$0xf]  ;;  %v8176_v4 = vor.u32 %v10882_v57, %v8173_v60 }
  0xa7   : > { %2339 = vmatpush.bf16.msra.mxu0 %v7916_v28  ;;  %2353 = vmatpush.bf16.msra.mxu1 %v8044_v29  ;;  %v10836_v28 = vld [vmem:[%s17331_s1 + $0x10c] sm:$0xf0]  ;;  %v10830_v29 = vld [vmem:[%s17331_s1 + $0xe4] sm:$0xf] }
  0xa8   : > { %v7980_v36 = vor.u32 %v10836_v28, %v7979_v25  ;;  %v7968_v39 = vor.u32 %v10830_v29, %v7965_v30  ;;  %v10874_v25 = vld [vmem:[%s17331_s1 + $0x244] sm:$0xf]  ;;  %v7920_v28 = vor.u32 %v10818_v3, %v7917_v26  ;;  %v8141_v30 = vld [vmem:[%s17331_s1 + $0x250] sm:$0xf0] }
  0xa9   : > { %2369 = vmatpush.bf16.msra.mxu2 %v8140_v34  ;;  %2383 = vmatpush.bf16.msra.mxu3 %v8268_v35  ;;  %v8336_v34 = vor.u32 %v10922_v17, %v8333_v27  ;;  %v7852_v35 = vor.u32 %v10804_v18, %v7851_v10  ;;  %v8064_v10 = vor.u32 %v10854_v0, %v8061_v2  ;;  %v8157_v18 = vld [vmem:[%s17331_s1 + $0x270] sm:$0xf0]  ;;  %v10838_v2 = vld [vmem:[%s17331_s1 + $0x124] sm:$0xf] }
  0xaa   : > { %v8144_v37 = vor.u32 %v10874_v25, %v8141_v30  ;;  %v8237_v0 = vld [vmem:[%s17331_s1 + $0x310] sm:$0xf0]  ;;  %v10802_v26 = vld [vmem:[%s17331_s1 + $0x4] sm:$0xf]  ;;  %v10865_v30 = vld [vmem:[%s17331_s1 + $0x1f4] sm:$0xf0] }
  0xab   : > { %2340 = vmatpush.bf16.msra.mxu0 %v7900_v41  ;;  %2354 = vmatpush.bf16.msra.mxu1 %v8028_v42  ;;  %v8096_v41 = vor.u32 %v10862_v31, %v8093_v32  ;;  %v8189_v42 = vld [vmem:[%s17331_s1 + $0x2b0] sm:$0xf0]  ;;  %v10906_v31 = vld [vmem:[%s17331_s1 + $0x344] sm:$0xf] }
  0xac   : > { %v8192_v50 = vor.u32 %v10886_v38, %v8189_v42  ;;  %v8269_v32 = vld [vmem:[%s17331_s1 + $0x350] sm:$0xf0] }
  0xad   : > { %2370 = vmatpush.bf16.msra.mxu2 %v8124_v53  ;;  %2384 = vmatpush.bf16.msra.mxu3 %v8252_v49  ;;  %v8077_v53 = vld [vmem:[%s17331_s1 + $0x1d0] sm:$0xf0]  ;;  %v10822_v49 = vld [vmem:[%s17331_s1 + $0xa4] sm:$0xf]  ;;  %v8272_v38 = vor.u32 %v10906_v31, %v8269_v32  ;;  %v8211_v31 = vld [vmem:[%s17331_s1 + $0x2c8] sm:$0xf] }
  0xae   : > { %v8080_v59 = vor.u32 %v10858_v48, %v8077_v53  ;;  %v7885_v48 = vld [vmem:[%s17331_s1 + $0x50] sm:$0xf0]  ;;  %v10842_v53 = vld [vmem:[%s17331_s1 + $0x144] sm:$0xf]  ;;  %v10893_v32 = vld [vmem:[%s17331_s1 + $0x2d4] sm:$0xf0] }
  0xaf   : > { %2341 = vmatpush.bf16.msra.mxu0 %v7884_v61  ;;  %2355 = vmatpush.bf16.msra.mxu1 %v8012_v62  ;;  %v10914_v61 = vld [vmem:[%s17331_s1 + $0x384] sm:$0xf]  ;;  %v8301_v62 = vld [vmem:[%s17331_s1 + $0x390] sm:$0xf0] }
  0xb0   : > { %v8304_v7 = vor.u32 %v10914_v61, %v8301_v62  ;;  %v8109_v62 = vld [vmem:[%s17331_s1 + $0x210] sm:$0xf0] }
  0xb1   : > { %2371 = vmatpush.bf16.msra.mxu2 %v8108_v8  ;;  %2385 = vmatpush.bf16.msra.mxu3 %v8236_v9  ;;  %v10878_v8 = vld [vmem:[%s17331_s1 + $0x264] sm:$0xf]  ;;  %v7936_v9 = vor.u32 %v10822_v49, %v7933_v63  ;;  %v8013_v49 = vld [vmem:[%s17331_s1 + $0x150] sm:$0xf0] }
  0xb2   : > { %v8160_v17 = vor.u32 %v10878_v8, %v8157_v18  ;;  %v8016_v61 = vor.u32 %v10842_v53, %v8013_v49  ;;  %v10898_v63 = vld [vmem:[%s17331_s1 + $0x304] sm:$0xf]  ;;  %v7997_v3 = vld [vmem:[%s17331_s1 + $0x130] sm:$0xf0]  ;;  %v8355_v8 = vld [vmem:[%s17331_s1 + $0x3e8] sm:$0xf] }
  0xb3   : > { %2342 = vmatpush.bf16.msra.mxu0 %v7868_v13  ;;  %2356 = vmatpush.bf16.msra.mxu1 %v7996_v14  ;;  %v10850_v13 = vld [vmem:[%s17331_s1 + $0x184] sm:$0xf]  ;;  %v8045_v14 = vld [vmem:[%s17331_s1 + $0x190] sm:$0xf0]  ;;  %v8240_v18 = vor.u32 %v10898_v63, %v8237_v0  ;;  %v10889_v53 = vld [vmem:[%s17331_s1 + $0x2b4] sm:$0xf0] }
  0xb4   : > { %2372 = vmatmul.bf16.vlgmr.msra.gmra.mxu2 %v12254_v55  ;;  %2386 = vmatmul.bf16.vlgmr.msra.gmra.mxu3 %v12258_v56  ;;  %v8048_v29 = vor.u32 %v10850_v13, %v8045_v14  ;;  %v7853_v13 = vld [vmem:[%s17331_s1 + $0x10] sm:$0xf0]  ;;  %v10834_v14 = vld [vmem:[%s17331_s1 + $0x104] sm:$0xf]  ;;  %v8323_v49 = vld [vmem:[%s17331_s1 + $0x3a8] sm:$0xf] }
  0xb5   : > { %2420 = vmatpush.bf16.msrb.mxu2 %v8224_v11  ;;  %2434 = vmatpush.bf16.msrb.mxu3 %v8352_v12  ;;  %v10910_v11 = vld [vmem:[%s17331_s1 + $0x364] sm:$0xf]  ;;  %v8285_v12 = vld [vmem:[%s17331_s1 + $0x370] sm:$0xf0]  ;;  %v8179_v0 = vld [vmem:[%s17331_s1 + $0x288] sm:$0xf] }
  0xb6   : > { %v8288_v27 = vor.u32 %v10910_v11, %v8285_v12  ;;  %v8000_v12 = vor.u32 %v10838_v2, %v7997_v3  ;;  %v10885_v2 = vld [vmem:[%s17331_s1 + $0x294] sm:$0xf0]  ;;  %v8307_v3 = vld [vmem:[%s17331_s1 + $0x388] sm:$0xf] }
  0xb7   : > { %2343 = vmatpush.bf16.msra.mxu0 %v7852_v35  ;;  %2357 = vmatpush.bf16.msra.mxu1 %v7980_v36  ;;  %v8029_v35 = vld [vmem:[%s17331_s1 + $0x170] sm:$0xf0]  ;;  %v10810_v36 = vld [vmem:[%s17331_s1 + $0x44] sm:$0xf] }
  0xb8   : > { %v7888_v60 = vor.u32 %v10810_v36, %v7885_v48  ;;  %v8195_v48 = vld [vmem:[%s17331_s1 + $0x2a8] sm:$0xf] }
  0xb9   : > { %2421 = vmatpush.bf16.msrb.mxu2 %v8208_v33  ;;  %2435 = vmatpush.bf16.msrb.mxu3 %v8336_v34  ;;  %v7901_v33 = vld [vmem:[%s17331_s1 + $0x70] sm:$0xf0]  ;;  %v10846_v34 = vld [vmem:[%s17331_s1 + $0x164] sm:$0xf] }
  0xba   : > { %2344 = vmatmul.bf16.vlgmr.msra.gmra.mxu0 %v12288_v19  ;;  %2358 = vmatmul.bf16.vlgmr.msra.gmra.mxu1 %v12292_v20  ;;  %v8032_v42 = vor.u32 %v10846_v34, %v8029_v35  ;;  %v10925_v34 = vld [vmem:[%s17331_s1 + $0x3d4] sm:$0xf0]  ;;  %v7856_v35 = vor.u32 %v10802_v26, %v7853_v13  ;;  %v8163_v13 = vld [vmem:[%s17331_s1 + $0x268] sm:$0xf] }
  0xbb   : > { %2392 = vmatpush.bf16.msrb.mxu0 %v7968_v39  ;;  %2406 = vmatpush.bf16.msrb.mxu1 %v8096_v41  ;;  %v10870_v39 = vld [vmem:[%s17331_s1 + $0x224] sm:$0xf]  ;;  %v7904_v41 = vor.u32 %v10814_v15, %v7901_v33  ;;  %v7981_v15 = vld [vmem:[%s17331_s1 + $0x110] sm:$0xf0]  ;;  %v8339_v33 = vld [vmem:[%s17331_s1 + $0x3c8] sm:$0xf] }
  0xbc   : > { %v8128_v57 = vor.u32 %v10870_v39, %v8125_v43  ;;  %v7984_v36 = vor.u32 %v10834_v14, %v7981_v15  ;;  %v7955_v39 = vld [vmem:[%s17331_s1 + $0xc8] sm:$0xf]  ;;  %v10861_v43 = vld [vmem:[%s17331_s1 + $0x1d4] sm:$0xf0] }
  0xbd   : > { %2422 = vmatpush.bf16.msrb.mxu2 %v8192_v50  ;;  %2436 = vmatpush.bf16.msrb.mxu3 %v8320_v54  ;;  %v10806_v50 = vld [vmem:[%s17331_s1 + $0x24] sm:$0xf]  ;;  %v7869_v54 = vld [vmem:[%s17331_s1 + $0x30] sm:$0xf0]  ;;  %v10881_v14 = vld [vmem:[%s17331_s1 + $0x274] sm:$0xf0] }
  0xbe   : > { %v7872_v11 = vor.u32 %v10806_v50, %v7869_v54  ;;  %v10921_v50 = vld [vmem:[%s17331_s1 + $0x3b4] sm:$0xf0]  ;;  %v8291_v15 = vld [vmem:[%s17331_s1 + $0x368] sm:$0xf] }
  0xbf   : > { %2393 = vmatpush.bf16.msrb.mxu0 %v7952_v58  ;;  %2407 = vmatpush.bf16.msrb.mxu1 %v8080_v59  ;;  %v8256_v58 = vor.u32 %v10902_v44, %v8253_v45  ;;  %v10866_v59 = vld [vmem:[%s17331_s1 + $0x204] sm:$0xf]  ;;  %v8212_v44 = vor.u32 %v10893_v32, %v8211_v31  ;;  %v8340_v45 = vor.u32 %v10925_v34, %v8339_v33  ;;  %v10817_v31 = vld [vmem:[%s17331_s1 + $0x74] sm:$0xf0] }
  0xc0   : > { %v8324_v63 = vor.u32 %v10921_v50, %v8323_v49  ;;  %v10813_v49 = vld [vmem:[%s17331_s1 + $0x54] sm:$0xf0] }
  0xc1   : > { %2423 = vmatpush.bf16.msrb.mxu2 %v8176_v4  ;;  %2437 = vmatpush.bf16.msrb.mxu3 %v8304_v7  ;;  %v8227_v4 = vld [vmem:[%s17331_s1 + $0x2e8] sm:$0xf]  ;;  %v10897_v7 = vld [vmem:[%s17331_s1 + $0x2f4] sm:$0xf0] }
  0xc2   : > { %v8228_v25 = vor.u32 %v10897_v7, %v8227_v4  ;;  %v10917_v4 = vld [vmem:[%s17331_s1 + $0x394] sm:$0xf0] }
  0xc3   : > { %2394 = vmatpush.bf16.msrb.mxu0 %v7936_v9  ;;  %2408 = vmatpush.bf16.msrb.mxu1 %v8064_v10  ;;  %v10929_v9 = vld [vmem:[%s17331_s1 + $0x3f4] sm:$0xf0]  ;;  %v8112_v10 = vor.u32 %v10866_v59, %v8109_v62  ;;  %v8196_v62 = vor.u32 %v10889_v53, %v8195_v48  ;;  %v8308_v26 = vor.u32 %v10917_v4, %v8307_v3  ;;  %v7891_v53 = vld [vmem:[%s17331_s1 + $0x48] sm:$0xf] }
  0xc4   : > { %v10825_v59 = vld [vmem:[%s17331_s1 + $0xb4] sm:$0xf0]  ;;  %v7892_v3 = vor.u32 %v10813_v49, %v7891_v53  ;;  %v10827_v53 = vld [vmem:[%s17331_s1 + $0xcc] sm:$0xf] }
  0xc5   : > { %2424 = vmatpush.bf16.msrb.mxu2 %v8160_v17  ;;  %2438 = vmatpush.bf16.msrb.mxu3 %v8288_v27  ;;  %v7971_v17 = vld [vmem:[%s17331_s1 + $0xe8] sm:$0xf]  ;;  %v10833_v27 = vld [vmem:[%s17331_s1 + $0xf4] sm:$0xf0]  ;;  %v10891_v49 = vld [vmem:[%s17331_s1 + $0x2cc] sm:$0xf] }
  0xc7   : > { %2395 = vmatpush.bf16.msrb.mxu0 %v7920_v28  ;;  %2409 = vmatpush.bf16.msrb.mxu1 %v8048_v29  ;;  %v8356_v28 = vor.u32 %v10929_v9, %v8355_v8  ;;  %v8099_v29 = vld [vmem:[%s17331_s1 + $0x1e8] sm:$0xf] }
  0xc8   : > { %v7923_v9 = vld [vmem:[%s17331_s1 + $0x88] sm:$0xf] }
  0xc9   : > { %2425 = vmatpush.bf16.msrb.mxu2 %v8144_v37  ;;  %2439 = vmatpush.bf16.msrb.mxu3 %v8272_v38  ;;  %v7972_v37 = vor.u32 %v10833_v27, %v7971_v17  ;;  %v8100_v38 = vor.u32 %v10865_v30, %v8099_v29  ;;  %v10913_v17 = vld [vmem:[%s17331_s1 + $0x374] sm:$0xf0]  ;;  %v7907_v30 = vld [vmem:[%s17331_s1 + $0x68] sm:$0xf] }
  0xcb   : > { %2396 = vmatpush.bf16.msrb.mxu0 %v7904_v41  ;;  %2410 = vmatpush.bf16.msrb.mxu1 %v8032_v42  ;;  %v10829_v41 = vld [vmem:[%s17331_s1 + $0xd4] sm:$0xf0]  ;;  %v8083_v42 = vld [vmem:[%s17331_s1 + $0x1c8] sm:$0xf] }
  0xcc   : > { %v7956_v54 = vor.u32 %v10829_v41, %v7955_v39  ;;  %v8147_v39 = vld [vmem:[%s17331_s1 + $0x248] sm:$0xf]  ;;  %v10877_v41 = vld [vmem:[%s17331_s1 + $0x254] sm:$0xf0] }
  0xcd   : > { %2426 = vmatpush.bf16.msrb.mxu2 %v8128_v57  ;;  %2440 = vmatpush.bf16.msrb.mxu3 %v8256_v58  ;;  %v8084_v57 = vor.u32 %v10861_v43, %v8083_v42  ;;  %v7939_v58 = vld [vmem:[%s17331_s1 + $0xa8] sm:$0xf]  ;;  %v10909_v43 = vld [vmem:[%s17331_s1 + $0x354] sm:$0xf0] }
  0xce   : > { %v7940_v7 = vor.u32 %v10825_v59, %v7939_v58  ;;  %v8275_v42 = vld [vmem:[%s17331_s1 + $0x348] sm:$0xf]  ;;  %v8148_v58 = vor.u32 %v10877_v41, %v8147_v39  ;;  %v7973_v39 = vld [vmem:[%s17331_s1 + $0xf8] sm:$0xf0]  ;;  %v10863_v41 = vld [vmem:[%s17331_s1 + $0x1ec] sm:$0xf] }
  0xcf   : > { %2397 = vmatpush.bf16.msrb.mxu0 %v7888_v60  ;;  %2411 = vmatpush.bf16.msrb.mxu1 %v8016_v61  ;;  %v8067_v60 = vld [vmem:[%s17331_s1 + $0x1a8] sm:$0xf]  ;;  %v10857_v61 = vld [vmem:[%s17331_s1 + $0x1b4] sm:$0xf0]  ;;  %v8276_v59 = vor.u32 %v10909_v43, %v8275_v42  ;;  %v8101_v42 = vld [vmem:[%s17331_s1 + $0x1f8] sm:$0xf0] }
  0xd0   : > { %v8068_v8 = vor.u32 %v10857_v61, %v8067_v60  ;;  %v8131_v60 = vld [vmem:[%s17331_s1 + $0x228] sm:$0xf]  ;;  %v10873_v61 = vld [vmem:[%s17331_s1 + $0x234] sm:$0xf0] }
  0xd1   : > { %2427 = vmatpush.bf16.msrb.mxu2 %v8112_v10  ;;  %2441 = vmatpush.bf16.msrb.mxu3 %v8240_v18  ;;  %v10821_v10 = vld [vmem:[%s17331_s1 + $0x94] sm:$0xf0]  ;;  %v8051_v18 = vld [vmem:[%s17331_s1 + $0x188] sm:$0xf] }
  0xd3   : > { %2398 = vmatpush.bf16.msrb.mxu0 %v7872_v11  ;;  %2412 = vmatpush.bf16.msrb.mxu1 %v8000_v12  ;;  %v10853_v11 = vld [vmem:[%s17331_s1 + $0x194] sm:$0xf0]  ;;  %v8180_v12 = vor.u32 %v10885_v2, %v8179_v0 }
  0xd4   : > { %2428 = vmatmul.bf16.vlgmr.msrb.gmra.mxu2 %v12254_v55  ;;  %2442 = vmatmul.bf16.vlgmr.msrb.gmra.mxu3 %v12258_v56  ;;  %v8052_v29 = vor.u32 %v10853_v11, %v8051_v18  ;;  %v10841_v18 = vld [vmem:[%s17331_s1 + $0x134] sm:$0xf0]  ;;  %v8132_v11 = vor.u32 %v10873_v61, %v8131_v60  ;;  %v8213_v60 = vld [vmem:[%s17331_s1 + $0x2d8] sm:$0xf0]  ;;  %v10923_v61 = vld [vmem:[%s17331_s1 + $0x3cc] sm:$0xf] }
  0xd5   : > { %2476 = vmatpush.bf16.msra.mxu2 %v8228_v25  ;;  %2490 = vmatpush.bf16.msra.mxu3 %v8356_v28  ;;  %v7924_v28 = vor.u32 %v10821_v10, %v7923_v9  ;;  %v8003_v9 = vld [vmem:[%s17331_s1 + $0x128] sm:$0xf] }
  0xd7   : > { %2399 = vmatpush.bf16.msrb.mxu0 %v7856_v35  ;;  %2413 = vmatpush.bf16.msrb.mxu1 %v7984_v36  ;;  %v1477_v27 = vpop.f32.mrf.mxu0  ;;  %v1491_v25 = vpop.f32.mrf.mxu1  ;;  %v8035_v35 = vld [vmem:[%s17331_s1 + $0x168] sm:$0xf]  ;;  %v10849_v36 = vld [vmem:[%s17331_s1 + $0x174] sm:$0xf0] }
  0xd8   : > { %v1492_v32 = vadd.f32 %v1491_v25, %v1477_v27  ;;  %v1505_v33 = vpop.f32.mrf.mxu2  ;;  %v1519_v34 = vpop.f32.mrf.mxu3  ;;  %v8036_v48 = vor.u32 %v10849_v36, %v8035_v35  ;;  %v8229_v25 = vld [vmem:[%s17331_s1 + $0x2f8] sm:$0xf0]  ;;  %v10837_v35 = vld [vmem:[%s17331_s1 + $0x114] sm:$0xf0] }
  0xd9   : > { %2477 = vmatpush.bf16.msra.mxu2 %v8212_v44  ;;  %2491 = vmatpush.bf16.msra.mxu3 %v8340_v45  ;;  %v7908_v45 = vor.u32 %v10817_v31, %v7907_v30  ;;  %v8004_v31 = vor.u32 %v10841_v18, %v8003_v9 }
  0xda   : > { %2400 = vmatmul.bf16.vlgmr.msrb.gmra.mxu0 %v12288_v19  ;;  %2414 = vmatmul.bf16.vlgmr.msrb.gmra.mxu1 %v12292_v20  ;;  %v1506_v44 = vadd.f32 %v1505_v33, %v1492_v32  ;;  %v7859_v32 = vld [vmem:[%s17331_s1 + $0x8] sm:$0xf]  ;;  %v10805_v33 = vld [vmem:[%s17331_s1 + $0x14] sm:$0xf0] }
  0xdb   : > { %2448 = vmatpush.bf16.msra.mxu0 %v7972_v37  ;;  %2462 = vmatpush.bf16.msra.mxu1 %v8100_v38  ;;  %v8164_v37 = vor.u32 %v10881_v14, %v8163_v13  ;;  %v8292_v38 = vor.u32 %v10913_v17, %v8291_v15  ;;  %v10869_v13 = vld [vmem:[%s17331_s1 + $0x214] sm:$0xf0]  ;;  %v8243_v14 = vld [vmem:[%s17331_s1 + $0x308] sm:$0xf]  ;;  %v10895_v17 = vld [vmem:[%s17331_s1 + $0x2ec] sm:$0xf] }
  0xdc   : > { %v13240_v50 = vadd.f32 %v1519_v34, %v1506_v44  ;;  %v10901_v15 = vld [vmem:[%s17331_s1 + $0x314] sm:$0xf0]  ;;  %v7987_v34 = vld [vmem:[%s17331_s1 + $0x108] sm:$0xf]  ;;  %v8232_v43 = vor.u32 %v10895_v17, %v8229_v25  ;;  %v8197_v17 = vld [vmem:[%s17331_s1 + $0x2b8] sm:$0xf0] }
  0xdd   : > { %2478 = vmatpush.bf16.msra.mxu2 %v8196_v62  ;;  %2492 = vmatpush.bf16.msra.mxu3 %v8324_v63  ;;  %v8259_v62 = vld [vmem:[%s17331_s1 + $0x328] sm:$0xf]  ;;  %v10905_v63 = vld [vmem:[%s17331_s1 + $0x334] sm:$0xf0]  ;;  %v10919_v25 = vld [vmem:[%s17331_s1 + $0x3ac] sm:$0xf] }
  0xdf   : > { %2449 = vmatpush.bf16.msra.mxu0 %v7956_v54  ;;  %2463 = vmatpush.bf16.msra.mxu1 %v8084_v57  ;;  %v8019_v54 = vld [vmem:[%s17331_s1 + $0x148] sm:$0xf]  ;;  %v10845_v57 = vld [vmem:[%s17331_s1 + $0x154] sm:$0xf0]  ;;  %v13260_v0 = vpop.f32.mrf.mxu0  ;;  %v13262_v2 = vpop.f32.mrf.mxu1 }
  0xe0   : > { %v8020_v4 = vor.u32 %v10845_v57, %v8019_v54  ;;  %v13273_v10 = vpop.f32.mrf.mxu2  ;;  %v13293_v27 = vpop.f32.mrf.mxu3 }
  0xe1   : > { %2479 = vmatpush.bf16.msra.mxu2 %v8180_v12  ;;  %2493 = vmatpush.bf16.msra.mxu3 %v8308_v26  ;;  %v8260_v12 = vor.u32 %v10905_v63, %v8259_v62  ;;  %v8115_v26 = vld [vmem:[%s17331_s1 + $0x208] sm:$0xf]  ;;  %v8341_v62 = vld [vmem:[%s17331_s1 + $0x3d8] sm:$0xf0] }
  0xe2   : > { %v8116_v36 = vor.u32 %v10869_v13, %v8115_v26  ;;  %v10823_v26 = vld [vmem:[%s17331_s1 + $0xac] sm:$0xf] }
  0xe3   : > { %2450 = vmatpush.bf16.msra.mxu0 %v7940_v7  ;;  %2464 = vmatpush.bf16.msra.mxu1 %v8068_v8  ;;  %v7875_v7 = vld [vmem:[%s17331_s1 + $0x28] sm:$0xf]  ;;  %v10809_v8 = vld [vmem:[%s17331_s1 + $0x34] sm:$0xf0]  ;;  %v10887_v13 = vld [vmem:[%s17331_s1 + $0x2ac] sm:$0xf] }
  0xe4   : > { %v7876_v30 = vor.u32 %v10809_v8, %v7875_v7  ;;  %v10859_v7 = vld [vmem:[%s17331_s1 + $0x1cc] sm:$0xf]  ;;  %v8085_v8 = vld [vmem:[%s17331_s1 + $0x1d8] sm:$0xf0] }
  0xe5   : > { %2480 = vmatpush.bf16.msra.mxu2 %v8164_v37  ;;  %2494 = vmatpush.bf16.msra.mxu3 %v8292_v38  ;;  %v8244_v37 = vor.u32 %v10901_v15, %v8243_v14  ;;  %v10831_v38 = vld [vmem:[%s17331_s1 + $0xec] sm:$0xf]  ;;  %v8088_v15 = vor.u32 %v10859_v7, %v8085_v8  ;;  %v7909_v7 = vld [vmem:[%s17331_s1 + $0x78] sm:$0xf0] }
  0xe6   : > { %v10847_v8 = vld [vmem:[%s17331_s1 + $0x16c] sm:$0xf] }
  0xe7   : > { %2451 = vmatpush.bf16.msra.mxu0 %v7924_v28  ;;  %2465 = vmatpush.bf16.msra.mxu1 %v8052_v29  ;;  %v10927_v28 = vld [vmem:[%s17331_s1 + $0x3ec] sm:$0xf]  ;;  %v8357_v29 = vld [vmem:[%s17331_s1 + $0x3f8] sm:$0xf0]  ;;  %v1533_v54 = vpop.f32.mrf.mxu0  ;;  %v1547_v57 = vpop.f32.mrf.mxu1 }
  0xe8   : > { %v8360_v44 = vor.u32 %v10927_v28, %v8357_v29  ;;  %v1548_v63 = vadd.f32 %v1547_v57, %v1533_v54  ;;  %v1575_v18 = vpop.f32.mrf.mxu3  ;;  %v8325_v28 = vld [vmem:[%s17331_s1 + $0x3b8] sm:$0xf0] }
  0xe9   : > { %2481 = vmatpush.bf16.msra.mxu2 %v8148_v58  ;;  %2495 = vmatpush.bf16.msra.mxu3 %v8276_v59  ;;  %v7976_v58 = vor.u32 %v10831_v38, %v7973_v39  ;;  %v8104_v59 = vor.u32 %v10863_v41, %v8101_v42  ;;  %v8181_v39 = vld [vmem:[%s17331_s1 + $0x298] sm:$0xf0]  ;;  %v10915_v41 = vld [vmem:[%s17331_s1 + $0x38c] sm:$0xf] }
  0xea   : > { %v8309_v42 = vld [vmem:[%s17331_s1 + $0x398] sm:$0xf0] }
  0xeb   : > { %2452 = vmatpush.bf16.msra.mxu0 %v7908_v45  ;;  %2466 = vmatpush.bf16.msra.mxu1 %v8036_v48  ;;  %v7860_v45 = vor.u32 %v10805_v33, %v7859_v32  ;;  %v7988_v48 = vor.u32 %v10837_v35, %v7987_v34  ;;  %v8069_v32 = vld [vmem:[%s17331_s1 + $0x1b8] sm:$0xf0]  ;;  %v8200_v33 = vor.u32 %v10887_v13, %v8197_v17  ;;  %v10819_v35 = vld [vmem:[%s17331_s1 + $0x8c] sm:$0xf] }
  0xec   : > { %v8328_v34 = vor.u32 %v10919_v25, %v8325_v28  ;;  %v8312_v57 = vor.u32 %v10915_v41, %v8309_v42  ;;  %v10907_v17 = vld [vmem:[%s17331_s1 + $0x34c] sm:$0xf]  ;;  %v8277_v25 = vld [vmem:[%s17331_s1 + $0x358] sm:$0xf0] }
  0xed   : > { %2482 = vmatpush.bf16.msra.mxu2 %v8132_v11  ;;  %2496 = vmatpush.bf16.msra.mxu3 %v8260_v12  ;;  %v8216_v11 = vor.u32 %v10891_v49, %v8213_v60  ;;  %v8344_v12 = vor.u32 %v10923_v61, %v8341_v62  ;;  %v8165_v62 = vld [vmem:[%s17331_s1 + $0x278] sm:$0xf0] }
  0xef   : > { %2453 = vmatpush.bf16.msra.mxu0 %v7892_v3  ;;  %2467 = vmatpush.bf16.msra.mxu1 %v8020_v4  ;;  %v1561_v3 = vpop.f32.mrf.mxu2  ;;  %v7957_v4 = vld [vmem:[%s17331_s1 + $0xd8] sm:$0xf0] }
  0xf0   : > { %v1562_v9 = vadd.f32 %v1561_v3, %v1548_v63  ;;  %v7960_v14 = vor.u32 %v10827_v53, %v7957_v4  ;;  %v8053_v53 = vld [vmem:[%s17331_s1 + $0x198] sm:$0xf0]  ;;  %v10911_v63 = vld [vmem:[%s17331_s1 + $0x36c] sm:$0xf]  ;;  %v13427_v4 = vpop.f32.mrf.mxu3 }
  0xf1   : > { %2483 = vmatpush.bf16.msra.mxu2 %v8116_v36  ;;  %2497 = vmatpush.bf16.msra.mxu3 %v8244_v37  ;;  %v10883_v36 = vld [vmem:[%s17331_s1 + $0x28c] sm:$0xf]  ;;  %v8293_v3 = vld [vmem:[%s17331_s1 + $0x378] sm:$0xf0] }
  0xf2   : > { %v13367_v29 = vadd.f32 %v1575_v18, %v1562_v9  ;;  %v8184_v54 = vor.u32 %v10883_v36, %v8181_v39  ;;  %v8037_v9 = vld [vmem:[%s17331_s1 + $0x178] sm:$0xf0]  ;;  %v10871_v39 = vld [vmem:[%s17331_s1 + $0x22c] sm:$0xf] }
  0xf3   : > { %2454 = vmatpush.bf16.msra.mxu0 %v7876_v30  ;;  %2468 = vmatpush.bf16.msra.mxu1 %v8004_v31  ;;  %v7941_v30 = vld [vmem:[%s17331_s1 + $0xb8] sm:$0xf0]  ;;  %v10855_v31 = vld [vmem:[%s17331_s1 + $0x1ac] sm:$0xf] }
  0xf4   : > { %2484 = vmatmul.bf16.vlgmr.msra.gmra.mxu2 %v12254_v55  ;;  %2498 = vmatmul.bf16.vlgmr.msra.gmra.mxu3 %v12258_v56  ;;  %v7944_v37 = vor.u32 %v10823_v26, %v7941_v30  ;;  %v8072_v38 = vor.u32 %v10855_v31, %v8069_v32  ;;  %v10875_v26 = vld [vmem:[%s17331_s1 + $0x24c] sm:$0xf]  ;;  %v7893_v31 = vld [vmem:[%s17331_s1 + $0x58] sm:$0xf0] }
  0xf5   : > { %2532 = vmatpush.bf16.msrb.mxu2 %v8232_v43  ;;  %2546 = vmatpush.bf16.msrb.mxu3 %v8360_v44  ;;  %v13397_v43 = vpop.f32.mrf.mxu0  ;;  %v13399_v44 = vpop.f32.mrf.mxu1  ;;  %v10843_v32 = vld [vmem:[%s17331_s1 + $0x14c] sm:$0xf] }
  0xf7   : > { %2455 = vmatpush.bf16.msra.mxu0 %v7860_v45  ;;  %2469 = vmatpush.bf16.msra.mxu1 %v7988_v48  ;;  %v7925_v45 = vld [vmem:[%s17331_s1 + $0x98] sm:$0xf0]  ;;  %v10851_v48 = vld [vmem:[%s17331_s1 + $0x18c] sm:$0xf]  ;;  %v13410_v49 = vpop.f32.mrf.mxu2 }
  0xf8   : > { %v7928_v60 = vor.u32 %v10819_v35, %v7925_v45  ;;  %v8056_v61 = vor.u32 %v10851_v48, %v8053_v53  ;;  %v8133_v48 = vld [vmem:[%s17331_s1 + $0x238] sm:$0xf0]  ;;  %v10903_v53 = vld [vmem:[%s17331_s1 + $0x32c] sm:$0xf] }
  0xf9   : > { %2533 = vmatpush.bf16.msrb.mxu2 %v8216_v11  ;;  %2547 = vmatpush.bf16.msrb.mxu3 %v8344_v12  ;;  %v8296_v11 = vor.u32 %v10911_v63, %v8293_v3  ;;  %v10811_v12 = vld [vmem:[%s17331_s1 + $0x4c] sm:$0xf] }
  0xfa   : > { %2456 = vmatmul.bf16.vlgmr.msra.gmra.mxu0 %v12288_v19  ;;  %2470 = vmatmul.bf16.vlgmr.msra.gmra.mxu1 %v12292_v20  ;;  %v7896_v42 = vor.u32 %v10811_v12, %v7893_v31  ;;  %v10803_v3 = vld [vmem:[%s17331_s1 + $0xc] sm:$0xf]  ;;  %v8117_v12 = vld [vmem:[%s17331_s1 + $0x218] sm:$0xf0] }
  0xfb   : > { %2504 = vmatpush.bf16.msrb.mxu0 %v7976_v58  ;;  %2518 = vmatpush.bf16.msrb.mxu1 %v8104_v59  ;;  %v10815_v58 = vld [vmem:[%s17331_s1 + $0x6c] sm:$0xf] }
  0xfc   : > { %v10879_v59 = vld [vmem:[%s17331_s1 + $0x26c] sm:$0xf]  ;;  %v7912_v13 = vor.u32 %v10815_v58, %v7909_v7  ;;  %v7877_v58 = vld [vmem:[%s17331_s1 + $0x38] sm:$0xf0] }
  0xfd   : > { %2534 = vmatpush.bf16.msrb.mxu2 %v8200_v33  ;;  %2548 = vmatpush.bf16.msrb.mxu3 %v8328_v34  ;;  %v8168_v18 = vor.u32 %v10879_v59, %v8165_v62  ;;  %v1589_v28 = vpop.f32.mrf.mxu0  ;;  %v1603_v30 = vpop.f32.mrf.mxu1  ;;  %v8021_v33 = vld [vmem:[%s17331_s1 + $0x158] sm:$0xf0]  ;;  %v10839_v59 = vld [vmem:[%s17331_s1 + $0x12c] sm:$0xf]  ;;  %v8136_v62 = vor.u32 %v10871_v39, %v8133_v48 }
  0xfe   : > { %v1604_v34 = vadd.f32 %v1603_v30, %v1589_v28  ;;  %v8024_v45 = vor.u32 %v10843_v32, %v8021_v33  ;;  %v7861_v7 = vld [vmem:[%s17331_s1 + $0x18] sm:$0xf0]  ;;  %v11120_v28 = vld [vmem:[%s17331_s1 + $0x9ec] sm:$0xf0]  ;;  %v8859_v30 = vld [vmem:[%s17331_s1 + $0xae0] sm:$0xf] }
  0xff   : > { %2505 = vmatpush.bf16.msrb.mxu0 %v7960_v14  ;;  %2519 = vmatpush.bf16.msrb.mxu1 %v8088_v15  ;;  %v8040_v14 = vor.u32 %v10847_v8, %v8037_v9  ;;  %v8149_v15 = vld [vmem:[%s17331_s1 + $0x258] sm:$0xf0]  ;;  %v1617_v35 = vpop.f32.mrf.mxu2  ;;  %v10835_v8 = vld [vmem:[%s17331_s1 + $0x10c] sm:$0xf]  ;;  %v11152_v33 = vld [vmem:[%s17331_s1 + $0xaec] sm:$0xf0] }
 0x100   : > { %v8152_v36 = vor.u32 %v10875_v26, %v8149_v15  ;;  %v1618_v41 = vadd.f32 %v1617_v35, %v1604_v34  ;;  %v10867_v9 = vld [vmem:[%s17331_s1 + $0x20c] sm:$0xf]  ;;  %v8603_v15 = vld [vmem:[%s17331_s1 + $0x8e0] sm:$0xf]  ;;  %v11184_v35 = vld [vmem:[%s17331_s1 + $0xbec] sm:$0xf0] }
 0x101   : > { %2535 = vmatpush.bf16.msrb.mxu2 %v8184_v54  ;;  %2549 = vmatpush.bf16.msrb.mxu3 %v8312_v57  ;;  %v8261_v54 = vld [vmem:[%s17331_s1 + $0x338] sm:$0xf0]  ;;  %v1631_v57 = vpop.f32.mrf.mxu3  ;;  %v10899_v26 = vld [vmem:[%s17331_s1 + $0x30c] sm:$0xf]  ;;  %v8120_v31 = vor.u32 %v10867_v9, %v8117_v12  ;;  %v8987_v34 = vld [vmem:[%s17331_s1 + $0xbe0] sm:$0xf] }
 0x102   : > { %v8264_v63 = vor.u32 %v10903_v53, %v8261_v54  ;;  %v8988_v48 = vor.u32 %v11184_v35, %v8987_v34  ;;  %v8715_v53 = vld [vmem:[%s17331_s1 + $0x9c0] sm:$0xf]  ;;  %v11116_v54 = vld [vmem:[%s17331_s1 + $0x9cc] sm:$0xf0] }
 0x103   : > { %2506 = vmatpush.bf16.msrb.mxu0 %v7944_v37  ;;  %2520 = vmatpush.bf16.msrb.mxu1 %v8072_v38  ;;  %v8280_v37 = vor.u32 %v10907_v17, %v8277_v25  ;;  %v10807_v38 = vld [vmem:[%s17331_s1 + $0x2c] sm:$0xf]  ;;  %v11088_v17 = vld [vmem:[%s17331_s1 + $0x8ec] sm:$0xf0]  ;;  %v8731_v25 = vld [vmem:[%s17331_s1 + $0x9e0] sm:$0xf] }
 0x104   : > { %v8732_v39 = vor.u32 %v11120_v28, %v8731_v25  ;;  %v8827_v12 = vld [vmem:[%s17331_s1 + $0xaa0] sm:$0xf]  ;;  %v11172_v35 = vld [vmem:[%s17331_s1 + $0xb8c] sm:$0xf0] }
 0x105   : > { %2536 = vmatpush.bf16.msrb.mxu2 %v8168_v18  ;;  %2550 = vmatpush.bf16.msrb.mxu3 %v8296_v11  ;;  %v7880_v18 = vor.u32 %v10807_v38, %v7877_v58  ;;  %v8604_v38 = vor.u32 %v11088_v17, %v8603_v15  ;;  %v11148_v58 = vld [vmem:[%s17331_s1 + $0xacc] sm:$0xf0]  ;;  %v8555_v15 = vld [vmem:[%s17331_s1 + $0x880] sm:$0xf]  ;;  %v13594_v25 = vpop.f32.mrf.mxu0  ;;  %v13596_v28 = vpop.f32.mrf.mxu1 }
 0x106   : > { %v11076_v17 = vld [vmem:[%s17331_s1 + $0x88c] sm:$0xf0]  ;;  %v8939_v34 = vld [vmem:[%s17331_s1 + $0xb80] sm:$0xf] }
 0x107   : > { %2507 = vmatpush.bf16.msrb.mxu0 %v7928_v60  ;;  %2521 = vmatpush.bf16.msrb.mxu1 %v8056_v61  ;;  %v8005_v60 = vld [vmem:[%s17331_s1 + $0x138] sm:$0xf0]  ;;  %v13486_v61 = vadd.f32 %v1631_v57, %v1618_v41  ;;  %v8587_v41 = vld [vmem:[%s17331_s1 + $0x8c0] sm:$0xf] }
 0x108   : > { %v8008_v11 = vor.u32 %v10839_v59, %v8005_v60  ;;  %v8843_v57 = vld [vmem:[%s17331_s1 + $0xac0] sm:$0xf]  ;;  %v11180_v60 = vld [vmem:[%s17331_s1 + $0xbcc] sm:$0xf0] }
 0x109   : > { %2537 = vmatpush.bf16.msrb.mxu2 %v8152_v36  ;;  %2551 = vmatpush.bf16.msrb.mxu3 %v8280_v37  ;;  %v7864_v36 = vor.u32 %v10803_v3, %v7861_v7  ;;  %v8971_v59 = vld [vmem:[%s17331_s1 + $0xbc0] sm:$0xf]  ;;  %v11080_v7 = vld [vmem:[%s17331_s1 + $0x8ac] sm:$0xf0] }
 0x10a   : > { %v8571_v3 = vld [vmem:[%s17331_s1 + $0x8a0] sm:$0xf]  ;;  %v8972_v9 = vor.u32 %v11180_v60, %v8971_v59  ;;  %v11168_v60 = vld [vmem:[%s17331_s1 + $0xb6c] sm:$0xf0] }
 0x10b   : > { %2508 = vmatpush.bf16.msrb.mxu0 %v7912_v13  ;;  %2522 = vmatpush.bf16.msrb.mxu1 %v8040_v14  ;;  %v8245_v13 = vld [vmem:[%s17331_s1 + $0x318] sm:$0xf0]  ;;  %v8923_v59 = vld [vmem:[%s17331_s1 + $0xb60] sm:$0xf] }
 0x10c   : > { %v7989_v14 = vld [vmem:[%s17331_s1 + $0x118] sm:$0xf0]  ;;  %v8248_v32 = vor.u32 %v10899_v26, %v8245_v13  ;;  %v11144_v26 = vld [vmem:[%s17331_s1 + $0xaac] sm:$0xf0]  ;;  %v8955_v13 = vld [vmem:[%s17331_s1 + $0xba0] sm:$0xf] }
 0x10d   : > { %2538 = vmatpush.bf16.msrb.mxu2 %v8136_v62  ;;  %2552 = vmatpush.bf16.msrb.mxu3 %v8264_v63  ;;  %v7992_v37 = vor.u32 %v10835_v8, %v7989_v14  ;;  %v8716_v63 = vor.u32 %v11116_v54, %v8715_v53  ;;  %v8844_v8 = vor.u32 %v11148_v58, %v8843_v57  ;;  %v11176_v14 = vld [vmem:[%s17331_s1 + $0xbac] sm:$0xf0]  ;;  %v8667_v53 = vld [vmem:[%s17331_s1 + $0x960] sm:$0xf] }
 0x10e   : > { %v11104_v54 = vld [vmem:[%s17331_s1 + $0x96c] sm:$0xf0]  ;;  %v8795_v57 = vld [vmem:[%s17331_s1 + $0xa60] sm:$0xf] }
 0x10f   : > { %2509 = vmatpush.bf16.msrb.mxu0 %v7896_v42  ;;  %2523 = vmatpush.bf16.msrb.mxu1 %v8024_v45  ;;  %v11084_v42 = vld [vmem:[%s17331_s1 + $0x8cc] sm:$0xf0]  ;;  %v8860_v45 = vor.u32 %v11152_v33, %v8859_v30  ;;  %v8683_v30 = vld [vmem:[%s17331_s1 + $0x980] sm:$0xf] }
 0x110   : > { %v8588_v62 = vor.u32 %v11084_v42, %v8587_v41  ;;  %v11140_v33 = vld [vmem:[%s17331_s1 + $0xa8c] sm:$0xf0]  ;;  %v13624_v42 = vpop.f32.mrf.mxu3 }
 0x111   : > { %2539 = vmatpush.bf16.msrb.mxu2 %v8120_v31  ;;  %2553 = vmatpush.bf16.msrb.mxu3 %v8248_v32  ;;  %v11108_v31 = vld [vmem:[%s17331_s1 + $0x98c] sm:$0xf0]  ;;  %v8811_v32 = vld [vmem:[%s17331_s1 + $0xa80] sm:$0xf] }
 0x112   : > { %v11072_v41 = vld [vmem:[%s17331_s1 + $0x86c] sm:$0xf0] }
 0x113   : > { %2510 = vmatpush.bf16.msrb.mxu0 %v7880_v18  ;;  %2524 = vmatpush.bf16.msrb.mxu1 %v8008_v11  ;;  %v8699_v18 = vld [vmem:[%s17331_s1 + $0x9a0] sm:$0xf]  ;;  %v11112_v11 = vld [vmem:[%s17331_s1 + $0x9ac] sm:$0xf0] }
 0x114   : > { %2540 = vmatmul.bf16.vlgmr.msrb.gmra.mxu2 %v12254_v55  ;;  %2554 = vmatmul.bf16.vlgmr.msrb.gmra.mxu3 %v12258_v56  ;;  %v8700_v55 = vor.u32 %v11112_v11, %v8699_v18  ;;  %v8956_v56 = vor.u32 %v11176_v14, %v8955_v13  ;;  %v11136_v58 = vld [vmem:[%s17331_s1 + $0xa6c] sm:$0xf0]  ;;  %v8779_v13 = vld [vmem:[%s17331_s1 + $0xa40] sm:$0xf] }
 0x115   : > { %3386 = vmatpush.bf16.msra.mxu2 %v8860_v45  ;;  %3400 = vmatpush.bf16.msra.mxu3 %v8988_v48  ;;  %v8812_v45 = vor.u32 %v11140_v33, %v8811_v32  ;;  %v8940_v48 = vor.u32 %v11172_v35, %v8939_v34  ;;  %v8796_v11 = vor.u32 %v11136_v58, %v8795_v57  ;;  %v11132_v14 = vld [vmem:[%s17331_s1 + $0xa4c] sm:$0xf0]  ;;  %v2560_v32 = vld [vmem:[#allocation2 + $0x18] sm:$0xee] }
 0x116   : > { %v8780_v35 = vor.u32 %v11132_v14, %v8779_v13  ;;  %v8875_v13 = vld [vmem:[%s17331_s1 + $0xb00] sm:$0xf]  ;;  %v11156_v14 = vld [vmem:[%s17331_s1 + $0xb0c] sm:$0xf0] }
 0x117   : > { %2511 = vmatpush.bf16.msrb.mxu0 %v7864_v36  ;;  %2525 = vmatpush.bf16.msrb.mxu1 %v7992_v37  ;;  %v13616_v36 = vpop.f32.mrf.mxu2  ;;  %v8556_v37 = vor.u32 %v11076_v17, %v8555_v15  ;;  %v1659_v18 = vpop.f32.mrf.mxu1  ;;  %v11164_v15 = vld [vmem:[%s17331_s1 + $0xb4c] sm:$0xf0]  ;;  %v8876_v40 = vor.u32 %v11156_v14, %v8875_v13 }
 0x119   : > { %3387 = vmatpush.bf16.msra.mxu2 %v8844_v8  ;;  %3401 = vmatpush.bf16.msra.mxu3 %v8972_v9  ;;  %v8651_v8 = vld [vmem:[%s17331_s1 + $0x940] sm:$0xf]  ;;  %v1645_v9 = vpop.f32.mrf.mxu0 }
 0x11a   : > { %2512 = vmatmul.bf16.vlgmr.msrb.gmra.mxu0 %v12288_v19  ;;  %2526 = vmatmul.bf16.vlgmr.msrb.gmra.mxu1 %v12292_v20  ;;  %v8572_v19 = vor.u32 %v11080_v7, %v8571_v3  ;;  %v8828_v20 = vor.u32 %v11144_v26, %v8827_v12  ;;  %v8523_v3 = vld [vmem:[%s17331_s1 + $0x840] sm:$0xf]  ;;  %v11068_v7 = vld [vmem:[%s17331_s1 + $0x84c] sm:$0xf0]  ;;  %v8924_v12 = vor.u32 %v11168_v60, %v8923_v59 }
 0x11b   : > { %3358 = vmatpush.bf16.msra.mxu0 %v8604_v38  ;;  %3372 = vmatpush.bf16.msra.mxu1 %v8732_v39  ;;  %v8684_v38 = vor.u32 %v11108_v31, %v8683_v30  ;;  %v8539_v39 = vld [vmem:[%s17331_s1 + $0x860] sm:$0xf]  ;;  %v11100_v26 = vld [vmem:[%s17331_s1 + $0x94c] sm:$0xf0]  ;;  %v8524_v33 = vor.u32 %v11068_v7, %v8523_v3  ;;  %v2693_v3 = vunpack.c.l.b16 %v2560_v32  ;;  %v2694_v7 = vunpack.c.h.b16 %v2560_v32 }
 0x11c   : > { %v11064_v30 = vld [vmem:[%s17331_s1 + $0x82c] sm:$0xf0]  ;;  %v8652_v34 = vor.u32 %v11100_v26, %v8651_v8  ;;  %v8491_v60 = vld [vmem:[%s17331_s1 + $0x800] sm:$0xf] }
 0x11d   : > { %3388 = vmatpush.bf16.msra.mxu2 %v8828_v20  ;;  %3402 = vmatpush.bf16.msra.mxu3 %v8956_v56  ;;  %v2561_v20 = vld [vmem:[#allocation2 + $0x20] sm:$0xee]  ;;  %v11092_v8 = vld [vmem:[%s17331_s1 + $0x90c] sm:$0xf0]  ;;  %v2698_v32 = vpack.c.b16 %v760_v6, %v2694_v7  ;;  %v8973_v7 = vld [vmem:[%s17331_s1 + $0xbd0] sm:$0xf0] }
 0x11e   : > { %v8507_v56 = vld [vmem:[%s17331_s1 + $0x820] sm:$0xf]  ;;  %v2695_v57 = vunpack.c.l.b16 %v2561_v20  ;;  %v2696_v59 = vunpack.c.h.b16 %v2561_v20  ;;  %v8733_v20 = vld [vmem:[%s17331_s1 + $0x9f0] sm:$0xf0] }
 0x11f   : > { %3359 = vmatpush.bf16.msra.mxu0 %v8588_v62  ;;  %3373 = vmatpush.bf16.msra.mxu1 %v8716_v63  ;;  %v8540_v62 = vor.u32 %v11072_v41, %v8539_v39  ;;  %v8668_v63 = vor.u32 %v11104_v54, %v8667_v53  ;;  %v1673_v17 = vpop.f32.mrf.mxu2  ;;  %v8763_v39 = vld [vmem:[%s17331_s1 + $0xa20] sm:$0xf]  ;;  %v1687_v41 = vpop.f32.mrf.mxu3  ;;  %v11160_v54 = vld [vmem:[%s17331_s1 + $0xb2c] sm:$0xf0] }
 0x120   : > { %v8891_v53 = vld [vmem:[%s17331_s1 + $0xb20] sm:$0xf] }
 0x121   : > { %3389 = vmatpush.bf16.msra.mxu2 %v8812_v45  ;;  %3403 = vmatpush.bf16.msra.mxu3 %v8940_v48  ;;  %v11128_v48 = vld [vmem:[%s17331_s1 + $0xa2c] sm:$0xf0] }
 0x122   : > { %v8764_v26 = vor.u32 %v11128_v48, %v8763_v39  ;;  %v2709_v39 = vrot.slane %v12294_v22, 1  ;;  %v11082_v48 = vld [vmem:[%s17331_s1 + $0x8c4] sm:$0xf] }
 0x123   : > { %3360 = vmatpush.bf16.msra.mxu0 %v8572_v19  ;;  %3374 = vmatpush.bf16.msra.mxu1 %v8700_v55  ;;  %v1660_v19 = vadd.f32 %v1659_v18, %v1645_v9  ;;  %v8907_v55 = vld [vmem:[%s17331_s1 + $0xb40] sm:$0xf]  ;;  %v11124_v18 = vld [vmem:[%s17331_s1 + $0xa0c] sm:$0xf0]  ;;  %v11114_v22 = vld [vmem:[%s17331_s1 + $0x9c4] sm:$0xf] }
 0x124   : > { %v8908_v45 = vor.u32 %v11164_v15, %v8907_v55  ;;  %v8747_v9 = vld [vmem:[%s17331_s1 + $0xa00] sm:$0xf]  ;;  %v8892_v55 = vor.u32 %v11160_v54, %v8891_v53  ;;  %v8605_v15 = vld [vmem:[%s17331_s1 + $0x8f0] sm:$0xf0] }
 0x125   : > { %v1674_v31 = vadd.f32 %v1673_v17, %v1660_v19  ;;  %3390 = vmatpush.bf16.msra.mxu2 %v8796_v11  ;;  %3404 = vmatpush.bf16.msra.mxu3 %v8924_v12  ;;  %v8508_v11 = vor.u32 %v11064_v30, %v8507_v56  ;;  %v11086_v19 = vld [vmem:[%s17331_s1 + $0x8e4] sm:$0xf]  ;;  %v2699_v56 = vpack.c.b16 %v761_v46, %v2695_v57  ;;  %v8861_v46 = vld [vmem:[%s17331_s1 + $0xaf0] sm:$0xf0]  ;;  %v2703_v57 = vrot.slane %v12322_v51, 1 }
 0x126   : > { %v11118_v17 = vld [vmem:[%s17331_s1 + $0x9e4] sm:$0xf]  ;;  %v2700_v30 = vpack.c.b16 %v762_v47, %v2696_v59  ;;  %v8608_v47 = vor.u32 %v11086_v19, %v8605_v15  ;;  %v8589_v53 = vld [vmem:[%s17331_s1 + $0x8d0] sm:$0xf0]  ;;  %v2705_v59 = vrot.slane %v2698_v32, 1 }
 0x127   : > { %3361 = vmatpush.bf16.msra.mxu0 %v8556_v37  ;;  %3375 = vmatpush.bf16.msra.mxu1 %v8684_v38  ;;  %v8635_v37 = vld [vmem:[%s17331_s1 + $0x920] sm:$0xf]  ;;  %v11096_v38 = vld [vmem:[%s17331_s1 + $0x92c] sm:$0xf0]  ;;  %v13692_v58 = vadd.f32 %v1687_v41, %v1674_v31  ;;  %v2697_v31 = vpack.c.b16 %v759_v5, %v2693_v3  ;;  %v8989_v5 = vld [vmem:[%s17331_s1 + $0xbf0] sm:$0xf0] }
 0x128   : > { %v8636_v12 = vor.u32 %v11096_v38, %v8635_v37  ;;  %v11150_v37 = vld [vmem:[%s17331_s1 + $0xae4] sm:$0xf]  ;;  %v8736_v38 = vor.u32 %v11118_v17, %v8733_v20  ;;  %v2708_v6 = vrot.slane %v2699_v56, 1  ;;  %v2711_v41 = vrot.slane %v2700_v30, 1  ;;  %v8845_v51 = vld [vmem:[%s17331_s1 + $0xad0] sm:$0xf0] }
 0x129   : > { %3391 = vmatpush.bf16.msra.mxu2 %v8780_v35  ;;  %3405 = vmatpush.bf16.msra.mxu3 %v8908_v45  ;;  %v8748_v35 = vor.u32 %v11124_v18, %v8747_v9  ;;  %v2712_v45 = vrot.slane %v12296_v24, 1  ;;  %v2702_v54 = vrot.slane %v2697_v31, 1  ;;  %v8717_v24 = vld [vmem:[%s17331_s1 + $0x9d0] sm:$0xf0]  ;;  %v11146_v3 = vld [vmem:[%s17331_s1 + $0xac4] sm:$0xf]  ;;  %v8592_v18 = vor.u32 %v11082_v48, %v8589_v53 }
 0x12a   : > { %v11078_v19 = vld [vmem:[%s17331_s1 + $0x8a4] sm:$0xf]  ;;  %v8848_v15 = vor.u32 %v11146_v3, %v8845_v51  ;;  %v8701_v56 = vld [vmem:[%s17331_s1 + $0x9b0] sm:$0xf0] }
 0x12b   : > { %3362 = vmatpush.bf16.msra.mxu0 %v8540_v62  ;;  %3376 = vmatpush.bf16.msra.mxu1 %v8668_v63  ;;  %v11060_v62 = vld [vmem:[%s17331_s1 + $0x80c] sm:$0xf0]  ;;  %v8619_v63 = vld [vmem:[%s17331_s1 + $0x900] sm:$0xf]  ;;  %v13782_v9 = vsel %vm2701_vm4, %v2711_v41, %v2712_v45  ;;  %v13789_v13 = vsel %vm2701_vm4, %v2702_v54, %v2703_v57  ;;  %v11110_v20 = vld [vmem:[%s17331_s1 + $0x9a4] sm:$0xf] }
 0x12c   : > { %v11142_v30 = vld [vmem:[%s17331_s1 + $0xaa4] sm:$0xf]  ;;  %v8829_v31 = vld [vmem:[%s17331_s1 + $0xab0] sm:$0xf0] }
 0x12d   : > { %3392 = vmatpush.bf16.msra.mxu2 %v8764_v26  ;;  %3406 = vmatpush.bf16.msra.mxu3 %v8892_v55  ;;  %v13786_v26 = vpop.f32.mrf.mxu1  ;;  %v8573_v55 = vld [vmem:[%s17331_s1 + $0x8b0] sm:$0xf0]  ;;  %v11174_v32 = vld [vmem:[%s17331_s1 + $0xba4] sm:$0xf] }
 0x12e   : > { %v8813_v41 = vld [vmem:[%s17331_s1 + $0xa90] sm:$0xf0]  ;;  %v11170_v45 = vld [vmem:[%s17331_s1 + $0xb84] sm:$0xf] }
 0x12f   : > { %3363 = vmatpush.bf16.msra.mxu0 %v8524_v33  ;;  %3377 = vmatpush.bf16.msra.mxu1 %v8652_v34  ;;  %v8492_v33 = vor.u32 %v11060_v62, %v8491_v60  ;;  %v8620_v34 = vor.u32 %v11092_v8, %v8619_v63  ;;  %v2706_v60 = vrot.slane %v12324_v52, 1  ;;  %v8864_v62 = vor.u32 %v11150_v37, %v8861_v46  ;;  %v11178_v52 = vld [vmem:[%s17331_s1 + $0xbc4] sm:$0xf]  ;;  %v13824_v46 = vpop.f32.mrf.mxu3  ;;  %v8941_v48 = vld [vmem:[%s17331_s1 + $0xb90] sm:$0xf0] }
 0x130   : > { %v8992_v63 = vor.u32 %v11182_v1, %v8989_v5  ;;  %v13779_v8 = vsel %vm2701_vm4, %v2708_v6, %v2709_v39  ;;  %v8976_v17 = vor.u32 %v11178_v52, %v8973_v7  ;;  %v8704_v37 = vor.u32 %v11110_v20, %v8701_v56  ;;  %v11106_v5 = vld [vmem:[%s17331_s1 + $0x984] sm:$0xf]  ;;  %v8685_v6 = vld [vmem:[%s17331_s1 + $0x990] sm:$0xf0] }
 0x131   : > { %3393 = vmatpush.bf16.msra.mxu2 %v8748_v35  ;;  %3407 = vmatpush.bf16.msra.mxu3 %v8876_v40  ;;  %v13792_v14 = vsel %vm2701_vm4, %v2705_v59, %v2706_v60  ;;  %v8576_v35 = vor.u32 %v11078_v19, %v8573_v55  ;;  %v11074_v40 = vld [vmem:[%s17331_s1 + $0x884] sm:$0xf]  ;;  %v8688_v54 = vor.u32 %v11106_v5, %v8685_v6  ;;  %v8541_v59 = vld [vmem:[%s17331_s1 + $0x870] sm:$0xf0] }
 0x132   : > { %v11138_v39 = vld [vmem:[%s17331_s1 + $0xa84] sm:$0xf]  ;;  %v8797_v52 = vld [vmem:[%s17331_s1 + $0xa70] sm:$0xf0] }
 0x133   : > { %3364 = vmatpush.bf16.msra.mxu0 %v8508_v11  ;;  %3378 = vmatpush.bf16.msra.mxu1 %v8636_v12  ;;  %v13784_v11 = vpop.f32.mrf.mxu0  ;;  %v8720_v12 = vor.u32 %v11114_v22, %v8717_v24  ;;  %v11070_v57 = vld [vmem:[%s17331_s1 + $0x864] sm:$0xf]  ;;  %v8816_v60 = vor.u32 %v11138_v39, %v8813_v41  ;;  %v8669_v22 = vld [vmem:[%s17331_s1 + $0x970] sm:$0xf0] }
 0x134   : > { %3394 = vmatmul.bf16.vlgmr.msra.gmra.mxu2 %v13779_v8  ;;  %3408 = vmatmul.bf16.vlgmr.msra.gmra.mxu3 %v13782_v9  ;;  %v11134_v24 = vld [vmem:[%s17331_s1 + $0xa64] sm:$0xf]  ;;  %v8544_v19 = vor.u32 %v11070_v57, %v8541_v59  ;;  %v8525_v20 = vld [vmem:[%s17331_s1 + $0x850] sm:$0xf0] }
 0x135   : > { %3442 = vmatpush.bf16.msrb.mxu2 %v8864_v62  ;;  %3456 = vmatpush.bf16.msrb.mxu3 %v8992_v63  ;;  %v8944_v62 = vor.u32 %v11170_v45, %v8941_v48  ;;  %v11102_v63 = vld [vmem:[%s17331_s1 + $0x964] sm:$0xf]  ;;  %v8509_v39 = vld [vmem:[%s17331_s1 + $0x830] sm:$0xf0] }
 0x136   : > { %v11166_v7 = vld [vmem:[%s17331_s1 + $0xb64] sm:$0xf]  ;;  %v8672_v55 = vor.u32 %v11102_v63, %v8669_v22  ;;  %v8765_v59 = vld [vmem:[%s17331_s1 + $0xa30] sm:$0xf0] }
 0x137   : > { %3365 = vmatpush.bf16.msra.mxu0 %v8492_v33  ;;  %3379 = vmatpush.bf16.msra.mxu1 %v8620_v34  ;;  %v8957_v33 = vld [vmem:[%s17331_s1 + $0xbb0] sm:$0xf0]  ;;  %v13820_v34 = vpop.f32.mrf.mxu2  ;;  %v2359_v51 = vpop.f32.mrf.mxu1  ;;  %v11062_v6 = vld [vmem:[%s17331_s1 + $0x824] sm:$0xf] }
 0x138   : > { %v8960_v1 = vor.u32 %v11174_v32, %v8957_v33  ;;  %v8653_v32 = vld [vmem:[%s17331_s1 + $0x950] sm:$0xf0]  ;;  %v11130_v33 = vld [vmem:[%s17331_s1 + $0xa44] sm:$0xf]  ;;  %v8512_v22 = vor.u32 %v11062_v6, %v8509_v39  ;;  %v11085_v6 = vld [vmem:[%s17331_s1 + $0x8d4] sm:$0xf0] }
 0x139   : > { %3443 = vmatpush.bf16.msrb.mxu2 %v8848_v15  ;;  %3457 = vmatpush.bf16.msrb.mxu3 %v8976_v17  ;;  %v11066_v17 = vld [vmem:[%s17331_s1 + $0x844] sm:$0xf] }
 0x13a   : > { %3366 = vmatmul.bf16.vlgmr.msra.gmra.mxu0 %v13789_v13  ;;  %3380 = vmatmul.bf16.vlgmr.msra.gmra.mxu1 %v13792_v14  ;;  %v11126_v57 = vld [vmem:[%s17331_s1 + $0xa24] sm:$0xf] }
 0x13b   : > { %3414 = vmatpush.bf16.msrb.mxu0 %v8608_v47  ;;  %3428 = vmatpush.bf16.msrb.mxu1 %v8736_v38  ;;  %v8557_v47 = vld [vmem:[%s17331_s1 + $0x890] sm:$0xf0]  ;;  %v8832_v38 = vor.u32 %v11142_v30, %v8829_v31  ;;  %v2345_v3 = vpop.f32.mrf.mxu0  ;;  %v8800_v30 = vor.u32 %v11134_v24, %v8797_v52  ;;  %v11058_v63 = vld [vmem:[%s17331_s1 + $0x804] sm:$0xf] }
 0x13c   : > { %v8560_v53 = vor.u32 %v11074_v40, %v8557_v47  ;;  %v11162_v40 = vld [vmem:[%s17331_s1 + $0xb44] sm:$0xf]  ;;  %v8909_v47 = vld [vmem:[%s17331_s1 + $0xb50] sm:$0xf0] }
 0x13d   : > { %3444 = vmatpush.bf16.msrb.mxu2 %v8832_v38  ;;  %3458 = vmatpush.bf16.msrb.mxu3 %v8960_v1  ;;  %v8528_v1 = vor.u32 %v11066_v17, %v8525_v20  ;;  %v8912_v48 = vor.u32 %v11162_v40, %v8909_v47  ;;  %v8621_v52 = vld [vmem:[%s17331_s1 + $0x910] sm:$0xf0]  ;;  %v8611_v17 = vld [vmem:[%s17331_s1 + $0x8e8] sm:$0xf]  ;;  %v11089_v20 = vld [vmem:[%s17331_s1 + $0x8f4] sm:$0xf0] }
 0x13f   : > { %3415 = vmatpush.bf16.msrb.mxu0 %v8592_v18  ;;  %3429 = vmatpush.bf16.msrb.mxu1 %v8720_v12  ;;  %v8925_v18 = vld [vmem:[%s17331_s1 + $0xb70] sm:$0xf0]  ;;  %v2346_v12 = vadd.f32 %v2345_v3, %v13240_v50  ;;  %v2373_v15 = vpop.f32.mrf.mxu2  ;;  %v11098_v50 = vld [vmem:[%s17331_s1 + $0x944] sm:$0xf] }
 0x140   : > { %v8928_v31 = vor.u32 %v11166_v7, %v8925_v18  ;;  %v8656_v5 = vor.u32 %v11098_v50, %v8653_v32  ;;  %v8493_v3 = vld [vmem:[%s17331_s1 + $0x810] sm:$0xf0]  ;;  %v8768_v7 = vor.u32 %v11126_v57, %v8765_v59  ;;  %v11149_v57 = vld [vmem:[%s17331_s1 + $0xad4] sm:$0xf0]  ;;  %v8979_v59 = vld [vmem:[%s17331_s1 + $0xbc8] sm:$0xf] }
 0x141   : > { %3445 = vmatpush.bf16.msrb.mxu2 %v8816_v60  ;;  %3459 = vmatpush.bf16.msrb.mxu3 %v8944_v62  ;;  %v2360_v56 = vadd.f32 %v2359_v51, %v2346_v12  ;;  %v11158_v60 = vld [vmem:[%s17331_s1 + $0xb24] sm:$0xf]  ;;  %v8893_v62 = vld [vmem:[%s17331_s1 + $0xb30] sm:$0xf0]  ;;  %v8496_v50 = vor.u32 %v11058_v63, %v8493_v3 }
 0x142   : > { %v11090_v51 = vld [vmem:[%s17331_s1 + $0x904] sm:$0xf]  ;;  %v8896_v18 = vor.u32 %v11158_v60, %v8893_v62  ;;  %v11181_v60 = vld [vmem:[%s17331_s1 + $0xbd4] sm:$0xf0] }
 0x143   : > { %3416 = vmatpush.bf16.msrb.mxu0 %v8576_v35  ;;  %3430 = vmatpush.bf16.msrb.mxu1 %v8704_v37  ;;  %v2387_v35 = vpop.f32.mrf.mxu3  ;;  %v8781_v37 = vld [vmem:[%s17331_s1 + $0xa50] sm:$0xf0]  ;;  %v2374_v38 = vadd.f32 %v2373_v15, %v2360_v56  ;;  %v11122_v12 = vld [vmem:[%s17331_s1 + $0xa04] sm:$0xf]  ;;  %v8739_v56 = vld [vmem:[%s17331_s1 + $0x9e8] sm:$0xf]  ;;  %v8624_v32 = vor.u32 %v11090_v51, %v8621_v52  ;;  %v14003_v3 = vpop.f32.mrf.mxu0 }
 0x144   : > { %v8784_v45 = vor.u32 %v11130_v33, %v8781_v37  ;;  %v8877_v15 = vld [vmem:[%s17331_s1 + $0xb10] sm:$0xf0]  ;;  %v11153_v33 = vld [vmem:[%s17331_s1 + $0xaf4] sm:$0xf0]  ;;  %v14005_v51 = vpop.f32.mrf.mxu1 }
 0x145   : > { %3446 = vmatpush.bf16.msrb.mxu2 %v8800_v30  ;;  %3460 = vmatpush.bf16.msrb.mxu3 %v8928_v31  ;;  %v13905_v41 = vadd.f32 %v2387_v35, %v2374_v38  ;;  %v11121_v30 = vld [vmem:[%s17331_s1 + $0x9f4] sm:$0xf0]  ;;  %v8867_v31 = vld [vmem:[%s17331_s1 + $0xae8] sm:$0xf]  ;;  %v8612_v38 = vor.u32 %v11089_v20, %v8611_v17 }
 0x146   : > { %v8995_v35 = vld [vmem:[%s17331_s1 + $0xbe8] sm:$0xf]  ;;  %v11185_v37 = vld [vmem:[%s17331_s1 + $0xbf4] sm:$0xf0]  ;;  %v8868_v39 = vor.u32 %v11153_v33, %v8867_v31 }
 0x147   : > { %3417 = vmatpush.bf16.msrb.mxu0 %v8560_v53  ;;  %3431 = vmatpush.bf16.msrb.mxu1 %v8688_v54  ;;  %v11094_v53 = vld [vmem:[%s17331_s1 + $0x924] sm:$0xf]  ;;  %v8637_v54 = vld [vmem:[%s17331_s1 + $0x930] sm:$0xf0]  ;;  %v11177_v17 = vld [vmem:[%s17331_s1 + $0xbb4] sm:$0xf0]  ;;  %v14027_v20 = vpop.f32.mrf.mxu2 }
 0x148   : > { %v8640_v24 = vor.u32 %v11094_v53, %v8637_v54  ;;  %v11117_v53 = vld [vmem:[%s17331_s1 + $0x9d4] sm:$0xf0]  ;;  %v8851_v54 = vld [vmem:[%s17331_s1 + $0xac8] sm:$0xf] }
 0x149   : > { %3447 = vmatpush.bf16.msrb.mxu2 %v8784_v45  ;;  %3461 = vmatpush.bf16.msrb.mxu3 %v8912_v48  ;;  %v8996_v45 = vor.u32 %v11185_v37, %v8995_v35  ;;  %v8723_v48 = vld [vmem:[%s17331_s1 + $0x9c8] sm:$0xf]  ;;  %v8852_v52 = vor.u32 %v11149_v57, %v8851_v54 }
 0x14a   : > { %v8724_v63 = vor.u32 %v11117_v53, %v8723_v48  ;;  %v8563_v31 = vld [vmem:[%s17331_s1 + $0x888] sm:$0xf]  ;;  %v11073_v48 = vld [vmem:[%s17331_s1 + $0x874] sm:$0xf0] }
 0x14b   : > { %3418 = vmatpush.bf16.msrb.mxu0 %v8544_v19  ;;  %3432 = vmatpush.bf16.msrb.mxu1 %v8672_v55  ;;  %v8749_v19 = vld [vmem:[%s17331_s1 + $0xa10] sm:$0xf0]  ;;  %v11154_v55 = vld [vmem:[%s17331_s1 + $0xb04] sm:$0xf]  ;;  %v8691_v37 = vld [vmem:[%s17331_s1 + $0x988] sm:$0xf] }
 0x14c   : > { %v8752_v40 = vor.u32 %v11122_v12, %v8749_v19  ;;  %v8880_v47 = vor.u32 %v11154_v55, %v8877_v15  ;;  %v11113_v12 = vld [vmem:[%s17331_s1 + $0x9b4] sm:$0xf0]  ;;  %v8835_v19 = vld [vmem:[%s17331_s1 + $0xaa8] sm:$0xf] }
 0x14d   : > { %3448 = vmatpush.bf16.msrb.mxu2 %v8768_v7  ;;  %3462 = vmatpush.bf16.msrb.mxu3 %v8896_v18  ;;  %v8980_v7 = vor.u32 %v11181_v60, %v8979_v59  ;;  %v8707_v18 = vld [vmem:[%s17331_s1 + $0x9a8] sm:$0xf]  ;;  %v11145_v55 = vld [vmem:[%s17331_s1 + $0xab4] sm:$0xf0] }
 0x14e   : > { %v8963_v15 = vld [vmem:[%s17331_s1 + $0xba8] sm:$0xf]  ;;  %v8836_v33 = vor.u32 %v11145_v55, %v8835_v19 }
 0x14f   : > { %3419 = vmatpush.bf16.msrb.mxu0 %v8528_v1  ;;  %3433 = vmatpush.bf16.msrb.mxu1 %v8656_v5  ;;  %v8740_v1 = vor.u32 %v11121_v30, %v8739_v56  ;;  %v8595_v5 = vld [vmem:[%s17331_s1 + $0x8c8] sm:$0xf]  ;;  %v8708_v30 = vor.u32 %v11113_v12, %v8707_v18  ;;  %v8964_v35 = vor.u32 %v11177_v17, %v8963_v15  ;;  %v11069_v15 = vld [vmem:[%s17331_s1 + $0x854] sm:$0xf0] }
 0x150   : > { %v8596_v62 = vor.u32 %v11085_v6, %v8595_v5  ;;  %v11173_v5 = vld [vmem:[%s17331_s1 + $0xb94] sm:$0xf0]  ;;  %v8675_v60 = vld [vmem:[%s17331_s1 + $0x968] sm:$0xf] }
 0x151   : > { %3449 = vmatpush.bf16.msrb.mxu2 %v8752_v40  ;;  %3463 = vmatpush.bf16.msrb.mxu3 %v8880_v47  ;;  %v11109_v40 = vld [vmem:[%s17331_s1 + $0x994] sm:$0xf0]  ;;  %v8819_v47 = vld [vmem:[%s17331_s1 + $0xa88] sm:$0xf] }
 0x153   : > { %3420 = vmatpush.bf16.msrb.mxu0 %v8512_v22  ;;  %3434 = vmatpush.bf16.msrb.mxu1 %v8640_v24  ;;  %v8579_v22 = vld [vmem:[%s17331_s1 + $0x8a8] sm:$0xf]  ;;  %v11081_v24 = vld [vmem:[%s17331_s1 + $0x8b4] sm:$0xf0] }
 0x154   : > { %3450 = vmatmul.bf16.vlgmr.msrb.gmra.mxu2 %v13779_v8  ;;  %3464 = vmatmul.bf16.vlgmr.msrb.gmra.mxu3 %v13782_v9  ;;  %v8580_v56 = vor.u32 %v11081_v24, %v8579_v22  ;;  %v11137_v24 = vld [vmem:[%s17331_s1 + $0xa74] sm:$0xf0] }
 0x155   : > { %3498 = vmatpush.bf16.msra.mxu2 %v8868_v39  ;;  %3512 = vmatpush.bf16.msra.mxu3 %v8996_v45  ;;  %v8692_v39 = vor.u32 %v11109_v40, %v8691_v37  ;;  %v8547_v45 = vld [vmem:[%s17331_s1 + $0x868] sm:$0xf]  ;;  %v11133_v37 = vld [vmem:[%s17331_s1 + $0xa54] sm:$0xf0] }
 0x156   : > { %v8548_v19 = vor.u32 %v11073_v48, %v8547_v45  ;;  %v8915_v40 = vld [vmem:[%s17331_s1 + $0xb48] sm:$0xf] }
 0x157   : > { %3421 = vmatpush.bf16.msrb.mxu0 %v8496_v50  ;;  %3435 = vmatpush.bf16.msrb.mxu1 %v8624_v32  ;;  %v11077_v50 = vld [vmem:[%s17331_s1 + $0x894] sm:$0xf0]  ;;  %v14037_v32 = vpop.f32.mrf.mxu3  ;;  %v2401_v53 = vpop.f32.mrf.mxu0 }
 0x158   : > { %v8564_v6 = vor.u32 %v11077_v50, %v8563_v31  ;;  %v2415_v59 = vpop.f32.mrf.mxu1  ;;  %v2402_v22 = vadd.f32 %v2401_v53, %v13367_v29  ;;  %v2429_v18 = vpop.f32.mrf.mxu2  ;;  %v8531_v29 = vld [vmem:[%s17331_s1 + $0x848] sm:$0xf]  ;;  %v11101_v50 = vld [vmem:[%s17331_s1 + $0x954] sm:$0xf0] }
 0x159   : > { %3499 = vmatpush.bf16.msra.mxu2 %v8852_v52  ;;  %3513 = vmatpush.bf16.msra.mxu3 %v8980_v7  ;;  %v8931_v52 = vld [vmem:[%s17331_s1 + $0xb68] sm:$0xf]  ;;  %v11169_v7 = vld [vmem:[%s17331_s1 + $0xb74] sm:$0xf0] }
 0x15a   : > { %3422 = vmatmul.bf16.vlgmr.msrb.gmra.mxu0 %v13789_v13  ;;  %3436 = vmatmul.bf16.vlgmr.msrb.gmra.mxu1 %v13792_v14  ;;  %v2416_v12 = vadd.f32 %v2415_v59, %v2402_v22  ;;  %v8659_v31 = vld [vmem:[%s17331_s1 + $0x948] sm:$0xf]  ;;  %v11129_v59 = vld [vmem:[%s17331_s1 + $0xa34] sm:$0xf0] }
 0x15b   : > { %3470 = vmatpush.bf16.msra.mxu0 %v8612_v38  ;;  %3484 = vmatpush.bf16.msra.mxu1 %v8740_v1  ;;  %v11141_v38 = vld [vmem:[%s17331_s1 + $0xa94] sm:$0xf0]  ;;  %v8947_v1 = vld [vmem:[%s17331_s1 + $0xb88] sm:$0xf] }
 0x15c   : > { %v8820_v54 = vor.u32 %v11141_v38, %v8819_v47  ;;  %v8948_v57 = vor.u32 %v11173_v5, %v8947_v1  ;;  %v11165_v47 = vld [vmem:[%s17331_s1 + $0xb54] sm:$0xf0]  ;;  %v8532_v1 = vor.u32 %v11069_v15, %v8531_v29  ;;  %v8660_v5 = vor.u32 %v11101_v50, %v8659_v31  ;;  %v8643_v53 = vld [vmem:[%s17331_s1 + $0x928] sm:$0xf]  ;;  %v11119_v31 = vld [vmem:[%s17331_s1 + $0x9ec] sm:$0xf] }
 0x15d   : > { %3500 = vmatpush.bf16.msra.mxu2 %v8836_v33  ;;  %3514 = vmatpush.bf16.msra.mxu3 %v8964_v35  ;;  %v8787_v33 = vld [vmem:[%s17331_s1 + $0xa48] sm:$0xf]  ;;  %v2430_v35 = vadd.f32 %v2429_v18, %v2416_v12  ;;  %v8916_v48 = vor.u32 %v11165_v47, %v8915_v40  ;;  %v11093_v18 = vld [vmem:[%s17331_s1 + $0x914] sm:$0xf0]  ;;  %v8741_v50 = vld [vmem:[%s17331_s1 + $0x9f8] sm:$0xf0] }
 0x15e   : > { %v8788_v45 = vor.u32 %v11133_v37, %v8787_v33  ;;  %v11125_v29 = vld [vmem:[%s17331_s1 + $0xa14] sm:$0xf0]  ;;  %v8883_v15 = vld [vmem:[%s17331_s1 + $0xb08] sm:$0xf]  ;;  %v11151_v33 = vld [vmem:[%s17331_s1 + $0xaec] sm:$0xf] }
 0x15f   : > { %3471 = vmatpush.bf16.msra.mxu0 %v8596_v62  ;;  %3485 = vmatpush.bf16.msra.mxu1 %v8724_v63  ;;  %v11105_v62 = vld [vmem:[%s17331_s1 + $0x974] sm:$0xf0]  ;;  %v8803_v63 = vld [vmem:[%s17331_s1 + $0xa68] sm:$0xf]  ;;  %v8869_v40 = vld [vmem:[%s17331_s1 + $0xaf8] sm:$0xf0] }
 0x160   : > { %v8676_v55 = vor.u32 %v11105_v62, %v8675_v60  ;;  %v8804_v17 = vor.u32 %v11137_v24, %v8803_v63  ;;  %v8899_v60 = vld [vmem:[%s17331_s1 + $0xb28] sm:$0xf]  ;;  %v11161_v62 = vld [vmem:[%s17331_s1 + $0xb34] sm:$0xf0]  ;;  %v11183_v47 = vld [vmem:[%s17331_s1 + $0xbec] sm:$0xf] }
 0x161   : > { %3501 = vmatpush.bf16.msra.mxu2 %v8820_v54  ;;  %3515 = vmatpush.bf16.msra.mxu3 %v8948_v57  ;;  %v11097_v54 = vld [vmem:[%s17331_s1 + $0x934] sm:$0xf0]  ;;  %v8771_v57 = vld [vmem:[%s17331_s1 + $0xa28] sm:$0xf] }
 0x162   : > { %v8499_v63 = vld [vmem:[%s17331_s1 + $0x808] sm:$0xf]  ;;  %v8644_v24 = vor.u32 %v11097_v54, %v8643_v53  ;;  %v8772_v12 = vor.u32 %v11129_v59, %v8771_v57  ;;  %v8597_v53 = vld [vmem:[%s17331_s1 + $0x8d8] sm:$0xf0]  ;;  %v8872_v54 = vor.u32 %v11151_v33, %v8869_v40  ;;  %v11115_v59 = vld [vmem:[%s17331_s1 + $0x9cc] sm:$0xf] }
 0x163   : > { %3472 = vmatpush.bf16.msra.mxu0 %v8580_v56  ;;  %3486 = vmatpush.bf16.msra.mxu1 %v8708_v30  ;;  %v8932_v56 = vor.u32 %v11169_v7, %v8931_v52  ;;  %v2443_v30 = vpop.f32.mrf.mxu3  ;;  %v11061_v52 = vld [vmem:[%s17331_s1 + $0x814] sm:$0xf0]  ;;  %v8627_v7 = vld [vmem:[%s17331_s1 + $0x908] sm:$0xf]  ;;  %v8965_v33 = vld [vmem:[%s17331_s1 + $0xbb8] sm:$0xf0] }
 0x164   : > { %v14106_v38 = vadd.f32 %v2443_v30, %v2430_v35  ;;  %v8613_v30 = vld [vmem:[%s17331_s1 + $0x8f8] sm:$0xf0]  ;;  %v8500_v35 = vor.u32 %v11061_v52, %v8499_v63  ;;  %v8628_v37 = vor.u32 %v11093_v18, %v8627_v7  ;;  %v14204_v52 = vpop.f32.mrf.mxu0  ;;  %v14206_v7 = vpop.f32.mrf.mxu1  ;;  %v11075_v40 = vld [vmem:[%s17331_s1 + $0x88c] sm:$0xf] }
 0x165   : > { %3502 = vmatpush.bf16.msra.mxu2 %v8804_v17  ;;  %3516 = vmatpush.bf16.msra.mxu3 %v8932_v56  ;;  %v11157_v17 = vld [vmem:[%s17331_s1 + $0xb14] sm:$0xf0]  ;;  %v11087_v56 = vld [vmem:[%s17331_s1 + $0x8ec] sm:$0xf]  ;;  %v8853_v63 = vld [vmem:[%s17331_s1 + $0xad8] sm:$0xf0] }
 0x167   : > { %3473 = vmatpush.bf16.msra.mxu0 %v8564_v6  ;;  %3487 = vmatpush.bf16.msra.mxu1 %v8692_v39  ;;  %v8515_v6 = vld [vmem:[%s17331_s1 + $0x828] sm:$0xf]  ;;  %v11065_v39 = vld [vmem:[%s17331_s1 + $0x834] sm:$0xf0] }
 0x168   : > { %v8516_v22 = vor.u32 %v11065_v39, %v8515_v6  ;;  %v8884_v6 = vor.u32 %v11157_v17, %v8883_v15  ;;  %v8616_v39 = vor.u32 %v11087_v56, %v8613_v30  ;;  %v11111_v17 = vld [vmem:[%s17331_s1 + $0x9ac] sm:$0xf]  ;;  %v8709_v56 = vld [vmem:[%s17331_s1 + $0x9b8] sm:$0xf0] }
 0x169   : > { %3503 = vmatpush.bf16.msra.mxu2 %v8788_v45  ;;  %3517 = vmatpush.bf16.msra.mxu3 %v8916_v48  ;;  %v8744_v45 = vor.u32 %v11119_v31, %v8741_v50  ;;  %v11083_v48 = vld [vmem:[%s17331_s1 + $0x8cc] sm:$0xf]  ;;  %v8837_v31 = vld [vmem:[%s17331_s1 + $0xab8] sm:$0xf0] }
 0x16a   : > { %v8600_v18 = vor.u32 %v11083_v48, %v8597_v53  ;;  %v11143_v30 = vld [vmem:[%s17331_s1 + $0xaac] sm:$0xf]  ;;  %v8693_v48 = vld [vmem:[%s17331_s1 + $0x998] sm:$0xf0] }
 0x16b   : > { %3474 = vmatpush.bf16.msra.mxu0 %v8548_v19  ;;  %3488 = vmatpush.bf16.msra.mxu1 %v8676_v55  ;;  %v8900_v19 = vor.u32 %v11161_v62, %v8899_v60  ;;  %v8755_v55 = vld [vmem:[%s17331_s1 + $0xa08] sm:$0xf]  ;;  %v8725_v60 = vld [vmem:[%s17331_s1 + $0x9d8] sm:$0xf0]  ;;  %v11147_v62 = vld [vmem:[%s17331_s1 + $0xacc] sm:$0xf] }
 0x16c   : > { %v11175_v50 = vld [vmem:[%s17331_s1 + $0xbac] sm:$0xf] }
 0x16d   : > { %3504 = vmatpush.bf16.msra.mxu2 %v8772_v12  ;;  %3518 = vmatpush.bf16.msra.mxu3 %v8900_v19  ;;  %v8728_v12 = vor.u32 %v11115_v59, %v8725_v60  ;;  %v11079_v19 = vld [vmem:[%s17331_s1 + $0x8ac] sm:$0xf]  ;;  %v8949_v59 = vld [vmem:[%s17331_s1 + $0xb98] sm:$0xf0] }
 0x16e   : > { %v11139_v53 = vld [vmem:[%s17331_s1 + $0xa8c] sm:$0xf] }
 0x16f   : > { %3475 = vmatpush.bf16.msra.mxu0 %v8532_v1  ;;  %3489 = vmatpush.bf16.msra.mxu1 %v8660_v5  ;;  %v8997_v1 = vld [vmem:[%s17331_s1 + $0xbf8] sm:$0xf0]  ;;  %v8756_v5 = vor.u32 %v11125_v29, %v8755_v55  ;;  %v8856_v29 = vor.u32 %v11147_v62, %v8853_v63 }
 0x170   : > { %v9000_v57 = vor.u32 %v11183_v47, %v8997_v1  ;;  %v8581_v55 = vld [vmem:[%s17331_s1 + $0x8b8] sm:$0xf0]  ;;  %v14242_v1 = vpop.f32.mrf.mxu2 }
 0x171   : > { %3505 = vmatpush.bf16.msra.mxu2 %v8756_v5  ;;  %3519 = vmatpush.bf16.msra.mxu3 %v8884_v6  ;;  %v8565_v47 = vld [vmem:[%s17331_s1 + $0x898] sm:$0xf0]  ;;  %v14244_v5 = vpop.f32.mrf.mxu3  ;;  %v8840_v6 = vor.u32 %v11143_v30, %v8837_v31 }
 0x172   : > { %v8568_v62 = vor.u32 %v11075_v40, %v8565_v47  ;;  %v8933_v30 = vld [vmem:[%s17331_s1 + $0xb78] sm:$0xf0] }
 0x173   : > { %3476 = vmatpush.bf16.msra.mxu0 %v8516_v22  ;;  %3490 = vmatpush.bf16.msra.mxu1 %v8644_v24  ;;  %v11179_v22 = vld [vmem:[%s17331_s1 + $0xbcc] sm:$0xf]  ;;  %v8981_v24 = vld [vmem:[%s17331_s1 + $0xbd8] sm:$0xf0] }
 0x174   : > { %v8984_v15 = vor.u32 %v11179_v22, %v8981_v24  ;;  %3506 = vmatmul.bf16.vlgmr.msra.gmra.mxu2 %v13779_v8  ;;  %3520 = vmatmul.bf16.vlgmr.msra.gmra.mxu3 %v13782_v9  ;;  %v11071_v24 = vld [vmem:[%s17331_s1 + $0x86c] sm:$0xf] }
 0x175   : > { %3554 = vmatpush.bf16.msrb.mxu2 %v8872_v54  ;;  %3568 = vmatpush.bf16.msrb.mxu3 %v9000_v57  ;;  %v8821_v54 = vld [vmem:[%s17331_s1 + $0xa98] sm:$0xf0]  ;;  %v11171_v57 = vld [vmem:[%s17331_s1 + $0xb8c] sm:$0xf] }
 0x177   : > { %3477 = vmatpush.bf16.msra.mxu0 %v8500_v35  ;;  %3491 = vmatpush.bf16.msra.mxu1 %v8628_v37  ;;  %v8584_v35 = vor.u32 %v11079_v19, %v8581_v55  ;;  %v8712_v37 = vor.u32 %v11111_v17, %v8709_v56  ;;  %v2457_v60 = vpop.f32.mrf.mxu0  ;;  %v2471_v22 = vpop.f32.mrf.mxu1  ;;  %v8824_v19 = vor.u32 %v11139_v53, %v8821_v54  ;;  %v11135_v17 = vld [vmem:[%s17331_s1 + $0xa6c] sm:$0xf]  ;;  %v8805_v56 = vld [vmem:[%s17331_s1 + $0xa78] sm:$0xf0] }
 0x178   : > { %v8952_v55 = vor.u32 %v11171_v57, %v8949_v59  ;;  %v8808_v40 = vor.u32 %v11135_v17, %v8805_v56  ;;  %v11131_v53 = vld [vmem:[%s17331_s1 + $0xa4c] sm:$0xf]  ;;  %v8789_v57 = vld [vmem:[%s17331_s1 + $0xa58] sm:$0xf0] }
 0x179   : > { %3555 = vmatpush.bf16.msrb.mxu2 %v8856_v29  ;;  %3569 = vmatpush.bf16.msrb.mxu3 %v8984_v15  ;;  %v11103_v29 = vld [vmem:[%s17331_s1 + $0x96c] sm:$0xf]  ;;  %v8677_v15 = vld [vmem:[%s17331_s1 + $0x978] sm:$0xf0] }
 0x17a   : > { %3478 = vmatmul.bf16.vlgmr.msra.gmra.mxu0 %v13789_v13  ;;  %3492 = vmatmul.bf16.vlgmr.msra.gmra.mxu1 %v13792_v14  ;;  %v11163_v59 = vld [vmem:[%s17331_s1 + $0xb4c] sm:$0xf]  ;;  %v8773_v17 = vld [vmem:[%s17331_s1 + $0xa38] sm:$0xf0] }
 0x17b   : > { %3526 = vmatpush.bf16.msrb.mxu0 %v8616_v39  ;;  %3540 = vmatpush.bf16.msrb.mxu1 %v8744_v45  ;;  %v8968_v39 = vor.u32 %v11175_v50, %v8965_v33  ;;  %v11107_v45 = vld [vmem:[%s17331_s1 + $0x98c] sm:$0xf]  ;;  %v8680_v33 = vor.u32 %v11103_v29, %v8677_v15  ;;  %v8645_v29 = vld [vmem:[%s17331_s1 + $0x938] sm:$0xf0] }
 0x17c   : > { %v8696_v63 = vor.u32 %v11107_v45, %v8693_v48  ;;  %v11099_v45 = vld [vmem:[%s17331_s1 + $0x94c] sm:$0xf]  ;;  %v8661_v48 = vld [vmem:[%s17331_s1 + $0x958] sm:$0xf0] }
 0x17d   : > { %3556 = vmatpush.bf16.msrb.mxu2 %v8840_v6  ;;  %3570 = vmatpush.bf16.msrb.mxu3 %v8968_v39  ;;  %v2485_v6 = vpop.f32.mrf.mxu2  ;;  %v2499_v39 = vpop.f32.mrf.mxu3  ;;  %v11127_v15 = vld [vmem:[%s17331_s1 + $0xa2c] sm:$0xf] }
 0x17e   : > { %v11159_v56 = vld [vmem:[%s17331_s1 + $0xb2c] sm:$0xf] }
 0x17f   : > { %3527 = vmatpush.bf16.msrb.mxu0 %v8600_v18  ;;  %3541 = vmatpush.bf16.msrb.mxu1 %v8728_v12  ;;  %v8549_v18 = vld [vmem:[%s17331_s1 + $0x878] sm:$0xf0]  ;;  %v2458_v12 = vadd.f32 %v2457_v60, %v13486_v61  ;;  %v11167_v61 = vld [vmem:[%s17331_s1 + $0xb6c] sm:$0xf] }
 0x180   : > { %v8552_v50 = vor.u32 %v11071_v24, %v8549_v18  ;;  %v8936_v47 = vor.u32 %v11167_v61, %v8933_v30  ;;  %v8917_v60 = vld [vmem:[%s17331_s1 + $0xb58] sm:$0xf0]  ;;  %v11063_v24 = vld [vmem:[%s17331_s1 + $0x82c] sm:$0xf] }
 0x181   : > { %v2472_v31 = vadd.f32 %v2471_v22, %v2458_v12  ;;  %3557 = vmatpush.bf16.msrb.mxu2 %v8824_v19  ;;  %3571 = vmatpush.bf16.msrb.mxu3 %v8952_v55  ;;  %v8664_v22 = vor.u32 %v11099_v45, %v8661_v48  ;;  %v8517_v18 = vld [vmem:[%s17331_s1 + $0x838] sm:$0xf0]  ;;  %v8792_v12 = vor.u32 %v11131_v53, %v8789_v57  ;;  %v11095_v55 = vld [vmem:[%s17331_s1 + $0x92c] sm:$0xf] }
 0x182   : > { %v8920_v19 = vor.u32 %v11163_v59, %v8917_v60  ;;  %v8901_v61 = vld [vmem:[%s17331_s1 + $0xb38] sm:$0xf0]  ;;  %v8520_v30 = vor.u32 %v11063_v24, %v8517_v18  ;;  %v11155_v45 = vld [vmem:[%s17331_s1 + $0xb0c] sm:$0xf]  ;;  %v14363_v60 = vpop.f32.mrf.mxu0 }
 0x183   : > { %3528 = vmatpush.bf16.msrb.mxu0 %v8584_v35  ;;  %3542 = vmatpush.bf16.msrb.mxu1 %v8712_v37  ;;  %v11067_v35 = vld [vmem:[%s17331_s1 + $0x84c] sm:$0xf]  ;;  %v8533_v37 = vld [vmem:[%s17331_s1 + $0x858] sm:$0xf0]  ;;  %v2486_v54 = vadd.f32 %v2485_v6, %v2472_v31  ;;  %v8648_v31 = vor.u32 %v11095_v55, %v8645_v29 }
 0x184   : > { %v11123_v6 = vld [vmem:[%s17331_s1 + $0xa0c] sm:$0xf]  ;;  %v8885_v48 = vld [vmem:[%s17331_s1 + $0xb18] sm:$0xf0] }
 0x185   : > { %3558 = vmatpush.bf16.msrb.mxu2 %v8808_v40  ;;  %3572 = vmatpush.bf16.msrb.mxu3 %v8936_v47  ;;  %v11091_v40 = vld [vmem:[%s17331_s1 + $0x90c] sm:$0xf]  ;;  %v8629_v47 = vld [vmem:[%s17331_s1 + $0x918] sm:$0xf0]  ;;  %v8888_v59 = vor.u32 %v11155_v45, %v8885_v48  ;;  %v14373_v24 = vpop.f32.mrf.mxu3 }
 0x187   : > { %3529 = vmatpush.bf16.msrb.mxu0 %v8568_v62  ;;  %3543 = vmatpush.bf16.msrb.mxu1 %v8696_v63  ;;  %v14313_v62 = vadd.f32 %v2499_v39, %v2486_v54  ;;  %v8536_v63 = vor.u32 %v11067_v35, %v8533_v37  ;;  %v8776_v35 = vor.u32 %v11127_v15, %v8773_v17  ;;  %v8757_v39 = vld [vmem:[%s17331_s1 + $0xa18] sm:$0xf0] }
 0x188   : > { %v8904_v37 = vor.u32 %v11159_v56, %v8901_v61  ;;  %v8632_v54 = vor.u32 %v11091_v40, %v8629_v47  ;;  %v8760_v57 = vor.u32 %v11123_v6, %v8757_v39  ;;  %v9227_v61 = vld [vmem:[%s17333_s3 + $0x4c0] sm:$0xf]  ;;  %v11336_v47 = vld [vmem:[%s17333_s3 + $0x4ac] sm:$0xf0] }
 0x189   : > { %3559 = vmatpush.bf16.msrb.mxu2 %v8792_v12  ;;  %3573 = vmatpush.bf16.msrb.mxu3 %v8920_v19  ;;  %v9211_v40 = vld [vmem:[%s17333_s3 + $0x4a0] sm:$0xf]  ;;  %v11368_v39 = vld [vmem:[%s17333_s3 + $0x5ac] sm:$0xf0] }
 0x18a   : > { %v9339_v6 = vld [vmem:[%s17333_s3 + $0x5a0] sm:$0xf]  ;;  %v9212_v45 = vor.u32 %v11336_v47, %v9211_v40 }
 0x18b   : > { %3530 = vmatpush.bf16.msrb.mxu0 %v8552_v50  ;;  %3544 = vmatpush.bf16.msrb.mxu1 %v8680_v33  ;;  %v11059_v50 = vld [vmem:[%s17331_s1 + $0x80c] sm:$0xf]  ;;  %v8501_v33 = vld [vmem:[%s17331_s1 + $0x818] sm:$0xf0]  ;;  %v9340_v48 = vor.u32 %v11368_v39, %v9339_v6  ;;  %v9147_v47 = vld [vmem:[%s17333_s3 + $0x420] sm:$0xf] }
 0x18c   : > { %v8504_v53 = vor.u32 %v11059_v50, %v8501_v33  ;;  %v9355_v50 = vld [vmem:[%s17333_s3 + $0x5c0] sm:$0xf]  ;;  %v11372_v33 = vld [vmem:[%s17333_s3 + $0x5cc] sm:$0xf0] }
 0x18d   : > { %3560 = vmatpush.bf16.msrb.mxu2 %v8776_v35  ;;  %3574 = vmatpush.bf16.msrb.mxu3 %v8904_v37  ;;  %v9356_v37 = vor.u32 %v11372_v33, %v9355_v50  ;;  %v11356_v33 = vld [vmem:[%s17333_s3 + $0x54c] sm:$0xf0]  ;;  %v9275_v39 = vld [vmem:[%s17333_s3 + $0x520] sm:$0xf] }
 0x18e   : > { %v11320_v6 = vld [vmem:[%s17333_s3 + $0x42c] sm:$0xf0] }
 0x18f   : > { %3531 = vmatpush.bf16.msrb.mxu0 %v8536_v63  ;;  %3545 = vmatpush.bf16.msrb.mxu1 %v8664_v22  ;;  %v14365_v63 = vpop.f32.mrf.mxu1  ;;  %v14371_v22 = vpop.f32.mrf.mxu2 }
 0x191   : > { %3561 = vmatpush.bf16.msrb.mxu2 %v8760_v57  ;;  %3575 = vmatpush.bf16.msrb.mxu3 %v8888_v59  ;;  %v9323_v57 = vld [vmem:[%s17333_s3 + $0x580] sm:$0xf] }
 0x193   : > { %3532 = vmatpush.bf16.msrb.mxu0 %v8520_v30  ;;  %3546 = vmatpush.bf16.msrb.mxu1 %v8648_v31  ;;  %v11340_v30 = vld [vmem:[%s17333_s3 + $0x4cc] sm:$0xf0] }
 0x194   : > { %3562 = vmatmul.bf16.vlgmr.msrb.gmra.mxu2 %v13779_v8  ;;  %3576 = vmatmul.bf16.vlgmr.msrb.gmra.mxu3 %v13782_v9  ;;  %v9243_v8 = vld [vmem:[%s17333_s3 + $0x4e0] sm:$0xf]  ;;  %v11344_v9 = vld [vmem:[%s17333_s3 + $0x4ec] sm:$0xf0]  ;;  %v9228_v35 = vor.u32 %v11340_v30, %v9227_v61 }
 0x195   : > { %v9163_v61 = vld [vmem:[%s17333_s3 + $0x440] sm:$0xf]  ;;  %v11324_v30 = vld [vmem:[%s17333_s3 + $0x44c] sm:$0xf0] }
 0x196   : > { %v9164_v50 = vor.u32 %v11324_v30, %v9163_v61  ;;  %v11374_v61 = vld [vmem:[%s17333_s3 + $0x5e4] sm:$0xf]  ;;  %v9373_v30 = vld [vmem:[%s17333_s3 + $0x5f0] sm:$0xf0] }
 0x197   : > { %3533 = vmatpush.bf16.msrb.mxu0 %v8504_v53  ;;  %3547 = vmatpush.bf16.msrb.mxu1 %v8632_v54  ;;  %v2513_v18 = vpop.f32.mrf.mxu0  ;;  %v2527_v19 = vpop.f32.mrf.mxu1  ;;  %v9195_v53 = vld [vmem:[%s17333_s3 + $0x480] sm:$0xf]  ;;  %v11332_v54 = vld [vmem:[%s17333_s3 + $0x48c] sm:$0xf0] }
 0x198   : > { %v2514_v12 = vadd.f32 %v2513_v18, %v13692_v58  ;;  %v2541_v29 = vpop.f32.mrf.mxu2  ;;  %v2555_v17 = vpop.f32.mrf.mxu3  ;;  %v9244_v58 = vor.u32 %v11344_v9, %v9243_v8  ;;  %v9196_v59 = vor.u32 %v11332_v54, %v9195_v53  ;;  %v11364_v18 = vld [vmem:[%s17333_s3 + $0x58c] sm:$0xf0] }
 0x199   : > { %v11360_v9 = vld [vmem:[%s17333_s3 + $0x56c] sm:$0xf0] }
 0x19a   : > { %3534 = vmatmul.bf16.vlgmr.msrb.gmra.mxu0 %v13789_v13  ;;  %3548 = vmatmul.bf16.vlgmr.msrb.gmra.mxu1 %v13792_v14  ;;  %v2528_v55 = vadd.f32 %v2527_v19, %v2514_v12  ;;  %v9371_v13 = vld [vmem:[%s17333_s3 + $0x5e0] sm:$0xf]  ;;  %v11376_v14 = vld [vmem:[%s17333_s3 + $0x5ec] sm:$0xf0]  ;;  %v9324_v12 = vor.u32 %v11364_v18, %v9323_v57 }
 0x19b   : > { %v9372_v31 = vor.u32 %v11376_v14, %v9371_v13  ;;  %4654 = vmatpush.bf16.msra.mxu0 %v9244_v58  ;;  %v11316_v18 = vld [vmem:[%s17333_s3 + $0x40c] sm:$0xf0] }
 0x19c   : > { %v2542_v15 = vadd.f32 %v2541_v29, %v2528_v55  ;;  %v9179_v29 = vld [vmem:[%s17333_s3 + $0x460] sm:$0xf] }
 0x19d   : > { %4668 = vmatpush.bf16.msra.mxu1 %v9372_v31  ;;  %v9291_v31 = vld [vmem:[%s17333_s3 + $0x540] sm:$0xf] }
 0x19e   : > { %v14376_v56 = vadd.f32 %v2555_v17, %v2542_v15  ;;  %v11328_v15 = vld [vmem:[%s17333_s3 + $0x46c] sm:$0xf0]  ;;  %v9307_v17 = vld [vmem:[%s17333_s3 + $0x560] sm:$0xf] }
 0x19f   : > { %4655 = vmatpush.bf16.msra.mxu0 %v9228_v35  ;;  %v14426_v19 = vpop.f32.mrf.mxu0  ;;  %v14428_v55 = vpop.f32.mrf.mxu1  ;;  %v9180_v8 = vor.u32 %v11328_v15, %v9179_v29  ;;  %v9308_v13 = vor.u32 %v11360_v9, %v9307_v17  ;;  %v9292_v35 = vor.u32 %v11356_v33, %v9291_v31  ;;  %v11348_v15 = vld [vmem:[%s17333_s3 + $0x50c] sm:$0xf0]  ;;  %v11342_v17 = vld [vmem:[%s17333_s3 + $0x4e4] sm:$0xf]  ;;  %v9376_v31 = vor.u32 %v11374_v61, %v9373_v30  ;;  %v9197_v61 = vld [vmem:[%s17333_s3 + $0x490] sm:$0xf0] }
 0x1a0   : > { %v14442_v58 = vpop.f32.mrf.mxu2  ;;  %v14444_v14 = vpop.f32.mrf.mxu3  ;;  %v11362_v30 = vld [vmem:[%s17333_s3 + $0x584] sm:$0xf] }
 0x1a1   : > { %4669 = vmatpush.bf16.msra.mxu1 %v9356_v37 }
 0x1a3   : > { %4656 = vmatpush.bf16.msra.mxu0 %v9212_v45  ;;  %v9148_v45 = vor.u32 %v11320_v6, %v9147_v47  ;;  %v11338_v47 = vld [vmem:[%s17333_s3 + $0x4c4] sm:$0xf]  ;;  %v9229_v6 = vld [vmem:[%s17333_s3 + $0x4d0] sm:$0xf0] }
 0x1a5   : > { %4670 = vmatpush.bf16.msra.mxu1 %v9340_v48  ;;  %v11352_v48 = vld [vmem:[%s17333_s3 + $0x52c] sm:$0xf0] }
 0x1a6   : > { %v9276_v53 = vor.u32 %v11352_v48, %v9275_v39  ;;  %v11370_v48 = vld [vmem:[%s17333_s3 + $0x5c4] sm:$0xf] }
 0x1a7   : > { %4657 = vmatpush.bf16.msra.mxu0 %v9196_v59  ;;  %v9131_v59 = vld [vmem:[%s17333_s3 + $0x400] sm:$0xf] }
 0x1a8   : > { %v9132_v29 = vor.u32 %v11316_v18, %v9131_v59  ;;  %v11366_v18 = vld [vmem:[%s17333_s3 + $0x5a4] sm:$0xf] }
 0x1a9   : > { %4671 = vmatpush.bf16.msra.mxu1 %v9324_v12  ;;  %v9259_v12 = vld [vmem:[%s17333_s3 + $0x500] sm:$0xf] }
 0x1aa   : > { %v9260_v9 = vor.u32 %v11348_v15, %v9259_v12 }
 0x1ab   : > { %4658 = vmatpush.bf16.msra.mxu0 %v9180_v8  ;;  %v9245_v8 = vld [vmem:[%s17333_s3 + $0x4f0] sm:$0xf0] }
 0x1ad   : > { %4672 = vmatpush.bf16.msra.mxu1 %v9308_v13  ;;  %v9248_v13 = vor.u32 %v11342_v17, %v9245_v8 }
 0x1af   : > { %4659 = vmatpush.bf16.msra.mxu0 %v9164_v50  ;;  %v1494_v50 = vadd.f32 %v13262_v2, %v13260_v0  ;;  %v9357_v0 = vld [vmem:[%s17333_s3 + $0x5d0] sm:$0xf0] }
 0x1b0   : > { %v9360_v2 = vor.u32 %v11370_v48, %v9357_v0  ;;  %v11358_v0 = vld [vmem:[%s17333_s3 + $0x564] sm:$0xf] }
 0x1b1   : > { %4673 = vmatpush.bf16.msra.mxu1 %v9292_v35  ;;  %v1508_v59 = vadd.f32 %v13273_v10, %v1494_v50  ;;  %v9341_v10 = vld [vmem:[%s17333_s3 + $0x5b0] sm:$0xf0] }
 0x1b3   : > { %4660 = vmatpush.bf16.msra.mxu0 %v9148_v45  ;;  %v9232_v45 = vor.u32 %v11338_v47, %v9229_v6  ;;  %v1522_v8 = vadd.f32 %v13293_v27, %v1508_v59  ;;  %v9325_v27 = vld [vmem:[%s17333_s3 + $0x590] sm:$0xf0]  ;;  %v14541_v47 = vld [vmem:[%s17332_s2] sm:$0xf] }
 0x1b5   : > { %4674 = vmatpush.bf16.msra.mxu1 %v9276_v53  ;;  %v1550_v53 = vadd.f32 %v13399_v44, %v13397_v43  ;;  %v9344_v44 = vor.u32 %v11366_v18, %v9341_v10  ;;  %v2348_v50 = vadd.f32 %v14003_v3, %v1522_v8  ;;  %v9181_v3 = vld [vmem:[%s17333_s3 + $0x470] sm:$0xf0]  ;;  %v11322_v8 = vld [vmem:[%s17333_s3 + $0x444] sm:$0xf] }
 0x1b7   : > { %v3367_v37 = vpop.f32.mrf.mxu0  ;;  %v3381_v40 = vpop.f32.mrf.mxu1  ;;  %4661 = vmatpush.bf16.msra.mxu0 %v9132_v29  ;;  %v1564_v17 = vadd.f32 %v13410_v49, %v1550_v53 }
 0x1b8   : > { %v3395_v54 = vpop.f32.mrf.mxu2  ;;  %v3409_v57 = vpop.f32.mrf.mxu3  ;;  %v3382_v39 = vadd.f32 %v3381_v40, %v3367_v37  ;;  %v11334_v37 = vld [vmem:[%s17333_s3 + $0x4a4] sm:$0xf]  ;;  %v9213_v40 = vld [vmem:[%s17333_s3 + $0x4b0] sm:$0xf0] }
 0x1b9   : > { %4675 = vmatpush.bf16.msra.mxu1 %v9260_v9  ;;  %v9216_v43 = vor.u32 %v11334_v37, %v9213_v40  ;;  %v1578_v48 = vadd.f32 %v13427_v4, %v1564_v17  ;;  %v3591_v4 = vperm.slane %v14541_v47, 0  ;;  %v9309_v37 = vld [vmem:[%s17333_s3 + $0x570] sm:$0xf0]  ;;  %v2362_v40 = vadd.f32 %v14005_v51, %v2348_v50 }
 0x1ba   : > { %v3396_v12 = vadd.f32 %v3395_v54, %v3382_v39  ;;  %v11330_v54 = vld [vmem:[%s17333_s3 + $0x484] sm:$0xf]  ;;  %v9165_v51 = vld [vmem:[%s17333_s3 + $0x450] sm:$0xf0] }
 0x1bb   : > { %4710 = vmatpush.bf16.msrb.mxu0 %v9248_v13  ;;  %v9200_v49 = vor.u32 %v11330_v54, %v9197_v61  ;;  %v2376_v10 = vadd.f32 %v14027_v20, %v2362_v40  ;;  %v11354_v20 = vld [vmem:[%s17333_s3 + $0x544] sm:$0xf]  ;;  %v9293_v54 = vld [vmem:[%s17333_s3 + $0x550] sm:$0xf0] }
 0x1bc   : > { %v11346_v40 = vld [vmem:[%s17333_s3 + $0x504] sm:$0xf] }
 0x1bd   : > { %4724 = vmatpush.bf16.msrb.mxu1 %v9376_v31  ;;  %v3410_v31 = vadd.f32 %v3409_v57, %v3396_v12  ;;  %v11326_v57 = vld [vmem:[%s17333_s3 + $0x464] sm:$0xf] }
 0x1be   : > { %v9184_v59 = vor.u32 %v11326_v57, %v9181_v3 }
 0x1bf   : > { %v3369_v33 = vpop.f32.mrf.mxu0  ;;  %v3383_v35 = vpop.f32.mrf.mxu1  ;;  %4711 = vmatpush.bf16.msrb.mxu0 %v9232_v45  ;;  %v9328_v45 = vor.u32 %v11362_v30, %v9325_v27  ;;  %v2390_v27 = vadd.f32 %v14037_v32, %v2376_v10 }
 0x1c0   : > { %v3397_v29 = vpop.f32.mrf.mxu2  ;;  %v3411_v15 = vpop.f32.mrf.mxu3  ;;  %v3384_v6 = vadd.f32 %v3383_v35, %v3369_v33  ;;  %v2404_v33 = vadd.f32 %v14204_v52, %v1578_v48  ;;  %v3582_v35 = vadd.f32 %v3410_v31, %v13905_v41  ;;  %v3592_v41 = vperm.slane %v14541_v47, 1 }
 0x1c1   : > { %4725 = vmatpush.bf16.msrb.mxu1 %v9360_v2 }
 0x1c2   : > { %v3398_v18 = vadd.f32 %v3397_v29, %v3384_v6  ;;  %v2418_v29 = vadd.f32 %v14206_v7, %v2404_v33  ;;  %v11318_v6 = vld [vmem:[%s17333_s3 + $0x424] sm:$0xf] }
 0x1c3   : > { %4712 = vmatpush.bf16.msrb.mxu0 %v9216_v43  ;;  %v9312_v43 = vor.u32 %v11358_v0, %v9309_v37  ;;  %v9133_v37 = vld [vmem:[%s17333_s3 + $0x410] sm:$0xf0] }
 0x1c4   : > { %v3412_v61 = vadd.f32 %v3411_v15, %v3398_v18  ;;  %v2432_v7 = vadd.f32 %v14242_v1, %v2418_v29  ;;  %v9277_v1 = vld [vmem:[%s17333_s3 + $0x530] sm:$0xf0] }
 0x1c5   : > { %4726 = vmatpush.bf16.msrb.mxu1 %v9344_v44 }
 0x1c6   : > { %v3586_v57 = vadd.f32 %v3412_v61, %v2390_v27  ;;  %v11404_v61 = vld [vmem:[%s17333_s3 + $0x6cc] sm:$0xf0] }
 0x1c7   : > { %4713 = vmatpush.bf16.msrb.mxu0 %v9200_v49  ;;  %v9296_v49 = vor.u32 %v11354_v20, %v9293_v54 }
 0x1c8   : > { %v3603_v10 = vadd.f32 %v3591_v4, %v3586_v57  ;;  %v11432_v57 = vld [vmem:[%s17333_s3 + $0x7ac] sm:$0xf0] }
 0x1c9   : > { %4727 = vmatpush.bf16.msrb.mxu1 %v9328_v45 }
 0x1cb   : > { %4714 = vmatpush.bf16.msrb.mxu0 %v9184_v59  ;;  %v11314_v59 = vld [vmem:[%s17333_s3 + $0x404] sm:$0xf] }
 0x1cc   : > { %v9136_v18 = vor.u32 %v11314_v59, %v9133_v37  ;;  %v9579_v59 = vld [vmem:[%s17333_s3 + $0x780] sm:$0xf] }
 0x1cd   : > { %4728 = vmatpush.bf16.msrb.mxu1 %v9312_v43  ;;  %v11408_v43 = vld [vmem:[%s17333_s3 + $0x6ec] sm:$0xf0] }
 0x1d1   : > { %4729 = vmatpush.bf16.msrb.mxu1 %v9296_v49 }
 0x1d7   : > { %v3423_v9 = vpop.f32.mrf.mxu0  ;;  %v3437_v13 = vpop.f32.mrf.mxu1 }
 0x1d8   : > { %v3438_v39 = vadd.f32 %v3437_v13, %v3423_v9  ;;  %v3451_v2 = vpop.f32.mrf.mxu2  ;;  %v3465_v53 = vpop.f32.mrf.mxu3  ;;  %v3599_v9 = vadd.f32 %v3591_v4, %v3582_v35  ;;  %v9168_v13 = vor.u32 %v11322_v8, %v9165_v51  ;;  %v2446_v35 = vadd.f32 %v14244_v5, %v2432_v7  ;;  %v9261_v5 = vld [vmem:[%s17333_s3 + $0x510] sm:$0xf0]  ;;  %v9627_v8 = vld [vmem:[%s17333_s3 + $0x7e0] sm:$0xf]  ;;  %v11440_v51 = vld [vmem:[%s17333_s3 + $0x7ec] sm:$0xf0] }
 0x1d9   : > { %v9483_v4 = vld [vmem:[%s17333_s3 + $0x6c0] sm:$0xf] }
 0x1da   : > { %v3452_v12 = vadd.f32 %v3451_v2, %v3438_v39  ;;  %4715 = vmatpush.bf16.msrb.mxu0 %v9168_v13  ;;  %v9149_v39 = vld [vmem:[%s17333_s3 + $0x430] sm:$0xf0]  ;;  %v3607_v15 = vmax.f32 %v3599_v9, 0.0  ;;  %v9628_v9 = vor.u32 %v11440_v51, %v9627_v8  ;;  %v9484_v7 = vor.u32 %v11404_v61, %v9483_v4  ;;  %v9435_v8 = vld [vmem:[%s17333_s3 + $0x660] sm:$0xf] }
 0x1db   : > { %v9152_v32 = vor.u32 %v11318_v6, %v9149_v39  ;;  %v11584_v6 = vld [vmem:[#allocation2 + $0x18] sm:$0xff]  ;;  %v11392_v51 = vld [vmem:[%s17333_s3 + $0x66c] sm:$0xf0] }
 0x1dc   : > { %v3466_v52 = vadd.f32 %v3465_v53, %v3452_v12  ;;  %v9499_v12 = vld [vmem:[%s17333_s3 + $0x6e0] sm:$0xf]  ;;  %4696 = vmatpush.bf16.msra.mxu3 %v9628_v9 }
 0x1dd   : > { %v9500_v29 = vor.u32 %v11408_v43, %v9499_v12  ;;  %v11428_v12 = vld [vmem:[%s17333_s3 + $0x78c] sm:$0xf0] }
 0x1de   : > { %v3583_v30 = vadd.f32 %v3466_v52, %v14106_v38  ;;  %v11350_v38 = vld [vmem:[%s17333_s3 + $0x524] sm:$0xf]  ;;  %4716 = vmatpush.bf16.msrb.mxu0 %v9152_v32  ;;  %v9580_v43 = vor.u32 %v11428_v12, %v9579_v59  ;;  %v9379_v12 = vld [vmem:[%s17333_s3 + $0x5e8] sm:$0xf] }
 0x1df   : > { %v3425_v44 = vpop.f32.mrf.mxu0  ;;  %v3439_v17 = vpop.f32.mrf.mxu1  ;;  %v9280_v33 = vor.u32 %v11350_v38, %v9277_v1  ;;  %4682 = vmatpush.bf16.msra.mxu2 %v9500_v29  ;;  %v9595_v1 = vld [vmem:[%s17333_s3 + $0x7a0] sm:$0xf] }
 0x1e0   : > { %v3440_v31 = vadd.f32 %v3439_v17, %v3425_v44  ;;  %v3600_v50 = vadd.f32 %v3592_v41, %v3583_v30  ;;  %v3453_v45 = vpop.f32.mrf.mxu2  ;;  %v3467_v48 = vpop.f32.mrf.mxu3  ;;  %v9264_v17 = vor.u32 %v11346_v40, %v9261_v5  ;;  %v9611_v30 = vld [vmem:[%s17333_s3 + $0x7c0] sm:$0xf] }
 0x1e1   : > { %4730 = vmatpush.bf16.msrb.mxu1 %v9280_v33 }
 0x1e2   : > { %v3608_v3 = vmax.f32 %v3600_v50, 0.0  ;;  %v3454_v0 = vadd.f32 %v3453_v45, %v3440_v31  ;;  %4717 = vmatpush.bf16.msrb.mxu0 %v9136_v18  ;;  %v11436_v31 = vld [vmem:[%s17333_s3 + $0x7cc] sm:$0xf0] }
 0x1e3   : > { %v9612_v50 = vor.u32 %v11436_v31, %v9611_v30  ;;  %4683 = vmatpush.bf16.msra.mxu2 %v9484_v7  ;;  %v11400_v45 = vld [vmem:[%s17333_s3 + $0x6ac] sm:$0xf0]  ;;  %v9419_v31 = vld [vmem:[%s17333_s3 + $0x640] sm:$0xf] }
 0x1e4   : > { %v3615_v2 = vpack.c.bf16 %v3608_v3, %v3607_v15  ;;  %v3468_v53 = vadd.f32 %v3467_v48, %v3454_v0  ;;  %v9467_v15 = vld [vmem:[%s17333_s3 + $0x6a0] sm:$0xf]  ;;  %v9596_v3 = vor.u32 %v11432_v57, %v9595_v1  ;;  %v11420_v7 = vld [vmem:[%s17333_s3 + $0x74c] sm:$0xf0] }
 0x1e5   : > { %4731 = vmatpush.bf16.msrb.mxu1 %v9264_v17  ;;  %4697 = vmatpush.bf16.msra.mxu3 %v9612_v50  ;;  %v9468_v32 = vor.u32 %v11400_v45, %v9467_v15  ;;  %v9403_v57 = vld [vmem:[%s17333_s3 + $0x620] sm:$0xf] }
 0x1e6   : > { %v3620_v52 = vshrl.u32 %v3615_v2, 16  ;;  %v3587_v44 = vadd.f32 %v3468_v53, %v2446_v35  ;;  %v3623_v20 = vshll.u32 %v3615_v2, 16  ;;  %v3666_v35 = vld [vmem:[#allocation2 + $0x8] sm:$0x11]  ;;  %v9451_v2 = vld [vmem:[%s17333_s3 + $0x680] sm:$0xf] }
 0x1e7   : > { %4684 = vmatpush.bf16.msra.mxu2 %v9468_v32  ;;  %v11396_v53 = vld [vmem:[%s17333_s3 + $0x68c] sm:$0xf0] }
 0x1e8   : > { %v3622_v13 = vrot.slane %v3620_v52, 7  ;;  %v3604_v54 = vadd.f32 %v3592_v41, %v3587_v44  ;;  %v3611_v41 = vmax.f32 %v3603_v10, 0.0  ;;  %v9452_v5 = vor.u32 %v11396_v53, %v9451_v2  ;;  %v11416_v53 = vld [vmem:[%s17333_s3 + $0x72c] sm:$0xf0] }
 0x1e9   : > { %4698 = vmatpush.bf16.msra.mxu3 %v9596_v3  ;;  %v11384_v3 = vld [vmem:[%s17333_s3 + $0x62c] sm:$0xf0] }
 0x1ea   : > { %v3625_v49 = vor.u32 %v3623_v20, %v3622_v13  ;;  %v3612_v27 = vmax.f32 %v3604_v54, 0.0  ;;  %v3633_v37 = vrot.slane %v3622_v13, 4  ;;  %v9436_v13 = vor.u32 %v11392_v51, %v9435_v8  ;;  %v9563_v20 = vld [vmem:[%s17333_s3 + $0x760] sm:$0xf]  ;;  %v11424_v54 = vld [vmem:[%s17333_s3 + $0x76c] sm:$0xf0] }
 0x1eb   : > { %4685 = vmatpush.bf16.msra.mxu2 %v9452_v5  ;;  %v9564_v4 = vor.u32 %v11424_v54, %v9563_v20  ;;  %v9404_v2 = vor.u32 %v11384_v3, %v9403_v57  ;;  %v11380_v20 = vld [vmem:[%s17333_s3 + $0x60c] sm:$0xf0]  ;;  %v11341_v57 = vld [vmem:[%s17333_s3 + $0x4d4] sm:$0xf0]  ;;  %v9363_v3 = vld [vmem:[%s17333_s3 + $0x5c8] sm:$0xf] }
 0x1ec   : > { %v3659_v39 = vsel %vm12183_vm2, %v3625_v49, %v11584_v6  ;;  %v3617_v38 = vpack.c.bf16 %v3612_v27, %v3611_v41  ;;  %v11388_v41 = vld [vmem:[%s17333_s3 + $0x64c] sm:$0xf0]  ;;  %v9547_v27 = vld [vmem:[%s17333_s3 + $0x740] sm:$0xf] }
 0x1ed   : > { %3660 = vst [vmem:[#allocation2 + $0x18] sm:$0xff] %v3659_v39  ;;  %4699 = vmatpush.bf16.msra.mxu3 %v9580_v43  ;;  %v3942_v29 = vunpack.c.l.b16 %v3659_v39  ;;  %v3943_v9 = vunpack.c.h.b16 %v3659_v39  ;;  %v9420_v49 = vor.u32 %v11388_v41, %v9419_v31  ;;  %v9548_v39 = vor.u32 %v11420_v7, %v9547_v27  ;;  %v11377_v43 = vld [vmem:[%s17333_s3 + $0x5f4] sm:$0xf0]  ;;  %v9515_v7 = vld [vmem:[%s17333_s3 + $0x700] sm:$0xf] }
 0x1ee   : > { %v3635_v48 = vshrl.u32 %v3617_v38, 16  ;;  %v3638_v33 = vshll.u32 %v3617_v38, 16  ;;  %v9380_v41 = vor.u32 %v11377_v43, %v9379_v12  ;;  %v1606_v12 = vadd.f32 %v13596_v28, %v13594_v25  ;;  %v9347_v25 = vld [vmem:[%s17333_s3 + $0x5a8] sm:$0xf] }
 0x1ef   : > { %4686 = vmatpush.bf16.msra.mxu2 %v9436_v13  ;;  %v9387_v13 = vld [vmem:[%s17333_s3 + $0x600] sm:$0xf] }
 0x1f0   : > { %v3637_v0 = vrot.slane %v3635_v48, 7  ;;  %v9388_v27 = vor.u32 %v11380_v20, %v9387_v13  ;;  %v11369_v13 = vld [vmem:[%s17333_s3 + $0x5b4] sm:$0xf0]  ;;  %v11402_v20 = vld [vmem:[%s17333_s3 + $0x6c4] sm:$0xf] }
 0x1f1   : > { %4700 = vmatpush.bf16.msra.mxu3 %v9564_v4 }
 0x1f2   : > { %v3640_v40 = vor.u32 %v3638_v33, %v3637_v0  ;;  %v3651_v18 = vrot.slane %v3637_v0, 4  ;;  %v9531_v0 = vld [vmem:[%s17333_s3 + $0x720] sm:$0xf]  ;;  %v9251_v33 = vld [vmem:[%s17333_s3 + $0x4e8] sm:$0xf] }
 0x1f3   : > { %4687 = vmatpush.bf16.msra.mxu2 %v9420_v49  ;;  %v9532_v51 = vor.u32 %v11416_v53, %v9531_v0  ;;  %v9235_v49 = vld [vmem:[%s17333_s3 + $0x4c8] sm:$0xf]  ;;  %v11373_v0 = vld [vmem:[%s17333_s3 + $0x5d4] sm:$0xf0] }
 0x1f4   : > { %v14655_v10 = vsel %vm12199_vm3, %v3633_v37, %v3640_v40  ;;  %v3667_v52 = vsel %vm12017_vm7, %v3651_v18, %v3666_v35  ;;  %v14695_v38 = vld [vmem:[#allocation2 + $0x18] sm:$0xee] }
 0x1f5   : > { %v3946_v44 = vunpack.c.l.b16 %v14655_v10  ;;  %v3947_v17 = vunpack.c.h.b16 %v14655_v10  ;;  %3668 = vst [vmem:[#allocation2 + $0x8] sm:$0x11] %v3667_v52  ;;  %4701 = vmatpush.bf16.msra.mxu3 %v9548_v39  ;;  %v11345_v35 = vld [vmem:[%s17333_s3 + $0x4f4] sm:$0xf0]  ;;  %v5879_v59 = vunpack.c.l.b16 %v14695_v38  ;;  %v9203_v10 = vld [vmem:[%s17333_s3 + $0x488] sm:$0xf] }
 0x1f6   : > { %v9252_v31 = vor.u32 %v11345_v35, %v9251_v33  ;;  %v9501_v35 = vld [vmem:[%s17333_s3 + $0x6f0] sm:$0xf0] }
 0x1f7   : > { %v14675_v61 = vpack.c.b16 %v3946_v44, %v3942_v29  ;;  %v14679_v30 = vpack.c.b16 %v3947_v17, %v3943_v9  ;;  %v14697_v15 = vpop.f32.mrf.mxu0  ;;  %v14699_v45 = vpop.f32.mrf.mxu1  ;;  %4688 = vmatpush.bf16.msra.mxu2 %v9404_v2 }
 0x1f8   : > { %v14740_v54 = vpop.f32.mrf.mxu2  ;;  %v14742_v4 = vpop.f32.mrf.mxu3 }
 0x1f9   : > { %v3965_v50 = vshll.u32 %v14675_v61, 16  ;;  %v3977_v6 = vshll.u32 %v14679_v30, 16  ;;  %v3963_v52 = vshrl.u32 %v14675_v61, 16  ;;  %v3975_v8 = vshrl.u32 %v14679_v30, 16  ;;  %4702 = vmatpush.bf16.msra.mxu3 %v9532_v51  ;;  %v11337_v51 = vld [vmem:[%s17333_s3 + $0x4b4] sm:$0xf0] }
 0x1fb   : > { %v3967_v40 = vrot.slane %v3965_v50, 1  ;;  %v3979_v5 = vrot.slane %v3977_v6, 1  ;;  %v11412_v50 = vld [vmem:[%s17333_s3 + $0x70c] sm:$0xf0]  ;;  %v5883_v6 = vpack.c.b16 %v3946_v44, %v5879_v59  ;;  %4689 = vmatpush.bf16.msra.mxu2 %v9388_v27  ;;  %v11406_v44 = vld [vmem:[%s17333_s3 + $0x6e4] sm:$0xf] }
 0x1fc   : > { %v3805_v48 = vld [vmem:[#allocation2 + $0x8] sm:$0x11]  ;;  %v9516_v33 = vor.u32 %v11412_v50, %v9515_v7  ;;  %v11438_v59 = vld [vmem:[%s17333_s3 + $0x7e4] sm:$0xf]  ;;  %v9504_v28 = vor.u32 %v11406_v44, %v9501_v35  ;;  %v3494_v50 = vadd.f32 %v14699_v45, %v14697_v15  ;;  %v1620_v45 = vadd.f32 %v13616_v36, %v1606_v12  ;;  %v11365_v44 = vld [vmem:[%s17333_s3 + $0x594] sm:$0xf0] }
 0x1fd   : > { %v3950_v32 = vunpack.c.l.b16 %v3805_v48  ;;  %v3951_v1 = vunpack.c.h.b16 %v3805_v48  ;;  %v3968_v39 = vor.u32 %v3967_v40, %v3963_v52  ;;  %v9629_v40 = vld [vmem:[%s17333_s3 + $0x7f0] sm:$0xf0]  ;;  %v5887_v27 = vrot.slane %v5883_v6, 1  ;;  %v11430_v36 = vld [vmem:[%s17333_s3 + $0x7a4] sm:$0xf] }
 0x1fe   : > { %4703 = vmatpush.bf16.msra.mxu3 %v9516_v33  ;;  %v9331_v33 = vld [vmem:[%s17333_s3 + $0x588] sm:$0xf] }
 0x1ff   : > { %v14720_v37 = vpack.c.b16 %v3950_v32, %v3950_v32  ;;  %v14722_v18 = vpack.c.b16 %v3951_v1, %v3951_v1  ;;  %v3980_v32 = vor.u32 %v3979_v5, %v3975_v8  ;;  %v5880_v5 = vunpack.c.h.b16 %v14695_v38  ;;  %v14785_v43 = vpop.f32.mrf.mxu0  ;;  %v14787_v52 = vpop.f32.mrf.mxu1  ;;  %v9219_v8 = vld [vmem:[%s17333_s3 + $0x4a8] sm:$0xf]  ;;  %4738 = vmatpush.bf16.msrb.mxu2 %v9504_v28 }
 0x200   : > { %v9632_v38 = vor.u32 %v11438_v59, %v9629_v40  ;;  %v3508_v59 = vadd.f32 %v14740_v54, %v3494_v50  ;;  %v9315_v50 = vld [vmem:[%s17333_s3 + $0x568] sm:$0xf] }
 0x201   : > { %v3970_v29 = vshll.u32 %v14720_v37, 16  ;;  %v3982_v9 = vshll.u32 %v14722_v18, 16  ;;  %v5888_v7 = vrot.slane %v14720_v37, 1  ;;  %v5884_v15 = vpack.c.b16 %v3947_v17, %v5880_v5  ;;  %v14841_v17 = vpop.f32.mrf.mxu3 }
 0x202   : > { %4752 = vmatpush.bf16.msrb.mxu3 %v9632_v38  ;;  %v5891_v12 = vrot.slane %v14722_v18, 1  ;;  %v11394_v38 = vld [vmem:[%s17333_s3 + $0x684] sm:$0xf]  ;;  %v9581_v18 = vld [vmem:[%s17333_s3 + $0x790] sm:$0xf0] }
 0x203   : > { %v3972_v48 = vrot.slane %v3970_v29, 1  ;;  %v3984_v1 = vrot.slane %v3982_v9, 1  ;;  %v9236_v29 = vor.u32 %v11341_v57, %v9235_v49  ;;  %v9364_v9 = vor.u32 %v11373_v0, %v9363_v3  ;;  %v9613_v49 = vld [vmem:[%s17333_s3 + $0x7d0] sm:$0xf0]  ;;  %v11333_v0 = vld [vmem:[%s17333_s3 + $0x494] sm:$0xf0] }
 0x204   : > { %v9220_v57 = vor.u32 %v11337_v51, %v9219_v8  ;;  %v9348_v3 = vor.u32 %v11369_v13, %v9347_v25  ;;  %v5890_v5 = vrot.slane %v5884_v15, 1  ;;  %v1634_v8 = vadd.f32 %v13624_v42, %v1620_v45  ;;  %v9187_v42 = vld [vmem:[%s17333_s3 + $0x468] sm:$0xf]  ;;  %v11422_v15 = vld [vmem:[%s17333_s3 + $0x764] sm:$0xf] }
 0x205   : > { %v14771_v2 = vsel %vm775_vm1, %v3968_v39, %v3972_v48  ;;  %v14774_v53 = vsel %vm775_vm1, %v3980_v32, %v3984_v1  ;;  %v14819_v39 = vsel %vm2701_vm4, %v5887_v27, %v5888_v7  ;;  %v1662_v48 = vadd.f32 %v13786_v26, %v13784_v11  ;;  %v11398_v32 = vld [vmem:[%s17333_s3 + $0x6a4] sm:$0xf]  ;;  %v9469_v1 = vld [vmem:[%s17333_s3 + $0x6b0] sm:$0xf0]  ;;  %v3509_v26 = vpop.f32.mrf.mxu2  ;;  %v11329_v7 = vld [vmem:[%s17333_s3 + $0x474] sm:$0xf0] }
 0x206   : > { %4662 = vmatmul.bf16.vlgmr.msra.gmra.mxu0 %v14771_v2  ;;  %4676 = vmatmul.bf16.vlgmr.msra.gmra.mxu1 %v14774_v53  ;;  %v9597_v11 = vld [vmem:[%s17333_s3 + $0x7b0] sm:$0xf0]  ;;  %v9472_v35 = vor.u32 %v11398_v32, %v9469_v1  ;;  %v9204_v54 = vor.u32 %v11333_v0, %v9203_v10  ;;  %v14872_v13 = vsel %vm2701_vm4, %v5890_v5, %v5891_v12  ;;  %v9171_v32 = vld [vmem:[%s17333_s3 + $0x448] sm:$0xf]  ;;  %v11357_v0 = vld [vmem:[%s17333_s3 + $0x554] sm:$0xf0] }
 0x207   : > { %4766 = vmatpush.bf16.msra.mxu0 %v9252_v31  ;;  %4780 = vmatpush.bf16.msra.mxu1 %v9380_v41  ;;  %v9485_v31 = vld [vmem:[%s17333_s3 + $0x6d0] sm:$0xf0]  ;;  %v11434_v41 = vld [vmem:[%s17333_s3 + $0x7c4] sm:$0xf]  ;;  %v9600_v40 = vor.u32 %v11430_v36, %v9597_v11  ;;  %v1676_v51 = vadd.f32 %v13820_v34, %v1662_v48  ;;  %v3496_v27 = vadd.f32 %v14787_v52, %v14785_v43  ;;  %v11325_v36 = vld [vmem:[%s17333_s3 + $0x454] sm:$0xf0] }
 0x208   : > { %v9488_v6 = vor.u32 %v11402_v20, %v9485_v31  ;;  %v9616_v37 = vor.u32 %v11434_v41, %v9613_v49  ;;  %v11426_v34 = vld [vmem:[%s17333_s3 + $0x784] sm:$0xf]  ;;  %v2460_v20 = vadd.f32 %v14363_v60, %v1634_v8  ;;  %v11361_v31 = vld [vmem:[%s17333_s3 + $0x574] sm:$0xf0]  ;;  %v3522_v49 = vadd.f32 %v14742_v4, %v3508_v59  ;;  %v9437_v52 = vld [vmem:[%s17333_s3 + $0x670] sm:$0xf0] }
 0x209   : > { %v11390_v43 = vld [vmem:[%s17333_s3 + $0x664] sm:$0xf]  ;;  %v9565_v4 = vld [vmem:[%s17333_s3 + $0x770] sm:$0xf0]  ;;  %v9188_v45 = vor.u32 %v11329_v7, %v9187_v42  ;;  %v9316_v48 = vor.u32 %v11361_v31, %v9315_v50  ;;  %v9299_v11 = vld [vmem:[%s17333_s3 + $0x548] sm:$0xf] }
 0x20a   : > { %4739 = vmatpush.bf16.msrb.mxu2 %v9488_v6  ;;  %4753 = vmatpush.bf16.msrb.mxu3 %v9616_v37  ;;  %v9584_v6 = vor.u32 %v11426_v34, %v9581_v18  ;;  %v1690_v37 = vadd.f32 %v13824_v46, %v1676_v51  ;;  %v2474_v1 = vadd.f32 %v14365_v63, %v2460_v20  ;;  %v9421_v59 = vld [vmem:[%s17333_s3 + $0x650] sm:$0xf0]  ;;  %v3594_v8 = vperm.slane %v14541_v47, 3  ;;  %v9283_v42 = vld [vmem:[%s17333_s3 + $0x528] sm:$0xf] }
 0x20b   : > { %4767 = vmatpush.bf16.msra.mxu0 %v9236_v29  ;;  %4781 = vmatpush.bf16.msra.mxu1 %v9364_v9  ;;  %v9453_v29 = vld [vmem:[%s17333_s3 + $0x690] sm:$0xf0]  ;;  %v9332_v9 = vor.u32 %v11365_v44, %v9331_v33  ;;  %v9440_v33 = vor.u32 %v11390_v43, %v9437_v52  ;;  %v3584_v63 = vadd.f32 %v3522_v49, %v14313_v62  ;;  %v11418_v62 = vld [vmem:[%s17333_s3 + $0x744] sm:$0xf]  ;;  %v11353_v34 = vld [vmem:[%s17333_s3 + $0x534] sm:$0xf0] }
 0x20c   : > { %v9456_v41 = vor.u32 %v11394_v38, %v9453_v29  ;;  %v2516_v46 = vadd.f32 %v14426_v19, %v1690_v37  ;;  %v3593_v19 = vperm.slane %v14541_v47, 2  ;;  %v9568_v44 = vor.u32 %v11422_v15, %v9565_v4  ;;  %v9549_v5 = vld [vmem:[%s17333_s3 + $0x750] sm:$0xf0]  ;;  %v9139_v49 = vld [vmem:[%s17333_s3 + $0x408] sm:$0xf] }
 0x20d   : > { %v9172_v51 = vor.u32 %v11325_v36, %v9171_v32  ;;  %v9405_v7 = vld [vmem:[%s17333_s3 + $0x630] sm:$0xf0]  ;;  %v9267_v52 = vld [vmem:[%s17333_s3 + $0x508] sm:$0xf]  ;;  %v11349_v37 = vld [vmem:[%s17333_s3 + $0x514] sm:$0xf0] }
 0x20e   : > { %4740 = vmatpush.bf16.msrb.mxu2 %v9472_v35  ;;  %4754 = vmatpush.bf16.msrb.mxu3 %v9600_v40  ;;  %v11386_v35 = vld [vmem:[%s17333_s3 + $0x644] sm:$0xf]  ;;  %v2488_v40 = vadd.f32 %v14371_v22, %v2474_v1  ;;  %v9155_v22 = vld [vmem:[%s17333_s3 + $0x428] sm:$0xf]  ;;  %v2530_v38 = vadd.f32 %v14428_v55, %v2516_v46  ;;  %v3601_v20 = vadd.f32 %v3593_v19, %v3584_v63  ;;  %v11375_v32 = vld [vmem:[%s17333_s3 + $0x5ec] sm:$0xf] }
 0x20f   : > { %4768 = vmatpush.bf16.msra.mxu0 %v9220_v57  ;;  %4782 = vmatpush.bf16.msra.mxu1 %v9348_v3  ;;  %v3510_v57 = vadd.f32 %v3509_v26, %v3496_v27  ;;  %v9424_v18 = vor.u32 %v11386_v35, %v9421_v59  ;;  %v9552_v55 = vor.u32 %v11418_v62, %v9549_v5  ;;  %v9517_v35 = vld [vmem:[%s17333_s3 + $0x710] sm:$0xf0]  ;;  %v11367_v47 = vld [vmem:[%s17333_s3 + $0x5ac] sm:$0xf] }
 0x210   : > { %v2502_v50 = vadd.f32 %v14373_v24, %v2488_v40  ;;  %v2544_v31 = vadd.f32 %v14442_v58, %v2530_v38  ;;  %v9284_v24 = vor.u32 %v11353_v34, %v9283_v42  ;;  %v11317_v58 = vld [vmem:[%s17333_s3 + $0x414] sm:$0xf0]  ;;  %v3609_v46 = vmax.f32 %v3601_v20, 0.0  ;;  %v11371_v38 = vld [vmem:[%s17333_s3 + $0x5cc] sm:$0xf] }
 0x211   : > { %v3524_v29 = vadd.f32 %v14841_v17, %v3510_v57  ;;  %v11382_v17 = vld [vmem:[%s17333_s3 + $0x624] sm:$0xf]  ;;  %v9140_v63 = vor.u32 %v11317_v58, %v9139_v49  ;;  %v9268_v62 = vor.u32 %v11349_v37, %v9267_v52  ;;  %v9333_v58 = vld [vmem:[%s17333_s3 + $0x598] sm:$0xf0] }
 0x212   : > { %4741 = vmatpush.bf16.msrb.mxu2 %v9456_v41  ;;  %4755 = vmatpush.bf16.msrb.mxu3 %v9584_v6  ;;  %v9408_v1 = vor.u32 %v11382_v17, %v9405_v7  ;;  %v9221_v17 = vld [vmem:[%s17333_s3 + $0x4b8] sm:$0xf0] }
 0x213   : > { %4769 = vmatpush.bf16.msra.mxu0 %v9204_v54  ;;  %4783 = vmatpush.bf16.msra.mxu1 %v9332_v9  ;;  %v3588_v15 = vadd.f32 %v3524_v29, %v2502_v50 }
 0x216   : > { %4718 = vmatmul.bf16.vlgmr.msrb.gmra.mxu0 %v14771_v2  ;;  %4732 = vmatmul.bf16.vlgmr.msrb.gmra.mxu1 %v14774_v53 }
 0x217   : > { %v3535_v25 = vpop.f32.mrf.mxu0  ;;  %v3549_v28 = vpop.f32.mrf.mxu1  ;;  %4770 = vmatpush.bf16.msra.mxu0 %v9188_v45  ;;  %4784 = vmatpush.bf16.msra.mxu1 %v9316_v48  ;;  %v11343_v45 = vld [vmem:[%s17333_s3 + $0x4ec] sm:$0xf]  ;;  %v9253_v48 = vld [vmem:[%s17333_s3 + $0x4f8] sm:$0xf0] }
 0x218   : > { %v3550_v60 = vadd.f32 %v3549_v28, %v3535_v25  ;;  %v3563_v3 = vpop.f32.mrf.mxu2  ;;  %v3577_v10 = vpop.f32.mrf.mxu3  ;;  %v9300_v25 = vor.u32 %v11357_v0, %v9299_v11  ;;  %v11321_v28 = vld [vmem:[%s17333_s3 + $0x434] sm:$0xf0]  ;;  %4742 = vmatpush.bf16.msrb.mxu2 %v9440_v33  ;;  %4756 = vmatpush.bf16.msrb.mxu3 %v9568_v44  ;;  %v11378_v11 = vld [vmem:[%s17333_s3 + $0x604] sm:$0xf]  ;;  %v2558_v0 = vadd.f32 %v14444_v14, %v2544_v31 }
 0x219   : > { %v9156_v41 = vor.u32 %v11321_v28, %v9155_v22  ;;  %v11410_v44 = vld [vmem:[%s17333_s3 + $0x704] sm:$0xf]  ;;  %v3605_v14 = vadd.f32 %v3593_v19, %v3588_v15  ;;  %v9256_v5 = vor.u32 %v11343_v45, %v9253_v48  ;;  %v9365_v19 = vld [vmem:[%s17333_s3 + $0x5d8] sm:$0xf0]  ;;  %v9336_v45 = vor.u32 %v11363_v16, %v9333_v58  ;;  %v11327_v48 = vld [vmem:[%s17333_s3 + $0x46c] sm:$0xf] }
 0x21a   : > { %v3564_v26 = vadd.f32 %v3563_v3, %v3550_v60  ;;  %v9533_v60 = vld [vmem:[%s17333_s3 + $0x730] sm:$0xf0]  ;;  %v3669_v15 = vld [vmem:[#allocation2] sm:$0x11]  ;;  %v9635_v16 = vld [vmem:[%s17333_s3 + $0x7e8] sm:$0xf] }
 0x21b   : > { %4771 = vmatpush.bf16.msra.mxu0 %v9172_v51  ;;  %4785 = vmatpush.bf16.msra.mxu1 %v9300_v25  ;;  %v11339_v51 = vld [vmem:[%s17333_s3 + $0x4cc] sm:$0xf]  ;;  %v9237_v25 = vld [vmem:[%s17333_s3 + $0x4d8] sm:$0xf0]  ;;  %v3613_v7 = vmax.f32 %v3605_v14, 0.0 }
 0x21c   : > { %v3578_v12 = vadd.f32 %v3577_v10, %v3564_v26  ;;  %4743 = vmatpush.bf16.msrb.mxu2 %v9424_v18  ;;  %v9381_v10 = vld [vmem:[%s17333_s3 + $0x5f8] sm:$0xf0]  ;;  %4757 = vmatpush.bf16.msrb.mxu3 %v9552_v55  ;;  %v9389_v26 = vld [vmem:[%s17333_s3 + $0x610] sm:$0xf0]  ;;  %v3661_v18 = vld [vmem:[#allocation2 + $0x20] sm:$0xff]  ;;  %v9240_v20 = vor.u32 %v11339_v51, %v9237_v25 }
 0x21d   : > { %v9392_v29 = vor.u32 %v11378_v11, %v9389_v26  ;;  %v11335_v55 = vld [vmem:[%s17333_s3 + $0x4ac] sm:$0xf]  ;;  %v9173_v26 = vld [vmem:[%s17333_s3 + $0x458] sm:$0xf0]  ;;  %v11441_v58 = vld [vmem:[%s17333_s3 + $0x7f4] sm:$0xf0] }
 0x21e   : > { %v3585_v27 = vadd.f32 %v3578_v12, %v14376_v56  ;;  %v11414_v56 = vld [vmem:[%s17333_s3 + $0x724] sm:$0xf]  ;;  %v9384_v12 = vor.u32 %v11375_v32, %v9381_v10  ;;  %v9189_v32 = vld [vmem:[%s17333_s3 + $0x478] sm:$0xf0]  ;;  %v11319_v51 = vld [vmem:[%s17333_s3 + $0x42c] sm:$0xf] }
 0x21f   : > { %v3537_v54 = vpop.f32.mrf.mxu0  ;;  %v3551_v9 = vpop.f32.mrf.mxu1  ;;  %v9536_v36 = vor.u32 %v11414_v56, %v9533_v60  ;;  %4772 = vmatpush.bf16.msra.mxu0 %v9156_v41  ;;  %4786 = vmatpush.bf16.msra.mxu1 %v9284_v24  ;;  %v9224_v56 = vor.u32 %v11335_v55, %v9221_v17  ;;  %v9317_v10 = vld [vmem:[%s17333_s3 + $0x578] sm:$0xf0]  ;;  %v11216_v55 = vld [vmem:[%s17333_s3 + $0xec] sm:$0xf0] }
 0x220   : > { %v3602_v6 = vadd.f32 %v3594_v8, %v3585_v27  ;;  %v3552_v43 = vadd.f32 %v3551_v9, %v3537_v54  ;;  %v3565_v4 = vpop.f32.mrf.mxu2  ;;  %v3579_v33 = vpop.f32.mrf.mxu3  ;;  %4744 = vmatpush.bf16.msrb.mxu2 %v9408_v1  ;;  %v9520_v54 = vor.u32 %v11410_v44, %v9517_v35  ;;  %v9368_v27 = vor.u32 %v11371_v38, %v9365_v19  ;;  %v9301_v35 = vld [vmem:[%s17333_s3 + $0x558] sm:$0xf0]  ;;  %v11315_v38 = vld [vmem:[%s17333_s3 + $0x40c] sm:$0xf] }
 0x221   : > { %4758 = vmatpush.bf16.msrb.mxu3 %v9536_v36  ;;  %v9157_v25 = vld [vmem:[%s17333_s3 + $0x438] sm:$0xf0] }
 0x222   : > { %v3610_v57 = vmax.f32 %v3602_v6, 0.0  ;;  %v3566_v3 = vadd.f32 %v3565_v4, %v3552_v43  ;;  %v11331_v6 = vld [vmem:[%s17333_s3 + $0x48c] sm:$0xf]  ;;  %v9205_v43 = vld [vmem:[%s17333_s3 + $0x498] sm:$0xf0] }
 0x223   : > { %4773 = vmatpush.bf16.msra.mxu0 %v9140_v63  ;;  %4787 = vmatpush.bf16.msra.mxu1 %v9268_v62  ;;  %v9208_v4 = vor.u32 %v11331_v6, %v9205_v43  ;;  %v11323_v63 = vld [vmem:[%s17333_s3 + $0x44c] sm:$0xf]  ;;  %v9141_v19 = vld [vmem:[%s17333_s3 + $0x418] sm:$0xf0] }
 0x224   : > { %v3616_v59 = vpack.c.bf16 %v3610_v57, %v3609_v46  ;;  %v3580_v40 = vadd.f32 %v3579_v33, %v3566_v3  ;;  %4745 = vmatpush.bf16.msrb.mxu2 %v9392_v29  ;;  %v11359_v3 = vld [vmem:[%s17333_s3 + $0x56c] sm:$0xf] }
 0x225   : > { %4759 = vmatpush.bf16.msrb.mxu3 %v9520_v54  ;;  %v9320_v33 = vor.u32 %v11359_v3, %v9317_v10  ;;  %v11347_v29 = vld [vmem:[%s17333_s3 + $0x50c] sm:$0xf]  ;;  %v9269_v54 = vld [vmem:[%s17333_s3 + $0x518] sm:$0xf0]  ;;  %v9636_v10 = vor.u32 %v11441_v58, %v9635_v16 }
 0x226   : > { %v3627_v22 = vshrl.u32 %v3616_v59, 16  ;;  %v3589_v28 = vadd.f32 %v3580_v40, %v2558_v0  ;;  %v3630_v42 = vshll.u32 %v3616_v59, 16  ;;  %4774 = vmatmul.bf16.vlgmr.msra.gmra.mxu0 %v14771_v2  ;;  %4788 = vmatmul.bf16.vlgmr.msra.gmra.mxu1 %v14774_v53  ;;  %v9192_v0 = vor.u32 %v11327_v48, %v9189_v32 }
 0x227   : > { %4822 = vmatpush.bf16.msrb.mxu0 %v9256_v5  ;;  %4836 = vmatpush.bf16.msrb.mxu1 %v9384_v12  ;;  %v9176_v5 = vor.u32 %v11323_v63, %v9173_v26  ;;  %v9304_v12 = vor.u32 %v11355_v21, %v9301_v35  ;;  %v9491_v35 = vld [vmem:[%s17333_s3 + $0x6c8] sm:$0xf] }
 0x228   : > { %v3629_v9 = vrot.slane %v3627_v22, 7  ;;  %v3606_v34 = vadd.f32 %v3594_v8, %v3589_v28  ;;  %v9349_v8 = vld [vmem:[%s17333_s3 + $0x5b8] sm:$0xf0]  ;;  %v11351_v22 = vld [vmem:[%s17333_s3 + $0x52c] sm:$0xf] }
 0x229   : > { %v9352_v60 = vor.u32 %v11367_v47, %v9349_v8  ;;  %v9285_v28 = vld [vmem:[%s17333_s3 + $0x538] sm:$0xf0]  ;;  %v9144_v8 = vor.u32 %v11315_v38, %v9141_v19  ;;  %v9723_v19 = vld [vmem:[%s17333_s3 + $0xa0] sm:$0xf] }
 0x22a   : > { %v3632_v50 = vor.u32 %v3630_v42, %v3629_v9  ;;  %v3614_v31 = vmax.f32 %v3606_v34, 0.0  ;;  %v3642_v1 = vrot.slane %v3629_v9, 4  ;;  %v9160_v34 = vor.u32 %v11319_v51, %v9157_v25 }
 0x22b   : > { %4823 = vmatpush.bf16.msrb.mxu0 %v9240_v20  ;;  %4837 = vmatpush.bf16.msrb.mxu1 %v9368_v27  ;;  %v9755_v27 = vld [vmem:[%s17333_s3 + $0xe0] sm:$0xf] }
 0x22c   : > { %v3662_v41 = vsel %vm12183_vm2, %v3632_v50, %v3661_v18  ;;  %v3618_v49 = vpack.c.bf16 %v3614_v31, %v3613_v7  ;;  %v9288_v18 = vor.u32 %v11351_v22, %v9285_v28  ;;  %v9883_v50 = vld [vmem:[%s17333_s3 + $0x1e0] sm:$0xf]  ;;  %v11248_v31 = vld [vmem:[%s17333_s3 + $0x1ec] sm:$0xf0] }
 0x22d   : > { %3663 = vst [vmem:[#allocation2 + $0x20] sm:$0xff] %v3662_v41  ;;  %v3944_v59 = vunpack.c.l.b16 %v3662_v41  ;;  %v3945_v40 = vunpack.c.h.b16 %v3662_v41  ;;  %v9272_v41 = vor.u32 %v11347_v29, %v9269_v54 }
 0x22e   : > { %v3644_v24 = vshrl.u32 %v3618_v49, 16  ;;  %v3647_v37 = vshll.u32 %v3618_v49, 16  ;;  %v9507_v49 = vld [vmem:[%s17333_s3 + $0x6e8] sm:$0xf] }
 0x22f   : > { %4824 = vmatpush.bf16.msrb.mxu0 %v9224_v56  ;;  %4838 = vmatpush.bf16.msrb.mxu1 %v9352_v60  ;;  %v11409_v56 = vld [vmem:[%s17333_s3 + $0x6f4] sm:$0xf0] }
 0x230   : > { %v3646_v52 = vrot.slane %v3644_v24, 7  ;;  %v9508_v3 = vor.u32 %v11409_v56, %v9507_v49 }
 0x232   : > { %v3649_v46 = vor.u32 %v3647_v37, %v3646_v52  ;;  %v3652_v57 = vrot.slane %v3646_v52, 4  ;;  %v9756_v52 = vor.u32 %v11216_v55, %v9755_v27  ;;  %v9884_v37 = vor.u32 %v11248_v31, %v9883_v50  ;;  %v9835_v31 = vld [vmem:[%s17333_s3 + $0x180] sm:$0xf] }
 0x233   : > { %4825 = vmatpush.bf16.msrb.mxu0 %v9208_v4  ;;  %4839 = vmatpush.bf16.msrb.mxu1 %v9336_v45 }
 0x234   : > { %v15060_v36 = vsel %vm12199_vm3, %v3642_v1, %v3649_v46  ;;  %v3670_v11 = vsel %vm12017_vm7, %v3652_v57, %v3669_v15  ;;  %v5747_v47 = vld [vmem:[#allocation2 + $0x20] sm:$0xee]  ;;  %v11212_v57 = vld [vmem:[%s17333_s3 + $0xcc] sm:$0xf0] }
 0x235   : > { %v3948_v44 = vunpack.c.l.b16 %v15060_v36  ;;  %v3949_v23 = vunpack.c.h.b16 %v15060_v36  ;;  %3671 = vst [vmem:[#allocation2] sm:$0x11] %v3670_v11  ;;  %v9739_v15 = vld [vmem:[%s17333_s3 + $0xc0] sm:$0xf]  ;;  %v5881_v4 = vunpack.c.l.b16 %v5747_v47  ;;  %v5882_v45 = vunpack.c.h.b16 %v5747_v47  ;;  %v11208_v36 = vld [vmem:[%s17333_s3 + $0xac] sm:$0xf0] }
 0x236   : > { %v9867_v11 = vld [vmem:[%s17333_s3 + $0x1c0] sm:$0xf]  ;;  %v11236_v47 = vld [vmem:[%s17333_s3 + $0x18c] sm:$0xf0] }
 0x237   : > { %v15080_v62 = vpack.c.b16 %v3948_v44, %v3944_v59  ;;  %v15084_v14 = vpack.c.b16 %v3949_v23, %v3945_v40  ;;  %4826 = vmatpush.bf16.msrb.mxu0 %v9192_v0  ;;  %4840 = vmatpush.bf16.msrb.mxu1 %v9320_v33  ;;  %v11244_v0 = vld [vmem:[%s17333_s3 + $0x1cc] sm:$0xf0]  ;;  %v11405_v59 = vld [vmem:[%s17333_s3 + $0x6d4] sm:$0xf0]  ;;  %v9619_v40 = vld [vmem:[%s17333_s3 + $0x7c8] sm:$0xf]  ;;  %v5885_v51 = vpack.c.b16 %v3948_v44, %v5881_v4 }
 0x238   : > { %v5886_v25 = vpack.c.b16 %v3949_v23, %v5882_v45  ;;  %v9868_v38 = vor.u32 %v11244_v0, %v9867_v11  ;;  %v9851_v44 = vld [vmem:[%s17333_s3 + $0x1a0] sm:$0xf]  ;;  %v11240_v23 = vld [vmem:[%s17333_s3 + $0x1ac] sm:$0xf0]  ;;  %v9492_v29 = vor.u32 %v11405_v59, %v9491_v35  ;;  %v9836_v58 = vor.u32 %v11236_v47, %v9835_v31  ;;  %v9427_v35 = vld [vmem:[%s17333_s3 + $0x648] sm:$0xf] }
 0x239   : > { %v3989_v9 = vshll.u32 %v15080_v62, 16  ;;  %v4001_v42 = vshll.u32 %v15084_v14, 16  ;;  %v3987_v48 = vshrl.u32 %v15080_v62, 16  ;;  %v3999_v1 = vshrl.u32 %v15084_v14, 16  ;;  %v11232_v4 = vld [vmem:[%s17333_s3 + $0x16c] sm:$0xf0] }
 0x23a   : > { %v5896_v55 = vrot.slane %v5886_v25, 1  ;;  %v9852_v50 = vor.u32 %v11240_v23, %v9851_v44  ;;  %v9675_v11 = vld [vmem:[%s17333_s3 + $0x40] sm:$0xf]  ;;  %v11196_v0 = vld [vmem:[%s17333_s3 + $0x4c] sm:$0xf0] }
 0x23b   : > { %4827 = vmatpush.bf16.msrb.mxu0 %v9176_v5  ;;  %4841 = vmatpush.bf16.msrb.mxu1 %v9304_v12  ;;  %v3991_v6 = vrot.slane %v3989_v9, 1  ;;  %v4003_v24 = vrot.slane %v4001_v42, 1  ;;  %v11437_v5 = vld [vmem:[%s17333_s3 + $0x7d4] sm:$0xf0]  ;;  %v9740_v12 = vor.u32 %v11212_v57, %v9739_v15  ;;  %v9475_v9 = vld [vmem:[%s17333_s3 + $0x6a8] sm:$0xf] }
 0x23c   : > { %v3806_v20 = vld [vmem:[#allocation2] sm:$0x11]  ;;  %v9620_v54 = vor.u32 %v11437_v5, %v9619_v40  ;;  %v11401_v42 = vld [vmem:[%s17333_s3 + $0x6b4] sm:$0xf0]  ;;  %v9555_v40 = vld [vmem:[%s17333_s3 + $0x748] sm:$0xf] }
 0x23d   : > { %v3952_v17 = vunpack.c.l.b16 %v3806_v20  ;;  %v3953_v7 = vunpack.c.h.b16 %v3806_v20  ;;  %v3992_v33 = vor.u32 %v3991_v6, %v3987_v48  ;;  %v4004_v26 = vor.u32 %v4003_v24, %v3999_v1  ;;  %v11397_v6 = vld [vmem:[%s17333_s3 + $0x694] sm:$0xf0]  ;;  %v9819_v15 = vld [vmem:[%s17333_s3 + $0x160] sm:$0xf]  ;;  %v9757_v47 = vld [vmem:[%s17333_s3 + $0xf0] sm:$0xf0] }
 0x23e   : > { %v5893_v20 = vrot.slane %v5885_v51, 1  ;;  %v9476_v49 = vor.u32 %v11401_v42, %v9475_v9  ;;  %v11429_v24 = vld [vmem:[%s17333_s3 + $0x794] sm:$0xf0]  ;;  %v9659_v25 = vld [vmem:[%s17333_s3 + $0x20] sm:$0xf] }
 0x23f   : > { %v15130_v60 = vpack.c.b16 %v3952_v17, %v3952_v17  ;;  %v15132_v43 = vpack.c.b16 %v3953_v7, %v3953_v7  ;;  %4828 = vmatpush.bf16.msrb.mxu0 %v9160_v34  ;;  %4842 = vmatpush.bf16.msrb.mxu1 %v9288_v18  ;;  %v9603_v34 = vld [vmem:[%s17333_s3 + $0x7a8] sm:$0xf]  ;;  %v11433_v18 = vld [vmem:[%s17333_s3 + $0x7b4] sm:$0xf0]  ;;  %v9724_v7 = vor.u32 %v11208_v36, %v9723_v19  ;;  %v9787_v19 = vld [vmem:[%s17333_s3 + $0x120] sm:$0xf] }
 0x240   : > { %v9604_v56 = vor.u32 %v11433_v18, %v9603_v34  ;;  %v11393_v1 = vld [vmem:[%s17333_s3 + $0x674] sm:$0xf0]  ;;  %v11224_v36 = vld [vmem:[%s17333_s3 + $0x12c] sm:$0xf0]  ;;  %v9539_v9 = vld [vmem:[%s17333_s3 + $0x728] sm:$0xf] }
 0x241   : > { %v3994_v32 = vshll.u32 %v15130_v60, 16  ;;  %v4006_v46 = vshll.u32 %v15132_v43, 16  ;;  %v5894_v27 = vrot.slane %v15130_v60, 1  ;;  %v5897_v17 = vrot.slane %v15132_v43, 1  ;;  %v9459_v60 = vld [vmem:[%s17333_s3 + $0x688] sm:$0xf] }
 0x242   : > { %v9587_v43 = vld [vmem:[%s17333_s3 + $0x788] sm:$0xf]  ;;  %v9460_v45 = vor.u32 %v11397_v6, %v9459_v60  ;;  %v11425_v57 = vld [vmem:[%s17333_s3 + $0x774] sm:$0xf0]  ;;  %v9788_v18 = vor.u32 %v11224_v36, %v9787_v19  ;;  %v11431_v19 = vld [vmem:[%s17333_s3 + $0x7ac] sm:$0xf] }
 0x243   : > { %v3996_v63 = vrot.slane %v3994_v32, 1  ;;  %v4008_v21 = vrot.slane %v4006_v46, 1  ;;  %4829 = vmatpush.bf16.msrb.mxu0 %v9144_v8  ;;  %4843 = vmatpush.bf16.msrb.mxu1 %v9272_v41  ;;  %v15221_v8 = vsel %vm2701_vm4, %v5893_v20, %v5894_v27  ;;  %v15224_v41 = vsel %vm2701_vm4, %v5896_v55, %v5897_v17  ;;  %v9443_v32 = vld [vmem:[%s17333_s3 + $0x668] sm:$0xf]  ;;  %v11389_v59 = vld [vmem:[%s17333_s3 + $0x654] sm:$0xf0] }
 0x244   : > { %v9588_v48 = vor.u32 %v11429_v24, %v9587_v43  ;;  %v9571_v46 = vld [vmem:[%s17333_s3 + $0x768] sm:$0xf]  ;;  %v11421_v5 = vld [vmem:[%s17333_s3 + $0x754] sm:$0xf0]  ;;  %v9428_v44 = vor.u32 %v11389_v59, %v9427_v35  ;;  %v9643_v20 = vld [vmem:[%s17333_s3] sm:$0xf] }
 0x245   : > { %v15173_v22 = vsel %vm775_vm1, %v3992_v33, %v3996_v63  ;;  %v15176_v28 = vsel %vm775_vm1, %v4004_v26, %v4008_v21  ;;  %v9803_v33 = vld [vmem:[%s17333_s3 + $0x140] sm:$0xf]  ;;  %v11228_v63 = vld [vmem:[%s17333_s3 + $0x14c] sm:$0xf0]  ;;  %v9444_v26 = vor.u32 %v11393_v1, %v9443_v32  ;;  %v9572_v21 = vor.u32 %v11425_v57, %v9571_v46  ;;  %v11417_v42 = vld [vmem:[%s17333_s3 + $0x734] sm:$0xf0] }
 0x246   : > { %4690 = vmatmul.bf16.vlgmr.msra.gmra.mxu2 %v15173_v22  ;;  %4704 = vmatmul.bf16.vlgmr.msra.gmra.mxu3 %v15176_v28  ;;  %v9804_v51 = vor.u32 %v11228_v63, %v9803_v33  ;;  %v9556_v23 = vor.u32 %v11421_v5, %v9555_v40  ;;  %v11188_v27 = vld [vmem:[%s17333_s3 + $0xc] sm:$0xf0]  ;;  %v9395_v55 = vld [vmem:[%s17333_s3 + $0x608] sm:$0xf]  ;;  %v11381_v17 = vld [vmem:[%s17333_s3 + $0x614] sm:$0xf0]  ;;  %v9540_v31 = vor.u32 %v11417_v42, %v9539_v9 }
 0x247   : > { %5522 = vmatpush.bf16.msra.mxu0 %v9756_v52  ;;  %5536 = vmatpush.bf16.msra.mxu1 %v9884_v37  ;;  %v9691_v52 = vld [vmem:[%s17333_s3 + $0x60] sm:$0xf]  ;;  %v11200_v37 = vld [vmem:[%s17333_s3 + $0x6c] sm:$0xf0]  ;;  %v9523_v60 = vld [vmem:[%s17333_s3 + $0x708] sm:$0xf]  ;;  %v9644_v24 = vor.u32 %v11188_v27, %v9643_v20 }
 0x248   : > { %4794 = vmatpush.bf16.msra.mxu2 %v9508_v3  ;;  %4808 = vmatpush.bf16.msra.mxu3 %v9636_v10  ;;  %v9692_v3 = vor.u32 %v11200_v37, %v9691_v52  ;;  %v9820_v10 = vor.u32 %v11232_v4, %v9819_v15  ;;  %v11413_v6 = vld [vmem:[%s17333_s3 + $0x714] sm:$0xf0]  ;;  %v11407_v43 = vld [vmem:[%s17333_s3 + $0x6ec] sm:$0xf]  ;;  %v9637_v37 = vld [vmem:[%s17333_s3 + $0x7f8] sm:$0xf0] }
 0x249   : > { %4830 = vmatmul.bf16.vlgmr.msrb.gmra.mxu0 %v14771_v2  ;;  %4844 = vmatmul.bf16.vlgmr.msrb.gmra.mxu1 %v14774_v53  ;;  %v9707_v2 = vld [vmem:[%s17333_s3 + $0x80] sm:$0xf]  ;;  %v11204_v53 = vld [vmem:[%s17333_s3 + $0x8c] sm:$0xf0]  ;;  %v11439_v52 = vld [vmem:[%s17333_s3 + $0x7ec] sm:$0xf] }
 0x24a   : > { %v9708_v16 = vor.u32 %v11204_v53, %v9707_v2  ;;  %v11214_v2 = vld [vmem:[%s17333_s3 + $0xe4] sm:$0xf]  ;;  %v11403_v32 = vld [vmem:[%s17333_s3 + $0x6cc] sm:$0xf]  ;;  %v9640_v57 = vor.u32 %v11439_v52, %v9637_v37  ;;  %v9621_v63 = vld [vmem:[%s17333_s3 + $0x7d8] sm:$0xf0] }
 0x24b   : > { %5523 = vmatpush.bf16.msra.mxu0 %v9740_v12  ;;  %5537 = vmatpush.bf16.msra.mxu1 %v9868_v38  ;;  %v9676_v12 = vor.u32 %v11196_v0, %v9675_v11  ;;  %v11192_v38 = vld [vmem:[%s17333_s3 + $0x2c] sm:$0xf0]  ;;  %v9760_v15 = vor.u32 %v11214_v2, %v9757_v47  ;;  %v11210_v1 = vld [vmem:[%s17333_s3 + $0xc4] sm:$0xf]  ;;  %v9869_v11 = vld [vmem:[%s17333_s3 + $0x1d0] sm:$0xf0] }
 0x24c   : > { %4795 = vmatpush.bf16.msra.mxu2 %v9492_v29  ;;  %4809 = vmatpush.bf16.msra.mxu3 %v9620_v54  ;;  %v9411_v29 = vld [vmem:[%s17333_s3 + $0x628] sm:$0xf]  ;;  %v11385_v54 = vld [vmem:[%s17333_s3 + $0x634] sm:$0xf0]  ;;  %v9660_v34 = vor.u32 %v11192_v38, %v9659_v25  ;;  %v9493_v0 = vld [vmem:[%s17333_s3 + $0x6d8] sm:$0xf0] }
 0x24d   : > { %v9412_v53 = vor.u32 %v11385_v54, %v9411_v29  ;;  %v11435_v33 = vld [vmem:[%s17333_s3 + $0x7cc] sm:$0xf]  ;;  %v11206_v59 = vld [vmem:[%s17333_s3 + $0xa4] sm:$0xf]  ;;  %v9496_v40 = vor.u32 %v11403_v32, %v9493_v0  ;;  %v9853_v25 = vld [vmem:[%s17333_s3 + $0x1b0] sm:$0xf0] }
 0x24e   : > { %v11399_v35 = vld [vmem:[%s17333_s3 + $0x6ac] sm:$0xf]  ;;  %v9624_v5 = vor.u32 %v11435_v33, %v9621_v63  ;;  %v9477_v38 = vld [vmem:[%s17333_s3 + $0x6b8] sm:$0xf0]  ;;  %v11202_v54 = vld [vmem:[%s17333_s3 + $0x84] sm:$0xf] }
 0x24f   : > { %5524 = vmatpush.bf16.msra.mxu0 %v9724_v7  ;;  %5538 = vmatpush.bf16.msra.mxu1 %v9852_v50  ;;  %v9771_v7 = vld [vmem:[%s17333_s3 + $0x100] sm:$0xf]  ;;  %v11220_v50 = vld [vmem:[%s17333_s3 + $0x10c] sm:$0xf0]  ;;  %v9605_v36 = vld [vmem:[%s17333_s3 + $0x7b8] sm:$0xf0]  ;;  %v9480_v9 = vor.u32 %v11399_v35, %v9477_v38 }
 0x250   : > { %4796 = vmatpush.bf16.msra.mxu2 %v9476_v49  ;;  %4810 = vmatpush.bf16.msra.mxu3 %v9604_v56  ;;  %v11246_v49 = vld [vmem:[%s17333_s3 + $0x1e4] sm:$0xf]  ;;  %v9885_v56 = vld [vmem:[%s17333_s3 + $0x1f0] sm:$0xf0]  ;;  %v11395_v29 = vld [vmem:[%s17333_s3 + $0x68c] sm:$0xf]  ;;  %v9608_v42 = vor.u32 %v11431_v19, %v9605_v36 }
 0x251   : > { %v9888_v4 = vor.u32 %v11246_v49, %v9885_v56  ;;  %v9837_v20 = vld [vmem:[%s17333_s3 + $0x190] sm:$0xf0]  ;;  %v9461_v27 = vld [vmem:[%s17333_s3 + $0x698] sm:$0xf0]  ;;  %v11391_v2 = vld [vmem:[%s17333_s3 + $0x66c] sm:$0xf] }
 0x252   : > { %v9693_v49 = vld [vmem:[%s17333_s3 + $0x70] sm:$0xf0]  ;;  %v11230_v56 = vld [vmem:[%s17333_s3 + $0x164] sm:$0xf]  ;;  %v11387_v52 = vld [vmem:[%s17333_s3 + $0x64c] sm:$0xf] }
 0x253   : > { %5525 = vmatpush.bf16.msra.mxu0 %v9708_v16  ;;  %5539 = vmatpush.bf16.msra.mxu1 %v9836_v58  ;;  %v9772_v16 = vor.u32 %v11220_v50, %v9771_v7  ;;  %v9509_v58 = vld [vmem:[%s17333_s3 + $0x6f8] sm:$0xf0]  ;;  %v11194_v37 = vld [vmem:[%s17333_s3 + $0x44] sm:$0xf]  ;;  %v9805_v32 = vld [vmem:[%s17333_s3 + $0x150] sm:$0xf0] }
 0x254   : > { %4797 = vmatpush.bf16.msra.mxu2 %v9460_v45  ;;  %4811 = vmatpush.bf16.msra.mxu3 %v9588_v48  ;;  %v9396_v45 = vor.u32 %v11381_v17, %v9395_v55  ;;  %v9524_v48 = vor.u32 %v11413_v6, %v9523_v60  ;;  %v9512_v46 = vor.u32 %v11407_v43, %v9509_v58  ;;  %v11427_v55 = vld [vmem:[%s17333_s3 + $0x78c] sm:$0xf]  ;;  %v9589_v17 = vld [vmem:[%s17333_s3 + $0x798] sm:$0xf0]  ;;  %v9821_v60 = vld [vmem:[%s17333_s3 + $0x170] sm:$0xf0] }
 0x255   : > { %v9592_v47 = vor.u32 %v11427_v55, %v9589_v17  ;;  %v9445_v6 = vld [vmem:[%s17333_s3 + $0x678] sm:$0xf0]  ;;  %v11423_v43 = vld [vmem:[%s17333_s3 + $0x76c] sm:$0xf]  ;;  %v9824_v58 = vor.u32 %v11230_v56, %v9821_v60  ;;  %v11190_v0 = vld [vmem:[%s17333_s3 + $0x24] sm:$0xf] }
 0x256   : > { %4746 = vmatmul.bf16.vlgmr.msrb.gmra.mxu2 %v15173_v22  ;;  %4760 = vmatmul.bf16.vlgmr.msrb.gmra.mxu3 %v15176_v28  ;;  %v9789_v35 = vld [vmem:[%s17333_s3 + $0x130] sm:$0xf0]  ;;  %v9397_v38 = vld [vmem:[%s17333_s3 + $0x618] sm:$0xf0]  ;;  %v11411_v19 = vld [vmem:[%s17333_s3 + $0x70c] sm:$0xf] }
 0x257   : > { %5526 = vmatpush.bf16.msra.mxu0 %v9692_v3  ;;  %5540 = vmatpush.bf16.msra.mxu1 %v9820_v10  ;;  %v9741_v3 = vld [vmem:[%s17333_s3 + $0xd0] sm:$0xf0]  ;;  %v11242_v10 = vld [vmem:[%s17333_s3 + $0x1c4] sm:$0xf]  ;;  %v9763_v55 = vld [vmem:[%s17333_s3 + $0xe8] sm:$0xf] }
 0x258   : > { %4798 = vmatpush.bf16.msra.mxu2 %v9444_v26  ;;  %4812 = vmatpush.bf16.msra.mxu3 %v9572_v21  ;;  %v9744_v26 = vor.u32 %v11210_v1, %v9741_v3  ;;  %v9872_v21 = vor.u32 %v11242_v10, %v9869_v11  ;;  %v9429_v1 = vld [vmem:[%s17333_s3 + $0x658] sm:$0xf0]  ;;  %v11383_v11 = vld [vmem:[%s17333_s3 + $0x62c] sm:$0xf]  ;;  %v11186_v36 = vld [vmem:[%s17333_s3 + $0x4] sm:$0xf] }
 0x259   : > { %v9432_v33 = vor.u32 %v11387_v52, %v9429_v1  ;;  %v9995_v60 = vld [vmem:[%s17333_s3 + $0x2c0] sm:$0xf]  ;;  %v9747_v52 = vld [vmem:[%s17333_s3 + $0xc8] sm:$0xf]  ;;  %v11272_v1 = vld [vmem:[%s17333_s3 + $0x2ac] sm:$0xf0] }
 0x25b   : > { %5527 = vmatpush.bf16.msra.mxu0 %v9676_v12  ;;  %5541 = vmatpush.bf16.msra.mxu1 %v9804_v51  ;;  %v9725_v12 = vld [vmem:[%s17333_s3 + $0xb0] sm:$0xf0]  ;;  %v11238_v51 = vld [vmem:[%s17333_s3 + $0x1a4] sm:$0xf] }
 0x25c   : > { %4799 = vmatpush.bf16.msra.mxu2 %v9428_v44  ;;  %4813 = vmatpush.bf16.msra.mxu3 %v9556_v23  ;;  %v9728_v44 = vor.u32 %v11206_v59, %v9725_v12  ;;  %v9856_v23 = vor.u32 %v11238_v51, %v9853_v25  ;;  %v9413_v59 = vld [vmem:[%s17333_s3 + $0x638] sm:$0xf0]  ;;  %v11379_v25 = vld [vmem:[%s17333_s3 + $0x60c] sm:$0xf] }
 0x25f   : > { %5528 = vmatpush.bf16.msra.mxu0 %v9660_v34  ;;  %5542 = vmatpush.bf16.msra.mxu1 %v9788_v18  ;;  %v9709_v34 = vld [vmem:[%s17333_s3 + $0x90] sm:$0xf0]  ;;  %v11234_v18 = vld [vmem:[%s17333_s3 + $0x184] sm:$0xf] }
 0x260   : > { %4800 = vmatpush.bf16.msra.mxu2 %v9412_v53  ;;  %4814 = vmatpush.bf16.msra.mxu3 %v9540_v31  ;;  %v9712_v7 = vor.u32 %v11202_v54, %v9709_v34  ;;  %v9840_v50 = vor.u32 %v11234_v18, %v9837_v20  ;;  %v11198_v53 = vld [vmem:[%s17333_s3 + $0x64] sm:$0xf]  ;;  %v9464_v31 = vor.u32 %v11395_v29, %v9461_v27  ;;  %v9645_v29 = vld [vmem:[%s17333_s3 + $0x10] sm:$0xf0]  ;;  %v10011_v34 = vld [vmem:[%s17333_s3 + $0x2e0] sm:$0xf] }
 0x261   : > { %v11218_v54 = vld [vmem:[%s17333_s3 + $0x104] sm:$0xf]  ;;  %v11280_v18 = vld [vmem:[%s17333_s3 + $0x2ec] sm:$0xf0]  ;;  %v10139_v20 = vld [vmem:[%s17333_s3 + $0x3e0] sm:$0xf]  ;;  %v9648_v17 = vor.u32 %v11186_v36, %v9645_v29 }
 0x262   : > { %v11312_v27 = vld [vmem:[%s17333_s3 + $0x3ec] sm:$0xf0]  ;;  %v11237_v36 = vld [vmem:[%s17333_s3 + $0x194] sm:$0xf0]  ;;  %v9947_v29 = vld [vmem:[%s17333_s3 + $0x260] sm:$0xf] }
 0x263   : > { %5529 = vmatpush.bf16.msra.mxu0 %v9644_v24  ;;  %5543 = vmatpush.bf16.msra.mxu1 %v9772_v16  ;;  %v9573_v24 = vld [vmem:[%s17333_s3 + $0x778] sm:$0xf0]  ;;  %v9696_v16 = vor.u32 %v11198_v53, %v9693_v49  ;;  %v11249_v53 = vld [vmem:[%s17333_s3 + $0x1f4] sm:$0xf0]  ;;  %v10012_v49 = vor.u32 %v11280_v18, %v10011_v34  ;;  %v10140_v56 = vor.u32 %v11312_v27, %v10139_v20  ;;  %v10075_v34 = vld [vmem:[%s17333_s3 + $0x360] sm:$0xf] }
 0x264   : > { %4801 = vmatpush.bf16.msra.mxu2 %v9396_v45  ;;  %4815 = vmatpush.bf16.msra.mxu3 %v9524_v48  ;;  %v9677_v45 = vld [vmem:[%s17333_s3 + $0x50] sm:$0xf0]  ;;  %v11226_v48 = vld [vmem:[%s17333_s3 + $0x144] sm:$0xf]  ;;  %v11296_v18 = vld [vmem:[%s17333_s3 + $0x36c] sm:$0xf0] }
 0x265   : > { %v9680_v3 = vor.u32 %v11194_v37, %v9677_v45  ;;  %v9808_v10 = vor.u32 %v11226_v48, %v9805_v32  ;;  %v11213_v37 = vld [vmem:[%s17333_s3 + $0xd4] sm:$0xf0]  ;;  %v9979_v32 = vld [vmem:[%s17333_s3 + $0x2a0] sm:$0xf]  ;;  %v9699_v20 = vld [vmem:[%s17333_s3 + $0x68] sm:$0xf] }
 0x266   : > { %5530 = vmatmul.bf16.vlgmr.msra.gmra.mxu0 %v14675_v61  ;;  %5544 = vmatmul.bf16.vlgmr.msra.gmra.mxu1 %v14679_v30  ;;  %v11201_v27 = vld [vmem:[%s17333_s3 + $0x74] sm:$0xf0] }
 0x267   : > { %5578 = vmatpush.bf16.msrb.mxu0 %v9760_v15  ;;  %5592 = vmatpush.bf16.msrb.mxu1 %v9888_v4  ;;  %v9448_v15 = vor.u32 %v11391_v2, %v9445_v6  ;;  %v9576_v4 = vor.u32 %v11423_v43, %v9573_v24  ;;  %v9891_v2 = vld [vmem:[%s17333_s3 + $0x1e8] sm:$0xf]  ;;  %v11276_v6 = vld [vmem:[%s17333_s3 + $0x2cc] sm:$0xf0] }
 0x268   : > { %4850 = vmatpush.bf16.msrb.mxu2 %v9512_v46  ;;  %4864 = vmatpush.bf16.msrb.mxu3 %v9640_v57  ;;  %v11419_v46 = vld [vmem:[%s17333_s3 + $0x74c] sm:$0xf]  ;;  %v9557_v57 = vld [vmem:[%s17333_s3 + $0x758] sm:$0xf0]  ;;  %v9892_v24 = vor.u32 %v11249_v53, %v9891_v2  ;;  %v9996_v45 = vor.u32 %v11276_v6, %v9995_v60  ;;  %v9931_v2 = vld [vmem:[%s17333_s3 + $0x240] sm:$0xf] }
 0x269   : > { %4802 = vmatmul.bf16.vlgmr.msra.gmra.mxu2 %v15173_v22  ;;  %4816 = vmatmul.bf16.vlgmr.msra.gmra.mxu3 %v15176_v28  ;;  %v9560_v63 = vor.u32 %v11419_v46, %v9557_v57  ;;  %v9748_v46 = vor.u32 %v11213_v37, %v9747_v52  ;;  %v11260_v53 = vld [vmem:[%s17333_s3 + $0x24c] sm:$0xf0]  ;;  %v9683_v60 = vld [vmem:[%s17333_s3 + $0x48] sm:$0xf] }
 0x26a   : > { %v9932_v52 = vor.u32 %v11260_v53, %v9931_v2  ;;  %v9997_v2 = vld [vmem:[%s17333_s3 + $0x2d0] sm:$0xf0] }
 0x26b   : > { %5579 = vmatpush.bf16.msrb.mxu0 %v9744_v26  ;;  %5593 = vmatpush.bf16.msrb.mxu1 %v9872_v21  ;;  %v9661_v26 = vld [vmem:[%s17333_s3 + $0x30] sm:$0xf0]  ;;  %v11222_v21 = vld [vmem:[%s17333_s3 + $0x124] sm:$0xf] }
 0x26c   : > { %4851 = vmatpush.bf16.msrb.mxu2 %v9496_v40  ;;  %4865 = vmatpush.bf16.msrb.mxu3 %v9624_v5  ;;  %v11415_v40 = vld [vmem:[%s17333_s3 + $0x72c] sm:$0xf]  ;;  %v9541_v5 = vld [vmem:[%s17333_s3 + $0x738] sm:$0xf0]  ;;  %v9664_v12 = vor.u32 %v11190_v0, %v9661_v26  ;;  %v9792_v51 = vor.u32 %v11222_v21, %v9789_v35  ;;  %v11209_v0 = vld [vmem:[%s17333_s3 + $0xb4] sm:$0xf0] }
 0x26d   : > { %v9963_v26 = vld [vmem:[%s17333_s3 + $0x280] sm:$0xf]  ;;  %v11268_v21 = vld [vmem:[%s17333_s3 + $0x28c] sm:$0xf0] }
 0x26f   : > { %5580 = vmatpush.bf16.msrb.mxu0 %v9728_v44  ;;  %5594 = vmatpush.bf16.msrb.mxu1 %v9856_v23  ;;  %v9416_v44 = vor.u32 %v11383_v11, %v9413_v59  ;;  %v9544_v23 = vor.u32 %v11415_v40, %v9541_v5  ;;  %v9731_v11 = vld [vmem:[%s17333_s3 + $0xa8] sm:$0xf]  ;;  %v10091_v40 = vld [vmem:[%s17333_s3 + $0x380] sm:$0xf]  ;;  %v11300_v5 = vld [vmem:[%s17333_s3 + $0x38c] sm:$0xf0] }
 0x270   : > { %4852 = vmatpush.bf16.msrb.mxu2 %v9480_v9  ;;  %4866 = vmatpush.bf16.msrb.mxu3 %v9608_v42  ;;  %v9773_v9 = vld [vmem:[%s17333_s3 + $0x110] sm:$0xf0]  ;;  %v9525_v42 = vld [vmem:[%s17333_s3 + $0x718] sm:$0xf0]  ;;  %v9732_v35 = vor.u32 %v11209_v0, %v9731_v11  ;;  %v9899_v11 = vld [vmem:[%s17333_s3 + $0x200] sm:$0xf] }
 0x273   : > { %5581 = vmatpush.bf16.msrb.mxu0 %v9712_v7  ;;  %5595 = vmatpush.bf16.msrb.mxu1 %v9840_v50  ;;  %v9776_v7 = vor.u32 %v11218_v54, %v9773_v9  ;;  %v11217_v50 = vld [vmem:[%s17333_s3 + $0xf4] sm:$0xf0]  ;;  %v11264_v54 = vld [vmem:[%s17333_s3 + $0x26c] sm:$0xf0] }
 0x274   : > { %4853 = vmatpush.bf16.msrb.mxu2 %v9464_v31  ;;  %4867 = vmatpush.bf16.msrb.mxu3 %v9592_v47  ;;  %v9400_v31 = vor.u32 %v11379_v25, %v9397_v38  ;;  %v9528_v47 = vor.u32 %v11411_v19, %v9525_v42  ;;  %v9764_v43 = vor.u32 %v11217_v50, %v9763_v55  ;;  %v11205_v38 = vld [vmem:[%s17333_s3 + $0x94] sm:$0xf0]  ;;  %v9843_v19 = vld [vmem:[%s17333_s3 + $0x188] sm:$0xf] }
 0x275   : > { %v9844_v42 = vor.u32 %v11237_v36, %v9843_v19  ;;  %v9827_v55 = vld [vmem:[%s17333_s3 + $0x168] sm:$0xf]  ;;  %v10076_v50 = vor.u32 %v11296_v18, %v10075_v34  ;;  %v11278_v19 = vld [vmem:[%s17333_s3 + $0x2e4] sm:$0xf]  ;;  %v10013_v36 = vld [vmem:[%s17333_s3 + $0x2f0] sm:$0xf0] }
 0x276   : > { %v9765_v34 = vld [vmem:[%s17333_s3 + $0xf8] sm:$0xf0]  ;;  %v11247_v18 = vld [vmem:[%s17333_s3 + $0x1ec] sm:$0xf] }
 0x277   : > { %5582 = vmatpush.bf16.msrb.mxu0 %v9696_v16  ;;  %5596 = vmatpush.bf16.msrb.mxu1 %v9824_v58  ;;  %v10123_v16 = vld [vmem:[%s17333_s3 + $0x3c0] sm:$0xf]  ;;  %v11308_v58 = vld [vmem:[%s17333_s3 + $0x3cc] sm:$0xf0] }
 0x278   : > { %4854 = vmatpush.bf16.msrb.mxu2 %v9448_v15  ;;  %4868 = vmatpush.bf16.msrb.mxu3 %v9576_v4  ;;  %v9875_v15 = vld [vmem:[%s17333_s3 + $0x1c8] sm:$0xf]  ;;  %v11245_v4 = vld [vmem:[%s17333_s3 + $0x1d4] sm:$0xf0]  ;;  %v10124_v48 = vor.u32 %v11308_v58, %v10123_v16 }
 0x279   : > { %v9876_v57 = vor.u32 %v11245_v4, %v9875_v15  ;;  %v9811_v16 = vld [vmem:[%s17333_s3 + $0x148] sm:$0xf]  ;;  %v11229_v58 = vld [vmem:[%s17333_s3 + $0x154] sm:$0xf0]  ;;  %v9915_v15 = vld [vmem:[%s17333_s3 + $0x220] sm:$0xf] }
 0x27a   : > { %v11256_v4 = vld [vmem:[%s17333_s3 + $0x22c] sm:$0xf0] }
 0x27b   : > { %5583 = vmatpush.bf16.msrb.mxu0 %v9680_v3  ;;  %5597 = vmatpush.bf16.msrb.mxu1 %v9808_v10  ;;  %v10107_v3 = vld [vmem:[%s17333_s3 + $0x3a0] sm:$0xf]  ;;  %v11304_v10 = vld [vmem:[%s17333_s3 + $0x3ac] sm:$0xf0]  ;;  %v9916_v0 = vor.u32 %v11256_v4, %v9915_v15  ;;  %v11270_v4 = vld [vmem:[%s17333_s3 + $0x2a4] sm:$0xf] }
 0x27c   : > { %4855 = vmatpush.bf16.msrb.mxu2 %v9432_v33  ;;  %4869 = vmatpush.bf16.msrb.mxu3 %v9560_v63  ;;  %v9859_v33 = vld [vmem:[%s17333_s3 + $0x1a8] sm:$0xf]  ;;  %v11241_v63 = vld [vmem:[%s17333_s3 + $0x1b4] sm:$0xf0] }
 0x27d   : > { %v9860_v59 = vor.u32 %v11241_v63, %v9859_v33  ;;  %v11252_v63 = vld [vmem:[%s17333_s3 + $0x20c] sm:$0xf0] }
 0x27f   : > { %5584 = vmatpush.bf16.msrb.mxu0 %v9664_v12  ;;  %5598 = vmatpush.bf16.msrb.mxu1 %v9792_v51  ;;  %v9715_v12 = vld [vmem:[%s17333_s3 + $0x88] sm:$0xf] }
 0x280   : > { %4856 = vmatpush.bf16.msrb.mxu2 %v9416_v44  ;;  %4870 = vmatpush.bf16.msrb.mxu3 %v9544_v23  ;;  %v9964_v44 = vor.u32 %v11268_v21, %v9963_v26  ;;  %v10092_v23 = vor.u32 %v11300_v5, %v10091_v40  ;;  %v9716_v9 = vor.u32 %v11205_v38, %v9715_v12  ;;  %v9779_v40 = vld [vmem:[%s17333_s3 + $0x108] sm:$0xf]  ;;  %v11221_v38 = vld [vmem:[%s17333_s3 + $0x114] sm:$0xf0] }
 0x283   : > { %5585 = vmatpush.bf16.msrb.mxu0 %v9648_v17  ;;  %5599 = vmatpush.bf16.msrb.mxu1 %v9776_v7  ;;  %v15623_v51 = vpop.f32.mrf.mxu0  ;;  %v15625_v25 = vpop.f32.mrf.mxu1  ;;  %v11233_v17 = vld [vmem:[%s17333_s3 + $0x174] sm:$0xf0]  ;;  %v9948_v7 = vor.u32 %v11264_v54, %v9947_v29  ;;  %v10141_v29 = vld [vmem:[%s17333_s3 + $0x3f0] sm:$0xf0]  ;;  %v11215_v54 = vld [vmem:[%s17333_s3 + $0xec] sm:$0xf] }
 0x284   : > { %4857 = vmatpush.bf16.msrb.mxu2 %v9400_v31  ;;  %4871 = vmatpush.bf16.msrb.mxu3 %v9528_v47  ;;  %v9700_v31 = vor.u32 %v11201_v27, %v9699_v20  ;;  %v9828_v47 = vor.u32 %v11233_v17, %v9827_v55  ;;  %v9893_v20 = vld [vmem:[%s17333_s3 + $0x1f8] sm:$0xf0]  ;;  %v9780_v55 = vor.u32 %v11221_v38, %v9779_v40  ;;  %v11203_v40 = vld [vmem:[%s17333_s3 + $0x8c] sm:$0xf] }
 0x285   : > { %v10016_v17 = vor.u32 %v11278_v19, %v10013_v36  ;;  %v9768_v53 = vor.u32 %v11215_v54, %v9765_v34  ;;  %v9845_v38 = vld [vmem:[%s17333_s3 + $0x198] sm:$0xf0]  ;;  %v11262_v54 = vld [vmem:[%s17333_s3 + $0x264] sm:$0xf] }
 0x286   : > { %5586 = vmatmul.bf16.vlgmr.msrb.gmra.mxu0 %v14675_v61  ;;  %5600 = vmatmul.bf16.vlgmr.msrb.gmra.mxu1 %v14679_v30 }
 0x287   : > { %5634 = vmatpush.bf16.msra.mxu0 %v9764_v43  ;;  %5648 = vmatpush.bf16.msra.mxu1 %v9892_v24  ;;  %v11197_v24 = vld [vmem:[%s17333_s3 + $0x54] sm:$0xf0] }
 0x288   : > { %5550 = vmatpush.bf16.msra.mxu2 %v10012_v49  ;;  %5564 = vmatpush.bf16.msra.mxu3 %v10140_v56  ;;  %v10059_v49 = vld [vmem:[%s17333_s3 + $0x340] sm:$0xf]  ;;  %v11292_v56 = vld [vmem:[%s17333_s3 + $0x34c] sm:$0xf0] }
 0x289   : > { %4858 = vmatmul.bf16.vlgmr.msrb.gmra.mxu2 %v15173_v22  ;;  %4872 = vmatmul.bf16.vlgmr.msrb.gmra.mxu3 %v15176_v28  ;;  %v9980_v22 = vor.u32 %v11272_v1, %v9979_v32  ;;  %v10108_v28 = vor.u32 %v11304_v10, %v10107_v3  ;;  %v10060_v37 = vor.u32 %v11292_v56, %v10059_v49  ;;  %v10043_v32 = vld [vmem:[%s17333_s3 + $0x320] sm:$0xf]  ;;  %v11288_v1 = vld [vmem:[%s17333_s3 + $0x32c] sm:$0xf0]  ;;  %v9795_v3 = vld [vmem:[%s17333_s3 + $0x128] sm:$0xf] }
 0x28a   : > { %v11225_v10 = vld [vmem:[%s17333_s3 + $0x134] sm:$0xf0]  ;;  %v10044_v33 = vor.u32 %v11288_v1, %v10043_v32  ;;  %v10125_v49 = vld [vmem:[%s17333_s3 + $0x3d0] sm:$0xf0]  ;;  %v11211_v56 = vld [vmem:[%s17333_s3 + $0xcc] sm:$0xf] }
 0x28b   : > { %5635 = vmatpush.bf16.msra.mxu0 %v9748_v46  ;;  %5649 = vmatpush.bf16.msra.mxu1 %v9876_v57  ;;  %v15675_v6 = vpop.f32.mrf.mxu0  ;;  %v15677_v43 = vpop.f32.mrf.mxu1  ;;  %v9667_v46 = vld [vmem:[%s17333_s3 + $0x28] sm:$0xf]  ;;  %v11193_v57 = vld [vmem:[%s17333_s3 + $0x34] sm:$0xf0]  ;;  %v9796_v21 = vor.u32 %v11225_v10, %v9795_v3  ;;  %v11207_v3 = vld [vmem:[%s17333_s3 + $0xac] sm:$0xf] }
 0x28c   : > { %5551 = vmatpush.bf16.msra.mxu2 %v9996_v45  ;;  %5565 = vmatpush.bf16.msra.mxu3 %v10124_v48  ;;  %v9684_v45 = vor.u32 %v11197_v24, %v9683_v60  ;;  %v9812_v48 = vor.u32 %v11229_v58, %v9811_v16  ;;  %v9668_v26 = vor.u32 %v11193_v57, %v9667_v46  ;;  %v9749_v60 = vld [vmem:[%s17333_s3 + $0xd8] sm:$0xf0]  ;;  %v11243_v24 = vld [vmem:[%s17333_s3 + $0x1cc] sm:$0xf]  ;;  %v11302_v46 = vld [vmem:[%s17333_s3 + $0x3a4] sm:$0xf] }
 0x28d   : > { %v9877_v16 = vld [vmem:[%s17333_s3 + $0x1d8] sm:$0xf0]  ;;  %v9752_v32 = vor.u32 %v11211_v56, %v9749_v60  ;;  %v10109_v57 = vld [vmem:[%s17333_s3 + $0x3b0] sm:$0xf0]  ;;  %v11290_v60 = vld [vmem:[%s17333_s3 + $0x344] sm:$0xf] }
 0x28e   : > { %v9880_v1 = vor.u32 %v11243_v24, %v9877_v16  ;;  %v9733_v10 = vld [vmem:[%s17333_s3 + $0xb8] sm:$0xf0]  ;;  %v10061_v24 = vld [vmem:[%s17333_s3 + $0x350] sm:$0xf0]  ;;  %v11195_v16 = vld [vmem:[%s17333_s3 + $0x4c] sm:$0xf] }
 0x28f   : > { %5636 = vmatpush.bf16.msra.mxu0 %v9732_v35  ;;  %5650 = vmatpush.bf16.msra.mxu1 %v9860_v59  ;;  %v9651_v35 = vld [vmem:[%s17333_s3 + $0x8] sm:$0xf]  ;;  %v11189_v59 = vld [vmem:[%s17333_s3 + $0x14] sm:$0xf0] }
 0x290   : > { %5552 = vmatpush.bf16.msra.mxu2 %v9980_v22  ;;  %5566 = vmatpush.bf16.msra.mxu3 %v10108_v28  ;;  %v10027_v22 = vld [vmem:[%s17333_s3 + $0x300] sm:$0xf]  ;;  %v11284_v28 = vld [vmem:[%s17333_s3 + $0x30c] sm:$0xf0]  ;;  %v9652_v27 = vor.u32 %v11189_v59, %v9651_v35  ;;  %v11298_v35 = vld [vmem:[%s17333_s3 + $0x384] sm:$0xf] }
 0x291   : > { %v10093_v59 = vld [vmem:[%s17333_s3 + $0x390] sm:$0xf0] }
 0x293   : > { %5637 = vmatpush.bf16.msra.mxu0 %v9716_v9  ;;  %5651 = vmatpush.bf16.msra.mxu1 %v9844_v42  ;;  %v4719_v5 = vpop.f32.mrf.mxu0  ;;  %v4733_v12 = vpop.f32.mrf.mxu1  ;;  %v9900_v9 = vor.u32 %v11252_v63, %v9899_v11  ;;  %v10028_v42 = vor.u32 %v11284_v28, %v10027_v22  ;;  %v11239_v11 = vld [vmem:[%s17333_s3 + $0x1ac] sm:$0xf]  ;;  %v10112_v63 = vor.u32 %v11302_v46, %v10109_v57  ;;  %v11266_v22 = vld [vmem:[%s17333_s3 + $0x284] sm:$0xf]  ;;  %v9965_v28 = vld [vmem:[%s17333_s3 + $0x290] sm:$0xf0] }
 0x294   : > { %5553 = vmatpush.bf16.msra.mxu2 %v9964_v44  ;;  %5567 = vmatpush.bf16.msra.mxu3 %v10092_v23  ;;  %v15742_v44 = vadd.f32 %v4733_v12, %v4719_v5  ;;  %v11310_v23 = vld [vmem:[%s17333_s3 + $0x3e4] sm:$0xf]  ;;  %v9717_v5 = vld [vmem:[%s17333_s3 + $0x98] sm:$0xf0]  ;;  %v11235_v12 = vld [vmem:[%s17333_s3 + $0x18c] sm:$0xf] }
 0x295   : > { %v9720_v34 = vor.u32 %v11203_v40, %v9717_v5  ;;  %v9917_v46 = vld [vmem:[%s17333_s3 + $0x230] sm:$0xf0]  ;;  %v11282_v40 = vld [vmem:[%s17333_s3 + $0x304] sm:$0xf] }
 0x296   : > { %v10029_v5 = vld [vmem:[%s17333_s3 + $0x310] sm:$0xf0] }
 0x297   : > { %5638 = vmatpush.bf16.msra.mxu0 %v9700_v31  ;;  %5652 = vmatpush.bf16.msra.mxu1 %v9828_v47  ;;  %v9896_v31 = vor.u32 %v11247_v18, %v9893_v20  ;;  %v11306_v47 = vld [vmem:[%s17333_s3 + $0x3c4] sm:$0xf]  ;;  %v9848_v18 = vor.u32 %v11235_v12, %v9845_v38 }
 0x298   : > { %5554 = vmatpush.bf16.msra.mxu2 %v9948_v7  ;;  %5568 = vmatpush.bf16.msra.mxu3 %v10076_v50  ;;  %v10144_v7 = vor.u32 %v11310_v23, %v10141_v29  ;;  %v11274_v50 = vld [vmem:[%s17333_s3 + $0x2c4] sm:$0xf]  ;;  %v10128_v15 = vor.u32 %v11306_v47, %v10125_v49  ;;  %v9968_v23 = vor.u32 %v11266_v22, %v9965_v28  ;;  %v9933_v47 = vld [vmem:[%s17333_s3 + $0x250] sm:$0xf0]  ;;  %v11223_v22 = vld [vmem:[%s17333_s3 + $0x12c] sm:$0xf] }
 0x299   : > { %v10096_v29 = vor.u32 %v11298_v35, %v10093_v59  ;;  %v11294_v20 = vld [vmem:[%s17333_s3 + $0x364] sm:$0xf]  ;;  %v9797_v28 = vld [vmem:[%s17333_s3 + $0x138] sm:$0xf0]  ;;  %v9901_v59 = vld [vmem:[%s17333_s3 + $0x210] sm:$0xf0] }
 0x29a   : > { %v9800_v38 = vor.u32 %v11223_v22, %v9797_v28  ;;  %v10491_v22 = vld [vmem:[%s17333_s3 + $0x9a0] sm:$0xf]  ;;  %v11496_v28 = vld [vmem:[%s17333_s3 + $0x9ac] sm:$0xf0] }
 0x29b   : > { %5639 = vmatpush.bf16.msra.mxu0 %v9684_v45  ;;  %5653 = vmatpush.bf16.msra.mxu1 %v9812_v48  ;;  %v4721_v58 = vpop.f32.mrf.mxu0  ;;  %v9981_v45 = vld [vmem:[%s17333_s3 + $0x2b0] sm:$0xf0] }
 0x29c   : > { %5555 = vmatpush.bf16.msra.mxu2 %v9932_v52  ;;  %5569 = vmatpush.bf16.msra.mxu3 %v10060_v37  ;;  %v4735_v52 = vpop.f32.mrf.mxu1  ;;  %v10000_v37 = vor.u32 %v11274_v50, %v9997_v2  ;;  %v9829_v50 = vld [vmem:[%s17333_s3 + $0x178] sm:$0xf0] }
 0x29d   : > { %v15792_v48 = vadd.f32 %v4735_v52, %v4721_v58  ;;  %v9685_v58 = vld [vmem:[%s17333_s3 + $0x58] sm:$0xf0]  ;;  %v11227_v52 = vld [vmem:[%s17333_s3 + $0x14c] sm:$0xf] }
 0x29f   : > { %5640 = vmatpush.bf16.msra.mxu0 %v9668_v26  ;;  %5654 = vmatpush.bf16.msra.mxu1 %v9796_v21  ;;  %v9736_v26 = vor.u32 %v11207_v3, %v9733_v10  ;;  %v9688_v3 = vor.u32 %v11195_v16, %v9685_v58  ;;  %v10131_v16 = vld [vmem:[%s17333_s3 + $0x3c8] sm:$0xf]  ;;  %v11309_v58 = vld [vmem:[%s17333_s3 + $0x3d4] sm:$0xf0] }
 0x2a0   : > { %5556 = vmatpush.bf16.msra.mxu2 %v9916_v0  ;;  %5570 = vmatpush.bf16.msra.mxu3 %v10044_v33  ;;  %v9861_v0 = vld [vmem:[%s17333_s3 + $0x1b8] sm:$0xf0]  ;;  %v9984_v33 = vor.u32 %v11270_v4, %v9981_v45 }
 0x2a1   : > { %v9864_v21 = vor.u32 %v11239_v11, %v9861_v0  ;;  %v11286_v11 = vld [vmem:[%s17333_s3 + $0x324] sm:$0xf]  ;;  %v10045_v0 = vld [vmem:[%s17333_s3 + $0x330] sm:$0xf0] }
 0x2a2   : > { %v10048_v35 = vor.u32 %v11286_v11, %v10045_v0  ;;  %v10115_v11 = vld [vmem:[%s17333_s3 + $0x3a8] sm:$0xf]  ;;  %v11305_v0 = vld [vmem:[%s17333_s3 + $0x3b4] sm:$0xf0] }
 0x2a3   : > { %5641 = vmatpush.bf16.msra.mxu0 %v9652_v27  ;;  %5655 = vmatpush.bf16.msra.mxu1 %v9780_v55  ;;  %v4775_v19 = vpop.f32.mrf.mxu0  ;;  %v10077_v27 = vld [vmem:[%s17333_s3 + $0x370] sm:$0xf0]  ;;  %v11199_v55 = vld [vmem:[%s17333_s3 + $0x6c] sm:$0xf] }
 0x2a4   : > { %5557 = vmatpush.bf16.msra.mxu2 %v9900_v9  ;;  %5571 = vmatpush.bf16.msra.mxu3 %v10028_v42  ;;  %v4789_v36 = vpop.f32.mrf.mxu1  ;;  %v9949_v9 = vld [vmem:[%s17333_s3 + $0x270] sm:$0xf0] }
 0x2a5   : > { %v15846_v42 = vadd.f32 %v4789_v36, %v4775_v19  ;;  %v9952_v2 = vor.u32 %v11262_v54, %v9949_v9  ;;  %v11187_v19 = vld [vmem:[%s17333_s3 + $0xc] sm:$0xf]  ;;  %v9653_v36 = vld [vmem:[%s17333_s3 + $0x18] sm:$0xf0]  ;;  %v10019_v54 = vld [vmem:[%s17333_s3 + $0x2e8] sm:$0xf] }
 0x2a6   : > { %5642 = vmatmul.bf16.vlgmr.msra.gmra.mxu0 %v14675_v61  ;;  %5656 = vmatmul.bf16.vlgmr.msra.gmra.mxu1 %v14679_v30  ;;  %v11281_v9 = vld [vmem:[%s17333_s3 + $0x2f4] sm:$0xf0] }
 0x2a7   : > { %5690 = vmatpush.bf16.msrb.mxu0 %v9768_v53  ;;  %5704 = vmatpush.bf16.msrb.mxu1 %v9896_v31  ;;  %v10080_v53 = vor.u32 %v11294_v20, %v10077_v27  ;;  %v11258_v31 = vld [vmem:[%s17333_s3 + $0x244] sm:$0xf]  ;;  %v10395_v20 = vld [vmem:[%s17333_s3 + $0x8e0] sm:$0xf] }
 0x2a8   : > { %5606 = vmatpush.bf16.msrb.mxu2 %v10016_v17  ;;  %5620 = vmatpush.bf16.msrb.mxu3 %v10144_v7  ;;  %v9701_v17 = vld [vmem:[%s17333_s3 + $0x78] sm:$0xf0]  ;;  %v11231_v7 = vld [vmem:[%s17333_s3 + $0x16c] sm:$0xf]  ;;  %v9936_v45 = vor.u32 %v11258_v31, %v9933_v47  ;;  %v10020_v31 = vor.u32 %v11281_v9, %v10019_v54 }
 0x2a9   : > { %5558 = vmatmul.bf16.vlgmr.msra.gmra.mxu2 %v15080_v62  ;;  %5572 = vmatmul.bf16.vlgmr.msra.gmra.mxu3 %v15084_v14  ;;  %v9704_v49 = vor.u32 %v11199_v55, %v9701_v17  ;;  %v9832_v56 = vor.u32 %v11231_v7, %v9829_v50  ;;  %v10032_v55 = vor.u32 %v11282_v40, %v10029_v5  ;;  %v11472_v17 = vld [vmem:[%s17333_s3 + $0x8ec] sm:$0xf0]  ;;  %v10523_v7 = vld [vmem:[%s17333_s3 + $0x9e0] sm:$0xf] }
 0x2aa   : > { %v11504_v50 = vld [vmem:[%s17333_s3 + $0x9ec] sm:$0xf0]  ;;  %v10492_v5 = vor.u32 %v11496_v28, %v10491_v22 }
 0x2ab   : > { %5691 = vmatpush.bf16.msrb.mxu0 %v9752_v32  ;;  %5705 = vmatpush.bf16.msrb.mxu1 %v9880_v1  ;;  %v10064_v32 = vor.u32 %v11290_v60, %v10061_v24  ;;  %v11254_v1 = vld [vmem:[%s17333_s3 + $0x224] sm:$0xf]  ;;  %v10396_v60 = vor.u32 %v11472_v17, %v10395_v20  ;;  %v10524_v24 = vor.u32 %v11504_v50, %v10523_v7  ;;  %v10083_v17 = vld [vmem:[%s17333_s3 + $0x368] sm:$0xf]  ;;  %v11297_v7 = vld [vmem:[%s17333_s3 + $0x374] sm:$0xf0] }
 0x2ac   : > { %5607 = vmatpush.bf16.msrb.mxu2 %v10000_v37  ;;  %5621 = vmatpush.bf16.msrb.mxu3 %v10128_v15  ;;  %v9813_v37 = vld [vmem:[%s17333_s3 + $0x158] sm:$0xf0]  ;;  %v4777_v15 = vpop.f32.mrf.mxu0  ;;  %v4791_v4 = vpop.f32.mrf.mxu1  ;;  %v10331_v50 = vld [vmem:[%s17333_s3 + $0x860] sm:$0xf] }
 0x2ad   : > { %v15896_v57 = vadd.f32 %v4791_v4, %v4777_v15  ;;  %v9816_v10 = vor.u32 %v11227_v52, %v9813_v37  ;;  %v10379_v52 = vld [vmem:[%s17333_s3 + $0x8c0] sm:$0xf]  ;;  %v11468_v37 = vld [vmem:[%s17333_s3 + $0x8cc] sm:$0xf0] }
 0x2ae   : > { %v10507_v15 = vld [vmem:[%s17333_s3 + $0x9c0] sm:$0xf]  ;;  %v11500_v4 = vld [vmem:[%s17333_s3 + $0x9cc] sm:$0xf0] }
 0x2af   : > { %5692 = vmatpush.bf16.msrb.mxu0 %v9736_v26  ;;  %5706 = vmatpush.bf16.msrb.mxu1 %v9864_v21  ;;  %v11250_v26 = vld [vmem:[%s17333_s3 + $0x204] sm:$0xf]  ;;  %v9920_v21 = vor.u32 %v11254_v1, %v9917_v46  ;;  %v9987_v1 = vld [vmem:[%s17333_s3 + $0x2a8] sm:$0xf]  ;;  %v11273_v46 = vld [vmem:[%s17333_s3 + $0x2b4] sm:$0xf0] }
 0x2b0   : > { %5608 = vmatpush.bf16.msrb.mxu2 %v9984_v33  ;;  %5622 = vmatpush.bf16.msrb.mxu3 %v10112_v63  ;;  %v11191_v33 = vld [vmem:[%s17333_s3 + $0x2c] sm:$0xf]  ;;  %v9669_v63 = vld [vmem:[%s17333_s3 + $0x38] sm:$0xf0]  ;;  %v9904_v27 = vor.u32 %v11250_v26, %v9901_v59  ;;  %v9988_v26 = vor.u32 %v11273_v46, %v9987_v1  ;;  %v11269_v59 = vld [vmem:[%s17333_s3 + $0x294] sm:$0xf0] }
 0x2b1   : > { %v9672_v12 = vor.u32 %v11191_v33, %v9669_v63  ;;  %v10363_v33 = vld [vmem:[%s17333_s3 + $0x8a0] sm:$0xf]  ;;  %v11464_v63 = vld [vmem:[%s17333_s3 + $0x8ac] sm:$0xf0] }
 0x2b2   : > { %v10364_v40 = vor.u32 %v11464_v63, %v10363_v33  ;;  %v11484_v1 = vld [vmem:[%s17333_s3 + $0x94c] sm:$0xf0]  ;;  %v11257_v33 = vld [vmem:[%s17333_s3 + $0x234] sm:$0xf0] }
 0x2b3   : > { %5693 = vmatpush.bf16.msrb.mxu0 %v9720_v34  ;;  %5707 = vmatpush.bf16.msrb.mxu1 %v9848_v18  ;;  %v10147_v34 = vld [vmem:[%s17333_s3 + $0x3e8] sm:$0xf]  ;;  %v11313_v18 = vld [vmem:[%s17333_s3 + $0x3f4] sm:$0xf0] }
 0x2b4   : > { %5609 = vmatpush.bf16.msrb.mxu2 %v9968_v23  ;;  %5623 = vmatpush.bf16.msrb.mxu3 %v10096_v29  ;;  %v11219_v23 = vld [vmem:[%s17333_s3 + $0x10c] sm:$0xf]  ;;  %v9781_v29 = vld [vmem:[%s17333_s3 + $0x118] sm:$0xf0]  ;;  %v10148_v47 = vor.u32 %v11313_v18, %v10147_v34  ;;  %v9955_v34 = vld [vmem:[%s17333_s3 + $0x268] sm:$0xf] }
 0x2b5   : > { %v11265_v18 = vld [vmem:[%s17333_s3 + $0x274] sm:$0xf0] }
 0x2b7   : > { %5694 = vmatpush.bf16.msrb.mxu0 %v9704_v49  ;;  %5708 = vmatpush.bf16.msrb.mxu1 %v9832_v56  ;;  %v10003_v49 = vld [vmem:[%s17333_s3 + $0x2c8] sm:$0xf]  ;;  %v11277_v56 = vld [vmem:[%s17333_s3 + $0x2d4] sm:$0xf0] }
 0x2b8   : > { %5610 = vmatpush.bf16.msrb.mxu2 %v9952_v2  ;;  %5624 = vmatpush.bf16.msrb.mxu3 %v10080_v53  ;;  %v9656_v2 = vor.u32 %v11187_v19, %v9653_v36  ;;  %v9784_v53 = vor.u32 %v11219_v23, %v9781_v29  ;;  %v10475_v19 = vld [vmem:[%s17333_s3 + $0x980] sm:$0xf]  ;;  %v11492_v36 = vld [vmem:[%s17333_s3 + $0x98c] sm:$0xf0] }
 0x2bb   : > { %5695 = vmatpush.bf16.msrb.mxu0 %v9688_v3  ;;  %5709 = vmatpush.bf16.msrb.mxu1 %v9816_v10  ;;  %v10380_v3 = vor.u32 %v11468_v37, %v10379_v52  ;;  %v10508_v10 = vor.u32 %v11500_v4, %v10507_v15  ;;  %v10067_v37 = vld [vmem:[%s17333_s3 + $0x348] sm:$0xf]  ;;  %v11293_v15 = vld [vmem:[%s17333_s3 + $0x354] sm:$0xf0]  ;;  %v10315_v4 = vld [vmem:[%s17333_s3 + $0x840] sm:$0xf] }
 0x2bc   : > { %5611 = vmatpush.bf16.msrb.mxu2 %v9936_v45  ;;  %5625 = vmatpush.bf16.msrb.mxu3 %v10064_v32  ;;  %v10004_v45 = vor.u32 %v11277_v56, %v10003_v49  ;;  %v10132_v32 = vor.u32 %v11309_v58, %v10131_v16  ;;  %v9956_v56 = vor.u32 %v11265_v18, %v9955_v34  ;;  %v11261_v16 = vld [vmem:[%s17333_s3 + $0x254] sm:$0xf0]  ;;  %v10283_v34 = vld [vmem:[%s17333_s3 + $0x800] sm:$0xf]  ;;  %v11444_v18 = vld [vmem:[%s17333_s3 + $0x80c] sm:$0xf0] }
 0x2bf   : > { %5696 = vmatpush.bf16.msrb.mxu0 %v9672_v12  ;;  %5710 = vmatpush.bf16.msrb.mxu1 %v9800_v38  ;;  %v10347_v12 = vld [vmem:[%s17333_s3 + $0x880] sm:$0xf]  ;;  %v11460_v38 = vld [vmem:[%s17333_s3 + $0x88c] sm:$0xf0] }
 0x2c0   : > { %5612 = vmatpush.bf16.msrb.mxu2 %v9920_v21  ;;  %5626 = vmatpush.bf16.msrb.mxu3 %v10048_v35  ;;  %v10116_v21 = vor.u32 %v11305_v0, %v10115_v11  ;;  %v9971_v35 = vld [vmem:[%s17333_s3 + $0x288] sm:$0xf]  ;;  %v10068_v11 = vor.u32 %v11293_v15, %v10067_v37 }
 0x2c1   : > { %v9972_v54 = vor.u32 %v11269_v59, %v9971_v35  ;;  %v9923_v0 = vld [vmem:[%s17333_s3 + $0x228] sm:$0xf]  ;;  %v10299_v35 = vld [vmem:[%s17333_s3 + $0x820] sm:$0xf]  ;;  %v11448_v59 = vld [vmem:[%s17333_s3 + $0x82c] sm:$0xf0] }
 0x2c3   : > { %5697 = vmatpush.bf16.msrb.mxu0 %v9656_v2  ;;  %5711 = vmatpush.bf16.msrb.mxu1 %v9784_v53  ;;  %v11456_v2 = vld [vmem:[%s17333_s3 + $0x86c] sm:$0xf0]  ;;  %v10459_v53 = vld [vmem:[%s17333_s3 + $0x960] sm:$0xf] }
 0x2c4   : > { %5613 = vmatpush.bf16.msrb.mxu2 %v9904_v27  ;;  %5627 = vmatpush.bf16.msrb.mxu3 %v10032_v55  ;;  %v10348_v27 = vor.u32 %v11460_v38, %v10347_v12  ;;  %v10476_v55 = vor.u32 %v11492_v36, %v10475_v19  ;;  %v10332_v58 = vor.u32 %v11456_v2, %v10331_v50  ;;  %v11253_v36 = vld [vmem:[%s17333_s3 + $0x214] sm:$0xf0]  ;;  %v11311_v50 = vld [vmem:[%s17333_s3 + $0x3ec] sm:$0xf]  ;;  %v10149_v2 = vld [vmem:[%s17333_s3 + $0x3f8] sm:$0xf0] }
 0x2c5   : > { %v9924_v38 = vor.u32 %v11257_v33, %v9923_v0  ;;  %v10152_v15 = vor.u32 %v11311_v50, %v10149_v2  ;;  %v10381_v33 = vld [vmem:[%s17333_s3 + $0x8d0] sm:$0xf0]  ;;  %v11458_v50 = vld [vmem:[%s17333_s3 + $0x884] sm:$0xf] }
 0x2c6   : > { %5698 = vmatmul.bf16.vlgmr.msrb.gmra.mxu0 %v14675_v61  ;;  %5712 = vmatmul.bf16.vlgmr.msrb.gmra.mxu1 %v14679_v30  ;;  %v10099_v61 = vld [vmem:[%s17333_s3 + $0x388] sm:$0xf]  ;;  %v11301_v30 = vld [vmem:[%s17333_s3 + $0x394] sm:$0xf0]  ;;  %v4831_v23 = vpop.f32.mrf.mxu0  ;;  %v4845_v29 = vpop.f32.mrf.mxu1 }
 0x2c7   : > { %6543 = vmatpush.bf16.msra.mxu0 %v10396_v60  ;;  %6557 = vmatpush.bf16.msra.mxu1 %v10524_v24  ;;  %v10100_v9 = vor.u32 %v11301_v30, %v10099_v61  ;;  %v16046_v20 = vadd.f32 %v4845_v29, %v4831_v23  ;;  %v10084_v60 = vor.u32 %v11297_v7, %v10083_v17  ;;  %v9939_v24 = vld [vmem:[%s17333_s3 + $0x248] sm:$0xf]  ;;  %v11285_v29 = vld [vmem:[%s17333_s3 + $0x314] sm:$0xf0]  ;;  %v11279_v17 = vld [vmem:[%s17333_s3 + $0x2ec] sm:$0xf] }
 0x2c8   : > { %5662 = vmatpush.bf16.msra.mxu2 %v10020_v31  ;;  %5676 = vmatpush.bf16.msra.mxu3 %v10148_v47  ;;  %v11488_v31 = vld [vmem:[%s17333_s3 + $0x96c] sm:$0xf0]  ;;  %v9907_v61 = vld [vmem:[%s17333_s3 + $0x208] sm:$0xf]  ;;  %v10021_v7 = vld [vmem:[%s17333_s3 + $0x2f8] sm:$0xf0] }
 0x2c9   : > { %5614 = vmatmul.bf16.vlgmr.msrb.gmra.mxu2 %v15080_v62  ;;  %5628 = vmatmul.bf16.vlgmr.msrb.gmra.mxu3 %v15084_v14  ;;  %v16066_v47 = vpop.f32.mrf.mxu2  ;;  %v16068_v49 = vpop.f32.mrf.mxu3  ;;  %v10460_v52 = vor.u32 %v11488_v31, %v10459_v53  ;;  %v10035_v23 = vld [vmem:[%s17333_s3 + $0x308] sm:$0xf]  ;;  %v11470_v53 = vld [vmem:[%s17333_s3 + $0x8e4] sm:$0xf]  ;;  %v9908_v31 = vor.u32 %v11253_v36, %v9907_v61  ;;  %v10024_v37 = vor.u32 %v11279_v17, %v10021_v7  ;;  %v11299_v17 = vld [vmem:[%s17333_s3 + $0x38c] sm:$0xf] }
 0x2ca   : > { %v10101_v7 = vld [vmem:[%s17333_s3 + $0x398] sm:$0xf0] }
 0x2cb   : > { %6544 = vmatpush.bf16.msra.mxu0 %v10380_v3  ;;  %6558 = vmatpush.bf16.msra.mxu1 %v10508_v10  ;;  %v9940_v10 = vor.u32 %v11261_v16, %v9939_v24  ;;  %v11502_v24 = vld [vmem:[%s17333_s3 + $0x9e4] sm:$0xf]  ;;  %v10525_v16 = vld [vmem:[%s17333_s3 + $0x9f0] sm:$0xf0] }
 0x2cc   : > { %5663 = vmatpush.bf16.msra.mxu2 %v10004_v45  ;;  %5677 = vmatpush.bf16.msra.mxu3 %v10132_v32  ;;  %v11452_v45 = vld [vmem:[%s17333_s3 + $0x84c] sm:$0xf0]  ;;  %v10443_v32 = vld [vmem:[%s17333_s3 + $0x940] sm:$0xf] }
 0x2cd   : > { %v10316_v22 = vor.u32 %v11452_v45, %v10315_v4  ;;  %v10444_v28 = vor.u32 %v11484_v1, %v10443_v32  ;;  %v11275_v4 = vld [vmem:[%s17333_s3 + $0x2cc] sm:$0xf]  ;;  %v10005_v45 = vld [vmem:[%s17333_s3 + $0x2d8] sm:$0xf0]  ;;  %v10528_v1 = vor.u32 %v11502_v24, %v10525_v16  ;;  %v10477_v24 = vld [vmem:[%s17333_s3 + $0x990] sm:$0xf0] }
 0x2ce   : > { %v4833_v46 = vpop.f32.mrf.mxu0  ;;  %v4847_v3 = vpop.f32.mrf.mxu1 }
 0x2cf   : > { %6545 = vmatpush.bf16.msra.mxu0 %v10364_v40  ;;  %6559 = vmatpush.bf16.msra.mxu1 %v10492_v5  ;;  %v16100_v63 = vadd.f32 %v4847_v3, %v4833_v46  ;;  %v10427_v40 = vld [vmem:[%s17333_s3 + $0x920] sm:$0xf]  ;;  %v11480_v5 = vld [vmem:[%s17333_s3 + $0x92c] sm:$0xf0]  ;;  %v11307_v46 = vld [vmem:[%s17333_s3 + $0x3cc] sm:$0xf] }
 0x2d0   : > { %5664 = vmatpush.bf16.msra.mxu2 %v9988_v26  ;;  %5678 = vmatpush.bf16.msra.mxu3 %v10116_v21  ;;  %v10051_v26 = vld [vmem:[%s17333_s3 + $0x328] sm:$0xf]  ;;  %v11289_v21 = vld [vmem:[%s17333_s3 + $0x334] sm:$0xf0]  ;;  %v10133_v3 = vld [vmem:[%s17333_s3 + $0x3d8] sm:$0xf0] }
 0x2d1   : > { %v16123_v30 = vpop.f32.mrf.mxu2  ;;  %v16125_v12 = vpop.f32.mrf.mxu3  ;;  %v10052_v19 = vor.u32 %v11289_v21, %v10051_v26  ;;  %v4678_v21 = vadd.f32 %v15625_v25, %v15623_v51  ;;  %v11303_v51 = vld [vmem:[%s17333_s3 + $0x3ac] sm:$0xf]  ;;  %v10117_v25 = vld [vmem:[%s17333_s3 + $0x3b8] sm:$0xf0] }
 0x2d3   : > { %6546 = vmatpush.bf16.msra.mxu0 %v10348_v27  ;;  %6560 = vmatpush.bf16.msra.mxu1 %v10476_v55  ;;  %v10411_v27 = vld [vmem:[%s17333_s3 + $0x900] sm:$0xf]  ;;  %v11476_v55 = vld [vmem:[%s17333_s3 + $0x90c] sm:$0xf0]  ;;  %v4692_v36 = vadd.f32 %v16066_v47, %v4678_v21  ;;  %v11259_v21 = vld [vmem:[%s17333_s3 + $0x24c] sm:$0xf] }
 0x2d4   : > { %5665 = vmatpush.bf16.msra.mxu2 %v9972_v54  ;;  %5679 = vmatpush.bf16.msra.mxu3 %v10100_v9  ;;  %v10300_v54 = vor.u32 %v11448_v59, %v10299_v35  ;;  %v10428_v9 = vor.u32 %v11480_v5, %v10427_v40  ;;  %v10008_v35 = vor.u32 %v11275_v4, %v10005_v45  ;;  %v11271_v40 = vld [vmem:[%s17333_s3 + $0x2ac] sm:$0xf]  ;;  %v9989_v5 = vld [vmem:[%s17333_s3 + $0x2b8] sm:$0xf0] }
 0x2d5   : > { %v10136_v59 = vor.u32 %v11307_v46, %v10133_v3  ;;  %v9992_v47 = vor.u32 %v11271_v40, %v9989_v5  ;;  %v4706_v2 = vadd.f32 %v16068_v49, %v4692_v36  ;;  %v9957_v4 = vld [vmem:[%s17333_s3 + $0x278] sm:$0xf0]  ;;  %v11295_v46 = vld [vmem:[%s17333_s3 + $0x36c] sm:$0xf]  ;;  %v11482_v36 = vld [vmem:[%s17333_s3 + $0x944] sm:$0xf] }
 0x2d6   : > { %v10085_v3 = vld [vmem:[%s17333_s3 + $0x378] sm:$0xf0]  ;;  %v11291_v5 = vld [vmem:[%s17333_s3 + $0x34c] sm:$0xf] }
 0x2d7   : > { %6547 = vmatpush.bf16.msra.mxu0 %v10332_v58  ;;  %6561 = vmatpush.bf16.msra.mxu1 %v10460_v52  ;;  %v10284_v58 = vor.u32 %v11444_v18, %v10283_v34  ;;  %v10412_v52 = vor.u32 %v11476_v55, %v10411_v27  ;;  %v11267_v34 = vld [vmem:[%s17333_s3 + $0x28c] sm:$0xf]  ;;  %v9973_v18 = vld [vmem:[%s17333_s3 + $0x298] sm:$0xf0] }
 0x2d8   : > { %5666 = vmatpush.bf16.msra.mxu2 %v9956_v56  ;;  %5680 = vmatpush.bf16.msra.mxu3 %v10084_v60  ;;  %v10036_v56 = vor.u32 %v11285_v29, %v10035_v23  ;;  %v10397_v60 = vld [vmem:[%s17333_s3 + $0x8f0] sm:$0xf0]  ;;  %v11494_v29 = vld [vmem:[%s17333_s3 + $0x9a4] sm:$0xf] }
 0x2d9   : > { %v10400_v32 = vor.u32 %v11470_v53, %v10397_v60  ;;  %v4761_v0 = vpop.f32.mrf.mxu3  ;;  %v10365_v23 = vld [vmem:[%s17333_s3 + $0x8b0] sm:$0xf0]  ;;  %v11490_v60 = vld [vmem:[%s17333_s3 + $0x984] sm:$0xf] }
 0x2db   : > { %6548 = vmatpush.bf16.msra.mxu0 %v10316_v22  ;;  %6562 = vmatpush.bf16.msra.mxu1 %v10444_v28  ;;  %v11498_v22 = vld [vmem:[%s17333_s3 + $0x9c4] sm:$0xf]  ;;  %v10509_v28 = vld [vmem:[%s17333_s3 + $0x9d0] sm:$0xf0] }
 0x2dc   : > { %5667 = vmatpush.bf16.msra.mxu2 %v9940_v10  ;;  %5681 = vmatpush.bf16.msra.mxu3 %v10068_v11  ;;  %v11466_v10 = vld [vmem:[%s17333_s3 + $0x8c4] sm:$0xf]  ;;  %v4747_v11 = vpop.f32.mrf.mxu2 }
 0x2dd   : > { %v4748_v26 = vadd.f32 %v4747_v11, %v15742_v44  ;;  %v10384_v44 = vor.u32 %v11466_v10, %v10381_v33  ;;  %v11454_v10 = vld [vmem:[%s17333_s3 + $0x864] sm:$0xf] }
 0x2de   : > { %v11486_v33 = vld [vmem:[%s17333_s3 + $0x964] sm:$0xf] }
 0x2df   : > { %6549 = vmatpush.bf16.msra.mxu0 %v10300_v54  ;;  %6563 = vmatpush.bf16.msra.mxu1 %v10428_v9  ;;  %v16205_v61 = vadd.f32 %v4761_v0, %v4748_v26  ;;  %v10493_v54 = vld [vmem:[%s17333_s3 + $0x9b0] sm:$0xf0]  ;;  %v10120_v9 = vor.u32 %v11303_v51, %v10117_v25  ;;  %v10088_v26 = vor.u32 %v11295_v46, %v10085_v3  ;;  %v11536_v46 = vld [vmem:[%s17333_s3 + $0xaec] sm:$0xf0] }
 0x2e0   : > { %5668 = vmatpush.bf16.msra.mxu2 %v9924_v38  ;;  %5682 = vmatpush.bf16.msra.mxu3 %v10052_v19  ;;  %v10512_v38 = vor.u32 %v11498_v22, %v10509_v28  ;;  %v11462_v19 = vld [vmem:[%s17333_s3 + $0x8a4] sm:$0xf]  ;;  %v10496_v55 = vor.u32 %v11494_v29, %v10493_v54  ;;  %v10333_v0 = vld [vmem:[%s17333_s3 + $0x870] sm:$0xf0] }
 0x2e1   : > { %v10368_v27 = vor.u32 %v11462_v19, %v10365_v23  ;;  %v10461_v22 = vld [vmem:[%s17333_s3 + $0x970] sm:$0xf0] }
 0x2e2   : > { %v10464_v40 = vor.u32 %v11486_v33, %v10461_v22  ;;  %v10317_v19 = vld [vmem:[%s17333_s3 + $0x850] sm:$0xf0]  ;;  %v10403_v33 = vld [vmem:[%s17333_s3 + $0x8e8] sm:$0xf] }
 0x2e3   : > { %6550 = vmatpush.bf16.msra.mxu0 %v10284_v58  ;;  %6564 = vmatpush.bf16.msra.mxu1 %v10412_v52  ;;  %v5531_v58 = vpop.f32.mrf.mxu0  ;;  %v9976_v52 = vor.u32 %v11267_v34, %v9973_v18  ;;  %v10445_v23 = vld [vmem:[%s17333_s3 + $0x950] sm:$0xf0]  ;;  %v9925_v34 = vld [vmem:[%s17333_s3 + $0x238] sm:$0xf0] }
 0x2e4   : > { %5669 = vmatpush.bf16.msra.mxu2 %v9908_v31  ;;  %5683 = vmatpush.bf16.msra.mxu3 %v10036_v56  ;;  %v4749_v53 = vpop.f32.mrf.mxu2  ;;  %v4763_v31 = vpop.f32.mrf.mxu3  ;;  %v10349_v56 = vld [vmem:[%s17333_s3 + $0x890] sm:$0xf0]  ;;  %v5532_v49 = vadd.f32 %v5531_v58, %v4706_v2  ;;  %v11478_v2 = vld [vmem:[%s17333_s3 + $0x924] sm:$0xf]  ;;  %v10037_v58 = vld [vmem:[%s17333_s3 + $0x318] sm:$0xf0] }
 0x2e5   : > { %v4750_v16 = vadd.f32 %v4749_v53, %v15792_v48  ;;  %v10352_v48 = vor.u32 %v11458_v50, %v10349_v56  ;;  %v10301_v50 = vld [vmem:[%s17333_s3 + $0x830] sm:$0xf0] }
 0x2e6   : > { %6551 = vmatmul.bf16.vlgmr.msra.gmra.mxu0 %v14819_v39  ;;  %6565 = vmatmul.bf16.vlgmr.msra.gmra.mxu1 %v14872_v13  ;;  %v10429_v53 = vld [vmem:[%s17333_s3 + $0x930] sm:$0xf0] }
 0x2e7   : > { %6599 = vmatpush.bf16.msrb.mxu0 %v10400_v32  ;;  %6613 = vmatpush.bf16.msrb.mxu1 %v10528_v1  ;;  %v16262_v45 = vadd.f32 %v4763_v31, %v4750_v16  ;;  %v5545_v32 = vpop.f32.mrf.mxu1  ;;  %v10480_v1 = vor.u32 %v11490_v60, %v10477_v24  ;;  %v11251_v31 = vld [vmem:[%s17333_s3 + $0x20c] sm:$0xf]  ;;  %v9909_v24 = vld [vmem:[%s17333_s3 + $0x218] sm:$0xf0] }
 0x2e8   : > { %5718 = vmatpush.bf16.msrb.mxu2 %v10024_v37  ;;  %5732 = vmatpush.bf16.msrb.mxu3 %v10152_v15  ;;  %v10104_v37 = vor.u32 %v11299_v17, %v10101_v7  ;;  %v11263_v15 = vld [vmem:[%s17333_s3 + $0x26c] sm:$0xf]  ;;  %v16273_v11 = vadd.f32 %v5545_v32, %v5532_v49  ;;  %v10053_v17 = vld [vmem:[%s17333_s3 + $0x338] sm:$0xf0]  ;;  %v11446_v7 = vld [vmem:[%s17333_s3 + $0x824] sm:$0xf] }
 0x2e9   : > { %5670 = vmatmul.bf16.vlgmr.msra.gmra.mxu2 %v15080_v62  ;;  %5684 = vmatmul.bf16.vlgmr.msra.gmra.mxu3 %v15084_v14  ;;  %v9960_v28 = vor.u32 %v11263_v15, %v9957_v4  ;;  %v11283_v16 = vld [vmem:[%s17333_s3 + $0x30c] sm:$0xf]  ;;  %v10304_v49 = vor.u32 %v11446_v7, %v10301_v50  ;;  %v10285_v15 = vld [vmem:[%s17333_s3 + $0x810] sm:$0xf0]  ;;  %v11474_v4 = vld [vmem:[%s17333_s3 + $0x904] sm:$0xf] }
 0x2ea   : > { %v10619_v7 = vld [vmem:[%s17333_s3 + $0xaa0] sm:$0xf]  ;;  %v11528_v50 = vld [vmem:[%s17333_s3 + $0xaac] sm:$0xf0] }
 0x2eb   : > { %6600 = vmatpush.bf16.msrb.mxu0 %v10384_v44  ;;  %6614 = vmatpush.bf16.msrb.mxu1 %v10512_v38  ;;  %v10069_v44 = vld [vmem:[%s17333_s3 + $0x358] sm:$0xf0]  ;;  %v11450_v38 = vld [vmem:[%s17333_s3 + $0x844] sm:$0xf] }
 0x2ec   : > { %5719 = vmatpush.bf16.msrb.mxu2 %v10008_v35  ;;  %5733 = vmatpush.bf16.msrb.mxu3 %v10136_v59  ;;  %v9941_v35 = vld [vmem:[%s17333_s3 + $0x258] sm:$0xf0]  ;;  %v10336_v59 = vor.u32 %v11454_v10, %v10333_v0  ;;  %v4803_v51 = vpop.f32.mrf.mxu2  ;;  %v4817_v25 = vpop.f32.mrf.mxu3  ;;  %v10779_v10 = vld [vmem:[%s17333_s3 + $0xbe0] sm:$0xf]  ;;  %v11568_v0 = vld [vmem:[%s17333_s3 + $0xbec] sm:$0xf0] }
 0x2ed   : > { %v4804_v29 = vadd.f32 %v4803_v51, %v15846_v42  ;;  %v9944_v54 = vor.u32 %v11259_v21, %v9941_v35  ;;  %v11287_v42 = vld [vmem:[%s17333_s3 + $0x32c] sm:$0xf]  ;;  %v10531_v21 = vld [vmem:[%s17333_s3 + $0x9e8] sm:$0xf]  ;;  %v11505_v35 = vld [vmem:[%s17333_s3 + $0x9f4] sm:$0xf0] }
 0x2ee   : > { %v10056_v60 = vor.u32 %v11287_v42, %v10053_v17  ;;  %v10635_v51 = vld [vmem:[%s17333_s3 + $0xac0] sm:$0xf] }
 0x2ef   : > { %6601 = vmatpush.bf16.msrb.mxu0 %v10368_v27  ;;  %6615 = vmatpush.bf16.msrb.mxu1 %v10496_v55  ;;  %v16315_v18 = vadd.f32 %v4817_v25, %v4804_v29  ;;  %v10320_v27 = vor.u32 %v11450_v38, %v10317_v19  ;;  %v10448_v55 = vor.u32 %v11482_v36, %v10445_v23  ;;  %v11532_v25 = vld [vmem:[%s17333_s3 + $0xacc] sm:$0xf0]  ;;  %v10763_v23 = vld [vmem:[%s17333_s3 + $0xbc0] sm:$0xf] }
 0x2f0   : > { %5720 = vmatpush.bf16.msrb.mxu2 %v9992_v47  ;;  %5734 = vmatpush.bf16.msrb.mxu3 %v10120_v9  ;;  %v10072_v47 = vor.u32 %v11291_v5, %v10069_v44  ;;  %v11255_v9 = vld [vmem:[%s17333_s3 + $0x22c] sm:$0xf]  ;;  %v10780_v38 = vor.u32 %v11568_v0, %v10779_v10  ;;  %v10532_v36 = vor.u32 %v11505_v35, %v10531_v21  ;;  %v11564_v29 = vld [vmem:[%s17333_s3 + $0xbcc] sm:$0xf0] }
 0x2f1   : > { %v9928_v56 = vor.u32 %v11255_v9, %v9925_v34  ;;  %v10515_v9 = vld [vmem:[%s17333_s3 + $0x9c8] sm:$0xf]  ;;  %v11501_v34 = vld [vmem:[%s17333_s3 + $0x9d4] sm:$0xf0]  ;;  %v10636_v42 = vor.u32 %v11532_v25, %v10635_v51  ;;  %v10764_v17 = vor.u32 %v11564_v29, %v10763_v23  ;;  %v10571_v23 = vld [vmem:[%s17333_s3 + $0xa40] sm:$0xf] }
 0x2f2   : > { %v11489_v51 = vld [vmem:[%s17333_s3 + $0x974] sm:$0xf0]  ;;  %v11516_v29 = vld [vmem:[%s17333_s3 + $0xa4c] sm:$0xf0] }
 0x2f3   : > { %6602 = vmatpush.bf16.msrb.mxu0 %v10352_v48  ;;  %6616 = vmatpush.bf16.msrb.mxu1 %v10480_v1  ;;  %v10413_v48 = vld [vmem:[%s17333_s3 + $0x910] sm:$0xf0]  ;;  %v10651_v1 = vld [vmem:[%s17333_s3 + $0xae0] sm:$0xf] }
 0x2f4   : > { %5721 = vmatpush.bf16.msrb.mxu2 %v9976_v52  ;;  %5735 = vmatpush.bf16.msrb.mxu3 %v10104_v37  ;;  %v10432_v52 = vor.u32 %v11478_v2, %v10429_v53  ;;  %v11442_v37 = vld [vmem:[%s17333_s3 + $0x804] sm:$0xf]  ;;  %v4805_v32 = vpop.f32.mrf.mxu2  ;;  %v4819_v22 = vpop.f32.mrf.mxu3  ;;  %v10416_v5 = vor.u32 %v11474_v4, %v10413_v48  ;;  %v10652_v44 = vor.u32 %v11536_v46, %v10651_v1  ;;  %v10731_v4 = vld [vmem:[%s17333_s3 + $0xb80] sm:$0xf]  ;;  %v10355_v48 = vld [vmem:[%s17333_s3 + $0x888] sm:$0xf] }
 0x2f5   : > { %v4806_v3 = vadd.f32 %v4805_v32, %v15896_v57  ;;  %v11473_v57 = vld [vmem:[%s17333_s3 + $0x8f4] sm:$0xf0]  ;;  %v10516_v53 = vor.u32 %v11501_v34, %v10515_v9  ;;  %v11556_v32 = vld [vmem:[%s17333_s3 + $0xb8c] sm:$0xf0]  ;;  %v10483_v46 = vld [vmem:[%s17333_s3 + $0x988] sm:$0xf] }
 0x2f6   : > { %v10404_v19 = vor.u32 %v11473_v57, %v10403_v33  ;;  %v11461_v1 = vld [vmem:[%s17333_s3 + $0x894] sm:$0xf0] }
 0x2f7   : > { %6603 = vmatpush.bf16.msrb.mxu0 %v10336_v59  ;;  %6617 = vmatpush.bf16.msrb.mxu1 %v10464_v40  ;;  %v16384_v59 = vadd.f32 %v4819_v22, %v4806_v3  ;;  %v10288_v40 = vor.u32 %v11442_v37, %v10285_v15  ;;  %v11493_v3 = vld [vmem:[%s17333_s3 + $0x994] sm:$0xf0]  ;;  %v10732_v22 = vor.u32 %v11556_v32, %v10731_v4 }
 0x2f8   : > { %5722 = vmatpush.bf16.msrb.mxu2 %v9960_v28  ;;  %5736 = vmatpush.bf16.msrb.mxu3 %v10088_v26  ;;  %v9912_v28 = vor.u32 %v11251_v31, %v9909_v24  ;;  %v10040_v26 = vor.u32 %v11283_v16, %v10037_v58  ;;  %v10747_v31 = vld [vmem:[%s17333_s3 + $0xba0] sm:$0xf]  ;;  %v11465_v24 = vld [vmem:[%s17333_s3 + $0x8b4] sm:$0xf0]  ;;  %v10499_v16 = vld [vmem:[%s17333_s3 + $0x9a8] sm:$0xf]  ;;  %v10356_v21 = vor.u32 %v11461_v1, %v10355_v48 }
 0x2f9   : > { %v11497_v58 = vld [vmem:[%s17333_s3 + $0x9b4] sm:$0xf0]  ;;  %v10484_v35 = vor.u32 %v11493_v3, %v10483_v46  ;;  %v10539_v46 = vld [vmem:[%s17333_s3 + $0xa00] sm:$0xf] }
 0x2fa   : > { %v10500_v15 = vor.u32 %v11497_v58, %v10499_v16  ;;  %v11512_v58 = vld [vmem:[%s17333_s3 + $0xa2c] sm:$0xf0]  ;;  %v11449_v32 = vld [vmem:[%s17333_s3 + $0x834] sm:$0xf0] }
 0x2fb   : > { %6604 = vmatpush.bf16.msrb.mxu0 %v10320_v27  ;;  %6618 = vmatpush.bf16.msrb.mxu1 %v10448_v55  ;;  %v16410_v27 = vpop.f32.mrf.mxu0  ;;  %v16412_v55 = vpop.f32.mrf.mxu1  ;;  %v11481_v48 = vld [vmem:[%s17333_s3 + $0x934] sm:$0xf0] }
 0x2fc   : > { %5723 = vmatpush.bf16.msrb.mxu2 %v9944_v54  ;;  %5737 = vmatpush.bf16.msrb.mxu3 %v10072_v47  ;;  %v10387_v54 = vld [vmem:[%s17333_s3 + $0x8c8] sm:$0xf]  ;;  %v11469_v47 = vld [vmem:[%s17333_s3 + $0x8d4] sm:$0xf0] }
 0x2fd   : > { %v10388_v2 = vor.u32 %v11469_v47, %v10387_v54 }
 0x2ff   : > { %6605 = vmatpush.bf16.msrb.mxu0 %v10304_v49  ;;  %6619 = vmatpush.bf16.msrb.mxu1 %v10432_v52  ;;  %v10603_v49 = vld [vmem:[%s17333_s3 + $0xa80] sm:$0xf]  ;;  %v11524_v52 = vld [vmem:[%s17333_s3 + $0xa8c] sm:$0xf0] }
 0x300   : > { %5724 = vmatpush.bf16.msrb.mxu2 %v9928_v56  ;;  %5738 = vmatpush.bf16.msrb.mxu3 %v10056_v60  ;;  %v11560_v56 = vld [vmem:[%s17333_s3 + $0xbac] sm:$0xf0]  ;;  %v10371_v60 = vld [vmem:[%s17333_s3 + $0x8a8] sm:$0xf]  ;;  %v10604_v33 = vor.u32 %v11524_v52, %v10603_v49  ;;  %v10683_v52 = vld [vmem:[%s17333_s3 + $0xb20] sm:$0xf] }
 0x301   : > { %v10372_v37 = vor.u32 %v11465_v24, %v10371_v60  ;;  %v10572_v24 = vor.u32 %v11516_v29, %v10571_v23 }
 0x303   : > { %6606 = vmatpush.bf16.msrb.mxu0 %v10288_v40  ;;  %6620 = vmatpush.bf16.msrb.mxu1 %v10416_v5  ;;  %v5587_v10 = vpop.f32.mrf.mxu0  ;;  %v5601_v0 = vpop.f32.mrf.mxu1  ;;  %v10715_v40 = vld [vmem:[%s17333_s3 + $0xb60] sm:$0xf]  ;;  %v11552_v5 = vld [vmem:[%s17333_s3 + $0xb6c] sm:$0xf0] }
 0x304   : > { %5725 = vmatpush.bf16.msrb.mxu2 %v9912_v28  ;;  %5739 = vmatpush.bf16.msrb.mxu3 %v10040_v26  ;;  %v10587_v28 = vld [vmem:[%s17333_s3 + $0xa60] sm:$0xf]  ;;  %v11520_v26 = vld [vmem:[%s17333_s3 + $0xa6c] sm:$0xf0]  ;;  %v5588_v57 = vadd.f32 %v5587_v10, %v16205_v61  ;;  %v10467_v61 = vld [vmem:[%s17333_s3 + $0x968] sm:$0xf] }
 0x305   : > { %v10468_v47 = vor.u32 %v11489_v51, %v10467_v61  ;;  %v10653_v61 = vld [vmem:[%s17333_s3 + $0xaf0] sm:$0xf0] }
 0x306   : > { %6607 = vmatmul.bf16.vlgmr.msrb.gmra.mxu0 %v14819_v39  ;;  %6621 = vmatmul.bf16.vlgmr.msrb.gmra.mxu1 %v14872_v13  ;;  %v16491_v25 = vadd.f32 %v5601_v0, %v5588_v57  ;;  %v11508_v0 = vld [vmem:[%s17333_s3 + $0xa0c] sm:$0xf0] }
 0x307   : > { %6655 = vmatpush.bf16.msra.mxu0 %v10404_v19  ;;  %6669 = vmatpush.bf16.msra.mxu1 %v10532_v36  ;;  %v10588_v19 = vor.u32 %v11520_v26, %v10587_v28  ;;  %v10716_v36 = vor.u32 %v11552_v5, %v10715_v40  ;;  %v10419_v40 = vld [vmem:[%s17333_s3 + $0x908] sm:$0xf]  ;;  %v10540_v29 = vor.u32 %v11508_v0, %v10539_v46  ;;  %v11463_v46 = vld [vmem:[%s17333_s3 + $0x8ac] sm:$0xf]  ;;  %v10501_v0 = vld [vmem:[%s17333_s3 + $0x9b8] sm:$0xf0] }
 0x308   : > { %6571 = vmatpush.bf16.msra.mxu2 %v10652_v44  ;;  %6585 = vmatpush.bf16.msra.mxu3 %v10780_v38  ;;  %v10339_v44 = vld [vmem:[%s17333_s3 + $0x868] sm:$0xf]  ;;  %v11457_v38 = vld [vmem:[%s17333_s3 + $0x874] sm:$0xf0] }
 0x309   : > { %5726 = vmatmul.bf16.vlgmr.msrb.gmra.mxu2 %v15080_v62  ;;  %5740 = vmatmul.bf16.vlgmr.msrb.gmra.mxu3 %v15084_v14  ;;  %v10620_v62 = vor.u32 %v11528_v50, %v10619_v7  ;;  %v10748_v14 = vor.u32 %v11560_v56, %v10747_v31  ;;  %v10340_v54 = vor.u32 %v11457_v38, %v10339_v44  ;;  %v10323_v7 = vld [vmem:[%s17333_s3 + $0x848] sm:$0xf]  ;;  %v11485_v31 = vld [vmem:[%s17333_s3 + $0x954] sm:$0xf0]  ;;  %v11534_v38 = vld [vmem:[%s17333_s3 + $0xae4] sm:$0xf] }
 0x30a   : > { %v11477_v44 = vld [vmem:[%s17333_s3 + $0x914] sm:$0xf0] }
 0x30b   : > { %6656 = vmatpush.bf16.msra.mxu0 %v10388_v2  ;;  %6670 = vmatpush.bf16.msra.mxu1 %v10516_v53  ;;  %v11453_v2 = vld [vmem:[%s17333_s3 + $0x854] sm:$0xf0]  ;;  %v10451_v53 = vld [vmem:[%s17333_s3 + $0x948] sm:$0xf]  ;;  %v5589_v60 = vpop.f32.mrf.mxu0  ;;  %v5603_v4 = vpop.f32.mrf.mxu1 }
 0x30c   : > { %6572 = vmatpush.bf16.msra.mxu2 %v10636_v42  ;;  %6586 = vmatpush.bf16.msra.mxu3 %v10764_v17  ;;  %v4859_v9 = vpop.f32.mrf.mxu2  ;;  %v4873_v34 = vpop.f32.mrf.mxu3  ;;  %v10699_v42 = vld [vmem:[%s17333_s3 + $0xb40] sm:$0xf]  ;;  %v11548_v17 = vld [vmem:[%s17333_s3 + $0xb4c] sm:$0xf0]  ;;  %v10452_v49 = vor.u32 %v11485_v31, %v10451_v53  ;;  %v10637_v53 = vld [vmem:[%s17333_s3 + $0xad0] sm:$0xf0] }
 0x30d   : > { %v4860_v50 = vadd.f32 %v4859_v9, %v16046_v20  ;;  %v10700_v16 = vor.u32 %v11548_v17, %v10699_v42  ;;  %v10555_v20 = vld [vmem:[%s17333_s3 + $0xa20] sm:$0xf]  ;;  %v11503_v9 = vld [vmem:[%s17333_s3 + $0x9ec] sm:$0xf]  ;;  %v10420_v17 = vor.u32 %v11477_v44, %v10419_v40  ;;  %v10733_v40 = vld [vmem:[%s17333_s3 + $0xb90] sm:$0xf0]  ;;  %v4680_v44 = vadd.f32 %v15677_v43, %v15675_v6 }
 0x30e   : > { %v10556_v3 = vor.u32 %v11512_v58, %v10555_v20  ;;  %v11467_v20 = vld [vmem:[%s17333_s3 + $0x8cc] sm:$0xf]  ;;  %v10389_v58 = vld [vmem:[%s17333_s3 + $0x8d8] sm:$0xf0]  ;;  %v11518_v43 = vld [vmem:[%s17333_s3 + $0xa64] sm:$0xf] }
 0x30f   : > { %6657 = vmatpush.bf16.msra.mxu0 %v10372_v37  ;;  %6671 = vmatpush.bf16.msra.mxu1 %v10500_v15  ;;  %v16518_v56 = vadd.f32 %v4873_v34, %v4860_v50  ;;  %v11544_v37 = vld [vmem:[%s17333_s3 + $0xb2c] sm:$0xf0]  ;;  %v10307_v15 = vld [vmem:[%s17333_s3 + $0x828] sm:$0xf]  ;;  %v10533_v34 = vld [vmem:[%s17333_s3 + $0x9f8] sm:$0xf0] }
 0x310   : > { %6573 = vmatpush.bf16.msra.mxu2 %v10620_v62  ;;  %6587 = vmatpush.bf16.msra.mxu3 %v10748_v14  ;;  %v5590_v62 = vadd.f32 %v5589_v60, %v16262_v45  ;;  %v10324_v14 = vor.u32 %v11453_v2, %v10323_v7  ;;  %v10435_v45 = vld [vmem:[%s17333_s3 + $0x928] sm:$0xf]  ;;  %v10684_v10 = vor.u32 %v11544_v37, %v10683_v52  ;;  %v11530_v2 = vld [vmem:[%s17333_s3 + $0xac4] sm:$0xf] }
 0x311   : > { %v10308_v28 = vor.u32 %v11449_v32, %v10307_v15  ;;  %v10436_v26 = vor.u32 %v11481_v48, %v10435_v45  ;;  %v10656_v7 = vor.u32 %v11534_v38, %v10653_v61  ;;  %v10536_v60 = vor.u32 %v11503_v9, %v10533_v34  ;;  %v11526_v37 = vld [vmem:[%s17333_s3 + $0xaa4] sm:$0xf]  ;;  %v10621_v15 = vld [vmem:[%s17333_s3 + $0xab0] sm:$0xf0]  ;;  %v10357_v38 = vld [vmem:[%s17333_s3 + $0x898] sm:$0xf0] }
 0x312   : > { %v16545_v1 = vadd.f32 %v5603_v4, %v5590_v62  ;;  %v11499_v62 = vld [vmem:[%s17333_s3 + $0x9cc] sm:$0xf]  ;;  %v10392_v4 = vor.u32 %v11467_v20, %v10389_v58  ;;  %v11558_v45 = vld [vmem:[%s17333_s3 + $0xba4] sm:$0xf]  ;;  %v10749_v48 = vld [vmem:[%s17333_s3 + $0xbb0] sm:$0xf0] }
 0x313   : > { %6658 = vmatpush.bf16.msra.mxu0 %v10356_v21  ;;  %6672 = vmatpush.bf16.msra.mxu1 %v10484_v35  ;;  %v10291_v21 = vld [vmem:[%s17333_s3 + $0x808] sm:$0xf]  ;;  %v11445_v35 = vld [vmem:[%s17333_s3 + $0x814] sm:$0xf0]  ;;  %v11491_v61 = vld [vmem:[%s17333_s3 + $0x98c] sm:$0xf] }
 0x314   : > { %6574 = vmatpush.bf16.msra.mxu2 %v10604_v33  ;;  %6588 = vmatpush.bf16.msra.mxu3 %v10732_v22  ;;  %v10667_v33 = vld [vmem:[%s17333_s3 + $0xb00] sm:$0xf]  ;;  %v11540_v22 = vld [vmem:[%s17333_s3 + $0xb0c] sm:$0xf0]  ;;  %v4861_v57 = vpop.f32.mrf.mxu2  ;;  %v4875_v51 = vpop.f32.mrf.mxu3  ;;  %v10292_v42 = vor.u32 %v11445_v35, %v10291_v21  ;;  %v11554_v35 = vld [vmem:[%s17333_s3 + $0xb84] sm:$0xf] }
 0x315   : > { %v4862_v5 = vadd.f32 %v4861_v57, %v16100_v63  ;;  %v10781_v63 = vld [vmem:[%s17333_s3 + $0xbf0] sm:$0xf0]  ;;  %v10736_v6 = vor.u32 %v11554_v35, %v10733_v40  ;;  %v11550_v34 = vld [vmem:[%s17333_s3 + $0xb64] sm:$0xf]  ;;  %v10309_v35 = vld [vmem:[%s17333_s3 + $0x838] sm:$0xf0] }
 0x316   : > { %v10437_v40 = vld [vmem:[%s17333_s3 + $0x938] sm:$0xf0] }
 0x317   : > { %6659 = vmatpush.bf16.msra.mxu0 %v10340_v54  ;;  %6673 = vmatpush.bf16.msra.mxu1 %v10468_v47  ;;  %v16587_v23 = vadd.f32 %v4875_v51, %v4862_v5  ;;  %v10668_v54 = vor.u32 %v11540_v22, %v10667_v33  ;;  %v10405_v47 = vld [vmem:[%s17333_s3 + $0x8f8] sm:$0xf0]  ;;  %v10624_v33 = vor.u32 %v11526_v37, %v10621_v15  ;;  %v11459_v5 = vld [vmem:[%s17333_s3 + $0x88c] sm:$0xf] }
 0x318   : > { %6575 = vmatpush.bf16.msra.mxu2 %v10588_v19  ;;  %6589 = vmatpush.bf16.msra.mxu3 %v10716_v36  ;;  %v11566_v19 = vld [vmem:[%s17333_s3 + $0xbe4] sm:$0xf]  ;;  %v11471_v36 = vld [vmem:[%s17333_s3 + $0x8ec] sm:$0xf]  ;;  %v10752_v22 = vor.u32 %v11558_v45, %v10749_v48  ;;  %v10485_v51 = vld [vmem:[%s17333_s3 + $0x998] sm:$0xf0]  ;;  %v10360_v9 = vor.u32 %v11459_v5, %v10357_v38 }
 0x319   : > { %v10784_v50 = vor.u32 %v11566_v19, %v10781_v63  ;;  %v10408_v31 = vor.u32 %v11471_v36, %v10405_v47  ;;  %v4694_v19 = vadd.f32 %v16123_v30, %v4680_v44  ;;  %v10488_v30 = vor.u32 %v11491_v61, %v10485_v51  ;;  %v11451_v37 = vld [vmem:[%s17333_s3 + $0x84c] sm:$0xf]  ;;  %v10325_v15 = vld [vmem:[%s17333_s3 + $0x858] sm:$0xf0]  ;;  %v11506_v51 = vld [vmem:[%s17333_s3 + $0xa04] sm:$0xf] }
 0x31b   : > { %6660 = vmatpush.bf16.msra.mxu0 %v10324_v14  ;;  %6674 = vmatpush.bf16.msra.mxu1 %v10452_v49  ;;  %v10517_v14 = vld [vmem:[%s17333_s3 + $0x9d8] sm:$0xf0]  ;;  %v10640_v49 = vor.u32 %v11530_v2, %v10637_v53 }
 0x31c   : > { %6576 = vmatpush.bf16.msra.mxu2 %v10572_v24  ;;  %6590 = vmatpush.bf16.msra.mxu3 %v10700_v16  ;;  %v11562_v24 = vld [vmem:[%s17333_s3 + $0xbc4] sm:$0xf]  ;;  %v10765_v16 = vld [vmem:[%s17333_s3 + $0xbd0] sm:$0xf0]  ;;  %v10520_v32 = vor.u32 %v11499_v62, %v10517_v14 }
 0x31d   : > { %v10768_v52 = vor.u32 %v11562_v24, %v10765_v16  ;;  %v10573_v24 = vld [vmem:[%s17333_s3 + $0xa50] sm:$0xf0]  ;;  %v4708_v16 = vadd.f32 %v16125_v12, %v4694_v19 }
 0x31e   : > { %v10541_v19 = vld [vmem:[%s17333_s3 + $0xa10] sm:$0xf0] }
 0x31f   : > { %6661 = vmatpush.bf16.msra.mxu0 %v10308_v28  ;;  %6675 = vmatpush.bf16.msra.mxu1 %v10436_v26  ;;  %v11522_v28 = vld [vmem:[%s17333_s3 + $0xa84] sm:$0xf]  ;;  %v10605_v26 = vld [vmem:[%s17333_s3 + $0xa90] sm:$0xf0]  ;;  %v5534_v45 = vadd.f32 %v16410_v27, %v4708_v16  ;;  %v10328_v27 = vor.u32 %v11451_v37, %v10325_v15  ;;  %v11529_v15 = vld [vmem:[%s17333_s3 + $0xab4] sm:$0xf0] }
 0x320   : > { %6577 = vmatpush.bf16.msra.mxu2 %v10556_v3  ;;  %6591 = vmatpush.bf16.msra.mxu3 %v10684_v10  ;;  %v10373_v3 = vld [vmem:[%s17333_s3 + $0x8b8] sm:$0xf0]  ;;  %v11495_v10 = vld [vmem:[%s17333_s3 + $0x9ac] sm:$0xf] }
 0x321   : > { %v10376_v57 = vor.u32 %v11463_v46, %v10373_v3  ;;  %v10504_v21 = vor.u32 %v11495_v10, %v10501_v0  ;;  %v11510_v10 = vld [vmem:[%s17333_s3 + $0xa24] sm:$0xf]  ;;  %v10557_v0 = vld [vmem:[%s17333_s3 + $0xa30] sm:$0xf0]  ;;  %v5548_v44 = vadd.f32 %v16412_v55, %v5534_v45 }
 0x322   : > { %v10560_v38 = vor.u32 %v11510_v10, %v10557_v0  ;;  %v10739_v10 = vld [vmem:[%s17333_s3 + $0xb88] sm:$0xf] }
 0x323   : > { %6662 = vmatpush.bf16.msra.mxu0 %v10292_v42  ;;  %6676 = vmatpush.bf16.msra.mxu1 %v10420_v17  ;;  %v5643_v63 = vpop.f32.mrf.mxu0  ;;  %v5657_v36 = vpop.f32.mrf.mxu1  ;;  %v10717_v42 = vld [vmem:[%s17333_s3 + $0xb70] sm:$0xf0]  ;;  %v11455_v17 = vld [vmem:[%s17333_s3 + $0x86c] sm:$0xf] }
 0x324   : > { %6578 = vmatpush.bf16.msra.mxu2 %v10540_v29  ;;  %6592 = vmatpush.bf16.msra.mxu3 %v10668_v54  ;;  %v10608_v29 = vor.u32 %v11522_v28, %v10605_v26  ;;  %v10589_v54 = vld [vmem:[%s17333_s3 + $0xa70] sm:$0xf0]  ;;  %v5644_v47 = vadd.f32 %v5643_v63, %v16315_v18  ;;  %v11487_v18 = vld [vmem:[%s17333_s3 + $0x96c] sm:$0xf]  ;;  %v11542_v28 = vld [vmem:[%s17333_s3 + $0xb24] sm:$0xf] }
 0x325   : > { %v10592_v53 = vor.u32 %v11518_v43, %v10589_v54  ;;  %v10685_v26 = vld [vmem:[%s17333_s3 + $0xb30] sm:$0xf0]  ;;  %v11538_v63 = vld [vmem:[%s17333_s3 + $0xb04] sm:$0xf]  ;;  %v11443_v43 = vld [vmem:[%s17333_s3 + $0x80c] sm:$0xf] }
 0x326   : > { %6663 = vmatmul.bf16.vlgmr.msra.gmra.mxu0 %v14819_v39  ;;  %6677 = vmatmul.bf16.vlgmr.msra.gmra.mxu1 %v14872_v13  ;;  %v16702_v2 = vadd.f32 %v5657_v36, %v5644_v47  ;;  %v10688_v61 = vor.u32 %v11542_v28, %v10685_v26  ;;  %v10293_v54 = vld [vmem:[%s17333_s3 + $0x818] sm:$0xf0]  ;;  %v11521_v26 = vld [vmem:[%s17333_s3 + $0xa74] sm:$0xf0] }
 0x327   : > { %6711 = vmatpush.bf16.msrb.mxu0 %v10408_v31  ;;  %6725 = vmatpush.bf16.msrb.mxu1 %v10536_v60  ;;  %v10720_v31 = vor.u32 %v11550_v34, %v10717_v42  ;;  %v11514_v60 = vld [vmem:[%s17333_s3 + $0xa44] sm:$0xf]  ;;  %v10659_v34 = vld [vmem:[%s17333_s3 + $0xae8] sm:$0xf] }
 0x328   : > { %6627 = vmatpush.bf16.msrb.mxu2 %v10656_v7  ;;  %6641 = vmatpush.bf16.msrb.mxu3 %v10784_v50  ;;  %v10341_v7 = vld [vmem:[%s17333_s3 + $0x878] sm:$0xf0] }
 0x329   : > { %6579 = vmatmul.bf16.vlgmr.msra.gmra.mxu2 %v15221_v8  ;;  %6593 = vmatmul.bf16.vlgmr.msra.gmra.mxu3 %v15224_v41  ;;  %v10469_v50 = vld [vmem:[%s17333_s3 + $0x978] sm:$0xf0]  ;;  %v10344_v20 = vor.u32 %v11455_v17, %v10341_v7  ;;  %v11537_v17 = vld [vmem:[%s17333_s3 + $0xaf4] sm:$0xf0]  ;;  %v10787_v7 = vld [vmem:[%s17333_s3 + $0xbe8] sm:$0xf] }
 0x32a   : > { %v10472_v58 = vor.u32 %v11487_v18, %v10469_v50  ;;  %v11569_v18 = vld [vmem:[%s17333_s3 + $0xbf4] sm:$0xf0]  ;;  %v10660_v16 = vor.u32 %v11537_v17, %v10659_v34 }
 0x32b   : > { %6712 = vmatpush.bf16.msrb.mxu0 %v10392_v4  ;;  %6726 = vmatpush.bf16.msrb.mxu1 %v10520_v32  ;;  %v11483_v4 = vld [vmem:[%s17333_s3 + $0x94c] sm:$0xf]  ;;  %v10453_v32 = vld [vmem:[%s17333_s3 + $0x958] sm:$0xf0]  ;;  %v5645_v46 = vpop.f32.mrf.mxu0 }
 0x32c   : > { %6628 = vmatpush.bf16.msrb.mxu2 %v10640_v49  ;;  %6642 = vmatpush.bf16.msrb.mxu3 %v10768_v52  ;;  %v5559_v62 = vpop.f32.mrf.mxu2  ;;  %v5573_v14 = vpop.f32.mrf.mxu3  ;;  %v11546_v49 = vld [vmem:[%s17333_s3 + $0xb44] sm:$0xf]  ;;  %v10701_v52 = vld [vmem:[%s17333_s3 + $0xb50] sm:$0xf0] }
 0x32d   : > { %v5560_v12 = vadd.f32 %v5559_v62, %v16273_v11  ;;  %v10576_v11 = vor.u32 %v11514_v60, %v10573_v24  ;;  %v10704_v3 = vor.u32 %v11546_v49, %v10701_v52  ;;  %v10296_v60 = vor.u32 %v11443_v43, %v10293_v54  ;;  %v11533_v62 = vld [vmem:[%s17333_s3 + $0xad4] sm:$0xf0]  ;;  %v10563_v43 = vld [vmem:[%s17333_s3 + $0xa28] sm:$0xf] }
 0x32e   : > { %v11565_v49 = vld [vmem:[%s17333_s3 + $0xbd4] sm:$0xf0] }
 0x32f   : > { %6713 = vmatpush.bf16.msrb.mxu0 %v10376_v57  ;;  %6727 = vmatpush.bf16.msrb.mxu1 %v10504_v21  ;;  %v16731_v48 = vadd.f32 %v5573_v14, %v5560_v12  ;;  %v11447_v57 = vld [vmem:[%s17333_s3 + $0x82c] sm:$0xf]  ;;  %v5659_v21 = vpop.f32.mrf.mxu1  ;;  %v10771_v14 = vld [vmem:[%s17333_s3 + $0xbc8] sm:$0xf] }
 0x330   : > { %6629 = vmatpush.bf16.msrb.mxu2 %v10624_v33  ;;  %6643 = vmatpush.bf16.msrb.mxu3 %v10752_v22  ;;  %v5646_v33 = vadd.f32 %v5645_v46, %v16384_v59  ;;  %v10456_v22 = vor.u32 %v11483_v4, %v10453_v32  ;;  %v11479_v59 = vld [vmem:[%s17333_s3 + $0x92c] sm:$0xf]  ;;  %v10312_v36 = vor.u32 %v11447_v57, %v10309_v35  ;;  %v10627_v12 = vld [vmem:[%s17333_s3 + $0xaa8] sm:$0xf]  ;;  %v11561_v32 = vld [vmem:[%s17333_s3 + $0xbb4] sm:$0xf0] }
 0x331   : > { %v10440_v55 = vor.u32 %v11479_v59, %v10437_v40  ;;  %v10772_v37 = vor.u32 %v11565_v49, %v10771_v14  ;;  %v10755_v4 = vld [vmem:[%s17333_s3 + $0xba8] sm:$0xf]  ;;  %v10628_v45 = vor.u32 %v11529_v15, %v10627_v12  ;;  %v11531_v12 = vld [vmem:[%s17333_s3 + $0xacc] sm:$0xf]  ;;  %v10645_v15 = vld [vmem:[%s17333_s3 + $0xad8] sm:$0xf0] }
 0x332   : > { %v16758_v5 = vadd.f32 %v5659_v21, %v5646_v33  ;;  %v10756_v46 = vor.u32 %v11561_v32, %v10755_v4  ;;  %v10723_v57 = vld [vmem:[%s17333_s3 + $0xb68] sm:$0xf]  ;;  %v11553_v21 = vld [vmem:[%s17333_s3 + $0xb74] sm:$0xf0]  ;;  %v11563_v4 = vld [vmem:[%s17333_s3 + $0xbcc] sm:$0xf] }
 0x333   : > { %6714 = vmatpush.bf16.msrb.mxu0 %v10360_v9  ;;  %6728 = vmatpush.bf16.msrb.mxu1 %v10488_v30  ;;  %v11475_v9 = vld [vmem:[%s17333_s3 + $0x90c] sm:$0xf]  ;;  %v10421_v30 = vld [vmem:[%s17333_s3 + $0x918] sm:$0xf0]  ;;  %v10724_v40 = vor.u32 %v11553_v21, %v10723_v57 }
 0x334   : > { %6630 = vmatpush.bf16.msrb.mxu2 %v10608_v29  ;;  %6644 = vmatpush.bf16.msrb.mxu3 %v10736_v6  ;;  %v5561_v29 = vpop.f32.mrf.mxu2  ;;  %v10669_v6 = vld [vmem:[%s17333_s3 + $0xb10] sm:$0xf0]  ;;  %v5575_v42 = vpop.f32.mrf.mxu3  ;;  %v10424_v24 = vor.u32 %v11475_v9, %v10421_v30  ;;  %v11545_v9 = vld [vmem:[%s17333_s3 + $0xb34] sm:$0xf0]  ;;  %v10773_v32 = vld [vmem:[%s17333_s3 + $0xbd8] sm:$0xf0] }
 0x335   : > { %v5562_v47 = vadd.f32 %v5561_v29, %v5548_v44  ;;  %v11519_v21 = vld [vmem:[%s17333_s3 + $0xa6c] sm:$0xf] }
 0x337   : > { %6715 = vmatpush.bf16.msrb.mxu0 %v10344_v20  ;;  %6729 = vmatpush.bf16.msrb.mxu1 %v10472_v58  ;;  %v16797_v50 = vadd.f32 %v5575_v42, %v5562_v47  ;;  %v10788_v20 = vor.u32 %v11569_v18, %v10787_v7  ;;  %v10643_v58 = vld [vmem:[%s17333_s3 + $0xac8] sm:$0xf]  ;;  %v11513_v47 = vld [vmem:[%s17333_s3 + $0xa34] sm:$0xf0] }
 0x338   : > { %6631 = vmatpush.bf16.msrb.mxu2 %v10592_v53  ;;  %6645 = vmatpush.bf16.msrb.mxu3 %v10720_v31  ;;  %v10544_v53 = vor.u32 %v11506_v51, %v10541_v19  ;;  %v10672_v31 = vor.u32 %v11538_v63, %v10669_v6  ;;  %v10644_v52 = vor.u32 %v11533_v62, %v10643_v58  ;;  %v10707_v51 = vld [vmem:[%s17333_s3 + $0xb48] sm:$0xf]  ;;  %v11549_v19 = vld [vmem:[%s17333_s3 + $0xb54] sm:$0xf0]  ;;  %v10789_v58 = vld [vmem:[%s17333_s3 + $0xbf8] sm:$0xf0] }
 0x339   : > { %v10708_v6 = vor.u32 %v11549_v19, %v10707_v51  ;;  %v10564_v42 = vor.u32 %v11513_v47, %v10563_v43  ;;  %v11509_v7 = vld [vmem:[%s17333_s3 + $0xa14] sm:$0xf0]  ;;  %v10581_v51 = vld [vmem:[%s17333_s3 + $0xa58] sm:$0xf0]  ;;  %v11547_v19 = vld [vmem:[%s17333_s3 + $0xb4c] sm:$0xf] }
 0x33a   : > { %v11511_v47 = vld [vmem:[%s17333_s3 + $0xa2c] sm:$0xf] }
 0x33b   : > { %6716 = vmatpush.bf16.msrb.mxu0 %v10328_v27  ;;  %6730 = vmatpush.bf16.msrb.mxu1 %v10456_v22  ;;  %v10595_v22 = vld [vmem:[%s17333_s3 + $0xa68] sm:$0xf] }
 0x33c   : > { %6632 = vmatpush.bf16.msrb.mxu2 %v10576_v11  ;;  %6646 = vmatpush.bf16.msrb.mxu3 %v10704_v3  ;;  %v10611_v11 = vld [vmem:[%s17333_s3 + $0xa88] sm:$0xf]  ;;  %v11525_v3 = vld [vmem:[%s17333_s3 + $0xa94] sm:$0xf0]  ;;  %v10596_v59 = vor.u32 %v11521_v26, %v10595_v22  ;;  %v11555_v22 = vld [vmem:[%s17333_s3 + $0xb8c] sm:$0xf] }
 0x33d   : > { %v10612_v33 = vor.u32 %v11525_v3, %v10611_v11  ;;  %v11527_v11 = vld [vmem:[%s17333_s3 + $0xaac] sm:$0xf]  ;;  %v10629_v3 = vld [vmem:[%s17333_s3 + $0xab8] sm:$0xf0] }
 0x33f   : > { %6717 = vmatpush.bf16.msrb.mxu0 %v10312_v36  ;;  %6731 = vmatpush.bf16.msrb.mxu1 %v10440_v55 }
 0x340   : > { %6633 = vmatpush.bf16.msrb.mxu2 %v10560_v38  ;;  %6647 = vmatpush.bf16.msrb.mxu3 %v10688_v61  ;;  %v11517_v61 = vld [vmem:[%s17333_s3 + $0xa54] sm:$0xf0] }
 0x343   : > { %6718 = vmatpush.bf16.msrb.mxu0 %v10296_v60  ;;  %6732 = vmatpush.bf16.msrb.mxu1 %v10424_v24  ;;  %v5713_v0 = vpop.f32.mrf.mxu1  ;;  %v11535_v60 = vld [vmem:[%s17333_s3 + $0xaec] sm:$0xf] }
 0x344   : > { %6634 = vmatpush.bf16.msrb.mxu2 %v10544_v53  ;;  %6648 = vmatpush.bf16.msrb.mxu3 %v10672_v31  ;;  %v10675_v53 = vld [vmem:[%s17333_s3 + $0xb08] sm:$0xf]  ;;  %v11541_v31 = vld [vmem:[%s17333_s3 + $0xb14] sm:$0xf0] }
 0x346   : > { %6719 = vmatmul.bf16.vlgmr.msrb.gmra.mxu0 %v14819_v39  ;;  %6733 = vmatmul.bf16.vlgmr.msrb.gmra.mxu1 %v14872_v13  ;;  %v11557_v39 = vld [vmem:[%s17333_s3 + $0xb94] sm:$0xf0]  ;;  %v5699_v13 = vpop.f32.mrf.mxu0 }
 0x347   : > { %6635 = vmatmul.bf16.vlgmr.msrb.gmra.mxu2 %v15221_v8  ;;  %6649 = vmatmul.bf16.vlgmr.msrb.gmra.mxu3 %v15224_v41  ;;  %v10740_v27 = vor.u32 %v11557_v39, %v10739_v10  ;;  %v5700_v28 = vadd.f32 %v5699_v13, %v16518_v56  ;;  %v10579_v56 = vld [vmem:[%s17333_s3 + $0xa48] sm:$0xf]  ;;  %v11559_v10 = vld [vmem:[%s17333_s3 + $0xbac] sm:$0xf]  ;;  %v10757_v39 = vld [vmem:[%s17333_s3 + $0xbb8] sm:$0xf0]  ;;  %v10632_v13 = vor.u32 %v11527_v11, %v10629_v3 }
 0x348   : > { %6683 = vmatpush.bf16.msra.mxu2 %v10660_v16  ;;  %6697 = vmatpush.bf16.msra.mxu3 %v10788_v20  ;;  %v10580_v29 = vor.u32 %v11517_v61, %v10579_v56  ;;  %v10661_v16 = vld [vmem:[%s17333_s3 + $0xaf8] sm:$0xf0]  ;;  %v11567_v20 = vld [vmem:[%s17333_s3 + $0xbec] sm:$0xf]  ;;  %v6826_v3 = vld [vmem:[%s17340_s10 + $0x30] sm:$0xff] }
 0x349   : > { %v16852_v35 = vadd.f32 %v5713_v0, %v5700_v28  ;;  %v10760_v0 = vor.u32 %v11559_v10, %v10757_v39  ;;  %v10741_v28 = vld [vmem:[%s17333_s3 + $0xb98] sm:$0xf0]  ;;  %v11515_v61 = vld [vmem:[%s17333_s3 + $0xa4c] sm:$0xf]  ;;  %v6824_v39 = vld [vmem:[%s17340_s10 + $0x20] sm:$0xff] }
 0x34a   : > { %v10744_v57 = vor.u32 %v11555_v22, %v10741_v28  ;;  %v10725_v56 = vld [vmem:[%s17333_s3 + $0xb78] sm:$0xf0]  ;;  %v10584_v43 = vor.u32 %v11515_v61, %v10581_v51  ;;  %v6825_v10 = vld [vmem:[%s17340_s10 + $0x28] sm:$0xff]  ;;  %v6848_v51 = vld [vmem:[%s17340_s10 + $0xe0] sm:$0xff] }
 0x34b   : > { %v5715_v30 = vpop.f32.mrf.mxu1  ;;  %v6827_v11 = vld [vmem:[%s17340_s10 + $0x38] sm:$0xff]  ;;  %v6821_v22 = vld [vmem:[%s17340_s10 + $0x8] sm:$0xff] }
 0x34c   : > { %6684 = vmatpush.bf16.msra.mxu2 %v10644_v52  ;;  %6698 = vmatpush.bf16.msra.mxu3 %v10772_v37  ;;  %v5615_v44 = vpop.f32.mrf.mxu2  ;;  %v5629_v38 = vpop.f32.mrf.mxu3  ;;  %v10676_v52 = vor.u32 %v11541_v31, %v10675_v53  ;;  %v10792_v37 = vor.u32 %v11567_v20, %v10789_v58  ;;  %v10677_v53 = vld [vmem:[%s17333_s3 + $0xb18] sm:$0xf0]  ;;  %v6849_v61 = vld [vmem:[%s17340_s10 + $0xe8] sm:$0xff] }
 0x34d   : > { %v5616_v63 = vadd.f32 %v5615_v44, %v16491_v25  ;;  %v10691_v25 = vld [vmem:[%s17333_s3 + $0xb28] sm:$0xf] }
 0x34e   : > { %v5701_v55 = vpop.f32.mrf.mxu0  ;;  %v10692_v17 = vor.u32 %v11545_v9, %v10691_v25  ;;  %v10565_v9 = vld [vmem:[%s17333_s3 + $0xa38] sm:$0xf0] }
 0x34f   : > { %v16867_v36 = vadd.f32 %v5629_v38, %v5616_v63  ;;  %v5702_v54 = vadd.f32 %v5701_v55, %v16587_v23  ;;  %v10547_v23 = vld [vmem:[%s17333_s3 + $0xa08] sm:$0xf]  ;;  %v10709_v63 = vld [vmem:[%s17333_s3 + $0xb58] sm:$0xf0] }
 0x350   : > { %6685 = vmatpush.bf16.msra.mxu2 %v10628_v45  ;;  %6699 = vmatpush.bf16.msra.mxu3 %v10756_v46  ;;  %v10548_v49 = vor.u32 %v11509_v7, %v10547_v23  ;;  %v10648_v45 = vor.u32 %v11531_v12, %v10645_v15  ;;  %v10776_v46 = vor.u32 %v11563_v4, %v10773_v32  ;;  %v11507_v23 = vld [vmem:[%s17333_s3 + $0xa0c] sm:$0xf]  ;;  %v10549_v7 = vld [vmem:[%s17333_s3 + $0xa18] sm:$0xf0] }
 0x351   : > { %v16882_v34 = vadd.f32 %v5715_v30, %v5702_v54  ;;  %v10712_v54 = vor.u32 %v11547_v19, %v10709_v63  ;;  %v11543_v30 = vld [vmem:[%s17333_s3 + $0xb2c] sm:$0xf]  ;;  %v6831_v15 = vld [vmem:[%s17340_s10 + $0x58] sm:$0xff] }
 0x354   : > { %6686 = vmatpush.bf16.msra.mxu2 %v10612_v33  ;;  %6700 = vmatpush.bf16.msra.mxu3 %v10740_v27  ;;  %v5617_v18 = vpop.f32.mrf.mxu2  ;;  %v5631_v62 = vpop.f32.mrf.mxu3  ;;  %v11523_v33 = vld [vmem:[%s17333_s3 + $0xa8c] sm:$0xf]  ;;  %v10613_v27 = vld [vmem:[%s17333_s3 + $0xa98] sm:$0xf0] }
 0x355   : > { %v5618_v24 = vadd.f32 %v5617_v18, %v16545_v1  ;;  %v10664_v1 = vor.u32 %v11535_v60, %v10661_v16  ;;  %v10616_v26 = vor.u32 %v11523_v33, %v10613_v27  ;;  %v11539_v18 = vld [vmem:[%s17333_s3 + $0xb0c] sm:$0xf]  ;;  %v10552_v16 = vor.u32 %v11507_v23, %v10549_v7  ;;  %v6823_v33 = vld [vmem:[%s17340_s10 + $0x18] sm:$0xff]  ;;  %v6822_v27 = vld [vmem:[%s17340_s10 + $0x10] sm:$0xff] }
 0x356   : > { %v10680_v20 = vor.u32 %v11539_v18, %v10677_v53  ;;  %v6844_v23 = vld [vmem:[%s17340_s10 + $0xc0] sm:$0xff] }
 0x357   : > { %v16909_v14 = vadd.f32 %v5631_v62, %v5618_v24 }
 0x358   : > { %6687 = vmatpush.bf16.msra.mxu2 %v10596_v59  ;;  %6701 = vmatpush.bf16.msra.mxu3 %v10724_v40  ;;  %v10597_v59 = vld [vmem:[%s17333_s3 + $0xa78] sm:$0xf0]  ;;  %v11551_v40 = vld [vmem:[%s17333_s3 + $0xb6c] sm:$0xf] }
 0x359   : > { %v10600_v44 = vor.u32 %v11519_v21, %v10597_v59  ;;  %v10728_v38 = vor.u32 %v11551_v40, %v10725_v56  ;;  %v6820_v59 = vld [vmem:[%s17340_s10] sm:$0xff]  ;;  %v6850_v40 = vld [vmem:[%s17340_s10 + $0xf0] sm:$0xff] }
 0x35c   : > { %6688 = vmatpush.bf16.msra.mxu2 %v10580_v29  ;;  %6702 = vmatpush.bf16.msra.mxu3 %v10708_v6 }
 0x360   : > { %6689 = vmatpush.bf16.msra.mxu2 %v10564_v42  ;;  %6703 = vmatpush.bf16.msra.mxu3 %v10692_v17  ;;  %v10568_v42 = vor.u32 %v11511_v47, %v10565_v9  ;;  %v6846_v47 = vld [vmem:[%s17340_s10 + $0xd0] sm:$0xff] }
 0x364   : > { %6690 = vmatpush.bf16.msra.mxu2 %v10548_v49  ;;  %6704 = vmatpush.bf16.msra.mxu3 %v10676_v52 }
 0x367   : > { %6691 = vmatmul.bf16.vlgmr.msra.gmra.mxu2 %v15221_v8  ;;  %6705 = vmatmul.bf16.vlgmr.msra.gmra.mxu3 %v15224_v41 }
 0x368   : > { %6739 = vmatpush.bf16.msrb.mxu2 %v10664_v1  ;;  %6753 = vmatpush.bf16.msrb.mxu3 %v10792_v37  ;;  %v6834_v37 = vld [vmem:[%s17340_s10 + $0x70] sm:$0xff] }
 0x36c   : > { %6740 = vmatpush.bf16.msrb.mxu2 %v10648_v45  ;;  %6754 = vmatpush.bf16.msrb.mxu3 %v10776_v46  ;;  %v5671_v55 = vpop.f32.mrf.mxu2  ;;  %v5685_v29 = vpop.f32.mrf.mxu3  ;;  %v6830_v45 = vld [vmem:[%s17340_s10 + $0x50] sm:$0xff]  ;;  %v6829_v46 = vld [vmem:[%s17340_s10 + $0x48] sm:$0xff] }
 0x36d   : > { %v5672_v6 = vadd.f32 %v5671_v55, %v16702_v2  ;;  %v10693_v2 = vld [vmem:[%s17333_s3 + $0xb38] sm:$0xf0]  ;;  %v17074_v55 = vld [vmem:[%s17334_s4] sm:$0xf] }
 0x36e   : > { %v10696_v17 = vor.u32 %v11543_v30, %v10693_v2  ;;  %v6776_v30 = vperm.slane %v17074_v55, 0 }
 0x36f   : > { %v16977_v25 = vadd.f32 %v5685_v29, %v5672_v6  ;;  %v6847_v6 = vld [vmem:[%s17340_s10 + $0xd8] sm:$0xff] }
 0x370   : > { %6741 = vmatpush.bf16.msrb.mxu2 %v10632_v13  ;;  %6755 = vmatpush.bf16.msrb.mxu3 %v10760_v0  ;;  %v6552_v13 = vpop.f32.mrf.mxu0  ;;  %v6566_v0 = vpop.f32.mrf.mxu1 }
 0x371   : > { %v6567_v21 = vadd.f32 %v6566_v0, %v6552_v13  ;;  %v6864_v13 = vld [vmem:[%s17340_s10 + $0x160] sm:$0xff] }
 0x374   : > { %6742 = vmatpush.bf16.msrb.mxu2 %v10616_v26  ;;  %6756 = vmatpush.bf16.msrb.mxu3 %v10744_v57  ;;  %v5673_v31 = vpop.f32.mrf.mxu2  ;;  %v5687_v24 = vpop.f32.mrf.mxu3  ;;  %v6851_v57 = vld [vmem:[%s17340_s10 + $0xf8] sm:$0xff] }
 0x375   : > { %v5674_v60 = vadd.f32 %v5673_v31, %v16758_v5  ;;  %v6835_v5 = vld [vmem:[%s17340_s10 + $0x78] sm:$0xff]  ;;  %6904 = vmatpush.msra.mxu1 %v6851_v57  ;;  %v6862_v57 = vld [vmem:[%s17340_s10 + $0x150] sm:$0xff] }
 0x376   : > { %6884 = vmatpush.msra.mxu0 %v6835_v5  ;;  %v6838_v5 = vld [vmem:[%s17340_s10 + $0x90] sm:$0xff] }
 0x377   : > { %v17001_v58 = vadd.f32 %v5687_v24, %v5674_v60  ;;  %6905 = vmatpush.msra.mxu1 %v6850_v40  ;;  %v6841_v60 = vld [vmem:[%s17340_s10 + $0xa8] sm:$0xff] }
 0x378   : > { %6743 = vmatpush.bf16.msrb.mxu2 %v10600_v44  ;;  %6757 = vmatpush.bf16.msrb.mxu3 %v10728_v38  ;;  %v6554_v44 = vpop.f32.mrf.mxu0  ;;  %v6568_v38 = vpop.f32.mrf.mxu1 }
 0x379   : > { %6885 = vmatpush.msra.mxu0 %v6834_v37  ;;  %6906 = vmatpush.msra.mxu1 %v6849_v61  ;;  %v6569_v19 = vadd.f32 %v6568_v38, %v6554_v44  ;;  %v6860_v38 = vld [vmem:[%s17340_s10 + $0x140] sm:$0xff] }
 0x37b   : > { %6907 = vmatpush.msra.mxu1 %v6848_v51 }
 0x37c   : > { %6744 = vmatpush.bf16.msrb.mxu2 %v10584_v43  ;;  %6758 = vmatpush.bf16.msrb.mxu3 %v10712_v54 }
 0x37d   : > { %6908 = vmatpush.msra.mxu1 %v6847_v6 }
 0x37f   : > { %6909 = vmatpush.msra.mxu1 %v6846_v47 }
 0x380   : > { %6745 = vmatpush.bf16.msrb.mxu2 %v10568_v42  ;;  %6759 = vmatpush.bf16.msrb.mxu3 %v10696_v17  ;;  %v6845_v42 = vld [vmem:[%s17340_s10 + $0xc8] sm:$0xff] }
 0x381   : > { %6910 = vmatpush.msra.mxu1 %v6845_v42  ;;  %v6854_v42 = vld [vmem:[%s17340_s10 + $0x110] sm:$0xff] }
 0x383   : > { %6911 = vmatpush.msra.mxu1 %v6844_v23 }
 0x384   : > { %6746 = vmatpush.bf16.msrb.mxu2 %v10552_v16  ;;  %6760 = vmatpush.bf16.msrb.mxu3 %v10680_v20  ;;  %v6840_v16 = vld [vmem:[%s17340_s10 + $0xa0] sm:$0xff]  ;;  %v6608_v20 = vpop.f32.mrf.mxu0 }
 0x387   : > { %6747 = vmatmul.bf16.vlgmr.msrb.gmra.mxu2 %v15221_v8  ;;  %6761 = vmatmul.bf16.vlgmr.msrb.gmra.mxu3 %v15224_v41  ;;  %v6833_v8 = vld [vmem:[%s17340_s10 + $0x68] sm:$0xff]  ;;  %v6832_v41 = vld [vmem:[%s17340_s10 + $0x60] sm:$0xff] }
 0x388   : > { %6886 = vmatpush.msra.mxu0 %v6833_v8  ;;  %v6837_v8 = vld [vmem:[%s17340_s10 + $0x88] sm:$0xff] }
 0x38a   : > { %6887 = vmatpush.msra.mxu0 %v6832_v41 }
 0x38c   : > { %v5727_v62 = vpop.f32.mrf.mxu2  ;;  %v5741_v49 = vpop.f32.mrf.mxu3  ;;  %6888 = vmatpush.msra.mxu0 %v6831_v15 }
 0x38d   : > { %v5728_v52 = vadd.f32 %v5727_v62, %v16852_v35  ;;  %v6622_v62 = vpop.f32.mrf.mxu1 }
 0x38e   : > { %6889 = vmatpush.msra.mxu0 %v6830_v45  ;;  %v6623_v45 = vadd.f32 %v6622_v62, %v6608_v20  ;;  %v6881_v62 = vld [vmem:[%s17340_s10 + $0x1e8] sm:$0xff] }
 0x38f   : > { %v17009_v1 = vadd.f32 %v5741_v49, %v5728_v52  ;;  %v6839_v52 = vld [vmem:[%s17340_s10 + $0x98] sm:$0xff] }
 0x390   : > { %6890 = vmatpush.msra.mxu0 %v6829_v46  ;;  %v6836_v46 = vld [vmem:[%s17340_s10 + $0x80] sm:$0xff] }
 0x394   : > { %v5729_v35 = vpop.f32.mrf.mxu2  ;;  %v5743_v4 = vpop.f32.mrf.mxu3 }
 0x395   : > { %v5730_v12 = vadd.f32 %v5729_v35, %v16882_v34  ;;  %v6828_v34 = vld [vmem:[%s17340_s10 + $0x40] sm:$0xff] }
 0x396   : > { %6891 = vmatpush.msra.mxu0 %v6828_v34  ;;  %v6866_v34 = vld [vmem:[%s17340_s10 + $0x170] sm:$0xff] }
 0x397   : > { %v17024_v32 = vadd.f32 %v5743_v4, %v5730_v12  ;;  %v6867_v4 = vld [vmem:[%s17340_s10 + $0x178] sm:$0xff] }
 0x398   : > { %6892 = vmatpush.msra.mxu0 %v6827_v11  ;;  %6924 = vmatpush.msra.mxu2 %v6867_v4 }
 0x39a   : > { %6893 = vmatpush.msra.mxu0 %v6826_v3  ;;  %6925 = vmatpush.msra.mxu2 %v6866_v34  ;;  %v6610_v3 = vpop.f32.mrf.mxu0 }
 0x39c   : > { %6894 = vmatpush.msra.mxu0 %v6825_v10  ;;  %v6624_v10 = vpop.f32.mrf.mxu1 }
 0x39d   : > { %v6625_v0 = vadd.f32 %v6624_v10, %v6610_v3  ;;  %v6876_v10 = vld [vmem:[%s17340_s10 + $0x1c0] sm:$0xff] }
 0x39e   : > { %6895 = vmatpush.msra.mxu0 %v6824_v39  ;;  %v6865_v39 = vld [vmem:[%s17340_s10 + $0x168] sm:$0xff] }
 0x39f   : > { %6926 = vmatpush.msra.mxu2 %v6865_v39 }
 0x3a0   : > { %6896 = vmatpush.msra.mxu0 %v6823_v33 }
 0x3a1   : > { %6927 = vmatpush.msra.mxu2 %v6864_v13 }
 0x3a2   : > { %6897 = vmatpush.msra.mxu0 %v6822_v27 }
 0x3a3   : > { %v6664_v47 = vpop.f32.mrf.mxu0 }
 0x3a4   : > { %6898 = vmatpush.msra.mxu0 %v6821_v22  ;;  %v6863_v22 = vld [vmem:[%s17340_s10 + $0x158] sm:$0xff] }
 0x3a5   : > { %6928 = vmatpush.msra.mxu2 %v6863_v22 }
 0x3a6   : > { %6899 = vmatpush.msra.mxu0 %v6820_v59  ;;  %v6777_v59 = vperm.slane %v17074_v55, 1 }
 0x3a7   : > { %6929 = vmatpush.msra.mxu2 %v6862_v57 }
 0x3ac   : > { %v6580_v28 = vpop.f32.mrf.mxu2  ;;  %v6594_v26 = vpop.f32.mrf.mxu3 }
 0x3ad   : > { %v6581_v56 = vadd.f32 %v6580_v28, %v6567_v21 }
 0x3af   : > { %v6595_v63 = vadd.f32 %v6594_v26, %v6581_v56  ;;  %v6861_v56 = vld [vmem:[%s17340_s10 + $0x148] sm:$0xff] }
 0x3b0   : > { %6930 = vmatpush.msra.mxu2 %v6861_v56 }
 0x3b1   : > { %v6767_v9 = vadd.f32 %v6595_v63, %v16731_v48  ;;  %v6843_v48 = vld [vmem:[%s17340_s10 + $0xb8] sm:$0xff] }
 0x3b2   : > { %6912 = vmatpush.msra.mxu1 %v6843_v48  ;;  %6931 = vmatpush.msra.mxu2 %v6860_v38 }
 0x3b3   : > { %v17091_v7 = vadd.f32 %v6776_v30, %v6767_v9  ;;  %v6678_v9 = vpop.f32.mrf.mxu1 }
 0x3b4   : > { %v6582_v29 = vpop.f32.mrf.mxu2  ;;  %v6596_v54 = vpop.f32.mrf.mxu3 }
 0x3b5   : > { %v6583_v43 = vadd.f32 %v6582_v29, %v6569_v19  ;;  %v6857_v29 = vld [vmem:[%s17340_s10 + $0x128] sm:$0xff] }
 0x3b7   : > { %v6597_v2 = vadd.f32 %v6596_v54, %v6583_v43  ;;  %v6856_v43 = vld [vmem:[%s17340_s10 + $0x120] sm:$0xff] }
 0x3b9   : > { %v6771_v17 = vadd.f32 %v6597_v2, %v16797_v50  ;;  %v6842_v50 = vld [vmem:[%s17340_s10 + $0xb0] sm:$0xff] }
 0x3ba   : > { %6913 = vmatpush.msra.mxu1 %v6842_v50 }
 0x3bb   : > { %v17093_v18 = vadd.f32 %v6776_v30, %v6771_v17  ;;  %v6855_v30 = vld [vmem:[%s17340_s10 + $0x118] sm:$0xff]  ;;  %v6853_v17 = vld [vmem:[%s17340_s10 + $0x108] sm:$0xff] }
 0x3bc   : > { %6914 = vmatpush.msra.mxu1 %v6841_v60  ;;  %v6852_v60 = vld [vmem:[%s17340_s10 + $0x100] sm:$0xff] }
 0x3bd   : > { %v6792_v53 = vadd.f32 %v17093_v18, %v17091_v7 }
 0x3be   : > { %6915 = vmatpush.msra.mxu1 %v6840_v16  ;;  %v6882_v16 = vld [vmem:[%s17340_s10 + $0x1f0] sm:$0xff] }
 0x3bf   : > { %v6793_v31 = vrot.slane %v6792_v53, 4 }
 0x3c0   : > { %6916 = vmatpush.msra.mxu1 %v6839_v52  ;;  %v6680_v52 = vpop.f32.mrf.mxu1 }
 0x3c1   : > { %v6794_v24 = vadd.f32 %v6793_v31, %v6792_v53  ;;  %v6883_v53 = vld [vmem:[%s17340_s10 + $0x1f8] sm:$0xff] }
 0x3c2   : > { %6917 = vmatpush.msra.mxu1 %v6838_v5  ;;  %6944 = vmatpush.msra.mxu3 %v6883_v53  ;;  %v6880_v5 = vld [vmem:[%s17340_s10 + $0x1e0] sm:$0xff] }
 0x3c3   : > { %v6795_v49 = vrot.slane %v6794_v24, 2 }
 0x3c4   : > { %6918 = vmatpush.msra.mxu1 %v6837_v8  ;;  %6945 = vmatpush.msra.mxu3 %v6882_v16 }
 0x3c5   : > { %v6796_v37 = vadd.f32 %v6795_v49, %v6794_v24  ;;  %v6679_v24 = vadd.f32 %v6678_v9, %v6664_v47  ;;  %v6666_v49 = vpop.f32.mrf.mxu0 }
 0x3c6   : > { %6919 = vmatpush.msra.mxu1 %v6836_v46  ;;  %6946 = vmatpush.msra.mxu3 %v6881_v62  ;;  %v6778_v46 = vperm.slane %v17074_v55, 2 }
 0x3c7   : > { %v6797_v41 = vrot.slane %v6796_v37, 1 }
 0x3c8   : > { %6947 = vmatpush.msra.mxu3 %v6880_v5  ;;  %v6734_v57 = vpop.f32.mrf.mxu1 }
 0x3c9   : > { %v6798_v15 = vadd.f32 %v6797_v41, %v6796_v37  ;;  %v6681_v37 = vadd.f32 %v6680_v52, %v6666_v49  ;;  %v6879_v41 = vld [vmem:[%s17340_s10 + $0x1d8] sm:$0xff] }
 0x3ca   : > { %v6636_v35 = vpop.f32.mrf.mxu2  ;;  %v6650_v12 = vpop.f32.mrf.mxu3  ;;  %6948 = vmatpush.msra.mxu3 %v6879_v41 }
 0x3cb   : > { %6900 = vmatmul.f32.vlgmr.msra.gmra.mxu0 %v6798_v15  ;;  %v6637_v11 = vadd.f32 %v6636_v35, %v6623_v45  ;;  %v6878_v15 = vld [vmem:[%s17340_s10 + $0x1d0] sm:$0xff] }
 0x3cc   : > { %6949 = vmatpush.msra.mxu3 %v6878_v15 }
 0x3cd   : > { %v6651_v33 = vadd.f32 %v6650_v12, %v6637_v11  ;;  %v6877_v11 = vld [vmem:[%s17340_s10 + $0x1c8] sm:$0xff] }
 0x3ce   : > { %6950 = vmatpush.msra.mxu3 %v6877_v11 }
 0x3cf   : > { %v6768_v21 = vadd.f32 %v6651_v33, %v16867_v36  ;;  %v6859_v36 = vld [vmem:[%s17340_s10 + $0x138] sm:$0xff] }
 0x3d0   : > { %6932 = vmatpush.msra.mxu2 %v6859_v36  ;;  %6951 = vmatpush.msra.mxu3 %v6876_v10  ;;  %v6868_v36 = vld [vmem:[%s17340_s10 + $0x180] sm:$0xff] }
 0x3d1   : > { %v17148_v61 = vadd.f32 %v6777_v59, %v6768_v21  ;;  %v6974_v10 = vld [vmem:[%s17337_s7] sm:$0x3] }
 0x3d2   : > { %v6638_v27 = vpop.f32.mrf.mxu2  ;;  %v6652_v26 = vpop.f32.mrf.mxu3 }
 0x3d3   : > { %v6639_v28 = vadd.f32 %v6638_v27, %v6625_v0  ;;  %v6873_v27 = vld [vmem:[%s17340_s10 + $0x1a8] sm:$0xff] }
 0x3d5   : > { %v6653_v40 = vadd.f32 %v6652_v26, %v6639_v28  ;;  %v6872_v28 = vld [vmem:[%s17340_s10 + $0x1a0] sm:$0xff]  ;;  %v6720_v26 = vpop.f32.mrf.mxu0 }
 0x3d7   : > { %v6772_v44 = vadd.f32 %v6653_v40, %v16909_v14  ;;  %v6858_v14 = vld [vmem:[%s17340_s10 + $0x130] sm:$0xff] }
 0x3d8   : > { %6933 = vmatpush.msra.mxu2 %v6858_v14  ;;  %v6870_v40 = vld [vmem:[%s17340_s10 + $0x190] sm:$0xff] }
 0x3d9   : > { %v17150_v51 = vadd.f32 %v6777_v59, %v6772_v44  ;;  %v6871_v59 = vld [vmem:[%s17340_s10 + $0x198] sm:$0xff]  ;;  %v6869_v44 = vld [vmem:[%s17340_s10 + $0x188] sm:$0xff] }
 0x3da   : > { %6934 = vmatpush.msra.mxu2 %v6857_v29  ;;  %v6735_v29 = vadd.f32 %v6734_v57, %v6720_v26  ;;  %v7018_v26 = vld [vmem:[%s17339_s9 + $0x48] sm:$0xff]  ;;  %v7015_v57 = vld [vmem:[%s17339_s9 + $0x30] sm:$0xff] }
 0x3db   : > { %v6799_v19 = vadd.f32 %v17150_v51, %v17148_v61 }
 0x3dc   : > { %6935 = vmatpush.msra.mxu2 %v6856_v43 }
 0x3dd   : > { %v6800_v63 = vrot.slane %v6799_v19, 4  ;;  %v6722_v43 = vpop.f32.mrf.mxu0 }
 0x3de   : > { %6936 = vmatpush.msra.mxu2 %v6855_v30 }
 0x3df   : > { %v6801_v6 = vadd.f32 %v6800_v63, %v6799_v19 }
 0x3e0   : > { %6937 = vmatpush.msra.mxu2 %v6854_v42 }
 0x3e1   : > { %v6802_v54 = vrot.slane %v6801_v6, 2 }
 0x3e2   : > { %6938 = vmatpush.msra.mxu2 %v6853_v17 }
 0x3e3   : > { %v6803_v2 = vadd.f32 %v6802_v54, %v6801_v6  ;;  %v6736_v54 = vpop.f32.mrf.mxu1 }
 0x3e4   : > { %6939 = vmatpush.msra.mxu2 %v6852_v60  ;;  %v6737_v47 = vadd.f32 %v6736_v54, %v6722_v43 }
 0x3e5   : > { %v6804_v23 = vrot.slane %v6803_v2, 1 }
 0x3e7   : > { %v6805_v48 = vadd.f32 %v6804_v23, %v6803_v2  ;;  %v6779_v23 = vperm.slane %v17074_v55, 3 }
 0x3e9   : > { %6920 = vmatmul.f32.vlgmr.msra.gmra.mxu1 %v6805_v48 }
 0x3ea   : > { %v6692_v50 = vpop.f32.mrf.mxu2  ;;  %v6706_v31 = vpop.f32.mrf.mxu3 }
 0x3eb   : > { %v6693_v20 = vadd.f32 %v6692_v50, %v6679_v24 }
 0x3ed   : > { %v6707_v8 = vadd.f32 %v6706_v31, %v6693_v20 }
 0x3ef   : > { %v6769_v45 = vadd.f32 %v6707_v8, %v16977_v25  ;;  %v6875_v25 = vld [vmem:[%s17340_s10 + $0x1b8] sm:$0xff] }
 0x3f0   : > { %6952 = vmatpush.msra.mxu3 %v6875_v25  ;;  %v7023_v25 = vld [vmem:[%s17339_s9 + $0x70] sm:$0xff] }
 0x3f1   : > { %v17205_v39 = vadd.f32 %v6778_v46, %v6769_v45  ;;  %v11593_v45 = vmov 0   ;;  %7081 = vmatpush.msrb.mxu2 %v7023_v25 }
 0x3f2   : > { %v6694_v35 = vpop.f32.mrf.mxu2  ;;  %v6708_v4 = vpop.f32.mrf.mxu3  ;;  %11579 = vset.pattern.permute.xlu0 %v11593_v45 }
 0x3f3   : > { %v6695_v12 = vadd.f32 %v6694_v35, %v6681_v37  ;;  %v6964_v35 = vld [vmem:[%s17335_s5] sm:$0x3] }
 0x3f5   : > { %v6709_v34 = vadd.f32 %v6708_v4, %v6695_v12 }
 0x3f7   : > { %v6773_v3 = vadd.f32 %v6709_v34, %v17001_v58  ;;  %v6874_v58 = vld [vmem:[%s17340_s10 + $0x1b0] sm:$0xff] }
 0x3f8   : > { %6953 = vmatpush.msra.mxu3 %v6874_v58  ;;  %v7021_v58 = vld [vmem:[%s17339_s9 + $0x60] sm:$0xff] }
 0x3f9   : > { %v17207_v13 = vadd.f32 %v6778_v46, %v6773_v3  ;;  %v6971_v46 = vld [vmem:[%s17336_s6] sm:$0x3]  ;;  %7041 = vmatpush.msrb.mxu0 %v7021_v58  ;;  %v7124_v58 = vld [vmem:[%s12053_s27 + $0x18] sm:$0xff] }
 0x3fa   : > { %6954 = vmatpush.msra.mxu3 %v6873_v27  ;;  %v7019_v27 = vld [vmem:[%s17339_s9 + $0x50] sm:$0xff] }
 0x3fb   : > { %v6806_v0 = vadd.f32 %v17207_v13, %v17205_v39  ;;  %7082 = vmatpush.msrb.mxu2 %v7019_v27 }
 0x3fc   : > { %6955 = vmatpush.msra.mxu3 %v6872_v28  ;;  %v7017_v28 = vld [vmem:[%s17339_s9 + $0x40] sm:$0xff] }
 0x3fd   : > { %v6807_v33 = vrot.slane %v6806_v0, 4  ;;  %7042 = vmatpush.msrb.mxu0 %v7017_v28  ;;  %7083 = vmatpush.msrb.mxu2 %v7015_v57 }
 0x3fe   : > { %6956 = vmatpush.msra.mxu3 %v6871_v59  ;;  %v7016_v59 = vld [vmem:[%s17339_s9 + $0x38] sm:$0xff] }
 0x3ff   : > { %v6808_v22 = vadd.f32 %v6807_v33, %v6806_v0  ;;  %v7024_v0 = vld [vmem:[%s17339_s9 + $0x78] sm:$0xff]  ;;  %v7022_v33 = vld [vmem:[%s17339_s9 + $0x68] sm:$0xff] }
 0x400   : > { %6957 = vmatpush.msra.mxu3 %v6870_v40  ;;  %7061 = vmatpush.msrb.mxu1 %v7022_v33  ;;  %v7013_v40 = vld [vmem:[%s17339_s9 + $0x20] sm:$0xff] }
 0x401   : > { %v6809_v21 = vrot.slane %v6808_v22, 2  ;;  %7043 = vmatpush.msrb.mxu0 %v7013_v40 }
 0x402   : > { %6958 = vmatpush.msra.mxu3 %v6869_v44  ;;  %7062 = vmatpush.msrb.mxu1 %v7018_v26  ;;  %v7128_v26 = vld [vmem:[%s12053_s27 + $0x38] sm:$0xff] }
 0x403   : > { %v6810_v56 = vadd.f32 %v6809_v21, %v6808_v22  ;;  %v7020_v22 = vld [vmem:[%s17339_s9 + $0x58] sm:$0xff] }
 0x404   : > { %6959 = vmatpush.msra.mxu3 %v6868_v36  ;;  %v7012_v36 = vld [vmem:[%s17339_s9 + $0x18] sm:$0xff] }
 0x405   : > { %v6811_v38 = vrot.slane %v6810_v56, 1 }
 0x406   : > { %7101 = vmatpush.msrb.mxu3 %v7024_v0  ;;  %v7127_v0 = vld [vmem:[%s12053_s27 + $0x30] sm:$0xff] }
 0x407   : > { %v6812_v63 = vadd.f32 %v6811_v38, %v6810_v56  ;;  %v7014_v56 = vld [vmem:[%s17339_s9 + $0x28] sm:$0xff]  ;;  %v7011_v38 = vld [vmem:[%s17339_s9 + $0x10] sm:$0xff] }
 0x408   : > { %7102 = vmatpush.msrb.mxu3 %v7020_v22  ;;  %7063 = vmatpush.msrb.mxu1 %v7014_v56 }
 0x409   : > { %6940 = vmatmul.f32.vlgmr.msra.gmra.mxu2 %v6812_v63 }
 0x40a   : > { %v6748_v19 = vpop.f32.mrf.mxu2  ;;  %v6762_v14 = vpop.f32.mrf.mxu3  ;;  %7103 = vmatpush.msrb.mxu3 %v7016_v59  ;;  %7084 = vmatpush.msrb.mxu2 %v7011_v38 }
 0x40b   : > { %v6749_v6 = vadd.f32 %v6748_v19, %v6735_v29  ;;  %v7009_v19 = vld [vmem:[%s17339_s9] sm:$0xff] }
 0x40c   : > { %7104 = vmatpush.msrb.mxu3 %v7012_v36  ;;  %7044 = vmatpush.msrb.mxu0 %v7009_v19 }
 0x40d   : > { %v6763_v9 = vadd.f32 %v6762_v14, %v6749_v6  ;;  %v7010_v14 = vld [vmem:[%s17339_s9 + $0x8] sm:$0xff] }
 0x40e   : > { %7064 = vmatpush.msrb.mxu1 %v7010_v14 }
 0x40f   : > { %v6770_v17 = vadd.f32 %v6763_v9, %v17009_v1  ;;  %v6988_v9 = vld [vmem:[%s17338_s8] sm:$0x1] }
 0x411   : > { %v17238_v50 = vadd.f32 %v6779_v23, %v6770_v17 }
 0x412   : > { %v6750_v30 = vpop.f32.mrf.mxu2  ;;  %v6764_v42 = vpop.f32.mrf.mxu3 }
 0x413   : > { %v6751_v2 = vadd.f32 %v6750_v30, %v6737_v47 }
 0x415   : > { %v6765_v48 = vadd.f32 %v6764_v42, %v6751_v2 }
 0x417   : > { %v6774_v53 = vadd.f32 %v6765_v48, %v17024_v32 }
 0x419   : > { %v17240_v31 = vadd.f32 %v6779_v23, %v6774_v53 }
 0x41b   : > { %v6813_v60 = vadd.f32 %v17240_v31, %v17238_v50 }
 0x41d   : > { %v6814_v24 = vrot.slane %v6813_v60, 4 }
 0x41f   : > { %v6815_v16 = vadd.f32 %v6814_v24, %v6813_v60 }
 0x421   : > { %v6816_v20 = vrot.slane %v6815_v16, 2 }
 0x423   : > { %v6817_v62 = vadd.f32 %v6816_v20, %v6815_v16 }
 0x425   : > { %v6818_v49 = vrot.slane %v6817_v62, 1 }
 0x427   : > { %v6819_v52 = vadd.f32 %v6818_v49, %v6817_v62 }
 0x429   : > { %6960 = vmatmul.f32.vlgmr.msra.gmra.mxu3 %v6819_v52 }
 0x448   : > { %v6901_v5 = vpop.f32.mrf.mxu0 }
 0x466   : > { %v6921_v1 = vpop.f32.mrf.mxu1 }
 0x467   : > { %v6922_v37 = vadd.f32 %v6921_v1, %v6901_v5 }
 0x48c   : > { %v6941_v55 = vpop.f32.mrf.mxu2 }
 0x48d   : > { %v6942_v8 = vadd.f32 %v6941_v55, %v6922_v37 }
 0x4ac   : > { %v6961_v32 = vpop.f32.mrf.mxu3 }
 0x4ad   : > { %v6962_v41 = vadd.f32 %v6961_v32, %v6942_v8  ;;  %v7121_v32 = vld [vmem:[%s12053_s27] sm:$0xff] }
 0x4af   : > { %v6965_v12 = vperm.slane %v6962_v41, 0  ;;  %v7125_v41 = vld [vmem:[%s12053_s27 + $0x20] sm:$0xff] }
 0x4b1   : > { %v6966_v15 = vmul.f32 %v6965_v12, %v6964_v35  ;;  %v7122_v35 = vld [vmem:[%s12053_s27 + $0x8] sm:$0xff] }
 0x4b3   : > { %v6968_v4 = vsel %vm6967_vm5, %v6966_v15, 0.0 }
 0x4b4   : > { %6969 = vadd.xlane.f32.xlu0 %v6968_v4 }
 0x527   : > { %v6970_v34 = vpop.xlane.xlu0 %6969 }
 0x528   : > { %v6972_v11 = vadd.f32 %v6971_v46, %v6970_v34  ;;  %v7126_v46 = vld [vmem:[%s12053_s27 + $0x28] sm:$0xff] }
 0x52a   : > { %v6973_v3 = vmax.f32 %v6972_v11, 0.0 }
 0x52c   : > { %6977 = vperm.xlu0 %11579, %v6973_v3  }
 0x59e   : > { %v6978_v21 = vpop.permute.xlu0 %6977 }
 0x59f   : > { %v6980_v44 = vmul.f32 %v6978_v21, %v6974_v10 }
 0x5a1   : > { %v6981_v63 = vsel %vm6967_vm5, %v6980_v44, 0.0 }
 0x5a2   : > { %v6982_v29 = vrot.slane %v6981_v63, 4 }
 0x5a4   : > { %v6983_v6 = vadd.f32 %v6982_v29, %v6981_v63 }
 0x5a6   : > { %v6984_v43 = vrot.slane %v6983_v6, 2 }
 0x5a8   : > { %v6985_v54 = vadd.f32 %v6984_v43, %v6983_v6 }
 0x5aa   : > { %v6986_v47 = vrot.slane %v6985_v54, 1 }
 0x5ac   : > { %v6987_v30 = vadd.f32 %v6986_v47, %v6985_v54 }
 0x5ae   : > { %v6989_v2 = vadd.f32 %v6988_v9, %v6987_v30 }
 0x5b0   : > { %v10793_v42 = vmul.f32 -1.442695, %v6989_v2 }
 0x5b2   : > { %11580 = vpow2.f32 %v10793_v42 }
 0x5b8   : > { %v11581_v17 = vpop.eup %11580 }
 0x5b9   : > { %v6993_v23 = vadd.f32 1.0, %v11581_v17 }
 0x5bb   : > { %11582 = vrcp.f32 %v6993_v23  ;;  %v7005_v24 = vand.u32 2147483648, %v6993_v23  ;;  %v7003_v20 = vand.u32 2147483647, %v6993_v23  ;;  %vm6999_vm7 = vweird.f32 %v6993_v23 }
 0x5bd   : > { %v7006_v49 = vor.u32 1.1754944e-38, %v7005_v24  ;;  %vm7004_vm10 = vcmp.eq.f32.partialorder %v7003_v20, 8.507059e+37 }
 0x5c1   : > { %v11583_v48 = vpop.eup %11582 }
 0x5c2   : > { %v6995_v53 = vmul.f32 %v11583_v48, %v6993_v23  ;;  %vm7000_vm6 = vweird.f32 %v11583_v48 }
 0x5c3   : > { %vm7001_vm8 = vmor %vm6999_vm7, %vm7000_vm6 }
 0x5c4   : > { %v6996_v60 = vsub.f32 1.0, %v6995_v53 }
 0x5c6   : > { %v6997_v16 = vmul.f32 %v11583_v48, %v6996_v60 }
 0x5c8   : > { %v6998_v62 = vadd.f32 %v11583_v48, %v6997_v16 }
 0x5ca   : > { %v7002_v52 = vsel %vm7001_vm8, %v11583_v48, %v6998_v62 }
 0x5cb   : > { %v7007_v1 = vsel %vm7004_vm10, %v7006_v49, %v7002_v52 }
 0x5cc   : > { %10794 = vmatmul.msk.f32.vlgmr.msrb.gmra.mxu0 %vm7025_vm9, %v7007_v1  ;;  %10795 = vmatmul.msk.f32.vlgmr.msrb.gmra.mxu1 %vm7025_vm9, %v7007_v1 }
 0x5cd   : > { %10796 = vmatmul.msk.f32.vlgmr.msrb.gmra.mxu2 %vm7025_vm9, %v7007_v1  ;;  %10797 = vmatmul.msk.f32.vlgmr.msrb.gmra.mxu3 %vm7025_vm9, %v7007_v1 }
 0x649   : > { %v7046_v5 = vpop.f32.mrf.mxu0  ;;  %v7066_v55 = vpop.f32.mrf.mxu1 }
 0x64a   : > { %v7109_v37 = vperm.slane %v7046_v5, 0  ;;  %v7110_v8 = vperm.slane %v7066_v55, 0 }
 0x64c   : > { %v7113_v12 = vmul.f32 %v7109_v37, %v17091_v7  ;;  %v7117_v15 = vmul.f32 %v7109_v37, %v17093_v18  ;;  %v7114_v4 = vmul.f32 %v7110_v8, %v17148_v61  ;;  %v7118_v45 = vmul.f32 %v7110_v8, %v17150_v51  ;;  %v7123_v51 = vld [vmem:[%s12053_s27 + $0x10] sm:$0xff] }
 0x64e   : > { %v7129_v34 = vadd.f32 %v7121_v32, %v7113_v12  ;;  %v7133_v11 = vadd.f32 %v7125_v41, %v7117_v15  ;;  %v7130_v3 = vadd.f32 %v7122_v35, %v7114_v4  ;;  %v7134_v10 = vadd.f32 %v7126_v46, %v7118_v45 }
 0x650   : > { %7137 = vst [vmem:[%s386_s19] sm:$0xff] %v7129_v34  ;;  %v7086_v7 = vpop.f32.mrf.mxu2  ;;  %v7106_v18 = vpop.f32.mrf.mxu3 }
 0x651   : > { %7141 = vst [vmem:[%s386_s19 + $0x20] sm:$0xff] %v7133_v11  ;;  %v7111_v61 = vperm.slane %v7086_v7, 0  ;;  %v7112_v25 = vperm.slane %v7106_v18, 0 }
 0x652   : > { %7138 = vst [vmem:[%s386_s19 + $0x8] sm:$0xff] %v7130_v3 }
 0x653   : > { %7142 = vst [vmem:[%s386_s19 + $0x28] sm:$0xff] %v7134_v10  ;;  %v7115_v33 = vmul.f32 %v7111_v61, %v17205_v39  ;;  %v7119_v27 = vmul.f32 %v7111_v61, %v17207_v13  ;;  %v7116_v22 = vmul.f32 %v7112_v25, %v17238_v50  ;;  %v7120_v28 = vmul.f32 %v7112_v25, %v17240_v31 }
 0x655   : > { %v7131_v57 = vadd.f32 %v7123_v51, %v7115_v33  ;;  %v7135_v21 = vadd.f32 %v7127_v0, %v7119_v27  ;;  %v7132_v59 = vadd.f32 %v7124_v58, %v7116_v22  ;;  %v7136_v40 = vadd.f32 %v7128_v26, %v7120_v28 }
 0x657   : > { %7139 = vst [vmem:[%s386_s19 + $0x10] sm:$0xff] %v7131_v57 }
 0x658   : > { %7143 = vst [vmem:[%s386_s19 + $0x30] sm:$0xff] %v7135_v21 }
 0x659   : > { %7140 = vst [vmem:[%s386_s19 + $0x18] sm:$0xff] %v7132_v59 }
 0x65a   : > { %7144 = vst [vmem:[%s386_s19 + $0x38] sm:$0xff] %v7136_v40 }
 0x65b PF: > { %s21_s17 = sadd.s32 1, %s11591_s17  }
 0x65c   : > { %p18_p4 = scmp.ge.s32.totalorder %s21_s17, 4  }
 0x65e   :  { %20 = sbr.rel (!%p18_p4) target bundleno = 1 (0x1), region = 98 }

</bundles_post_ra>
